<compile_context>
chip_gen: v7x
topology: tpu7x:2x2x1
jax: 0.10.0
libtpu: 0.0.40
codegen_flags: <defaults>
</compile_context>

<pallas_src>
import functools
import math

import numpy as np
import jax
import jax.numpy as jnp
from jax import lax
from jax.experimental import pallas as pl
from jax.experimental.pallas import tpu as pltpu


def _pvalue_comp_coeffs(d):
    # scipy.stats.pearsonr two-sided p-value for sample size d:
    #   p = 2*(1 - I_z(a, a)),  z = (|r|+1)/2,  a = d/2 - 1.
    # For integer a, via the binomial expansion and the complement identity:
    #   p = 2 * sum_{j=0}^{a-1} C(2a-1, j) z^j (1-z)^(2a-1-j)
    # (complementary series -> no "1 - (value near 1)" f32 cancellation).
    # TODO(synk): odd d (non-integer beta parameters) has no polynomial form here.
    assert d % 2 == 0 and d >= 4, "closed-form pearson p-value needs even d >= 4"
    a = d // 2 - 1
    n = 2 * a - 1
    coeffs = tuple(2.0 * math.comb(n, j) for j in range(a))   # factor 2 folded in
    return a, coeffs


def _feature_catch_kernel(x_ref, pv_ref, st_ref, *, d, stride, L, NW,
                          apar, coeffs, wts):
    # x_ref: (L, W, *batch) f32, batch on the trailing axes (either (TB,) lanes
    # for small batches or (S, 128) sublane x lane for large ones).  The body is
    # rank-agnostic: all reductions are over axis=1, all broadcasts over leading
    # axes, so one kernel serves both layouts.
    x = x_ref[...]
    inv_d = 1.0 / d
    sqrt_d = math.sqrt(d)
    inv_sqrt_d = 1.0 / sqrt_d

    for w in range(NW):                               # static unroll, NW == 3
        col = w * stride
        win = x[:, col:col + d]                       # (L, d, *batch)
        s = jnp.sum(win, axis=1)                      # (L, *batch)  ts_return
        mean = s * inv_d
        cent = win - mean[:, None]                    # (L, d, *batch)
        ss = jnp.sum(cent * cent, axis=1)             # (L, *batch)  sum sq. deviations

        # single EUP op per row: rsqrt(ss) feeds std, zscore and pearson r.
        # (flat windows: ss == 0 -> Inf/NaN, same as the reference's /0.)
        inv_ss = lax.rsqrt(ss)
        std = ss * inv_ss * inv_sqrt_d                # sqrt(ss/d)  == np.std
        zsc = mean * inv_ss * sqrt_d                  # mean / std

        # ts_decaylinear as an unrolled sum with scalar constants (no captured
        # array constants -> fixes the f32[10] trace error).
        dl = win[:, 0] * wts[0]
        for k in range(1, d):
            dl = dl + win[:, k] * wts[k]

        # all-pairs pearson r, strict-upper-triangle row-major order, VPU only
        # (no MXU: 9x10 tiles are far below MXU shapes; MXU idling is correct).
        r_chunks = []
        for i in range(L - 1):
            cross = jnp.sum(cent[i + 1:] * cent[i:i + 1], axis=1)    # (L-1-i, *batch)
            r_chunks.append(cross * inv_ss[i + 1:] * inv_ss[i:i + 1])
        rmat = jnp.concatenate(r_chunks, axis=0)                     # (P, *batch)

        # two-sided p-value via the complementary incomplete-beta series
        # (running powers / Horner; the *2 is folded into the coefficients).
        ar = jnp.minimum(jnp.abs(rmat), 1.0)
        z = (ar + 1.0) * 0.5
        omz = (1.0 - ar) * 0.5
        ser = coeffs[0]                       # Python scalar, broadcasts on first use
        zj = z
        for j in range(1, apar):
            ser = ser * omz + coeffs[j] * zj
            if j + 1 < apar:
                zj = zj * z
        omz_a = omz
        for _ in range(apar - 1):
            omz_a = omz_a * omz
        pmat = omz_a * ser                                           # (P, *batch)

        # Compact lane-dense stores: only p-values (cov channel duplicates them)
        # and the four (L, *batch) stats.  Zero padding to P rows and the
        # 6-channel NCHW assembly happen in the wrapper.
        pv_ref[w] = pmat
        st_ref[0 * NW + w] = std
        st_ref[1 * NW + w] = zsc
        st_ref[2 * NW + w] = s
        st_ref[3 * NW + w] = dl


def _pick_batch_layout(B, batch_tile):
    """Decide how the batch maps onto vreg axes and how it is tiled.

    Returns (sublane_tile, padded_batch).  sublane_tile is None for small
    batches (< 8 lane-groups): batch stays on lanes only, one full-extent grid
    step.  Otherwise the batch is laid out on (sublane x lane) = (S, 128) and
    tiled in steps of `sublane_tile` lane-groups (a multiple of 8, per the
    (8,128) block rule), padding the batch UP so the tile divides it -- no gcd
    collapse -- and preferring >= 2 grid steps so the v7x megacore can shard
    the 'parallel' batch axis across both TensorCores.
    """
    S_total = -(-B // 128)                     # 128-lane groups needed
    if S_total < 8:
        return None, S_total * 128
    S_des = max(8, (max(1, batch_tile // 128) // 8) * 8)
    if S_total >= 2 * S_des:
        S_tile = S_des
    elif S_total >= 16:
        S_tile = max(8, (S_total // 2) // 8 * 8)   # force >= 2 steps
    else:
        S_tile = 8                                  # 8 <= S_total < 16: 1-2 steps
    S_pad = -(-S_total // S_tile) * S_tile
    return S_tile, S_pad * 128


def feature_catch(x, d=10, stride=10, batch_tile=1024):
    B, C, L, W = x.shape
    assert C == 1
    NW = (W - d) // stride + 1
    P = L * (L - 1) // 2
    apar, coeffs = _pvalue_comp_coeffs(d)
    wvec = np.arange(d, 0, -1, dtype=np.float64)
    wts = tuple((wvec / wvec.sum()).astype(np.float32).tolist())

    S_tile, B_pad = _pick_batch_layout(B, batch_tile)

    # TODO(synk): the reference's NCHW contract forces batch-major input/output;
    # the transposes below are full HBM passes (XLA fuses them with the pad /
    # concat assembly) -- a batch-minor layout negotiated with the consumer
    # would remove ~2/3 of end-to-end HBM traffic.
    xt = jnp.transpose(x[:, 0, :, :].astype(jnp.float32), (1, 2, 0))   # (L, W, B)
    if B_pad != B:
        xt = jnp.pad(xt, ((0, 0), (0, 0), (0, B_pad - B)))

    if S_tile is None:
        # Small batch: batch on lanes only, one grid step, full-extent blocks.
        grid = (1,)
        in_spec = pl.BlockSpec((L, W, B_pad), lambda b: (0, 0, 0))
        pv_shape = (NW, P, B_pad)
        st_shape = (4 * NW, L, B_pad)
        pv_spec = pl.BlockSpec(pv_shape, lambda b: (0, 0, 0))
        st_spec = pl.BlockSpec(st_shape, lambda b: (0, 0, 0))
    else:
        # Large batch: batch on (sublane x lane); S_tile lane-groups per step.
        S_pad = B_pad // 128
        xt = xt.reshape(L, W, S_pad, 128)
        grid = (S_pad // S_tile,)
        in_spec = pl.BlockSpec((L, W, S_tile, 128), lambda b: (0, 0, b, 0))
        pv_shape = (NW, P, S_pad, 128)
        st_shape = (4 * NW, L, S_pad, 128)
        pv_spec = pl.BlockSpec((NW, P, S_tile, 128), lambda b: (0, 0, b, 0))
        st_spec = pl.BlockSpec((4 * NW, L, S_tile, 128), lambda b: (0, 0, b, 0))

    kernel = functools.partial(_feature_catch_kernel, d=d, stride=stride, L=L,
                               NW=NW, apar=apar, coeffs=coeffs, wts=wts)

    pvals, stats = pl.pallas_call(
        kernel,
        out_shape=(jax.ShapeDtypeStruct(pv_shape, jnp.float32),
                   jax.ShapeDtypeStruct(st_shape, jnp.float32)),
        grid_spec=pltpu.PrefetchScalarGridSpec(
            num_scalar_prefetch=0,
            grid=grid,
            in_specs=[in_spec],
            out_specs=[pv_spec, st_spec],
        ),
        compiler_params=pltpu.CompilerParams(
            dimension_semantics=("parallel",),
            # ~8-12 MiB/step at the default 1024-example tile; 32 MiB leaves
            # headroom for larger batch_tile and is within every gen's VMEM.
            vmem_limit_bytes=32 * 1024 * 1024),
    )(xt)

    # Assemble the padded 6-channel NCHW output in the wrapper (fused by XLA
    # with the transpose): ch1 (ts_cov) aliases ch0, stats get the cat2 zeros.
    pv = pvals.reshape(NW, P, B_pad)[..., :B]                    # (NW, P, B)
    st = stats.reshape(4, NW, L, B_pad)[..., :B]                 # (4, NW, L, B)
    corr = jnp.transpose(pv, (2, 1, 0))[:, None]                 # (B, 1, P, NW)
    ch01 = jnp.concatenate([corr, corr], axis=1)                 # ts_corr, ts_cov
    st_t = jnp.transpose(st, (3, 0, 2, 1))                       # (B, 4, L, NW)
    st_pad = jnp.pad(st_t, ((0, 0), (0, 0), (0, P - L), (0, 0)))  # cat2 zero rows
    return jnp.concatenate([ch01, st_pad], axis=1)               # (B, 6, P, NW)


def _reference_numpy(x, d, stride):
    x = np.asarray(x, np.float64)
    B, _, L, W = x.shape
    NW = (W - d) // stride + 1
    P = L * (L - 1) // 2
    a = d // 2 - 1
    n = 2 * a - 1
    wvec = np.arange(d, 0, -1, dtype=np.float64)
    wts = wvec / wvec.sum()
    out = np.zeros((B, 6, P, NW), np.float64)
    for w in range(NW):
        win = x[:, 0, :, w * stride:w * stride + d]          # (B, L, d)
        mean = win.mean(-1)
        std = win.std(-1)
        cent = win - mean[..., None]
        ss = (cent * cent).sum(-1)
        out[:, 2, :L, w] = std
        out[:, 3, :L, w] = mean / std
        out[:, 4, :L, w] = win.sum(-1)
        out[:, 5, :L, w] = win @ wts
        idx = 0
        for r1 in range(L):
            for r2 in range(r1 + 1, L):
                r = (cent[:, r1] * cent[:, r2]).sum(-1) / np.sqrt(ss[:, r1] * ss[:, r2])
                z = (np.minimum(np.abs(r), 1.0) + 1.0) / 2.0
                ib = sum(math.comb(n, j) * z ** j * (1 - z) ** (n - j)
                         for j in range(a, n + 1))
                p = 2.0 * (1.0 - ib)
                out[:, 0, idx, w] = p
                out[:, 1, idx, w] = p
                idx += 1
    return out.astype(np.float32)


if __name__ == "__main__":
    d, stride = 10, 10
    L, W = 9, 30          # reference hard-codes 9 rows -> 36 pairs / 3 windows
    key = jax.random.PRNGKey(0)
    k_small, k_big = jax.random.split(key)

    # small batch: exercises the lanes-only layout (single grid step)
    x_small = jax.random.normal(k_small, (2, 1, L, W), dtype=jnp.float32)
    out_small = jax.block_until_ready(feature_catch(x_small, d=d, stride=stride))
    np.testing.assert_allclose(np.asarray(out_small),
                               _reference_numpy(np.asarray(x_small), d, stride),
                               rtol=3e-3, atol=3e-3)

    # larger batch: exercises the (sublane x lane) relayout, tile padding and
    # the 2-step 'parallel' grid path
    x_big = jax.random.normal(k_big, (1056, 1, L, W), dtype=jnp.float32)
    out_big = jax.block_until_ready(feature_catch(x_big, d=d, stride=stride))
    np.testing.assert_allclose(np.asarray(out_big),
                               _reference_numpy(np.asarray(x_big), d, stride),
                               rtol=3e-3, atol=3e-3)

    print("KERNEL_OK")
</pallas_src>

<mosaic_0001>
module attributes {stable_mosaic.version = 11 : i64} {
  func.func @_feature_catch_kernel(%arg0: i32, %arg1: memref<9x30x128xf32, #tpu.memory_space<vmem>>, %arg2: memref<3x36x128xf32, #tpu.memory_space<vmem>>, %arg3: memref<12x9x128xf32, #tpu.memory_space<vmem>>) attributes {dimension_semantics = [#tpu.dimension_semantics<parallel>], iteration_bounds = array<i64: 1>, scalar_prefetch = 0 : i64, scratch_operands = 0 : i64, tpu.core_type = #tpu.core_type<tc>, window_params = [{pipeline_mode = #tpu.pipeline_mode<synchronous>, transform_indices = @transform_0, window_bounds = array<i64: 9, 30, 128>}, {pipeline_mode = #tpu.pipeline_mode<synchronous>, transform_indices = @transform_1, window_bounds = array<i64: 3, 36, 128>}, {pipeline_mode = #tpu.pipeline_mode<synchronous>, transform_indices = @transform_2, window_bounds = array<i64: 12, 9, 128>}]} {
    %c0 = arith.constant 0 : index
    %c0_0 = arith.constant 0 : index
    %c0_1 = arith.constant 0 : index
    %0 = vector.load %arg1[%c0, %c0_0, %c0_1] : memref<9x30x128xf32, #tpu.memory_space<vmem>>, vector<9x30x128xf32>
    %1 = vector.extract_strided_slice %0 {offsets = [0, 0, 0], sizes = [9, 10, 128], strides = [1, 1, 1]} : vector<9x30x128xf32> to vector<9x10x128xf32>
    %cst = arith.constant dense<0.000000e+00> : vector<9x128xf32>
    %2 = vector.multi_reduction <add>, %1, %cst [1] : vector<9x10x128xf32> to vector<9x128xf32>
    %cst_2 = arith.constant 1.000000e-01 : f32
    %3 = vector.broadcast %cst_2 : f32 to vector<9x128xf32>
    %4 = arith.mulf %2, %3 : vector<9x128xf32>
    %5 = vector.shape_cast %4 : vector<9x128xf32> to vector<9x1x128xf32>
    %6 = vector.broadcast %5 : vector<9x1x128xf32> to vector<9x10x128xf32>
    %7 = arith.subf %1, %6 : vector<9x10x128xf32>
    %8 = arith.mulf %7, %7 : vector<9x10x128xf32>
    %cst_3 = arith.constant dense<0.000000e+00> : vector<9x128xf32>
    %9 = vector.multi_reduction <add>, %8, %cst_3 [1] : vector<9x10x128xf32> to vector<9x128xf32>
    %10 = math.rsqrt %9 : vector<9x128xf32>
    %11 = arith.mulf %9, %10 : vector<9x128xf32>
    %cst_4 = arith.constant 0.316227764 : f32
    %12 = vector.broadcast %cst_4 : f32 to vector<9x128xf32>
    %13 = arith.mulf %11, %12 : vector<9x128xf32>
    %14 = arith.mulf %4, %10 : vector<9x128xf32>
    %cst_5 = arith.constant 3.1622777 : f32
    %15 = vector.broadcast %cst_5 : f32 to vector<9x128xf32>
    %16 = arith.mulf %14, %15 : vector<9x128xf32>
    %17 = vector.extract_strided_slice %1 {offsets = [0, 0, 0], sizes = [9, 1, 128], strides = [1, 1, 1]} : vector<9x10x128xf32> to vector<9x1x128xf32>
    %18 = vector.shape_cast %17 : vector<9x1x128xf32> to vector<9x128xf32>
    %cst_6 = arith.constant 0.181818187 : f32
    %19 = vector.broadcast %cst_6 : f32 to vector<9x128xf32>
    %20 = arith.mulf %18, %19 : vector<9x128xf32>
    %21 = vector.extract_strided_slice %1 {offsets = [0, 1, 0], sizes = [9, 1, 128], strides = [1, 1, 1]} : vector<9x10x128xf32> to vector<9x1x128xf32>
    %22 = vector.shape_cast %21 : vector<9x1x128xf32> to vector<9x128xf32>
    %cst_7 = arith.constant 0.163636357 : f32
    %23 = vector.broadcast %cst_7 : f32 to vector<9x128xf32>
    %24 = arith.mulf %22, %23 : vector<9x128xf32>
    %25 = arith.addf %20, %24 : vector<9x128xf32>
    %26 = vector.extract_strided_slice %1 {offsets = [0, 2, 0], sizes = [9, 1, 128], strides = [1, 1, 1]} : vector<9x10x128xf32> to vector<9x1x128xf32>
    %27 = vector.shape_cast %26 : vector<9x1x128xf32> to vector<9x128xf32>
    %cst_8 = arith.constant 0.145454541 : f32
    %28 = vector.broadcast %cst_8 : f32 to vector<9x128xf32>
    %29 = arith.mulf %27, %28 : vector<9x128xf32>
    %30 = arith.addf %25, %29 : vector<9x128xf32>
    %31 = vector.extract_strided_slice %1 {offsets = [0, 3, 0], sizes = [9, 1, 128], strides = [1, 1, 1]} : vector<9x10x128xf32> to vector<9x1x128xf32>
    %32 = vector.shape_cast %31 : vector<9x1x128xf32> to vector<9x128xf32>
    %cst_9 = arith.constant 0.127272725 : f32
    %33 = vector.broadcast %cst_9 : f32 to vector<9x128xf32>
    %34 = arith.mulf %32, %33 : vector<9x128xf32>
    %35 = arith.addf %30, %34 : vector<9x128xf32>
    %36 = vector.extract_strided_slice %1 {offsets = [0, 4, 0], sizes = [9, 1, 128], strides = [1, 1, 1]} : vector<9x10x128xf32> to vector<9x1x128xf32>
    %37 = vector.shape_cast %36 : vector<9x1x128xf32> to vector<9x128xf32>
    %cst_10 = arith.constant 0.109090909 : f32
    %38 = vector.broadcast %cst_10 : f32 to vector<9x128xf32>
    %39 = arith.mulf %37, %38 : vector<9x128xf32>
    %40 = arith.addf %35, %39 : vector<9x128xf32>
    %41 = vector.extract_strided_slice %1 {offsets = [0, 5, 0], sizes = [9, 1, 128], strides = [1, 1, 1]} : vector<9x10x128xf32> to vector<9x1x128xf32>
    %42 = vector.shape_cast %41 : vector<9x1x128xf32> to vector<9x128xf32>
    %cst_11 = arith.constant 0.0909090936 : f32
    %43 = vector.broadcast %cst_11 : f32 to vector<9x128xf32>
    %44 = arith.mulf %42, %43 : vector<9x128xf32>
    %45 = arith.addf %40, %44 : vector<9x128xf32>
    %46 = vector.extract_strided_slice %1 {offsets = [0, 6, 0], sizes = [9, 1, 128], strides = [1, 1, 1]} : vector<9x10x128xf32> to vector<9x1x128xf32>
    %47 = vector.shape_cast %46 : vector<9x1x128xf32> to vector<9x128xf32>
    %cst_12 = arith.constant 0.0727272704 : f32
    %48 = vector.broadcast %cst_12 : f32 to vector<9x128xf32>
    %49 = arith.mulf %47, %48 : vector<9x128xf32>
    %50 = arith.addf %45, %49 : vector<9x128xf32>
    %51 = vector.extract_strided_slice %1 {offsets = [0, 7, 0], sizes = [9, 1, 128], strides = [1, 1, 1]} : vector<9x10x128xf32> to vector<9x1x128xf32>
    %52 = vector.shape_cast %51 : vector<9x1x128xf32> to vector<9x128xf32>
    %cst_13 = arith.constant 0.0545454547 : f32
    %53 = vector.broadcast %cst_13 : f32 to vector<9x128xf32>
    %54 = arith.mulf %52, %53 : vector<9x128xf32>
    %55 = arith.addf %50, %54 : vector<9x128xf32>
    %56 = vector.extract_strided_slice %1 {offsets = [0, 8, 0], sizes = [9, 1, 128], strides = [1, 1, 1]} : vector<9x10x128xf32> to vector<9x1x128xf32>
    %57 = vector.shape_cast %56 : vector<9x1x128xf32> to vector<9x128xf32>
    %cst_14 = arith.constant 0.0363636352 : f32
    %58 = vector.broadcast %cst_14 : f32 to vector<9x128xf32>
    %59 = arith.mulf %57, %58 : vector<9x128xf32>
    %60 = arith.addf %55, %59 : vector<9x128xf32>
    %61 = vector.extract_strided_slice %1 {offsets = [0, 9, 0], sizes = [9, 1, 128], strides = [1, 1, 1]} : vector<9x10x128xf32> to vector<9x1x128xf32>
    %62 = vector.shape_cast %61 : vector<9x1x128xf32> to vector<9x128xf32>
    %cst_15 = arith.constant 0.0181818176 : f32
    %63 = vector.broadcast %cst_15 : f32 to vector<9x128xf32>
    %64 = arith.mulf %62, %63 : vector<9x128xf32>
    %65 = arith.addf %60, %64 : vector<9x128xf32>
    %66 = vector.extract_strided_slice %7 {offsets = [1, 0, 0], sizes = [8, 10, 128], strides = [1, 1, 1]} : vector<9x10x128xf32> to vector<8x10x128xf32>
    %67 = vector.extract_strided_slice %7 {offsets = [0, 0, 0], sizes = [1, 10, 128], strides = [1, 1, 1]} : vector<9x10x128xf32> to vector<1x10x128xf32>
    %68 = vector.broadcast %67 : vector<1x10x128xf32> to vector<8x10x128xf32>
    %69 = arith.mulf %66, %68 : vector<8x10x128xf32>
    %cst_16 = arith.constant dense<0.000000e+00> : vector<8x128xf32>
    %70 = vector.multi_reduction <add>, %69, %cst_16 [1] : vector<8x10x128xf32> to vector<8x128xf32>
    %71 = vector.extract_strided_slice %10 {offsets = [1, 0], sizes = [8, 128], strides = [1, 1]} : vector<9x128xf32> to vector<8x128xf32>
    %72 = arith.mulf %70, %71 : vector<8x128xf32>
    %73 = vector.extract_strided_slice %10 {offsets = [0, 0], sizes = [1, 128], strides = [1, 1]} : vector<9x128xf32> to vector<1x128xf32>
    %74 = vector.broadcast %73 : vector<1x128xf32> to vector<8x128xf32>
    %75 = arith.mulf %72, %74 : vector<8x128xf32>
    %76 = vector.extract_strided_slice %7 {offsets = [2, 0, 0], sizes = [7, 10, 128], strides = [1, 1, 1]} : vector<9x10x128xf32> to vector<7x10x128xf32>
    %77 = vector.extract_strided_slice %7 {offsets = [1, 0, 0], sizes = [1, 10, 128], strides = [1, 1, 1]} : vector<9x10x128xf32> to vector<1x10x128xf32>
    %78 = vector.broadcast %77 : vector<1x10x128xf32> to vector<7x10x128xf32>
    %79 = arith.mulf %76, %78 : vector<7x10x128xf32>
    %cst_17 = arith.constant dense<0.000000e+00> : vector<7x128xf32>
    %80 = vector.multi_reduction <add>, %79, %cst_17 [1] : vector<7x10x128xf32> to vector<7x128xf32>
    %81 = vector.extract_strided_slice %10 {offsets = [2, 0], sizes = [7, 128], strides = [1, 1]} : vector<9x128xf32> to vector<7x128xf32>
    %82 = arith.mulf %80, %81 : vector<7x128xf32>
    %83 = vector.extract_strided_slice %10 {offsets = [1, 0], sizes = [1, 128], strides = [1, 1]} : vector<9x128xf32> to vector<1x128xf32>
    %84 = vector.broadcast %83 : vector<1x128xf32> to vector<7x128xf32>
    %85 = arith.mulf %82, %84 : vector<7x128xf32>
    %86 = vector.extract_strided_slice %7 {offsets = [3, 0, 0], sizes = [6, 10, 128], strides = [1, 1, 1]} : vector<9x10x128xf32> to vector<6x10x128xf32>
    %87 = vector.extract_strided_slice %7 {offsets = [2, 0, 0], sizes = [1, 10, 128], strides = [1, 1, 1]} : vector<9x10x128xf32> to vector<1x10x128xf32>
    %88 = vector.broadcast %87 : vector<1x10x128xf32> to vector<6x10x128xf32>
    %89 = arith.mulf %86, %88 : vector<6x10x128xf32>
    %cst_18 = arith.constant dense<0.000000e+00> : vector<6x128xf32>
    %90 = vector.multi_reduction <add>, %89, %cst_18 [1] : vector<6x10x128xf32> to vector<6x128xf32>
    %91 = vector.extract_strided_slice %10 {offsets = [3, 0], sizes = [6, 128], strides = [1, 1]} : vector<9x128xf32> to vector<6x128xf32>
    %92 = arith.mulf %90, %91 : vector<6x128xf32>
    %93 = vector.extract_strided_slice %10 {offsets = [2, 0], sizes = [1, 128], strides = [1, 1]} : vector<9x128xf32> to vector<1x128xf32>
    %94 = vector.broadcast %93 : vector<1x128xf32> to vector<6x128xf32>
    %95 = arith.mulf %92, %94 : vector<6x128xf32>
    %96 = vector.extract_strided_slice %7 {offsets = [4, 0, 0], sizes = [5, 10, 128], strides = [1, 1, 1]} : vector<9x10x128xf32> to vector<5x10x128xf32>
    %97 = vector.extract_strided_slice %7 {offsets = [3, 0, 0], sizes = [1, 10, 128], strides = [1, 1, 1]} : vector<9x10x128xf32> to vector<1x10x128xf32>
    %98 = vector.broadcast %97 : vector<1x10x128xf32> to vector<5x10x128xf32>
    %99 = arith.mulf %96, %98 : vector<5x10x128xf32>
    %cst_19 = arith.constant dense<0.000000e+00> : vector<5x128xf32>
    %100 = vector.multi_reduction <add>, %99, %cst_19 [1] : vector<5x10x128xf32> to vector<5x128xf32>
    %101 = vector.extract_strided_slice %10 {offsets = [4, 0], sizes = [5, 128], strides = [1, 1]} : vector<9x128xf32> to vector<5x128xf32>
    %102 = arith.mulf %100, %101 : vector<5x128xf32>
    %103 = vector.extract_strided_slice %10 {offsets = [3, 0], sizes = [1, 128], strides = [1, 1]} : vector<9x128xf32> to vector<1x128xf32>
    %104 = vector.broadcast %103 : vector<1x128xf32> to vector<5x128xf32>
    %105 = arith.mulf %102, %104 : vector<5x128xf32>
    %106 = vector.extract_strided_slice %7 {offsets = [5, 0, 0], sizes = [4, 10, 128], strides = [1, 1, 1]} : vector<9x10x128xf32> to vector<4x10x128xf32>
    %107 = vector.extract_strided_slice %7 {offsets = [4, 0, 0], sizes = [1, 10, 128], strides = [1, 1, 1]} : vector<9x10x128xf32> to vector<1x10x128xf32>
    %108 = vector.broadcast %107 : vector<1x10x128xf32> to vector<4x10x128xf32>
    %109 = arith.mulf %106, %108 : vector<4x10x128xf32>
    %cst_20 = arith.constant dense<0.000000e+00> : vector<4x128xf32>
    %110 = vector.multi_reduction <add>, %109, %cst_20 [1] : vector<4x10x128xf32> to vector<4x128xf32>
    %111 = vector.extract_strided_slice %10 {offsets = [5, 0], sizes = [4, 128], strides = [1, 1]} : vector<9x128xf32> to vector<4x128xf32>
    %112 = arith.mulf %110, %111 : vector<4x128xf32>
    %113 = vector.extract_strided_slice %10 {offsets = [4, 0], sizes = [1, 128], strides = [1, 1]} : vector<9x128xf32> to vector<1x128xf32>
    %114 = vector.broadcast %113 : vector<1x128xf32> to vector<4x128xf32>
    %115 = arith.mulf %112, %114 : vector<4x128xf32>
    %116 = vector.extract_strided_slice %7 {offsets = [6, 0, 0], sizes = [3, 10, 128], strides = [1, 1, 1]} : vector<9x10x128xf32> to vector<3x10x128xf32>
    %117 = vector.extract_strided_slice %7 {offsets = [5, 0, 0], sizes = [1, 10, 128], strides = [1, 1, 1]} : vector<9x10x128xf32> to vector<1x10x128xf32>
    %118 = vector.broadcast %117 : vector<1x10x128xf32> to vector<3x10x128xf32>
    %119 = arith.mulf %116, %118 : vector<3x10x128xf32>
    %cst_21 = arith.constant dense<0.000000e+00> : vector<3x128xf32>
    %120 = vector.multi_reduction <add>, %119, %cst_21 [1] : vector<3x10x128xf32> to vector<3x128xf32>
    %121 = vector.extract_strided_slice %10 {offsets = [6, 0], sizes = [3, 128], strides = [1, 1]} : vector<9x128xf32> to vector<3x128xf32>
    %122 = arith.mulf %120, %121 : vector<3x128xf32>
    %123 = vector.extract_strided_slice %10 {offsets = [5, 0], sizes = [1, 128], strides = [1, 1]} : vector<9x128xf32> to vector<1x128xf32>
    %124 = vector.broadcast %123 : vector<1x128xf32> to vector<3x128xf32>
    %125 = arith.mulf %122, %124 : vector<3x128xf32>
    %126 = vector.extract_strided_slice %7 {offsets = [7, 0, 0], sizes = [2, 10, 128], strides = [1, 1, 1]} : vector<9x10x128xf32> to vector<2x10x128xf32>
    %127 = vector.extract_strided_slice %7 {offsets = [6, 0, 0], sizes = [1, 10, 128], strides = [1, 1, 1]} : vector<9x10x128xf32> to vector<1x10x128xf32>
    %128 = vector.broadcast %127 : vector<1x10x128xf32> to vector<2x10x128xf32>
    %129 = arith.mulf %126, %128 : vector<2x10x128xf32>
    %cst_22 = arith.constant dense<0.000000e+00> : vector<2x128xf32>
    %130 = vector.multi_reduction <add>, %129, %cst_22 [1] : vector<2x10x128xf32> to vector<2x128xf32>
    %131 = vector.extract_strided_slice %10 {offsets = [7, 0], sizes = [2, 128], strides = [1, 1]} : vector<9x128xf32> to vector<2x128xf32>
    %132 = arith.mulf %130, %131 : vector<2x128xf32>
    %133 = vector.extract_strided_slice %10 {offsets = [6, 0], sizes = [1, 128], strides = [1, 1]} : vector<9x128xf32> to vector<1x128xf32>
    %134 = vector.broadcast %133 : vector<1x128xf32> to vector<2x128xf32>
    %135 = arith.mulf %132, %134 : vector<2x128xf32>
    %136 = vector.extract_strided_slice %7 {offsets = [8, 0, 0], sizes = [1, 10, 128], strides = [1, 1, 1]} : vector<9x10x128xf32> to vector<1x10x128xf32>
    %137 = vector.extract_strided_slice %7 {offsets = [7, 0, 0], sizes = [1, 10, 128], strides = [1, 1, 1]} : vector<9x10x128xf32> to vector<1x10x128xf32>
    %138 = arith.mulf %136, %137 : vector<1x10x128xf32>
    %cst_23 = arith.constant dense<0.000000e+00> : vector<1x128xf32>
    %139 = vector.multi_reduction <add>, %138, %cst_23 [1] : vector<1x10x128xf32> to vector<1x128xf32>
    %140 = vector.extract_strided_slice %10 {offsets = [8, 0], sizes = [1, 128], strides = [1, 1]} : vector<9x128xf32> to vector<1x128xf32>
    %141 = arith.mulf %139, %140 : vector<1x128xf32>
    %142 = vector.extract_strided_slice %10 {offsets = [7, 0], sizes = [1, 128], strides = [1, 1]} : vector<9x128xf32> to vector<1x128xf32>
    %143 = arith.mulf %141, %142 : vector<1x128xf32>
    %144 = tpu.concatenate %75, %85, %95, %105, %115, %125, %135, %143 in 0 : vector<8x128xf32>, vector<7x128xf32>, vector<6x128xf32>, vector<5x128xf32>, vector<4x128xf32>, vector<3x128xf32>, vector<2x128xf32>, vector<1x128xf32> -> vector<36x128xf32>
    %145 = math.absf %144 : vector<36x128xf32>
    %cst_24 = arith.constant 1.000000e+00 : f32
    %146 = vector.broadcast %cst_24 : f32 to vector<36x128xf32>
    %147 = arith.minimumf %145, %146 : vector<36x128xf32>
    %cst_25 = arith.constant 1.000000e+00 : f32
    %148 = vector.broadcast %cst_25 : f32 to vector<36x128xf32>
    %149 = arith.addf %147, %148 : vector<36x128xf32>
    %cst_26 = arith.constant 5.000000e-01 : f32
    %150 = vector.broadcast %cst_26 : f32 to vector<36x128xf32>
    %151 = arith.mulf %149, %150 : vector<36x128xf32>
    %cst_27 = arith.constant 1.000000e+00 : f32
    %152 = vector.broadcast %cst_27 : f32 to vector<36x128xf32>
    %153 = arith.subf %152, %147 : vector<36x128xf32>
    %cst_28 = arith.constant 5.000000e-01 : f32
    %154 = vector.broadcast %cst_28 : f32 to vector<36x128xf32>
    %155 = arith.mulf %153, %154 : vector<36x128xf32>
    %cst_29 = arith.constant 2.000000e+00 : f32
    %156 = vector.broadcast %cst_29 : f32 to vector<36x128xf32>
    %157 = arith.mulf %156, %155 : vector<36x128xf32>
    %cst_30 = arith.constant 1.400000e+01 : f32
    %158 = vector.broadcast %cst_30 : f32 to vector<36x128xf32>
    %159 = arith.mulf %158, %151 : vector<36x128xf32>
    %160 = arith.addf %157, %159 : vector<36x128xf32>
    %161 = arith.mulf %151, %151 : vector<36x128xf32>
    %162 = arith.mulf %160, %155 : vector<36x128xf32>
    %cst_31 = arith.constant 4.200000e+01 : f32
    %163 = vector.broadcast %cst_31 : f32 to vector<36x128xf32>
    %164 = arith.mulf %163, %161 : vector<36x128xf32>
    %165 = arith.addf %162, %164 : vector<36x128xf32>
    %166 = arith.mulf %161, %151 : vector<36x128xf32>
    %167 = arith.mulf %165, %155 : vector<36x128xf32>
    %cst_32 = arith.constant 7.000000e+01 : f32
    %168 = vector.broadcast %cst_32 : f32 to vector<36x128xf32>
    %169 = arith.mulf %168, %166 : vector<36x128xf32>
    %170 = arith.addf %167, %169 : vector<36x128xf32>
    %171 = arith.mulf %155, %155 : vector<36x128xf32>
    %172 = arith.mulf %171, %155 : vector<36x128xf32>
    %173 = arith.mulf %172, %155 : vector<36x128xf32>
    %174 = arith.mulf %173, %170 : vector<36x128xf32>
    %c0_33 = arith.constant 0 : index
    %c0_34 = arith.constant 0 : index
    %c0_35 = arith.constant 0 : index
    %175 = vector.load %arg2[%c0_33, %c0_34, %c0_35] : memref<3x36x128xf32, #tpu.memory_space<vmem>>, vector<1x36x128xf32>
    %176 = vector.shape_cast %175 : vector<1x36x128xf32> to vector<36x128xf32>
    %177 = vector.shape_cast %174 : vector<36x128xf32> to vector<1x36x128xf32>
    tpu.vector_store %arg2[%c0_33, %c0_34, %c0_35], %177 {strides = array<i32>} : memref<3x36x128xf32, #tpu.memory_space<vmem>>, vector<1x36x128xf32>,
    %c0_36 = arith.constant 0 : index
    %c0_37 = arith.constant 0 : index
    %c0_38 = arith.constant 0 : index
    %178 = vector.load %arg3[%c0_36, %c0_37, %c0_38] : memref<12x9x128xf32, #tpu.memory_space<vmem>>, vector<1x9x128xf32>
    %179 = vector.shape_cast %178 : vector<1x9x128xf32> to vector<9x128xf32>
    %180 = vector.shape_cast %13 : vector<9x128xf32> to vector<1x9x128xf32>
    tpu.vector_store %arg3[%c0_36, %c0_37, %c0_38], %180 {strides = array<i32>} : memref<12x9x128xf32, #tpu.memory_space<vmem>>, vector<1x9x128xf32>,
    %c3 = arith.constant 3 : index
    %c0_39 = arith.constant 0 : index
    %c0_40 = arith.constant 0 : index
    %181 = vector.load %arg3[%c3, %c0_39, %c0_40] : memref<12x9x128xf32, #tpu.memory_space<vmem>>, vector<1x9x128xf32>
    %182 = vector.shape_cast %181 : vector<1x9x128xf32> to vector<9x128xf32>
    %183 = vector.shape_cast %16 : vector<9x128xf32> to vector<1x9x128xf32>
    tpu.vector_store %arg3[%c3, %c0_39, %c0_40], %183 {strides = array<i32>} : memref<12x9x128xf32, #tpu.memory_space<vmem>>, vector<1x9x128xf32>,
    %c6 = arith.constant 6 : index
    %c0_41 = arith.constant 0 : index
    %c0_42 = arith.constant 0 : index
    %184 = vector.load %arg3[%c6, %c0_41, %c0_42] : memref<12x9x128xf32, #tpu.memory_space<vmem>>, vector<1x9x128xf32>
    %185 = vector.shape_cast %184 : vector<1x9x128xf32> to vector<9x128xf32>
    %186 = vector.shape_cast %2 : vector<9x128xf32> to vector<1x9x128xf32>
    tpu.vector_store %arg3[%c6, %c0_41, %c0_42], %186 {strides = array<i32>} : memref<12x9x128xf32, #tpu.memory_space<vmem>>, vector<1x9x128xf32>,
    %c9 = arith.constant 9 : index
    %c0_43 = arith.constant 0 : index
    %c0_44 = arith.constant 0 : index
    %187 = vector.load %arg3[%c9, %c0_43, %c0_44] : memref<12x9x128xf32, #tpu.memory_space<vmem>>, vector<1x9x128xf32>
    %188 = vector.shape_cast %187 : vector<1x9x128xf32> to vector<9x128xf32>
    %189 = vector.shape_cast %65 : vector<9x128xf32> to vector<1x9x128xf32>
    tpu.vector_store %arg3[%c9, %c0_43, %c0_44], %189 {strides = array<i32>} : memref<12x9x128xf32, #tpu.memory_space<vmem>>, vector<1x9x128xf32>,
    %190 = vector.extract_strided_slice %0 {offsets = [0, 10, 0], sizes = [9, 10, 128], strides = [1, 1, 1]} : vector<9x30x128xf32> to vector<9x10x128xf32>
    %cst_45 = arith.constant dense<0.000000e+00> : vector<9x128xf32>
    %191 = vector.multi_reduction <add>, %190, %cst_45 [1] : vector<9x10x128xf32> to vector<9x128xf32>
    %cst_46 = arith.constant 1.000000e-01 : f32
    %192 = vector.broadcast %cst_46 : f32 to vector<9x128xf32>
    %193 = arith.mulf %191, %192 : vector<9x128xf32>
    %194 = vector.shape_cast %193 : vector<9x128xf32> to vector<9x1x128xf32>
    %195 = vector.broadcast %194 : vector<9x1x128xf32> to vector<9x10x128xf32>
    %196 = arith.subf %190, %195 : vector<9x10x128xf32>
    %197 = arith.mulf %196, %196 : vector<9x10x128xf32>
    %cst_47 = arith.constant dense<0.000000e+00> : vector<9x128xf32>
    %198 = vector.multi_reduction <add>, %197, %cst_47 [1] : vector<9x10x128xf32> to vector<9x128xf32>
    %199 = math.rsqrt %198 : vector<9x128xf32>
    %200 = arith.mulf %198, %199 : vector<9x128xf32>
    %cst_48 = arith.constant 0.316227764 : f32
    %201 = vector.broadcast %cst_48 : f32 to vector<9x128xf32>
    %202 = arith.mulf %200, %201 : vector<9x128xf32>
    %203 = arith.mulf %193, %199 : vector<9x128xf32>
    %cst_49 = arith.constant 3.1622777 : f32
    %204 = vector.broadcast %cst_49 : f32 to vector<9x128xf32>
    %205 = arith.mulf %203, %204 : vector<9x128xf32>
    %206 = vector.extract_strided_slice %190 {offsets = [0, 0, 0], sizes = [9, 1, 128], strides = [1, 1, 1]} : vector<9x10x128xf32> to vector<9x1x128xf32>
    %207 = vector.shape_cast %206 : vector<9x1x128xf32> to vector<9x128xf32>
    %cst_50 = arith.constant 0.181818187 : f32
    %208 = vector.broadcast %cst_50 : f32 to vector<9x128xf32>
    %209 = arith.mulf %207, %208 : vector<9x128xf32>
    %210 = vector.extract_strided_slice %190 {offsets = [0, 1, 0], sizes = [9, 1, 128], strides = [1, 1, 1]} : vector<9x10x128xf32> to vector<9x1x128xf32>
    %211 = vector.shape_cast %210 : vector<9x1x128xf32> to vector<9x128xf32>
    %cst_51 = arith.constant 0.163636357 : f32
    %212 = vector.broadcast %cst_51 : f32 to vector<9x128xf32>
    %213 = arith.mulf %211, %212 : vector<9x128xf32>
    %214 = arith.addf %209, %213 : vector<9x128xf32>
    %215 = vector.extract_strided_slice %190 {offsets = [0, 2, 0], sizes = [9, 1, 128], strides = [1, 1, 1]} : vector<9x10x128xf32> to vector<9x1x128xf32>
    %216 = vector.shape_cast %215 : vector<9x1x128xf32> to vector<9x128xf32>
    %cst_52 = arith.constant 0.145454541 : f32
    %217 = vector.broadcast %cst_52 : f32 to vector<9x128xf32>
    %218 = arith.mulf %216, %217 : vector<9x128xf32>
    %219 = arith.addf %214, %218 : vector<9x128xf32>
    %220 = vector.extract_strided_slice %190 {offsets = [0, 3, 0], sizes = [9, 1, 128], strides = [1, 1, 1]} : vector<9x10x128xf32> to vector<9x1x128xf32>
    %221 = vector.shape_cast %220 : vector<9x1x128xf32> to vector<9x128xf32>
    %cst_53 = arith.constant 0.127272725 : f32
    %222 = vector.broadcast %cst_53 : f32 to vector<9x128xf32>
    %223 = arith.mulf %221, %222 : vector<9x128xf32>
    %224 = arith.addf %219, %223 : vector<9x128xf32>
    %225 = vector.extract_strided_slice %190 {offsets = [0, 4, 0], sizes = [9, 1, 128], strides = [1, 1, 1]} : vector<9x10x128xf32> to vector<9x1x128xf32>
    %226 = vector.shape_cast %225 : vector<9x1x128xf32> to vector<9x128xf32>
    %cst_54 = arith.constant 0.109090909 : f32
    %227 = vector.broadcast %cst_54 : f32 to vector<9x128xf32>
    %228 = arith.mulf %226, %227 : vector<9x128xf32>
    %229 = arith.addf %224, %228 : vector<9x128xf32>
    %230 = vector.extract_strided_slice %190 {offsets = [0, 5, 0], sizes = [9, 1, 128], strides = [1, 1, 1]} : vector<9x10x128xf32> to vector<9x1x128xf32>
    %231 = vector.shape_cast %230 : vector<9x1x128xf32> to vector<9x128xf32>
    %cst_55 = arith.constant 0.0909090936 : f32
    %232 = vector.broadcast %cst_55 : f32 to vector<9x128xf32>
    %233 = arith.mulf %231, %232 : vector<9x128xf32>
    %234 = arith.addf %229, %233 : vector<9x128xf32>
    %235 = vector.extract_strided_slice %190 {offsets = [0, 6, 0], sizes = [9, 1, 128], strides = [1, 1, 1]} : vector<9x10x128xf32> to vector<9x1x128xf32>
    %236 = vector.shape_cast %235 : vector<9x1x128xf32> to vector<9x128xf32>
    %cst_56 = arith.constant 0.0727272704 : f32
    %237 = vector.broadcast %cst_56 : f32 to vector<9x128xf32>
    %238 = arith.mulf %236, %237 : vector<9x128xf32>
    %239 = arith.addf %234, %238 : vector<9x128xf32>
    %240 = vector.extract_strided_slice %190 {offsets = [0, 7, 0], sizes = [9, 1, 128], strides = [1, 1, 1]} : vector<9x10x128xf32> to vector<9x1x128xf32>
    %241 = vector.shape_cast %240 : vector<9x1x128xf32> to vector<9x128xf32>
    %cst_57 = arith.constant 0.0545454547 : f32
    %242 = vector.broadcast %cst_57 : f32 to vector<9x128xf32>
    %243 = arith.mulf %241, %242 : vector<9x128xf32>
    %244 = arith.addf %239, %243 : vector<9x128xf32>
    %245 = vector.extract_strided_slice %190 {offsets = [0, 8, 0], sizes = [9, 1, 128], strides = [1, 1, 1]} : vector<9x10x128xf32> to vector<9x1x128xf32>
    %246 = vector.shape_cast %245 : vector<9x1x128xf32> to vector<9x128xf32>
    %cst_58 = arith.constant 0.0363636352 : f32
    %247 = vector.broadcast %cst_58 : f32 to vector<9x128xf32>
    %248 = arith.mulf %246, %247 : vector<9x128xf32>
    %249 = arith.addf %244, %248 : vector<9x128xf32>
    %250 = vector.extract_strided_slice %190 {offsets = [0, 9, 0], sizes = [9, 1, 128], strides = [1, 1, 1]} : vector<9x10x128xf32> to vector<9x1x128xf32>
    %251 = vector.shape_cast %250 : vector<9x1x128xf32> to vector<9x128xf32>
    %cst_59 = arith.constant 0.0181818176 : f32
    %252 = vector.broadcast %cst_59 : f32 to vector<9x128xf32>
    %253 = arith.mulf %251, %252 : vector<9x128xf32>
    %254 = arith.addf %249, %253 : vector<9x128xf32>
    %255 = vector.extract_strided_slice %196 {offsets = [1, 0, 0], sizes = [8, 10, 128], strides = [1, 1, 1]} : vector<9x10x128xf32> to vector<8x10x128xf32>
    %256 = vector.extract_strided_slice %196 {offsets = [0, 0, 0], sizes = [1, 10, 128], strides = [1, 1, 1]} : vector<9x10x128xf32> to vector<1x10x128xf32>
    %257 = vector.broadcast %256 : vector<1x10x128xf32> to vector<8x10x128xf32>
    %258 = arith.mulf %255, %257 : vector<8x10x128xf32>
    %cst_60 = arith.constant dense<0.000000e+00> : vector<8x128xf32>
    %259 = vector.multi_reduction <add>, %258, %cst_60 [1] : vector<8x10x128xf32> to vector<8x128xf32>
    %260 = vector.extract_strided_slice %199 {offsets = [1, 0], sizes = [8, 128], strides = [1, 1]} : vector<9x128xf32> to vector<8x128xf32>
    %261 = arith.mulf %259, %260 : vector<8x128xf32>
    %262 = vector.extract_strided_slice %199 {offsets = [0, 0], sizes = [1, 128], strides = [1, 1]} : vector<9x128xf32> to vector<1x128xf32>
    %263 = vector.broadcast %262 : vector<1x128xf32> to vector<8x128xf32>
    %264 = arith.mulf %261, %263 : vector<8x128xf32>
    %265 = vector.extract_strided_slice %196 {offsets = [2, 0, 0], sizes = [7, 10, 128], strides = [1, 1, 1]} : vector<9x10x128xf32> to vector<7x10x128xf32>
    %266 = vector.extract_strided_slice %196 {offsets = [1, 0, 0], sizes = [1, 10, 128], strides = [1, 1, 1]} : vector<9x10x128xf32> to vector<1x10x128xf32>
    %267 = vector.broadcast %266 : vector<1x10x128xf32> to vector<7x10x128xf32>
    %268 = arith.mulf %265, %267 : vector<7x10x128xf32>
    %cst_61 = arith.constant dense<0.000000e+00> : vector<7x128xf32>
    %269 = vector.multi_reduction <add>, %268, %cst_61 [1] : vector<7x10x128xf32> to vector<7x128xf32>
    %270 = vector.extract_strided_slice %199 {offsets = [2, 0], sizes = [7, 128], strides = [1, 1]} : vector<9x128xf32> to vector<7x128xf32>
    %271 = arith.mulf %269, %270 : vector<7x128xf32>
    %272 = vector.extract_strided_slice %199 {offsets = [1, 0], sizes = [1, 128], strides = [1, 1]} : vector<9x128xf32> to vector<1x128xf32>
    %273 = vector.broadcast %272 : vector<1x128xf32> to vector<7x128xf32>
    %274 = arith.mulf %271, %273 : vector<7x128xf32>
    %275 = vector.extract_strided_slice %196 {offsets = [3, 0, 0], sizes = [6, 10, 128], strides = [1, 1, 1]} : vector<9x10x128xf32> to vector<6x10x128xf32>
    %276 = vector.extract_strided_slice %196 {offsets = [2, 0, 0], sizes = [1, 10, 128], strides = [1, 1, 1]} : vector<9x10x128xf32> to vector<1x10x128xf32>
    %277 = vector.broadcast %276 : vector<1x10x128xf32> to vector<6x10x128xf32>
    %278 = arith.mulf %275, %277 : vector<6x10x128xf32>
    %cst_62 = arith.constant dense<0.000000e+00> : vector<6x128xf32>
    %279 = vector.multi_reduction <add>, %278, %cst_62 [1] : vector<6x10x128xf32> to vector<6x128xf32>
    %280 = vector.extract_strided_slice %199 {offsets = [3, 0], sizes = [6, 128], strides = [1, 1]} : vector<9x128xf32> to vector<6x128xf32>
    %281 = arith.mulf %279, %280 : vector<6x128xf32>
    %282 = vector.extract_strided_slice %199 {offsets = [2, 0], sizes = [1, 128], strides = [1, 1]} : vector<9x128xf32> to vector<1x128xf32>
    %283 = vector.broadcast %282 : vector<1x128xf32> to vector<6x128xf32>
    %284 = arith.mulf %281, %283 : vector<6x128xf32>
    %285 = vector.extract_strided_slice %196 {offsets = [4, 0, 0], sizes = [5, 10, 128], strides = [1, 1, 1]} : vector<9x10x128xf32> to vector<5x10x128xf32>
    %286 = vector.extract_strided_slice %196 {offsets = [3, 0, 0], sizes = [1, 10, 128], strides = [1, 1, 1]} : vector<9x10x128xf32> to vector<1x10x128xf32>
    %287 = vector.broadcast %286 : vector<1x10x128xf32> to vector<5x10x128xf32>
    %288 = arith.mulf %285, %287 : vector<5x10x128xf32>
    %cst_63 = arith.constant dense<0.000000e+00> : vector<5x128xf32>
    %289 = vector.multi_reduction <add>, %288, %cst_63 [1] : vector<5x10x128xf32> to vector<5x128xf32>
    %290 = vector.extract_strided_slice %199 {offsets = [4, 0], sizes = [5, 128], strides = [1, 1]} : vector<9x128xf32> to vector<5x128xf32>
    %291 = arith.mulf %289, %290 : vector<5x128xf32>
    %292 = vector.extract_strided_slice %199 {offsets = [3, 0], sizes = [1, 128], strides = [1, 1]} : vector<9x128xf32> to vector<1x128xf32>
    %293 = vector.broadcast %292 : vector<1x128xf32> to vector<5x128xf32>
    %294 = arith.mulf %291, %293 : vector<5x128xf32>
    %295 = vector.extract_strided_slice %196 {offsets = [5, 0, 0], sizes = [4, 10, 128], strides = [1, 1, 1]} : vector<9x10x128xf32> to vector<4x10x128xf32>
    %296 = vector.extract_strided_slice %196 {offsets = [4, 0, 0], sizes = [1, 10, 128], strides = [1, 1, 1]} : vector<9x10x128xf32> to vector<1x10x128xf32>
    %297 = vector.broadcast %296 : vector<1x10x128xf32> to vector<4x10x128xf32>
    %298 = arith.mulf %295, %297 : vector<4x10x128xf32>
    %cst_64 = arith.constant dense<0.000000e+00> : vector<4x128xf32>
    %299 = vector.multi_reduction <add>, %298, %cst_64 [1] : vector<4x10x128xf32> to vector<4x128xf32>
    %300 = vector.extract_strided_slice %199 {offsets = [5, 0], sizes = [4, 128], strides = [1, 1]} : vector<9x128xf32> to vector<4x128xf32>
    %301 = arith.mulf %299, %300 : vector<4x128xf32>
    %302 = vector.extract_strided_slice %199 {offsets = [4, 0], sizes = [1, 128], strides = [1, 1]} : vector<9x128xf32> to vector<1x128xf32>
    %303 = vector.broadcast %302 : vector<1x128xf32> to vector<4x128xf32>
    %304 = arith.mulf %301, %303 : vector<4x128xf32>
    %305 = vector.extract_strided_slice %196 {offsets = [6, 0, 0], sizes = [3, 10, 128], strides = [1, 1, 1]} : vector<9x10x128xf32> to vector<3x10x128xf32>
    %306 = vector.extract_strided_slice %196 {offsets = [5, 0, 0], sizes = [1, 10, 128], strides = [1, 1, 1]} : vector<9x10x128xf32> to vector<1x10x128xf32>
    %307 = vector.broadcast %306 : vector<1x10x128xf32> to vector<3x10x128xf32>
    %308 = arith.mulf %305, %307 : vector<3x10x128xf32>
    %cst_65 = arith.constant dense<0.000000e+00> : vector<3x128xf32>
    %309 = vector.multi_reduction <add>, %308, %cst_65 [1] : vector<3x10x128xf32> to vector<3x128xf32>
    %310 = vector.extract_strided_slice %199 {offsets = [6, 0], sizes = [3, 128], strides = [1, 1]} : vector<9x128xf32> to vector<3x128xf32>
    %311 = arith.mulf %309, %310 : vector<3x128xf32>
    %312 = vector.extract_strided_slice %199 {offsets = [5, 0], sizes = [1, 128], strides = [1, 1]} : vector<9x128xf32> to vector<1x128xf32>
    %313 = vector.broadcast %312 : vector<1x128xf32> to vector<3x128xf32>
    %314 = arith.mulf %311, %313 : vector<3x128xf32>
    %315 = vector.extract_strided_slice %196 {offsets = [7, 0, 0], sizes = [2, 10, 128], strides = [1, 1, 1]} : vector<9x10x128xf32> to vector<2x10x128xf32>
    %316 = vector.extract_strided_slice %196 {offsets = [6, 0, 0], sizes = [1, 10, 128], strides = [1, 1, 1]} : vector<9x10x128xf32> to vector<1x10x128xf32>
    %317 = vector.broadcast %316 : vector<1x10x128xf32> to vector<2x10x128xf32>
    %318 = arith.mulf %315, %317 : vector<2x10x128xf32>
    %cst_66 = arith.constant dense<0.000000e+00> : vector<2x128xf32>
    %319 = vector.multi_reduction <add>, %318, %cst_66 [1] : vector<2x10x128xf32> to vector<2x128xf32>
    %320 = vector.extract_strided_slice %199 {offsets = [7, 0], sizes = [2, 128], strides = [1, 1]} : vector<9x128xf32> to vector<2x128xf32>
    %321 = arith.mulf %319, %320 : vector<2x128xf32>
    %322 = vector.extract_strided_slice %199 {offsets = [6, 0], sizes = [1, 128], strides = [1, 1]} : vector<9x128xf32> to vector<1x128xf32>
    %323 = vector.broadcast %322 : vector<1x128xf32> to vector<2x128xf32>
    %324 = arith.mulf %321, %323 : vector<2x128xf32>
    %325 = vector.extract_strided_slice %196 {offsets = [8, 0, 0], sizes = [1, 10, 128], strides = [1, 1, 1]} : vector<9x10x128xf32> to vector<1x10x128xf32>
    %326 = vector.extract_strided_slice %196 {offsets = [7, 0, 0], sizes = [1, 10, 128], strides = [1, 1, 1]} : vector<9x10x128xf32> to vector<1x10x128xf32>
    %327 = arith.mulf %325, %326 : vector<1x10x128xf32>
    %cst_67 = arith.constant dense<0.000000e+00> : vector<1x128xf32>
    %328 = vector.multi_reduction <add>, %327, %cst_67 [1] : vector<1x10x128xf32> to vector<1x128xf32>
    %329 = vector.extract_strided_slice %199 {offsets = [8, 0], sizes = [1, 128], strides = [1, 1]} : vector<9x128xf32> to vector<1x128xf32>
    %330 = arith.mulf %328, %329 : vector<1x128xf32>
    %331 = vector.extract_strided_slice %199 {offsets = [7, 0], sizes = [1, 128], strides = [1, 1]} : vector<9x128xf32> to vector<1x128xf32>
    %332 = arith.mulf %330, %331 : vector<1x128xf32>
    %333 = tpu.concatenate %264, %274, %284, %294, %304, %314, %324, %332 in 0 : vector<8x128xf32>, vector<7x128xf32>, vector<6x128xf32>, vector<5x128xf32>, vector<4x128xf32>, vector<3x128xf32>, vector<2x128xf32>, vector<1x128xf32> -> vector<36x128xf32>
    %334 = math.absf %333 : vector<36x128xf32>
    %cst_68 = arith.constant 1.000000e+00 : f32
    %335 = vector.broadcast %cst_68 : f32 to vector<36x128xf32>
    %336 = arith.minimumf %334, %335 : vector<36x128xf32>
    %cst_69 = arith.constant 1.000000e+00 : f32
    %337 = vector.broadcast %cst_69 : f32 to vector<36x128xf32>
    %338 = arith.addf %336, %337 : vector<36x128xf32>
    %cst_70 = arith.constant 5.000000e-01 : f32
    %339 = vector.broadcast %cst_70 : f32 to vector<36x128xf32>
    %340 = arith.mulf %338, %339 : vector<36x128xf32>
    %cst_71 = arith.constant 1.000000e+00 : f32
    %341 = vector.broadcast %cst_71 : f32 to vector<36x128xf32>
    %342 = arith.subf %341, %336 : vector<36x128xf32>
    %cst_72 = arith.constant 5.000000e-01 : f32
    %343 = vector.broadcast %cst_72 : f32 to vector<36x128xf32>
    %344 = arith.mulf %342, %343 : vector<36x128xf32>
    %cst_73 = arith.constant 2.000000e+00 : f32
    %345 = vector.broadcast %cst_73 : f32 to vector<36x128xf32>
    %346 = arith.mulf %345, %344 : vector<36x128xf32>
    %cst_74 = arith.constant 1.400000e+01 : f32
    %347 = vector.broadcast %cst_74 : f32 to vector<36x128xf32>
    %348 = arith.mulf %347, %340 : vector<36x128xf32>
    %349 = arith.addf %346, %348 : vector<36x128xf32>
    %350 = arith.mulf %340, %340 : vector<36x128xf32>
    %351 = arith.mulf %349, %344 : vector<36x128xf32>
    %cst_75 = arith.constant 4.200000e+01 : f32
    %352 = vector.broadcast %cst_75 : f32 to vector<36x128xf32>
    %353 = arith.mulf %352, %350 : vector<36x128xf32>
    %354 = arith.addf %351, %353 : vector<36x128xf32>
    %355 = arith.mulf %350, %340 : vector<36x128xf32>
    %356 = arith.mulf %354, %344 : vector<36x128xf32>
    %cst_76 = arith.constant 7.000000e+01 : f32
    %357 = vector.broadcast %cst_76 : f32 to vector<36x128xf32>
    %358 = arith.mulf %357, %355 : vector<36x128xf32>
    %359 = arith.addf %356, %358 : vector<36x128xf32>
    %360 = arith.mulf %344, %344 : vector<36x128xf32>
    %361 = arith.mulf %360, %344 : vector<36x128xf32>
    %362 = arith.mulf %361, %344 : vector<36x128xf32>
    %363 = arith.mulf %362, %359 : vector<36x128xf32>
    %c1 = arith.constant 1 : index
    %c0_77 = arith.constant 0 : index
    %c0_78 = arith.constant 0 : index
    %364 = vector.load %arg2[%c1, %c0_77, %c0_78] : memref<3x36x128xf32, #tpu.memory_space<vmem>>, vector<1x36x128xf32>
    %365 = vector.shape_cast %364 : vector<1x36x128xf32> to vector<36x128xf32>
    %366 = vector.shape_cast %363 : vector<36x128xf32> to vector<1x36x128xf32>
    tpu.vector_store %arg2[%c1, %c0_77, %c0_78], %366 {strides = array<i32>} : memref<3x36x128xf32, #tpu.memory_space<vmem>>, vector<1x36x128xf32>,
    %c1_79 = arith.constant 1 : index
    %c0_80 = arith.constant 0 : index
    %c0_81 = arith.constant 0 : index
    %367 = vector.load %arg3[%c1_79, %c0_80, %c0_81] : memref<12x9x128xf32, #tpu.memory_space<vmem>>, vector<1x9x128xf32>
    %368 = vector.shape_cast %367 : vector<1x9x128xf32> to vector<9x128xf32>
    %369 = vector.shape_cast %202 : vector<9x128xf32> to vector<1x9x128xf32>
    tpu.vector_store %arg3[%c1_79, %c0_80, %c0_81], %369 {strides = array<i32>} : memref<12x9x128xf32, #tpu.memory_space<vmem>>, vector<1x9x128xf32>,
    %c4 = arith.constant 4 : index
    %c0_82 = arith.constant 0 : index
    %c0_83 = arith.constant 0 : index
    %370 = vector.load %arg3[%c4, %c0_82, %c0_83] : memref<12x9x128xf32, #tpu.memory_space<vmem>>, vector<1x9x128xf32>
    %371 = vector.shape_cast %370 : vector<1x9x128xf32> to vector<9x128xf32>
    %372 = vector.shape_cast %205 : vector<9x128xf32> to vector<1x9x128xf32>
    tpu.vector_store %arg3[%c4, %c0_82, %c0_83], %372 {strides = array<i32>} : memref<12x9x128xf32, #tpu.memory_space<vmem>>, vector<1x9x128xf32>,
    %c7 = arith.constant 7 : index
    %c0_84 = arith.constant 0 : index
    %c0_85 = arith.constant 0 : index
    %373 = vector.load %arg3[%c7, %c0_84, %c0_85] : memref<12x9x128xf32, #tpu.memory_space<vmem>>, vector<1x9x128xf32>
    %374 = vector.shape_cast %373 : vector<1x9x128xf32> to vector<9x128xf32>
    %375 = vector.shape_cast %191 : vector<9x128xf32> to vector<1x9x128xf32>
    tpu.vector_store %arg3[%c7, %c0_84, %c0_85], %375 {strides = array<i32>} : memref<12x9x128xf32, #tpu.memory_space<vmem>>, vector<1x9x128xf32>,
    %c10 = arith.constant 10 : index
    %c0_86 = arith.constant 0 : index
    %c0_87 = arith.constant 0 : index
    %376 = vector.load %arg3[%c10, %c0_86, %c0_87] : memref<12x9x128xf32, #tpu.memory_space<vmem>>, vector<1x9x128xf32>
    %377 = vector.shape_cast %376 : vector<1x9x128xf32> to vector<9x128xf32>
    %378 = vector.shape_cast %254 : vector<9x128xf32> to vector<1x9x128xf32>
    tpu.vector_store %arg3[%c10, %c0_86, %c0_87], %378 {strides = array<i32>} : memref<12x9x128xf32, #tpu.memory_space<vmem>>, vector<1x9x128xf32>,
    %379 = vector.extract_strided_slice %0 {offsets = [0, 20, 0], sizes = [9, 10, 128], strides = [1, 1, 1]} : vector<9x30x128xf32> to vector<9x10x128xf32>
    %cst_88 = arith.constant dense<0.000000e+00> : vector<9x128xf32>
    %380 = vector.multi_reduction <add>, %379, %cst_88 [1] : vector<9x10x128xf32> to vector<9x128xf32>
    %cst_89 = arith.constant 1.000000e-01 : f32
    %381 = vector.broadcast %cst_89 : f32 to vector<9x128xf32>
    %382 = arith.mulf %380, %381 : vector<9x128xf32>
    %383 = vector.shape_cast %382 : vector<9x128xf32> to vector<9x1x128xf32>
    %384 = vector.broadcast %383 : vector<9x1x128xf32> to vector<9x10x128xf32>
    %385 = arith.subf %379, %384 : vector<9x10x128xf32>
    %386 = arith.mulf %385, %385 : vector<9x10x128xf32>
    %cst_90 = arith.constant dense<0.000000e+00> : vector<9x128xf32>
    %387 = vector.multi_reduction <add>, %386, %cst_90 [1] : vector<9x10x128xf32> to vector<9x128xf32>
    %388 = math.rsqrt %387 : vector<9x128xf32>
    %389 = arith.mulf %387, %388 : vector<9x128xf32>
    %cst_91 = arith.constant 0.316227764 : f32
    %390 = vector.broadcast %cst_91 : f32 to vector<9x128xf32>
    %391 = arith.mulf %389, %390 : vector<9x128xf32>
    %392 = arith.mulf %382, %388 : vector<9x128xf32>
    %cst_92 = arith.constant 3.1622777 : f32
    %393 = vector.broadcast %cst_92 : f32 to vector<9x128xf32>
    %394 = arith.mulf %392, %393 : vector<9x128xf32>
    %395 = vector.extract_strided_slice %379 {offsets = [0, 0, 0], sizes = [9, 1, 128], strides = [1, 1, 1]} : vector<9x10x128xf32> to vector<9x1x128xf32>
    %396 = vector.shape_cast %395 : vector<9x1x128xf32> to vector<9x128xf32>
    %cst_93 = arith.constant 0.181818187 : f32
    %397 = vector.broadcast %cst_93 : f32 to vector<9x128xf32>
    %398 = arith.mulf %396, %397 : vector<9x128xf32>
    %399 = vector.extract_strided_slice %379 {offsets = [0, 1, 0], sizes = [9, 1, 128], strides = [1, 1, 1]} : vector<9x10x128xf32> to vector<9x1x128xf32>
    %400 = vector.shape_cast %399 : vector<9x1x128xf32> to vector<9x128xf32>
    %cst_94 = arith.constant 0.163636357 : f32
    %401 = vector.broadcast %cst_94 : f32 to vector<9x128xf32>
    %402 = arith.mulf %400, %401 : vector<9x128xf32>
    %403 = arith.addf %398, %402 : vector<9x128xf32>
    %404 = vector.extract_strided_slice %379 {offsets = [0, 2, 0], sizes = [9, 1, 128], strides = [1, 1, 1]} : vector<9x10x128xf32> to vector<9x1x128xf32>
    %405 = vector.shape_cast %404 : vector<9x1x128xf32> to vector<9x128xf32>
    %cst_95 = arith.constant 0.145454541 : f32
    %406 = vector.broadcast %cst_95 : f32 to vector<9x128xf32>
    %407 = arith.mulf %405, %406 : vector<9x128xf32>
    %408 = arith.addf %403, %407 : vector<9x128xf32>
    %409 = vector.extract_strided_slice %379 {offsets = [0, 3, 0], sizes = [9, 1, 128], strides = [1, 1, 1]} : vector<9x10x128xf32> to vector<9x1x128xf32>
    %410 = vector.shape_cast %409 : vector<9x1x128xf32> to vector<9x128xf32>
    %cst_96 = arith.constant 0.127272725 : f32
    %411 = vector.broadcast %cst_96 : f32 to vector<9x128xf32>
    %412 = arith.mulf %410, %411 : vector<9x128xf32>
    %413 = arith.addf %408, %412 : vector<9x128xf32>
    %414 = vector.extract_strided_slice %379 {offsets = [0, 4, 0], sizes = [9, 1, 128], strides = [1, 1, 1]} : vector<9x10x128xf32> to vector<9x1x128xf32>
    %415 = vector.shape_cast %414 : vector<9x1x128xf32> to vector<9x128xf32>
    %cst_97 = arith.constant 0.109090909 : f32
    %416 = vector.broadcast %cst_97 : f32 to vector<9x128xf32>
    %417 = arith.mulf %415, %416 : vector<9x128xf32>
    %418 = arith.addf %413, %417 : vector<9x128xf32>
    %419 = vector.extract_strided_slice %379 {offsets = [0, 5, 0], sizes = [9, 1, 128], strides = [1, 1, 1]} : vector<9x10x128xf32> to vector<9x1x128xf32>
    %420 = vector.shape_cast %419 : vector<9x1x128xf32> to vector<9x128xf32>
    %cst_98 = arith.constant 0.0909090936 : f32
    %421 = vector.broadcast %cst_98 : f32 to vector<9x128xf32>
    %422 = arith.mulf %420, %421 : vector<9x128xf32>
    %423 = arith.addf %418, %422 : vector<9x128xf32>
    %424 = vector.extract_strided_slice %379 {offsets = [0, 6, 0], sizes = [9, 1, 128], strides = [1, 1, 1]} : vector<9x10x128xf32> to vector<9x1x128xf32>
    %425 = vector.shape_cast %424 : vector<9x1x128xf32> to vector<9x128xf32>
    %cst_99 = arith.constant 0.0727272704 : f32
    %426 = vector.broadcast %cst_99 : f32 to vector<9x128xf32>
    %427 = arith.mulf %425, %426 : vector<9x128xf32>
    %428 = arith.addf %423, %427 : vector<9x128xf32>
    %429 = vector.extract_strided_slice %379 {offsets = [0, 7, 0], sizes = [9, 1, 128], strides = [1, 1, 1]} : vector<9x10x128xf32> to vector<9x1x128xf32>
    %430 = vector.shape_cast %429 : vector<9x1x128xf32> to vector<9x128xf32>
    %cst_100 = arith.constant 0.0545454547 : f32
    %431 = vector.broadcast %cst_100 : f32 to vector<9x128xf32>
    %432 = arith.mulf %430, %431 : vector<9x128xf32>
    %433 = arith.addf %428, %432 : vector<9x128xf32>
    %434 = vector.extract_strided_slice %379 {offsets = [0, 8, 0], sizes = [9, 1, 128], strides = [1, 1, 1]} : vector<9x10x128xf32> to vector<9x1x128xf32>
    %435 = vector.shape_cast %434 : vector<9x1x128xf32> to vector<9x128xf32>
    %cst_101 = arith.constant 0.0363636352 : f32
    %436 = vector.broadcast %cst_101 : f32 to vector<9x128xf32>
    %437 = arith.mulf %435, %436 : vector<9x128xf32>
    %438 = arith.addf %433, %437 : vector<9x128xf32>
    %439 = vector.extract_strided_slice %379 {offsets = [0, 9, 0], sizes = [9, 1, 128], strides = [1, 1, 1]} : vector<9x10x128xf32> to vector<9x1x128xf32>
    %440 = vector.shape_cast %439 : vector<9x1x128xf32> to vector<9x128xf32>
    %cst_102 = arith.constant 0.0181818176 : f32
    %441 = vector.broadcast %cst_102 : f32 to vector<9x128xf32>
    %442 = arith.mulf %440, %441 : vector<9x128xf32>
    %443 = arith.addf %438, %442 : vector<9x128xf32>
    %444 = vector.extract_strided_slice %385 {offsets = [1, 0, 0], sizes = [8, 10, 128], strides = [1, 1, 1]} : vector<9x10x128xf32> to vector<8x10x128xf32>
    %445 = vector.extract_strided_slice %385 {offsets = [0, 0, 0], sizes = [1, 10, 128], strides = [1, 1, 1]} : vector<9x10x128xf32> to vector<1x10x128xf32>
    %446 = vector.broadcast %445 : vector<1x10x128xf32> to vector<8x10x128xf32>
    %447 = arith.mulf %444, %446 : vector<8x10x128xf32>
    %cst_103 = arith.constant dense<0.000000e+00> : vector<8x128xf32>
    %448 = vector.multi_reduction <add>, %447, %cst_103 [1] : vector<8x10x128xf32> to vector<8x128xf32>
    %449 = vector.extract_strided_slice %388 {offsets = [1, 0], sizes = [8, 128], strides = [1, 1]} : vector<9x128xf32> to vector<8x128xf32>
    %450 = arith.mulf %448, %449 : vector<8x128xf32>
    %451 = vector.extract_strided_slice %388 {offsets = [0, 0], sizes = [1, 128], strides = [1, 1]} : vector<9x128xf32> to vector<1x128xf32>
    %452 = vector.broadcast %451 : vector<1x128xf32> to vector<8x128xf32>
    %453 = arith.mulf %450, %452 : vector<8x128xf32>
    %454 = vector.extract_strided_slice %385 {offsets = [2, 0, 0], sizes = [7, 10, 128], strides = [1, 1, 1]} : vector<9x10x128xf32> to vector<7x10x128xf32>
    %455 = vector.extract_strided_slice %385 {offsets = [1, 0, 0], sizes = [1, 10, 128], strides = [1, 1, 1]} : vector<9x10x128xf32> to vector<1x10x128xf32>
    %456 = vector.broadcast %455 : vector<1x10x128xf32> to vector<7x10x128xf32>
    %457 = arith.mulf %454, %456 : vector<7x10x128xf32>
    %cst_104 = arith.constant dense<0.000000e+00> : vector<7x128xf32>
    %458 = vector.multi_reduction <add>, %457, %cst_104 [1] : vector<7x10x128xf32> to vector<7x128xf32>
    %459 = vector.extract_strided_slice %388 {offsets = [2, 0], sizes = [7, 128], strides = [1, 1]} : vector<9x128xf32> to vector<7x128xf32>
    %460 = arith.mulf %458, %459 : vector<7x128xf32>
    %461 = vector.extract_strided_slice %388 {offsets = [1, 0], sizes = [1, 128], strides = [1, 1]} : vector<9x128xf32> to vector<1x128xf32>
    %462 = vector.broadcast %461 : vector<1x128xf32> to vector<7x128xf32>
    %463 = arith.mulf %460, %462 : vector<7x128xf32>
    %464 = vector.extract_strided_slice %385 {offsets = [3, 0, 0], sizes = [6, 10, 128], strides = [1, 1, 1]} : vector<9x10x128xf32> to vector<6x10x128xf32>
    %465 = vector.extract_strided_slice %385 {offsets = [2, 0, 0], sizes = [1, 10, 128], strides = [1, 1, 1]} : vector<9x10x128xf32> to vector<1x10x128xf32>
    %466 = vector.broadcast %465 : vector<1x10x128xf32> to vector<6x10x128xf32>
    %467 = arith.mulf %464, %466 : vector<6x10x128xf32>
    %cst_105 = arith.constant dense<0.000000e+00> : vector<6x128xf32>
    %468 = vector.multi_reduction <add>, %467, %cst_105 [1] : vector<6x10x128xf32> to vector<6x128xf32>
    %469 = vector.extract_strided_slice %388 {offsets = [3, 0], sizes = [6, 128], strides = [1, 1]} : vector<9x128xf32> to vector<6x128xf32>
    %470 = arith.mulf %468, %469 : vector<6x128xf32>
    %471 = vector.extract_strided_slice %388 {offsets = [2, 0], sizes = [1, 128], strides = [1, 1]} : vector<9x128xf32> to vector<1x128xf32>
    %472 = vector.broadcast %471 : vector<1x128xf32> to vector<6x128xf32>
    %473 = arith.mulf %470, %472 : vector<6x128xf32>
    %474 = vector.extract_strided_slice %385 {offsets = [4, 0, 0], sizes = [5, 10, 128], strides = [1, 1, 1]} : vector<9x10x128xf32> to vector<5x10x128xf32>
    %475 = vector.extract_strided_slice %385 {offsets = [3, 0, 0], sizes = [1, 10, 128], strides = [1, 1, 1]} : vector<9x10x128xf32> to vector<1x10x128xf32>
    %476 = vector.broadcast %475 : vector<1x10x128xf32> to vector<5x10x128xf32>
    %477 = arith.mulf %474, %476 : vector<5x10x128xf32>
    %cst_106 = arith.constant dense<0.000000e+00> : vector<5x128xf32>
    %478 = vector.multi_reduction <add>, %477, %cst_106 [1] : vector<5x10x128xf32> to vector<5x128xf32>
    %479 = vector.extract_strided_slice %388 {offsets = [4, 0], sizes = [5, 128], strides = [1, 1]} : vector<9x128xf32> to vector<5x128xf32>
    %480 = arith.mulf %478, %479 : vector<5x128xf32>
    %481 = vector.extract_strided_slice %388 {offsets = [3, 0], sizes = [1, 128], strides = [1, 1]} : vector<9x128xf32> to vector<1x128xf32>
    %482 = vector.broadcast %481 : vector<1x128xf32> to vector<5x128xf32>
    %483 = arith.mulf %480, %482 : vector<5x128xf32>
    %484 = vector.extract_strided_slice %385 {offsets = [5, 0, 0], sizes = [4, 10, 128], strides = [1, 1, 1]} : vector<9x10x128xf32> to vector<4x10x128xf32>
    %485 = vector.extract_strided_slice %385 {offsets = [4, 0, 0], sizes = [1, 10, 128], strides = [1, 1, 1]} : vector<9x10x128xf32> to vector<1x10x128xf32>
    %486 = vector.broadcast %485 : vector<1x10x128xf32> to vector<4x10x128xf32>
    %487 = arith.mulf %484, %486 : vector<4x10x128xf32>
    %cst_107 = arith.constant dense<0.000000e+00> : vector<4x128xf32>
    %488 = vector.multi_reduction <add>, %487, %cst_107 [1] : vector<4x10x128xf32> to vector<4x128xf32>
    %489 = vector.extract_strided_slice %388 {offsets = [5, 0], sizes = [4, 128], strides = [1, 1]} : vector<9x128xf32> to vector<4x128xf32>
    %490 = arith.mulf %488, %489 : vector<4x128xf32>
    %491 = vector.extract_strided_slice %388 {offsets = [4, 0], sizes = [1, 128], strides = [1, 1]} : vector<9x128xf32> to vector<1x128xf32>
    %492 = vector.broadcast %491 : vector<1x128xf32> to vector<4x128xf32>
    %493 = arith.mulf %490, %492 : vector<4x128xf32>
    %494 = vector.extract_strided_slice %385 {offsets = [6, 0, 0], sizes = [3, 10, 128], strides = [1, 1, 1]} : vector<9x10x128xf32> to vector<3x10x128xf32>
    %495 = vector.extract_strided_slice %385 {offsets = [5, 0, 0], sizes = [1, 10, 128], strides = [1, 1, 1]} : vector<9x10x128xf32> to vector<1x10x128xf32>
    %496 = vector.broadcast %495 : vector<1x10x128xf32> to vector<3x10x128xf32>
    %497 = arith.mulf %494, %496 : vector<3x10x128xf32>
    %cst_108 = arith.constant dense<0.000000e+00> : vector<3x128xf32>
    %498 = vector.multi_reduction <add>, %497, %cst_108 [1] : vector<3x10x128xf32> to vector<3x128xf32>
    %499 = vector.extract_strided_slice %388 {offsets = [6, 0], sizes = [3, 128], strides = [1, 1]} : vector<9x128xf32> to vector<3x128xf32>
    %500 = arith.mulf %498, %499 : vector<3x128xf32>
    %501 = vector.extract_strided_slice %388 {offsets = [5, 0], sizes = [1, 128], strides = [1, 1]} : vector<9x128xf32> to vector<1x128xf32>
    %502 = vector.broadcast %501 : vector<1x128xf32> to vector<3x128xf32>
    %503 = arith.mulf %500, %502 : vector<3x128xf32>
    %504 = vector.extract_strided_slice %385 {offsets = [7, 0, 0], sizes = [2, 10, 128], strides = [1, 1, 1]} : vector<9x10x128xf32> to vector<2x10x128xf32>
    %505 = vector.extract_strided_slice %385 {offsets = [6, 0, 0], sizes = [1, 10, 128], strides = [1, 1, 1]} : vector<9x10x128xf32> to vector<1x10x128xf32>
    %506 = vector.broadcast %505 : vector<1x10x128xf32> to vector<2x10x128xf32>
    %507 = arith.mulf %504, %506 : vector<2x10x128xf32>
    %cst_109 = arith.constant dense<0.000000e+00> : vector<2x128xf32>
    %508 = vector.multi_reduction <add>, %507, %cst_109 [1] : vector<2x10x128xf32> to vector<2x128xf32>
    %509 = vector.extract_strided_slice %388 {offsets = [7, 0], sizes = [2, 128], strides = [1, 1]} : vector<9x128xf32> to vector<2x128xf32>
    %510 = arith.mulf %508, %509 : vector<2x128xf32>
    %511 = vector.extract_strided_slice %388 {offsets = [6, 0], sizes = [1, 128], strides = [1, 1]} : vector<9x128xf32> to vector<1x128xf32>
    %512 = vector.broadcast %511 : vector<1x128xf32> to vector<2x128xf32>
    %513 = arith.mulf %510, %512 : vector<2x128xf32>
    %514 = vector.extract_strided_slice %385 {offsets = [8, 0, 0], sizes = [1, 10, 128], strides = [1, 1, 1]} : vector<9x10x128xf32> to vector<1x10x128xf32>
    %515 = vector.extract_strided_slice %385 {offsets = [7, 0, 0], sizes = [1, 10, 128], strides = [1, 1, 1]} : vector<9x10x128xf32> to vector<1x10x128xf32>
    %516 = arith.mulf %514, %515 : vector<1x10x128xf32>
    %cst_110 = arith.constant dense<0.000000e+00> : vector<1x128xf32>
    %517 = vector.multi_reduction <add>, %516, %cst_110 [1] : vector<1x10x128xf32> to vector<1x128xf32>
    %518 = vector.extract_strided_slice %388 {offsets = [8, 0], sizes = [1, 128], strides = [1, 1]} : vector<9x128xf32> to vector<1x128xf32>
    %519 = arith.mulf %517, %518 : vector<1x128xf32>
    %520 = vector.extract_strided_slice %388 {offsets = [7, 0], sizes = [1, 128], strides = [1, 1]} : vector<9x128xf32> to vector<1x128xf32>
    %521 = arith.mulf %519, %520 : vector<1x128xf32>
    %522 = tpu.concatenate %453, %463, %473, %483, %493, %503, %513, %521 in 0 : vector<8x128xf32>, vector<7x128xf32>, vector<6x128xf32>, vector<5x128xf32>, vector<4x128xf32>, vector<3x128xf32>, vector<2x128xf32>, vector<1x128xf32> -> vector<36x128xf32>
    %523 = math.absf %522 : vector<36x128xf32>
    %cst_111 = arith.constant 1.000000e+00 : f32
    %524 = vector.broadcast %cst_111 : f32 to vector<36x128xf32>
    %525 = arith.minimumf %523, %524 : vector<36x128xf32>
    %cst_112 = arith.constant 1.000000e+00 : f32
    %526 = vector.broadcast %cst_112 : f32 to vector<36x128xf32>
    %527 = arith.addf %525, %526 : vector<36x128xf32>
    %cst_113 = arith.constant 5.000000e-01 : f32
    %528 = vector.broadcast %cst_113 : f32 to vector<36x128xf32>
    %529 = arith.mulf %527, %528 : vector<36x128xf32>
    %cst_114 = arith.constant 1.000000e+00 : f32
    %530 = vector.broadcast %cst_114 : f32 to vector<36x128xf32>
    %531 = arith.subf %530, %525 : vector<36x128xf32>
    %cst_115 = arith.constant 5.000000e-01 : f32
    %532 = vector.broadcast %cst_115 : f32 to vector<36x128xf32>
    %533 = arith.mulf %531, %532 : vector<36x128xf32>
    %cst_116 = arith.constant 2.000000e+00 : f32
    %534 = vector.broadcast %cst_116 : f32 to vector<36x128xf32>
    %535 = arith.mulf %534, %533 : vector<36x128xf32>
    %cst_117 = arith.constant 1.400000e+01 : f32
    %536 = vector.broadcast %cst_117 : f32 to vector<36x128xf32>
    %537 = arith.mulf %536, %529 : vector<36x128xf32>
    %538 = arith.addf %535, %537 : vector<36x128xf32>
    %539 = arith.mulf %529, %529 : vector<36x128xf32>
    %540 = arith.mulf %538, %533 : vector<36x128xf32>
    %cst_118 = arith.constant 4.200000e+01 : f32
    %541 = vector.broadcast %cst_118 : f32 to vector<36x128xf32>
    %542 = arith.mulf %541, %539 : vector<36x128xf32>
    %543 = arith.addf %540, %542 : vector<36x128xf32>
    %544 = arith.mulf %539, %529 : vector<36x128xf32>
    %545 = arith.mulf %543, %533 : vector<36x128xf32>
    %cst_119 = arith.constant 7.000000e+01 : f32
    %546 = vector.broadcast %cst_119 : f32 to vector<36x128xf32>
    %547 = arith.mulf %546, %544 : vector<36x128xf32>
    %548 = arith.addf %545, %547 : vector<36x128xf32>
    %549 = arith.mulf %533, %533 : vector<36x128xf32>
    %550 = arith.mulf %549, %533 : vector<36x128xf32>
    %551 = arith.mulf %550, %533 : vector<36x128xf32>
    %552 = arith.mulf %551, %548 : vector<36x128xf32>
    %c2 = arith.constant 2 : index
    %c0_120 = arith.constant 0 : index
    %c0_121 = arith.constant 0 : index
    %553 = vector.load %arg2[%c2, %c0_120, %c0_121] : memref<3x36x128xf32, #tpu.memory_space<vmem>>, vector<1x36x128xf32>
    %554 = vector.shape_cast %553 : vector<1x36x128xf32> to vector<36x128xf32>
    %555 = vector.shape_cast %552 : vector<36x128xf32> to vector<1x36x128xf32>
    tpu.vector_store %arg2[%c2, %c0_120, %c0_121], %555 {strides = array<i32>} : memref<3x36x128xf32, #tpu.memory_space<vmem>>, vector<1x36x128xf32>,
    %c2_122 = arith.constant 2 : index
    %c0_123 = arith.constant 0 : index
    %c0_124 = arith.constant 0 : index
    %556 = vector.load %arg3[%c2_122, %c0_123, %c0_124] : memref<12x9x128xf32, #tpu.memory_space<vmem>>, vector<1x9x128xf32>
    %557 = vector.shape_cast %556 : vector<1x9x128xf32> to vector<9x128xf32>
    %558 = vector.shape_cast %391 : vector<9x128xf32> to vector<1x9x128xf32>
    tpu.vector_store %arg3[%c2_122, %c0_123, %c0_124], %558 {strides = array<i32>} : memref<12x9x128xf32, #tpu.memory_space<vmem>>, vector<1x9x128xf32>,
    %c5 = arith.constant 5 : index
    %c0_125 = arith.constant 0 : index
    %c0_126 = arith.constant 0 : index
    %559 = vector.load %arg3[%c5, %c0_125, %c0_126] : memref<12x9x128xf32, #tpu.memory_space<vmem>>, vector<1x9x128xf32>
    %560 = vector.shape_cast %559 : vector<1x9x128xf32> to vector<9x128xf32>
    %561 = vector.shape_cast %394 : vector<9x128xf32> to vector<1x9x128xf32>
    tpu.vector_store %arg3[%c5, %c0_125, %c0_126], %561 {strides = array<i32>} : memref<12x9x128xf32, #tpu.memory_space<vmem>>, vector<1x9x128xf32>,
    %c8 = arith.constant 8 : index
    %c0_127 = arith.constant 0 : index
    %c0_128 = arith.constant 0 : index
    %562 = vector.load %arg3[%c8, %c0_127, %c0_128] : memref<12x9x128xf32, #tpu.memory_space<vmem>>, vector<1x9x128xf32>
    %563 = vector.shape_cast %562 : vector<1x9x128xf32> to vector<9x128xf32>
    %564 = vector.shape_cast %380 : vector<9x128xf32> to vector<1x9x128xf32>
    tpu.vector_store %arg3[%c8, %c0_127, %c0_128], %564 {strides = array<i32>} : memref<12x9x128xf32, #tpu.memory_space<vmem>>, vector<1x9x128xf32>,
    %c11 = arith.constant 11 : index
    %c0_129 = arith.constant 0 : index
    %c0_130 = arith.constant 0 : index
    %565 = vector.load %arg3[%c11, %c0_129, %c0_130] : memref<12x9x128xf32, #tpu.memory_space<vmem>>, vector<1x9x128xf32>
    %566 = vector.shape_cast %565 : vector<1x9x128xf32> to vector<9x128xf32>
    %567 = vector.shape_cast %443 : vector<9x128xf32> to vector<1x9x128xf32>
    tpu.vector_store %arg3[%c11, %c0_129, %c0_130], %567 {strides = array<i32>} : memref<12x9x128xf32, #tpu.memory_space<vmem>>, vector<1x9x128xf32>,
    return
  }
  func.func @transform_0(%arg0: i32) -> (i32, i32, i32) {
    %c0_i32 = arith.constant 0 : i32
    %c0_i32_0 = arith.constant 0 : i32
    %c0_i32_1 = arith.constant 0 : i32
    %c0_i32_2 = arith.constant 0 : i32
    return %c0_i32, %c0_i32_0, %c0_i32_1 : i32, i32, i32
  }
  func.func @transform_1(%arg0: i32) -> (i32, i32, i32) {
    %c0_i32 = arith.constant 0 : i32
    %c0_i32_0 = arith.constant 0 : i32
    %c0_i32_1 = arith.constant 0 : i32
    %c0_i32_2 = arith.constant 0 : i32
    return %c0_i32, %c0_i32_0, %c0_i32_1 : i32, i32, i32
  }
  func.func @transform_2(%arg0: i32) -> (i32, i32, i32) {
    %c0_i32 = arith.constant 0 : i32
    %c0_i32_0 = arith.constant 0 : i32
    %c0_i32_1 = arith.constant 0 : i32
    %c0_i32_2 = arith.constant 0 : i32
    return %c0_i32, %c0_i32_0, %c0_i32_1 : i32, i32, i32
  }
}

</mosaic_0001>

<bundles_post_ra>
// kernel: tpu_custom_call.1
= control target key start
LH: loop header
LB: loop body
LE: loop exit
PB: predicated region body
PF: predicated region fallthrough
CT: control target
= control target key end

     0   :  { %8 = vsyncpa [#allocation3], 0  ;;  %s8335_s0 = inlined_call_operand.hbm [shape: f32[9,30,128], index: 0, kind: input, shape index: {}]   ;;  %s8336_s1 = inlined_call_operand.hbm [shape: f32[3,36,128], index: 1, kind: output, shape index: {0}]   ;;  %s8337_s2 = inlined_call_operand.vmem [shape: f32[12,9,128], index: 2, kind: output, shape index: {1}]  }
   0x1   :  { %9 = vsyncpa [#allocation4], 0  ;;  %s5088_s9 = smov [#allocation2]   ;;  %s5040_s13 = scalar_lea.hbm %s8335_s0, 4608 }
   0x2   :  { %s15_s10 = sshll.u32 %s5088_s9, 4  ;;  %p5041_p0 = scmp.ne.s32.totalorder %s8335_s0, %s5040_s13  ;;  %s16_s10 = int_to_ptr.vmem [resolvable:$true] %s15_s10 }
   0x3   :  { %p5044_p1 = scmp.lt.u32.totalorder %s5040_s13, %s8335_s0 }
   0x5   :  { %p5046_p2 = pnand %p5044_p1, %p5041_p0 }
   0x7   :  { %5049 = shalt.err (!%p5046_p2)
}
   0x8   :  { %s5050_s18 = scalar_lea.vmem %s16_s10, 4608  ;;  %p5055_p4 = scmp.lt.s32.totalorder %s16_s10, %s16_s10 }
   0x9   :  { %p5051_p3 = scmp.ne.s32.totalorder %s16_s10, %s5050_s18  ;;  %p5056_p5 = scmp.lt.s32.totalorder %s5050_s18, %s5050_s18 }
   0xb   :  { %p5057_p6 = por %p5056_p5, %p5055_p4 }
   0xd   :  { %p5058_p7 = pnand %p5057_p6, %p5051_p3 }
   0xf   :  { %5061 = shalt.err (!%p5058_p7)
}
  0x10   :  { %s5089_s19 = smov 128   ;;  %s5090_s20 = smov 8  }
  0x11   :  { %21 = dma.hbm_to_vmem [thread:$0]  %s8335_s0, 4608, %s16_s10, [#allocation3], %s5089_s19, %s5089_s19, %s5090_s20  }
  0x12   :  { %5084 = dma.done.wait [#allocation3], 4608  }
  0x13   :  { %5085 = vsyncadd [#allocation3], 4294962688  ;;  %v5122_v0 = vld [vmem:[#allocation2] sm:$0xff]  ;;  %v5124_v1 = vld [vmem:[#allocation2 + $0x8] sm:$0xff]  ;;  %vm61_vm0 = vcmask 1041408   ;;  %vm1124_vm1 = vcmask 1041409  }
  0x14   :  { %8541 = vst [vmem:[#allocation8_spill] sm:$0xff] %v5124_v1  ;;  %v5126_v2 = vld [vmem:[#allocation2 + $0x20] sm:$0xff]  ;;  %v5128_v3 = vld [vmem:[#allocation2 + $0x28] sm:$0xff]  ;;  %v62_v4 = vsel %vm61_vm0, %v5124_v1, 0.0  ;;  %v5166_v31 = vmul.f32 0.18181819, %v5122_v0 }
  0x15   :  { %8542 = vst [vmem:[#allocation9_spill] sm:$0xff] %v5128_v3  ;;  %v5132_v5 = vld [vmem:[#allocation2 + $0x40] sm:$0xff]  ;;  %v63_v6 = vadd.f32 %v62_v4, %v5122_v0  ;;  %v70_v7 = vsel %vm61_vm0, %v5128_v3, 0.0  ;;  %v5137_v8 = vld [vmem:[#allocation2 + $0x48] sm:$0xff]  ;;  %vm1127_vm2 = vcmask 1042434   ;;  %vm1130_vm3 = vcmask 1043459  }
  0x16   :  { %8543 = vst [vmem:[#allocation10_spill] sm:$0xff] %v5137_v8  ;;  %v71_v9 = vadd.f32 %v70_v7, %v5126_v2  ;;  %v5140_v10 = vld [vmem:[#allocation2 + $0x60] sm:$0xff]  ;;  %v5142_v11 = vld [vmem:[#allocation2 + $0x68] sm:$0xff]  ;;  %v78_v13 = vsel %vm61_vm0, %v5137_v8, 0.0  ;;  %vm1133_vm4 = vcmask 1044484   ;;  %vm1136_vm5 = vcmask 1045509  }
  0x17   :  { %8544 = vst [vmem:[#allocation11_spill] sm:$0xff] %v5142_v11  ;;  %v64_v12 = vrot.slane %v63_v6, 4  ;;  %v5146_v14 = vld [vmem:[#allocation2 + $0x80] sm:$0xff]  ;;  %v5148_v15 = vld [vmem:[#allocation2 + $0x88] sm:$0xff]  ;;  %v79_v17 = vadd.f32 %v78_v13, %v5132_v5  ;;  %v86_v18 = vsel %vm61_vm0, %v5142_v11, 0.0  ;;  %vm1139_vm6 = vcmask 1046534  }
  0x18   :  { %8545 = vst [vmem:[#allocation12_spill] sm:$0xff] %v5148_v15  ;;  %v72_v16 = vrot.slane %v71_v9, 4  ;;  %v5153_v19 = vld [vmem:[#allocation2 + $0xa0] sm:$0xff]  ;;  %v87_v21 = vadd.f32 %v86_v18, %v5140_v10  ;;  %v94_v22 = vsel %vm61_vm0, %v5148_v15, 0.0  ;;  %v5158_v23 = vld [vmem:[#allocation2 + $0xa8] sm:$0xff]  ;;  %vm1142_vm7 = vcmask 1047559  }
  0x19   :  { %v65_v20 = vadd.f32 %v64_v12, %v63_v6  ;;  %8546 = vst [vmem:[#allocation13_spill] sm:$0xff] %v5158_v23  ;;  %v80_v25 = vrot.slane %v79_v17, 4  ;;  %v95_v26 = vadd.f32 %v94_v22, %v5146_v14  ;;  %v5161_v27 = vld [vmem:[#allocation2 + $0xc0] sm:$0xff]  ;;  %v102_v30 = vsel %vm61_vm0, %v5158_v23, 0.0  ;;  %v5168_v32 = vld [vmem:[#allocation2 + $0xc8] sm:$0xff]  ;;  %s5091_s5 = smov [#allocation5]  }
  0x1a   :  { %v73_v24 = vadd.f32 %v72_v16, %v71_v9  ;;  %v88_v29 = vrot.slane %v87_v21, 4  ;;  %8547 = vst [vmem:[#allocation14_spill] sm:$0xff] %v5168_v32  ;;  %v5170_v33 = vld [vmem:[#allocation2 + $0xe0] sm:$0xff]  ;;  %v5172_v34 = vld [vmem:[#allocation2 + $0xe8] sm:$0xff]  ;;  %v103_v38 = vadd.f32 %v102_v30, %v5153_v19  ;;  %v110_v41 = vsel %vm61_vm0, %v5168_v32, 0.0  ;;  %s4908_s6 = sshll.u32 %s5091_s5, 4  ;;  %s8265_s6 = int_to_ptr.vmem [resolvable:$true] %s4908_s6 }
  0x1b   :  { %v66_v28 = vrot.slane %v65_v20, 2  ;;  %8548 = vst [vmem:[#allocation15_spill] sm:$0xff] %v5172_v34  ;;  %v81_v36 = vadd.f32 %v80_v25, %v79_v17  ;;  %v96_v37 = vrot.slane %v95_v26, 4  ;;  %v118_v42 = vsel %vm61_vm0, %v5172_v34, 0.0  ;;  %v5181_v55 = vld [vmem:[#allocation2 + $0x100] sm:$0xff]  ;;  %v5185_v60 = vld [vmem:[#allocation2 + $0x108] sm:$0xff]  ;;  %p5067_p9 = scmp.lt.s32.totalorder %s8265_s6, %s8265_s6 }
  0x1c   :  { %v74_v35 = vrot.slane %v73_v24, 2  ;;  %v89_v40 = vadd.f32 %v88_v29, %v87_v21  ;;  %v104_v46 = vrot.slane %v103_v38, 4  ;;  %v111_v49 = vadd.f32 %v110_v41, %v5161_v27  ;;  %8550 = vst [vmem:[#allocation17_spill] sm:$0xff] %v5185_v60  ;;  %s5062_s9 = scalar_lea.vmem %s8265_s6, 1920 }
  0x1d   :  { %v67_v39 = vadd.f32 %v66_v28, %v65_v20  ;;  %v82_v44 = vrot.slane %v81_v36, 2  ;;  %v97_v45 = vadd.f32 %v96_v37, %v95_v26  ;;  %v119_v50 = vadd.f32 %v118_v42, %v5170_v33  ;;  %p5063_p8 = scmp.ne.s32.totalorder %s8265_s6, %s5062_s9  ;;  %p5068_p10 = scmp.lt.s32.totalorder %s5062_s9, %s5062_s9 }
  0x1e   :  { %v75_v43 = vadd.f32 %v74_v35, %v73_v24  ;;  %v90_v48 = vrot.slane %v89_v40, 2  ;;  %v105_v54 = vadd.f32 %v104_v46, %v103_v38  ;;  %v112_v58 = vrot.slane %v111_v49, 4 }
  0x1f   :  { %v68_v47 = vrot.slane %v67_v39, 1  ;;  %v83_v52 = vadd.f32 %v82_v44, %v81_v36  ;;  %v98_v53 = vrot.slane %v97_v45, 2  ;;  %v120_v59 = vrot.slane %v119_v50, 4  ;;  %p5069_p11 = por %p5068_p10, %p5067_p9 }
  0x20   :  { %v76_v51 = vrot.slane %v75_v43, 1  ;;  %v91_v57 = vadd.f32 %v90_v48, %v89_v40  ;;  %v106_v4 = vrot.slane %v105_v54, 2  ;;  %v113_v7 = vadd.f32 %v112_v58, %v111_v49 }
  0x21   :  { %v5183_v56 = vadd.f32 %v68_v47, %v67_v39  ;;  %v84_v62 = vrot.slane %v83_v52, 1  ;;  %v99_v63 = vadd.f32 %v98_v53, %v97_v45  ;;  %v121_v9 = vadd.f32 %v120_v59, %v119_v50  ;;  %p5070_p12 = pnand %p5069_p11, %p5063_p8 }
  0x22   :  { %v5187_v61 = vadd.f32 %v76_v51, %v75_v43  ;;  %v92_v6 = vrot.slane %v91_v57, 1  ;;  %v126_v12 = vsel %vm61_vm0, %v5185_v60, 0.0  ;;  %v107_v17 = vadd.f32 %v106_v4, %v105_v54 }
  0x23   :  { %8549 = vst [vmem:[#allocation16_spill] sm:$0xff] %v5183_v56  ;;  %v5191_v13 = vadd.f32 %v84_v62, %v83_v52  ;;  %v100_v16 = vrot.slane %v99_v63, 1  ;;  %v127_v18 = vadd.f32 %v126_v12, %v5181_v55  ;;  %v114_v21 = vrot.slane %v113_v7, 2 }
  0x24   :  { %8551 = vst [vmem:[#allocation18_spill] sm:$0xff] %v5187_v61  ;;  %v5194_v20 = vadd.f32 %v92_v6, %v91_v57  ;;  %v122_v22 = vrot.slane %v121_v9, 2  ;;  %v5197_v24 = vmul.f32 0.1, %v5183_v56  ;;  %v108_v26 = vrot.slane %v107_v17, 1 }
  0x25   :  { %8552 = vst [vmem:[#allocation19_spill] sm:$0xff] %v5191_v13  ;;  %v5199_v25 = vadd.f32 %v100_v16, %v99_v63  ;;  %v128_v28 = vrot.slane %v127_v18, 4  ;;  %v5202_v29 = vmul.f32 0.1, %v5187_v61  ;;  %v115_v30 = vadd.f32 %v114_v21, %v113_v7 }
  0x26   :  { %8553 = vst [vmem:[#allocation20_spill] sm:$0xff] %v5194_v20  ;;  %v123_v35 = vadd.f32 %v122_v22, %v121_v9  ;;  %v5205_v36 = vmul.f32 0.1, %v5191_v13  ;;  %v5208_v37 = vmul.f32 0.1, %v5194_v20  ;;  %v5210_v38 = vadd.f32 %v108_v26, %v107_v17 }
  0x27   :  { %8554 = vst [vmem:[#allocation21_spill] sm:$0xff] %v5199_v25  ;;  %v129_v39 = vadd.f32 %v128_v28, %v127_v18  ;;  %v5213_v40 = vmul.f32 0.1, %v5199_v25  ;;  %v5217_v41 = vsub.f32 %v5122_v0, %v5197_v24  ;;  %v116_v42 = vrot.slane %v115_v30, 1 }
  0x28   :  { %8555 = vst [vmem:[#allocation22_spill] sm:$0xff] %v5210_v38  ;;  %v124_v43 = vrot.slane %v123_v35, 1  ;;  %v5221_v44 = vsub.f32 %v5124_v1, %v5197_v24  ;;  %v5225_v45 = vsub.f32 %v5126_v2, %v5202_v29  ;;  %v5228_v47 = vmul.f32 0.1, %v5210_v38 }
  0x29   :  { %v130_v46 = vrot.slane %v129_v39, 2  ;;  %v5232_v48 = vsub.f32 %v5128_v3, %v5202_v29  ;;  %v5236_v49 = vsub.f32 %v5132_v5, %v5205_v36  ;;  %v5238_v50 = vadd.f32 %v116_v42, %v115_v30 }
  0x2a   :  { %v5240_v51 = vadd.f32 %v124_v43, %v123_v35  ;;  %v5244_v52 = vsub.f32 %v5137_v8, %v5205_v36  ;;  %v5248_v53 = vsub.f32 %v5140_v10, %v5208_v37  ;;  %v5252_v57 = vsub.f32 %v5142_v11, %v5208_v37 }
  0x2b   :  { %8556 = vst [vmem:[#allocation23_spill] sm:$0xff] %v5232_v48  ;;  %8557 = vst [vmem:[#allocation24_spill] sm:$0xff] %v5238_v50  ;;  %v131_v54 = vadd.f32 %v130_v46, %v129_v39  ;;  %v5256_v58 = vsub.f32 %v5146_v14, %v5213_v40  ;;  %v5260_v59 = vsub.f32 %v5148_v15, %v5213_v40  ;;  %v5263_v62 = vmul.f32 0.1, %v5238_v50 }
  0x2c   :  { %8558 = vst [vmem:[#allocation25_spill] sm:$0xff] %v5240_v51  ;;  %8559 = vst [vmem:[#allocation26_spill] sm:$0xff] %v5244_v52  ;;  %v5266_v63 = vmul.f32 0.1, %v5240_v51  ;;  %v5270_v4 = vsub.f32 %v5153_v19, %v5228_v47  ;;  %v5274_v6 = vsub.f32 %v5158_v23, %v5228_v47  ;;  %v161_v9 = vmul.f32 %v5217_v41, %v5217_v41 }
  0x2d   :  { %8560 = vst [vmem:[#allocation27_spill] sm:$0xff] %v5248_v53  ;;  %8561 = vst [vmem:[#allocation28_spill] sm:$0xff] %v5252_v57  ;;  %v132_v7 = vrot.slane %v131_v54, 1  ;;  %v162_v12 = vmul.f32 %v5221_v44, %v5221_v44  ;;  %v163_v16 = vmul.f32 %v5225_v45, %v5225_v45  ;;  %v5284_v17 = vsub.f32 %v5161_v27, %v5263_v62 }
  0x2e   :  { %8562 = vst [vmem:[#allocation29_spill] sm:$0xff] %v5256_v58  ;;  %8563 = vst [vmem:[#allocation30_spill] sm:$0xff] %v5260_v59  ;;  %v5288_v18 = vsub.f32 %v5168_v32, %v5263_v62  ;;  %v5292_v21 = vsub.f32 %v5170_v33, %v5266_v63  ;;  %v5296_v22 = vsub.f32 %v5172_v34, %v5266_v63  ;;  %vm1222_vm8 = vcmask 1046528  }
  0x2f   :  { %8564 = vst [vmem:[#allocation31_spill] sm:$0xff] %v5270_v4  ;;  %8565 = vst [vmem:[#allocation32_spill] sm:$0xff] %v5274_v6  ;;  %v133_v26 = vadd.f32 %v132_v7, %v131_v54  ;;  %v164_v28 = vmul.f32 %v5232_v48, %v5232_v48  ;;  %v165_v30 = vmul.f32 %v5236_v49, %v5236_v49  ;;  %v179_v13 = vsel %vm61_vm0, %v162_v12, 0.0 }
  0x30   :  { %8566 = vst [vmem:[#allocation33_spill] sm:$0xff] %v5284_v17  ;;  %8567 = vst [vmem:[#allocation34_spill] sm:$0xff] %v5288_v18  ;;  %v166_v35 = vmul.f32 %v5244_v52, %v5244_v52  ;;  %v167_v39 = vmul.f32 %v5248_v53, %v5248_v53  ;;  %v168_v42 = vmul.f32 %v5252_v57, %v5252_v57  ;;  %vm1224_vm9 = vcmask 1044480  }
  0x31   :  { %8568 = vst [vmem:[#allocation35_spill] sm:$0xff] %v5292_v21  ;;  %8569 = vst [vmem:[#allocation36_spill] sm:$0xff] %v5296_v22  ;;  %v169_v43 = vmul.f32 %v5256_v58, %v5256_v58  ;;  %v170_v46 = vmul.f32 %v5260_v59, %v5260_v59  ;;  %v5312_v54 = vmul.f32 0.1, %v133_v26  ;;  %v171_v7 = vmul.f32 %v5270_v4, %v5270_v4 }
  0x32   :  { %v172_v51 = vmul.f32 %v5274_v6, %v5274_v6  ;;  %v173_v50 = vmul.f32 %v5284_v17, %v5284_v17  ;;  %4927 = vst [vmem:[%s8337_s2 + $0x68] sm:$0x1] %v133_v26  ;;  %v174_v38 = vmul.f32 %v5288_v18, %v5288_v18  ;;  %v175_v25 = vmul.f32 %v5292_v21, %v5292_v21 }
  0x33   :  { %v176_v20 = vmul.f32 %v5296_v22, %v5296_v22  ;;  %v5332_v61 = vsub.f32 %v5181_v55, %v5312_v54  ;;  %v5336_v56 = vsub.f32 %v5185_v60, %v5312_v54  ;;  %v180_v26 = vadd.f32 %v179_v13, %v161_v9 }
  0x34   :  { %v187_v34 = vsel %vm61_vm0, %v164_v28, 0.0  ;;  %v195_v23 = vsel %vm61_vm0, %v166_v35, 0.0  ;;  %v203_v15 = vsel %vm61_vm0, %v168_v42, 0.0  ;;  %v211_v11 = vsel %vm61_vm0, %v170_v46, 0.0 }
  0x35   :  { %8570 = vst [vmem:[#allocation37_spill] sm:$0xff] %v5332_v61  ;;  %8571 = vst [vmem:[#allocation38_spill] sm:$0xff] %v5336_v56  ;;  %v188_v32 = vadd.f32 %v187_v34, %v163_v16  ;;  %v177_v12 = vmul.f32 %v5332_v61, %v5332_v61  ;;  %v178_v8 = vmul.f32 %v5336_v56, %v5336_v56  ;;  %v181_v3 = vrot.slane %v180_v26, 4 }
  0x36   :  { %v196_v1 = vadd.f32 %v195_v23, %v165_v30  ;;  %v204_v22 = vadd.f32 %v203_v15, %v167_v39  ;;  %v212_v13 = vadd.f32 %v211_v11, %v169_v43  ;;  %v219_v9 = vsel %vm61_vm0, %v172_v51, 0.0 }
  0x37   :  { %v189_v60 = vrot.slane %v188_v32, 4  ;;  %v182_v34 = vadd.f32 %v181_v3, %v180_v26  ;;  %v220_v28 = vadd.f32 %v219_v9, %v171_v7  ;;  %v227_v35 = vsel %vm61_vm0, %v174_v38, 0.0 }
  0x38   :  { %v197_v16 = vrot.slane %v196_v1, 4  ;;  %v205_v46 = vrot.slane %v204_v22, 4  ;;  %v213_v21 = vrot.slane %v212_v13, 4  ;;  %v228_v18 = vadd.f32 %v227_v35, %v173_v50 }
  0x39   :  { %v190_v42 = vadd.f32 %v189_v60, %v188_v32  ;;  %v183_v61 = vrot.slane %v182_v34, 2  ;;  %v221_v6 = vrot.slane %v220_v28, 4  ;;  %v235_v56 = vsel %vm61_vm0, %v176_v20, 0.0 }
  0x3a   :  { %v198_v17 = vadd.f32 %v197_v16, %v196_v1  ;;  %v206_v30 = vadd.f32 %v205_v46, %v204_v22  ;;  %v214_v15 = vadd.f32 %v213_v21, %v212_v13  ;;  %v229_v11 = vrot.slane %v228_v18, 4 }
  0x3b   :  { %v191_v23 = vrot.slane %v190_v42, 2  ;;  %v184_v39 = vadd.f32 %v183_v61, %v182_v34  ;;  %v222_v3 = vadd.f32 %v221_v6, %v220_v28  ;;  %v236_v43 = vadd.f32 %v235_v56, %v175_v25 }
  0x3c   :  { %v199_v51 = vrot.slane %v198_v17, 2  ;;  %v207_v26 = vrot.slane %v206_v30, 2  ;;  %v215_v38 = vrot.slane %v214_v15, 2  ;;  %v230_v32 = vadd.f32 %v229_v11, %v228_v18 }
  0x3d   :  { %v192_v7 = vadd.f32 %v191_v23, %v190_v42  ;;  %v185_v60 = vrot.slane %v184_v39, 1  ;;  %v223_v50 = vrot.slane %v222_v3, 2  ;;  %v237_v35 = vrot.slane %v236_v43, 4 }
  0x3e   :  { %v200_v9 = vadd.f32 %v199_v51, %v198_v17  ;;  %v208_v16 = vadd.f32 %v207_v26, %v206_v30  ;;  %v216_v4 = vadd.f32 %v215_v38, %v214_v15  ;;  %v231_v20 = vrot.slane %v230_v32, 2 }
  0x3f   :  { %v193_v1 = vrot.slane %v192_v7, 1  ;;  %v5349_v59 = vadd.f32 %v185_v60, %v184_v39  ;;  %v224_v22 = vadd.f32 %v223_v50, %v222_v3  ;;  %v238_v61 = vadd.f32 %v237_v35, %v236_v43 }
  0x40   :  { %v201_v21 = vrot.slane %v200_v9, 1  ;;  %v209_v56 = vrot.slane %v208_v16, 1  ;;  %v217_v25 = vrot.slane %v216_v4, 1  ;;  %v232_v6 = vadd.f32 %v231_v20, %v230_v32 }
  0x41   :  { %v5351_v13 = vadd.f32 %v193_v1, %v192_v7  ;;  %v225_v18 = vrot.slane %v224_v22, 1  ;;  %v239_v17 = vrot.slane %v238_v61, 2  ;;  %v243_v28 = vsel %vm61_vm0, %v178_v8, 0.0 }
  0x42   :  { %v5353_v34 = vadd.f32 %v201_v21, %v200_v9  ;;  %v5356_v42 = vadd.f32 %v209_v56, %v208_v16  ;;  %v5358_v46 = vadd.f32 %v217_v25, %v216_v4  ;;  %v233_v23 = vrot.slane %v232_v6, 1 }
  0x43   :  { %v244_v30 = vadd.f32 %v243_v28, %v177_v12  ;;  %v5360_v15 = vadd.f32 %v225_v18, %v224_v22  ;;  %v240_v11 = vadd.f32 %v239_v17, %v238_v61  ;;  %4950 = vrsqrt.f32 %v5349_v59 }
  0x44   :  { %v297_v39 = vmul.f32 0.18181819, %v5126_v2  ;;  %v5364_v51 = vadd.f32 %v233_v23, %v232_v6  ;;  %4952 = vrsqrt.f32 %v5351_v13  ;;  %v298_v8 = vmul.f32 0.18181819, %v5132_v5 }
  0x45   :  { %v245_v3 = vrot.slane %v244_v30, 4  ;;  %v241_v43 = vrot.slane %v240_v11, 1  ;;  %4954 = vrsqrt.f32 %v5353_v34  ;;  %v5370_v4 = vmul.f32 0.18181819, %v5140_v10 }
  0x46   :  { %v5373_v12 = vmul.f32 0.18181819, %v5146_v14  ;;  %4956 = vrsqrt.f32 %v5356_v42  ;;  %v5377_v26 = vmul.f32 0.18181819, %v5153_v19  ;;  %v5380_v38 = vmul.f32 0.18181819, %v5161_v27 }
  0x47   :  { %v246_v7 = vadd.f32 %v245_v3, %v244_v30  ;;  %v5382_v32 = vadd.f32 %v241_v43, %v240_v11  ;;  %4958 = vrsqrt.f32 %v5358_v46  ;;  %v5386_v60 = vmul.f32 0.18181819, %v5170_v33 }
  0x48   :  { %v5389_v9 = vmul.f32 0.18181819, %v5181_v55  ;;  %4960 = vrsqrt.f32 %v5360_v15  ;;  %v305_v35 = vmul.f32 0.16363636, %v5122_v0  ;;  %v306_v1 = vmul.f32 0.16363636, %v5126_v2 }
  0x49   :  { %v247_v50 = vrot.slane %v246_v7, 2  ;;  %4962 = vrsqrt.f32 %v5364_v51  ;;  %v307_v16 = vmul.f32 0.16363636, %v5132_v5  ;;  %v308_v20 = vmul.f32 0.16363636, %v5140_v10 }
  0x4a   :  { %v5398_v21 = vmul.f32 0.16363636, %v5146_v14  ;;  %4964 = vrsqrt.f32 %v5382_v32  ;;  %v310_v61 = vmul.f32 0.16363636, %v5153_v19  ;;  %v311_v56 = vmul.f32 0.16363636, %v5161_v27 }
  0x4b   :  { %v248_v22 = vadd.f32 %v247_v50, %v246_v7  ;;  %v312_v25 = vmul.f32 0.16363636, %v5170_v33  ;;  %v313_v6 = vmul.f32 0.16363636, %v5181_v55  ;;  %v323_v18 = vrot.slane %v305_v35, 1 }
  0x4c   :  { %v324_v17 = vrot.slane %v306_v1, 1  ;;  %v325_v23 = vrot.slane %v307_v16, 1  ;;  %v326_v30 = vrot.slane %v308_v20, 1  ;;  %v327_v11 = vrot.slane %v5398_v21, 1 }
  0x4d   :  { %v249_v28 = vrot.slane %v248_v22, 1  ;;  %v5406_v3 = vpop.eup %4950  ;;  %v328_v43 = vrot.slane %v310_v61, 1  ;;  %v329_v7 = vrot.slane %v311_v56, 1  ;;  %v330_v50 = vrot.slane %v312_v25, 1 }
  0x4e   :  { %8572 = vst [vmem:[#allocation39_spill] sm:$0xff] %v5406_v3  ;;  %v331_v58 = vrot.slane %v313_v6, 1  ;;  %v5408_v57 = vpop.eup %4952  ;;  %v260_v52 = vmul.f32 %v5406_v3, %v5349_v59  ;;  %v278_v35 = vmul.f32 %v5406_v3, %v5197_v24  ;;  %v5415_v1 = vadd.f32 %v323_v18, %v5166_v31 }
  0x4f   :  { %v250_v53 = vadd.f32 %v249_v28, %v248_v22  ;;  %v5417_v16 = vpop.eup %4954  ;;  %v261_v20 = vmul.f32 %v5408_v57, %v5351_v13  ;;  %v279_v21 = vmul.f32 %v5408_v57, %v5202_v29  ;;  %v5423_v61 = vadd.f32 %v324_v17, %v297_v39 }
  0x50   :  { %v5425_v22 = vadd.f32 %v325_v23, %v298_v8  ;;  %v5427_v56 = vpop.eup %4956  ;;  %v262_v24 = vmul.f32 %v5417_v16, %v5353_v34  ;;  %v5431_v31 = vmul.f32 0.31622776, %v260_v52  ;;  %v280_v59 = vmul.f32 %v5417_v16, %v5205_v36 }
  0x51   :  { %8573 = vst [vmem:[#allocation40_spill] sm:$0xff] %v5427_v56  ;;  %4966 = vrsqrt.f32 %v250_v53  ;;  %v5435_v25 = vpop.eup %4958  ;;  %v263_v29 = vmul.f32 %v5427_v56, %v5356_v42  ;;  %v5439_v13 = vmul.f32 0.31622776, %v261_v20  ;;  %v281_v39 = vmul.f32 %v5427_v56, %v5208_v37 }
  0x52   :  { %8574 = vst [vmem:[#allocation41_spill] sm:$0xff] %v5431_v31  ;;  %8575 = vst [vmem:[#allocation42_spill] sm:$0xff] %v5435_v25  ;;  %v5443_v8 = vmul.f32 3.1622777, %v278_v35  ;;  %v5445_v6 = vpop.eup %4960  ;;  %v264_v52 = vmul.f32 %v5435_v25, %v5358_v46  ;;  %v5449_v34 = vmul.f32 0.31622776, %v262_v24  ;;  %v282_v36 = vmul.f32 %v5435_v25, %v5213_v40 }
  0x53   :  { %8576 = vst [vmem:[#allocation43_spill] sm:$0xff] %v5439_v13  ;;  %8578 = vst [vmem:[#allocation45_spill] sm:$0xff] %v5445_v6  ;;  %v5453_v18 = vmul.f32 3.1622777, %v279_v21  ;;  %v5455_v42 = vpop.eup %4962  ;;  %v265_v17 = vmul.f32 %v5445_v6, %v5360_v15  ;;  %v5459_v37 = vmul.f32 0.31622776, %v263_v29  ;;  %v283_v28 = vmul.f32 %v5445_v6, %v5228_v47 }
  0x54   :  { %8577 = vst [vmem:[#allocation44_spill] sm:$0xff] %v5443_v8  ;;  %8579 = vst [vmem:[#allocation46_spill] sm:$0xff] %v5449_v34  ;;  %v5463_v23 = vmul.f32 3.1622777, %v280_v59  ;;  %v5465_v46 = vpop.eup %4964  ;;  %v266_v35 = vmul.f32 %v5455_v42, %v5364_v51  ;;  %v5469_v40 = vmul.f32 0.31622776, %v264_v52  ;;  %v284_v20 = vmul.f32 %v5455_v42, %v5263_v62 }
  0x55   :  { %8580 = vst [vmem:[#allocation47_spill] sm:$0xff] %v5453_v18  ;;  %8581 = vst [vmem:[#allocation48_spill] sm:$0xff] %v5455_v42  ;;  %v5473_v21 = vmul.f32 3.1622777, %v281_v39  ;;  %v267_v15 = vmul.f32 %v5465_v46, %v5382_v32  ;;  %v5477_v24 = vmul.f32 0.31622776, %v265_v17  ;;  %v285_v47 = vmul.f32 %v5465_v46, %v5266_v63 }
  0x56   :  { %8582 = vst [vmem:[#allocation49_spill] sm:$0xff] %v5459_v37  ;;  %8583 = vst [vmem:[#allocation50_spill] sm:$0xff] %v5463_v23  ;;  %v5481_v59 = vmul.f32 3.1622777, %v282_v36  ;;  %v5483_v29 = vmul.f32 0.31622776, %v266_v35  ;;  %v344_v62 = vadd.f32 %v326_v30, %v5370_v4  ;;  %v345_v32 = vadd.f32 %v327_v11, %v5373_v12 }
  0x57   :  { %8584 = vst [vmem:[#allocation51_spill] sm:$0xff] %v5465_v46  ;;  %8585 = vst [vmem:[#allocation52_spill] sm:$0xff] %v5469_v40  ;;  %v5485_v51 = vmul.f32 3.1622777, %v283_v28  ;;  %v5487_v52 = vmul.f32 3.1622777, %v284_v20  ;;  %v346_v17 = vadd.f32 %v328_v43, %v5377_v26  ;;  %v347_v63 = vadd.f32 %v329_v7, %v5380_v38 }
  0x58   :  { %8586 = vst [vmem:[#allocation53_spill] sm:$0xff] %v5473_v21  ;;  %8587 = vst [vmem:[#allocation54_spill] sm:$0xff] %v5477_v24  ;;  %v5490_v39 = vmul.f32 0.31622776, %v267_v15  ;;  %v5492_v21 = vmul.f32 3.1622777, %v285_v47  ;;  %v348_v36 = vadd.f32 %v330_v50, %v5386_v60  ;;  %v349_v35 = vadd.f32 %v331_v58, %v5389_v9 }
  0x59   :  { %8588 = vst [vmem:[#allocation55_spill] sm:$0xff] %v5481_v59  ;;  %8589 = vst [vmem:[#allocation56_spill] sm:$0xff] %v5483_v29  ;;  %v350_v28 = vmul.f32 0.14545454, %v5122_v0  ;;  %v351_v20 = vmul.f32 0.14545454, %v5126_v2  ;;  %v5505_v15 = vmul.f32 %v5225_v45, %v5217_v41  ;;  %v5514_v60 = vmul.f32 %v5232_v48, %v5221_v44 }
  0x5a   :  { %8590 = vst [vmem:[#allocation57_spill] sm:$0xff] %v5485_v51  ;;  %8591 = vst [vmem:[#allocation58_spill] sm:$0xff] %v5487_v52  ;;  %v352_v4 = vmul.f32 0.14545454, %v5132_v5  ;;  %v353_v30 = vmul.f32 0.14545454, %v5140_v10 }
  0x5b   :  { %8592 = vst [vmem:[#allocation59_spill] sm:$0xff] %v5490_v39  ;;  %8593 = vst [vmem:[#allocation60_spill] sm:$0xff] %v5492_v21  ;;  %v5507_v12 = vpop.eup %4966  ;;  %v354_v26 = vmul.f32 0.14545454, %v5146_v14  ;;  %v355_v38 = vmul.f32 0.14545454, %v5153_v19 }
  0x5c   :  { %8594 = vst [vmem:[#allocation61_spill] sm:$0xff] %v5507_v12  ;;  %v356_v58 = vmul.f32 0.14545454, %v5161_v27  ;;  %v268_v9 = vmul.f32 %v5507_v12, %v250_v53  ;;  %v286_v11 = vmul.f32 %v5507_v12, %v5312_v54  ;;  %v357_v43 = vmul.f32 0.14545454, %v5170_v33 }
  0x5d   :  { %v358_v7 = vmul.f32 0.14545454, %v5181_v55  ;;  %v368_v50 = vrot.slane %v350_v28, 2  ;;  %v369_v47 = vrot.slane %v351_v20, 2  ;;  %v370_v21 = vrot.slane %v352_v4, 2 }
  0x5e   :  { %v371_v52 = vrot.slane %v353_v30, 2  ;;  %v277_v51 = vmul.f32 0.31622776, %v268_v9  ;;  %v295_v39 = vmul.f32 3.1622777, %v286_v11  ;;  %v372_v59 = vrot.slane %v354_v26, 2 }
  0x5f   :  { %v373_v29 = vrot.slane %v355_v38, 2  ;;  %v374_v24 = vrot.slane %v356_v58, 2  ;;  %v375_v23 = vrot.slane %v357_v43, 2  ;;  %v376_v40 = vrot.slane %v358_v7, 2 }
  0x60   :  { %v386_v53 = vadd.f32 %v368_v50, %v5415_v1  ;;  %v387_v18 = vadd.f32 %v369_v47, %v5423_v61  ;;  %v388_v54 = vadd.f32 %v370_v21, %v5425_v22  ;;  %v389_v8 = vadd.f32 %v371_v52, %v344_v62  ;;  %1362 = vst [vmem:[%s8337_s2 + $0x8] sm:$0x1] %v277_v51 }
  0x61   :  { %v390_v37 = vadd.f32 %v372_v59, %v345_v32  ;;  %4925 = vst [vmem:[%s8337_s2 + $0x38] sm:$0x1] %v295_v39  ;;  %v391_v28 = vadd.f32 %v373_v29, %v346_v17  ;;  %v392_v20 = vadd.f32 %v374_v24, %v347_v63  ;;  %v393_v4 = vadd.f32 %v375_v23, %v348_v36  ;;  %v8595_v24 = vld [vmem:[#allocation26_spill] sm:$0xff]  ;;  %v8596_v39 = vld [vmem:[#allocation27_spill] sm:$0xff] }
  0x62   :  { %v394_v30 = vadd.f32 %v376_v40, %v349_v35  ;;  %v395_v1 = vmul.f32 0.12727273, %v5122_v0  ;;  %v396_v61 = vmul.f32 0.12727273, %v5126_v2  ;;  %v397_v22 = vmul.f32 0.12727273, %v5132_v5 }
  0x63   :  { %v5535_v21 = vmul.f32 %v5236_v49, %v5217_v41  ;;  %v398_v59 = vmul.f32 0.12727273, %v5140_v10  ;;  %v399_v51 = vmul.f32 0.12727273, %v5146_v14  ;;  %v400_v52 = vmul.f32 0.12727273, %v5153_v19 }
  0x64   :  { %v5542_v23 = vmul.f32 %v8595_v24, %v5221_v44  ;;  %v401_v40 = vmul.f32 0.12727273, %v5161_v27  ;;  %v402_v29 = vmul.f32 0.12727273, %v5170_v33  ;;  %v403_v62 = vmul.f32 0.12727273, %v5181_v55 }
  0x65   :  { %v5549_v32 = vmul.f32 %v8596_v39, %v5217_v41  ;;  %v413_v17 = vrot.slane %v395_v1, 3  ;;  %v414_v63 = vrot.slane %v396_v61, 3  ;;  %v415_v36 = vrot.slane %v397_v22, 3 }
  0x66   :  { %v416_v35 = vrot.slane %v398_v59, 3  ;;  %v417_v26 = vrot.slane %v399_v51, 3  ;;  %v418_v38 = vrot.slane %v400_v52, 3  ;;  %v419_v58 = vrot.slane %v401_v40, 3 }
  0x67   :  { %v420_v9 = vrot.slane %v402_v29, 3  ;;  %v421_v11 = vrot.slane %v403_v62, 3  ;;  %v431_v43 = vadd.f32 %v413_v17, %v386_v53  ;;  %v432_v7 = vadd.f32 %v414_v63, %v387_v18  ;;  %v8597_v53 = vld [vmem:[#allocation28_spill] sm:$0xff] }
  0x68   :  { %v433_v50 = vadd.f32 %v415_v36, %v388_v54  ;;  %v434_v47 = vadd.f32 %v416_v35, %v389_v8  ;;  %v435_v34 = vadd.f32 %v417_v26, %v390_v37  ;;  %v436_v13 = vadd.f32 %v418_v38, %v391_v28  ;;  %v8598_v28 = vld [vmem:[#allocation29_spill] sm:$0xff] }
  0x69   :  { %v437_v31 = vadd.f32 %v419_v58, %v392_v20  ;;  %v438_v12 = vadd.f32 %v420_v9, %v393_v4  ;;  %v439_v24 = vadd.f32 %v421_v11, %v394_v30  ;;  %v440_v39 = vmul.f32 0.10909091, %v5122_v0 }
  0x6a   :  { %v441_v1 = vmul.f32 0.10909091, %v5126_v2  ;;  %v442_v61 = vmul.f32 0.10909091, %v5132_v5  ;;  %v443_v22 = vmul.f32 0.10909091, %v5140_v10  ;;  %v5558_v18 = vmul.f32 %v8597_v53, %v5221_v44 }
  0x6b   :  { %v444_v59 = vmul.f32 0.10909091, %v5146_v14  ;;  %v445_v8 = vmul.f32 0.10909091, %v5153_v19  ;;  %v446_v37 = vmul.f32 0.10909091, %v5161_v27  ;;  %v5565_v20 = vmul.f32 %v8598_v28, %v5217_v41 }
  0x6c   :  { %v447_v54 = vmul.f32 0.10909091, %v5170_v33  ;;  %v448_v4 = vmul.f32 0.10909091, %v5181_v55  ;;  %v458_v30 = vrot.slane %v440_v39, 4  ;;  %v459_v51 = vrot.slane %v441_v1, 4 }
  0x6d   :  { %v460_v52 = vrot.slane %v442_v61, 4  ;;  %v461_v40 = vrot.slane %v443_v22, 4  ;;  %v462_v29 = vrot.slane %v444_v59, 4  ;;  %v463_v62 = vrot.slane %v445_v8, 4  ;;  %v8599_v22 = vld [vmem:[#allocation30_spill] sm:$0xff] }
  0x6e   :  { %v464_v17 = vrot.slane %v446_v37, 4  ;;  %v465_v63 = vrot.slane %v447_v54, 4  ;;  %v466_v36 = vrot.slane %v448_v4, 4  ;;  %v476_v35 = vadd.f32 %v458_v30, %v431_v43 }
  0x6f   :  { %v477_v26 = vadd.f32 %v459_v51, %v432_v7  ;;  %v478_v38 = vadd.f32 %v460_v52, %v433_v50  ;;  %v479_v58 = vadd.f32 %v461_v40, %v434_v47  ;;  %v480_v9 = vadd.f32 %v462_v29, %v435_v34 }
  0x70   :  { %v481_v11 = vadd.f32 %v463_v62, %v436_v13  ;;  %v482_v53 = vadd.f32 %v464_v17, %v437_v31  ;;  %v483_v28 = vadd.f32 %v465_v63, %v438_v12  ;;  %v484_v48 = vadd.f32 %v466_v36, %v439_v24  ;;  %v8600_v13 = vld [vmem:[#allocation31_spill] sm:$0xff] }
  0x71   :  { %v485_v46 = vmul.f32 0.09090909, %v5122_v0  ;;  %v486_v39 = vmul.f32 0.09090909, %v5126_v2  ;;  %v487_v1 = vmul.f32 0.09090909, %v5132_v5  ;;  %v5574_v59 = vmul.f32 %v8599_v22, %v5221_v44 }
  0x72   :  { %v488_v61 = vmul.f32 0.09090909, %v5140_v10  ;;  %v489_v43 = vmul.f32 0.09090909, %v5146_v14  ;;  %v490_v34 = vmul.f32 0.09090909, %v5153_v19  ;;  %v5581_v12 = vmul.f32 %v8600_v13, %v5217_v41 }
  0x73   :  { %v491_v31 = vmul.f32 0.09090909, %v5161_v27  ;;  %v492_v24 = vmul.f32 0.09090909, %v5170_v33  ;;  %v493_v7 = vmul.f32 0.09090909, %v5181_v55 }
  0x74   :  { %v503_v50 = vrot.slane %v485_v46, 5  ;;  %v504_v47 = vrot.slane %v486_v39, 5  ;;  %v505_v8 = vrot.slane %v487_v1, 5  ;;  %v506_v37 = vrot.slane %v488_v61, 5  ;;  %v8601_v1 = vld [vmem:[#allocation32_spill] sm:$0xff] }
  0x75   :  { %v507_v54 = vrot.slane %v489_v43, 5  ;;  %v508_v4 = vrot.slane %v490_v34, 5  ;;  %v509_v30 = vrot.slane %v491_v31, 5  ;;  %v510_v51 = vrot.slane %v492_v24, 5 }
  0x76   :  { %v511_v52 = vrot.slane %v493_v7, 5  ;;  %v521_v40 = vadd.f32 %v503_v50, %v476_v35  ;;  %v522_v29 = vadd.f32 %v504_v47, %v477_v26  ;;  %v523_v62 = vadd.f32 %v505_v8, %v478_v38 }
  0x77   :  { %v524_v17 = vadd.f32 %v506_v37, %v479_v58  ;;  %v525_v63 = vadd.f32 %v507_v54, %v480_v9  ;;  %v526_v36 = vadd.f32 %v508_v4, %v481_v11  ;;  %v527_v13 = vadd.f32 %v509_v30, %v482_v53  ;;  %v8602_v53 = vld [vmem:[#allocation33_spill] sm:$0xff]  ;;  %v8603_v11 = vld [vmem:[#allocation34_spill] sm:$0xff] }
  0x78   :  { %v528_v22 = vadd.f32 %v510_v51, %v483_v28  ;;  %v529_v42 = vadd.f32 %v511_v52, %v484_v48  ;;  %v530_v3 = vmul.f32 0.07272727, %v5122_v0  ;;  %v531_v46 = vmul.f32 0.07272727, %v5126_v2 }
  0x79   :  { %v532_v39 = vmul.f32 0.07272727, %v5132_v5  ;;  %v5590_v61 = vmul.f32 %v8601_v1, %v5221_v44  ;;  %v533_v35 = vmul.f32 0.07272727, %v5140_v10  ;;  %v534_v26 = vmul.f32 0.07272727, %v5146_v14 }
  0x7a   :  { %v535_v38 = vmul.f32 0.07272727, %v5153_v19  ;;  %v5597_v28 = vmul.f32 %v8602_v53, %v5217_v41  ;;  %v536_v48 = vmul.f32 0.07272727, %v5161_v27  ;;  %v537_v58 = vmul.f32 0.07272727, %v5170_v33 }
  0x7b   :  { %v538_v9 = vmul.f32 0.07272727, %v5181_v55  ;;  %v5604_v43 = vmul.f32 %v8603_v11, %v5221_v44  ;;  %v548_v34 = vrot.slane %v530_v3, 6  ;;  %v549_v31 = vrot.slane %v531_v46, 6 }
  0x7c   :  { %v550_v24 = vrot.slane %v532_v39, 6  ;;  %v551_v7 = vrot.slane %v533_v35, 6  ;;  %v552_v50 = vrot.slane %v534_v26, 6  ;;  %v553_v47 = vrot.slane %v535_v38, 6 }
  0x7d   :  { %v554_v8 = vrot.slane %v536_v48, 6  ;;  %v555_v37 = vrot.slane %v537_v58, 6  ;;  %v556_v54 = vrot.slane %v538_v9, 6  ;;  %v566_v4 = vadd.f32 %v548_v34, %v521_v40  ;;  %v8604_v40 = vld [vmem:[#allocation35_spill] sm:$0xff] }
  0x7e   :  { %v567_v30 = vadd.f32 %v549_v31, %v522_v29  ;;  %v568_v51 = vadd.f32 %v550_v24, %v523_v62  ;;  %v569_v52 = vadd.f32 %v551_v7, %v524_v17  ;;  %v570_v53 = vadd.f32 %v552_v50, %v525_v63  ;;  %v8606_v50 = vld [vmem:[#allocation8_spill] sm:$0xff] }
  0x7f   :  { %v571_v1 = vadd.f32 %v553_v47, %v526_v36  ;;  %v572_v6 = vadd.f32 %v554_v8, %v527_v13  ;;  %v573_v25 = vadd.f32 %v555_v37, %v528_v22  ;;  %v574_v56 = vadd.f32 %v556_v54, %v529_v42  ;;  %v8608_v8 = vld [vmem:[#allocation10_spill] sm:$0xff]  ;;  %v8609_v54 = vld [vmem:[#allocation11_spill] sm:$0xff] }
  0x80   :  { %v575_v11 = vmul.f32 0.054545455, %v5122_v0  ;;  %v576_v3 = vmul.f32 0.054545455, %v5126_v2  ;;  %v577_v46 = vmul.f32 0.054545455, %v5132_v5  ;;  %v5613_v29 = vmul.f32 %v8604_v40, %v5217_v41 }
  0x81   :  { %v578_v39 = vmul.f32 0.054545455, %v5140_v10  ;;  %v579_v35 = vmul.f32 0.054545455, %v5146_v14  ;;  %v580_v62 = vmul.f32 0.054545455, %v5153_v19 }
  0x82   :  { %v581_v13 = vmul.f32 0.054545455, %v5161_v27  ;;  %v582_v42 = vmul.f32 0.054545455, %v5170_v33  ;;  %v8605_v0 = vld [vmem:[#allocation36_spill] sm:$0xff]  ;;  %v593_v5 = vrot.slane %v575_v11, 7 }
  0x83   :  { %v5620_v22 = vmul.f32 %v8605_v0, %v5221_v44  ;;  %v583_v2 = vmul.f32 0.054545455, %v5181_v55  ;;  %v594_v10 = vrot.slane %v576_v3, 7  ;;  %v595_v17 = vrot.slane %v577_v46, 7  ;;  %v8607_v11 = vld [vmem:[#allocation9_spill] sm:$0xff] }
  0x84   :  { %v596_v14 = vrot.slane %v578_v39, 7  ;;  %v597_v63 = vrot.slane %v579_v35, 7  ;;  %v598_v36 = vrot.slane %v580_v62, 7  ;;  %v599_v26 = vrot.slane %v581_v13, 7  ;;  %v8610_v46 = vld [vmem:[#allocation37_spill] sm:$0xff] }
  0x85   :  { %v600_v38 = vrot.slane %v582_v42, 7  ;;  %v601_v48 = vrot.slane %v583_v2, 7  ;;  %v611_v19 = vadd.f32 %v593_v5, %v566_v4  ;;  %v612_v58 = vadd.f32 %v594_v10, %v567_v30  ;;  %v8611_v4 = vld [vmem:[#allocation12_spill] sm:$0xff]  ;;  %v8615_v35 = vld [vmem:[#allocation17_spill] sm:$0xff] }
  0x86   :  { %v613_v27 = vadd.f32 %v595_v17, %v568_v51  ;;  %v614_v9 = vadd.f32 %v596_v14, %v569_v52  ;;  %v615_v33 = vadd.f32 %v597_v63, %v570_v53  ;;  %v616_v34 = vadd.f32 %v598_v36, %v571_v1  ;;  %v8612_v51 = vld [vmem:[#allocation13_spill] sm:$0xff]  ;;  %v8613_v1 = vld [vmem:[#allocation14_spill] sm:$0xff] }
  0x87   :  { %v617_v31 = vadd.f32 %v599_v26, %v572_v6  ;;  %v618_v24 = vadd.f32 %v600_v38, %v573_v25  ;;  %v619_v7 = vadd.f32 %v601_v48, %v574_v56  ;;  %v620_v55 = vmul.f32 0.036363635, %v8606_v50  ;;  %v8614_v56 = vld [vmem:[#allocation15_spill] sm:$0xff] }
  0x88   :  { %v621_v47 = vmul.f32 0.036363635, %v8607_v11  ;;  %v622_v37 = vmul.f32 0.036363635, %v8608_v8  ;;  %v623_v3 = vmul.f32 0.036363635, %v8609_v54  ;;  %v5629_v39 = vmul.f32 %v8610_v46, %v5217_v41 }
  0x89   :  { %v624_v30 = vmul.f32 0.036363635, %v8611_v4  ;;  %v625_v53 = vmul.f32 0.036363635, %v8612_v51  ;;  %v626_v6 = vmul.f32 0.036363635, %v8613_v1  ;;  %v629_v25 = vadd.f32 %v620_v55, %v611_v19 }
  0x8a   :  { %v627_v52 = vmul.f32 0.036363635, %v8614_v56  ;;  %v628_v62 = vmul.f32 0.036363635, %v8615_v35  ;;  %v630_v13 = vadd.f32 %v621_v47, %v612_v58  ;;  %v631_v42 = vadd.f32 %v622_v37, %v613_v27  ;;  %v8616_v19 = vld [vmem:[#allocation38_spill] sm:$0xff] }
  0x8b   :  { %v632_v2 = vadd.f32 %v623_v3, %v614_v9  ;;  %v633_v5 = vadd.f32 %v624_v30, %v615_v33  ;;  %v634_v10 = vadd.f32 %v625_v53, %v616_v34  ;;  %v635_v17 = vadd.f32 %v626_v6, %v617_v31 }
  0x8c   :  { %v636_v14 = vadd.f32 %v627_v52, %v618_v24  ;;  %v637_v41 = vadd.f32 %v628_v62, %v619_v7  ;;  %v638_v63 = vmul.f32 0.018181818, %v8606_v50  ;;  %v639_v36 = vmul.f32 0.018181818, %v8607_v11 }
  0x8d   :  { %v640_v26 = vmul.f32 0.018181818, %v8608_v8  ;;  %v641_v38 = vmul.f32 0.018181818, %v8609_v54  ;;  %v642_v48 = vmul.f32 0.018181818, %v8611_v4  ;;  %v698_v58 = vmul.f32 %v8616_v19, %v5221_v44 }
  0x8e   :  { %v643_v27 = vmul.f32 0.018181818, %v8612_v51  ;;  %v644_v9 = vmul.f32 0.018181818, %v8613_v1  ;;  %v645_v33 = vmul.f32 0.018181818, %v8614_v56  ;;  %v5648_v34 = vmul.f32 %v5236_v49, %v5225_v45 }
  0x8f   :  { %v646_v31 = vmul.f32 0.018181818, %v8615_v35  ;;  %v656_v24 = vrot.slane %v638_v63, 1  ;;  %v657_v7 = vrot.slane %v639_v36, 1  ;;  %v658_v50 = vrot.slane %v640_v26, 1 }
  0x90   :  { %v659_v55 = vrot.slane %v641_v38, 1  ;;  %v660_v11 = vrot.slane %v642_v48, 1  ;;  %v661_v47 = vrot.slane %v643_v27, 1  ;;  %v662_v8 = vrot.slane %v644_v9, 1 }
  0x91   :  { %v663_v44 = vrot.slane %v645_v33, 1  ;;  %v664_v37 = vrot.slane %v646_v31, 1  ;;  %v5651_v54 = vadd.f32 %v656_v24, %v629_v25  ;;  %v5653_v3 = vadd.f32 %v657_v7, %v630_v13 }
  0x92   :  { %v5655_v4 = vadd.f32 %v658_v50, %v631_v42  ;;  %v5657_v30 = vadd.f32 %v659_v55, %v632_v2  ;;  %v5659_v51 = vadd.f32 %v660_v11, %v633_v5  ;;  %v5661_v53 = vadd.f32 %v661_v47, %v634_v10 }
  0x93   :  { %8617 = vst [vmem:[#allocation35_spill] sm:$0xff] %v5651_v54  ;;  %8618 = vst [vmem:[#allocation36_spill] sm:$0xff] %v5653_v3  ;;  %v5663_v1 = vadd.f32 %v662_v8, %v635_v17  ;;  %v5665_v6 = vadd.f32 %v663_v44, %v636_v14  ;;  %v682_v56 = vadd.f32 %v664_v37, %v637_v41  ;;  %v699_v52 = vsel %vm61_vm0, %v5514_v60, 0.0 }
  0x94   :  { %8619 = vst [vmem:[#allocation8_spill] sm:$0xff] %v5655_v4  ;;  %8620 = vst [vmem:[#allocation9_spill] sm:$0xff] %v5657_v30  ;;  %v700_v25 = vadd.f32 %v699_v52, %v5505_v15  ;;  %v707_v35 = vsel %vm61_vm0, %v5542_v23, 0.0  ;;  %v715_v62 = vsel %vm61_vm0, %v5558_v18, 0.0  ;;  %v723_v13 = vsel %vm61_vm0, %v5574_v59, 0.0 }
  0x95   :  { %8621 = vst [vmem:[#allocation10_spill] sm:$0xff] %v5659_v51  ;;  %8622 = vst [vmem:[#allocation11_spill] sm:$0xff] %v5661_v53  ;;  %v708_v42 = vadd.f32 %v707_v35, %v5535_v21  ;;  %v716_v2 = vadd.f32 %v715_v62, %v5549_v32  ;;  %v724_v5 = vadd.f32 %v723_v13, %v5565_v20  ;;  %v731_v60 = vsel %vm61_vm0, %v5590_v61, 0.0 }
  0x96   :  { %8623 = vst [vmem:[#allocation37_spill] sm:$0xff] %v5663_v1  ;;  %8624 = vst [vmem:[#allocation12_spill] sm:$0xff] %v5665_v6  ;;  %v701_v15 = vrot.slane %v700_v25, 4  ;;  %v732_v23 = vadd.f32 %v731_v60, %v5581_v12  ;;  %v739_v18 = vsel %vm61_vm0, %v5604_v43, 0.0  ;;  %v747_v21 = vsel %vm61_vm0, %v5620_v22, 0.0 }
  0x97   :  { %4929 = vst [vmem:[%s8337_s2 + $0x98] sm:$0x1] %v682_v56  ;;  %v709_v59 = vrot.slane %v708_v42, 4  ;;  %v717_v32 = vrot.slane %v716_v2, 4  ;;  %v725_v10 = vrot.slane %v724_v5, 4  ;;  %v740_v20 = vadd.f32 %v739_v18, %v5597_v28 }
  0x98   :  { %v702_v17 = vadd.f32 %v701_v15, %v700_v25  ;;  %v733_v61 = vrot.slane %v732_v23, 4  ;;  %v748_v14 = vadd.f32 %v747_v21, %v5613_v29  ;;  %v755_v41 = vsel %vm61_vm0, %v698_v58, 0.0 }
  0x99   :  { %v710_v63 = vadd.f32 %v709_v59, %v708_v42  ;;  %v718_v36 = vadd.f32 %v717_v32, %v716_v2  ;;  %v726_v12 = vadd.f32 %v725_v10, %v724_v5  ;;  %v741_v26 = vrot.slane %v740_v20, 4 }
  0x9a   :  { %v703_v38 = vrot.slane %v702_v17, 2  ;;  %v734_v43 = vadd.f32 %v733_v61, %v732_v23  ;;  %v749_v48 = vrot.slane %v748_v14, 4  ;;  %v756_v22 = vadd.f32 %v755_v41, %v5629_v39  ;;  %v8626_v61 = vld [vmem:[#allocation42_spill] sm:$0xff] }
  0x9b   :  { %v711_v27 = vrot.slane %v710_v63, 2  ;;  %v719_v9 = vrot.slane %v718_v36, 2  ;;  %v727_v33 = vrot.slane %v726_v12, 2  ;;  %v742_v31 = vadd.f32 %v741_v26, %v740_v20  ;;  %v8625_v20 = vld [vmem:[#allocation40_spill] sm:$0xff]  ;;  %v8628_v26 = vld [vmem:[#allocation39_spill] sm:$0xff] }
  0x9c   :  { %v704_v28 = vadd.f32 %v703_v38, %v702_v17  ;;  %v735_v24 = vrot.slane %v734_v43, 2  ;;  %v750_v7 = vadd.f32 %v749_v48, %v748_v14  ;;  %v757_v50 = vrot.slane %v756_v22, 4 }
  0x9d   :  { %v712_v29 = vadd.f32 %v711_v27, %v710_v63  ;;  %v720_v55 = vadd.f32 %v719_v9, %v718_v36  ;;  %v728_v58 = vadd.f32 %v727_v33, %v726_v12  ;;  %v743_v11 = vrot.slane %v742_v31, 2  ;;  %v8627_v36 = vld [vmem:[#allocation45_spill] sm:$0xff] }
  0x9e   :  { %v705_v47 = vrot.slane %v704_v28, 1  ;;  %v736_v8 = vadd.f32 %v735_v24, %v734_v43  ;;  %v751_v44 = vrot.slane %v750_v7, 2  ;;  %v758_v37 = vadd.f32 %v757_v50, %v756_v22  ;;  %v8629_v43 = vld [vmem:[#allocation48_spill] sm:$0xff]  ;;  %v8632_v50 = vld [vmem:[#allocation26_spill] sm:$0xff] }
  0x9f   :  { %v713_v56 = vrot.slane %v712_v29, 1  ;;  %v721_v52 = vrot.slane %v720_v55, 1  ;;  %v729_v25 = vrot.slane %v728_v58, 1  ;;  %v744_v39 = vadd.f32 %v743_v11, %v742_v31  ;;  %v8630_v31 = vld [vmem:[#allocation51_spill] sm:$0xff] }
  0xa0   :  { %v706_v35 = vadd.f32 %v705_v47, %v704_v28  ;;  %v737_v62 = vrot.slane %v736_v8, 1  ;;  %v752_v13 = vadd.f32 %v751_v44, %v750_v7  ;;  %v759_v42 = vrot.slane %v758_v37, 2  ;;  %v8631_v7 = vld [vmem:[#allocation23_spill] sm:$0xff]  ;;  %v8634_v47 = vld [vmem:[#allocation28_spill] sm:$0xff]  ;;  %v8635_v44 = vld [vmem:[#allocation29_spill] sm:$0xff] }
  0xa1   :  { %v714_v2 = vadd.f32 %v713_v56, %v712_v29  ;;  %v722_v5 = vadd.f32 %v721_v52, %v720_v55  ;;  %v730_v60 = vadd.f32 %v729_v25, %v728_v58  ;;  %v745_v15 = vrot.slane %v744_v39, 1  ;;  %v8633_v58 = vld [vmem:[#allocation27_spill] sm:$0xff]  ;;  %v8636_v56 = vld [vmem:[#allocation61_spill] sm:$0xff] }
  0xa2   :  { %v738_v23 = vadd.f32 %v737_v62, %v736_v8  ;;  %v753_v18 = vrot.slane %v752_v13, 1  ;;  %v760_v21 = vadd.f32 %v759_v42, %v758_v37  ;;  %v763_v59 = vmul.f32 %v5408_v57, %v706_v35  ;;  %v8638_v62 = vld [vmem:[#allocation31_spill] sm:$0xff]  ;;  %v8639_v42 = vld [vmem:[#allocation32_spill] sm:$0xff] }
  0xa3   :  { %v746_v32 = vadd.f32 %v745_v15, %v744_v39  ;;  %v764_v10 = vmul.f32 %v5417_v16, %v714_v2  ;;  %v765_v17 = vmul.f32 %v8625_v20, %v722_v5  ;;  %v766_v14 = vmul.f32 %v8626_v61, %v730_v60  ;;  %v8637_v39 = vld [vmem:[#allocation30_spill] sm:$0xff]  ;;  %v8640_v5 = vld [vmem:[#allocation33_spill] sm:$0xff] }
  0xa4   :  { %v754_v41 = vadd.f32 %v753_v18, %v752_v13  ;;  %v761_v63 = vrot.slane %v760_v21, 1  ;;  %v767_v12 = vmul.f32 %v8627_v36, %v738_v23  ;;  %v5699_v38 = vmul.f32 %v8628_v26, %v763_v59  ;;  %v8641_v15 = vld [vmem:[#allocation34_spill] sm:$0xff] }
  0xa5   :  { %v768_v48 = vmul.f32 %v8629_v43, %v746_v32  ;;  %v5703_v22 = vmul.f32 %v8628_v26, %v764_v10  ;;  %v5706_v27 = vmul.f32 %v8628_v26, %v765_v17  ;;  %v5709_v9 = vmul.f32 %v8628_v26, %v766_v14 }
  0xa6   :  { %v762_v33 = vadd.f32 %v761_v63, %v760_v21  ;;  %v769_v28 = vmul.f32 %v8630_v31, %v754_v41  ;;  %v5713_v24 = vmul.f32 %v8628_v26, %v767_v12  ;;  %v780_v29 = vmul.f32 %v8632_v50, %v8631_v7 }
  0xa7   :  { %v5718_v55 = vmul.f32 %v8628_v26, %v768_v48  ;;  %v781_v11 = vmul.f32 %v8633_v58, %v5225_v45  ;;  %v782_v8 = vmul.f32 %v8634_v47, %v8631_v7  ;;  %v783_v37 = vmul.f32 %v8635_v44, %v5225_v45 }
  0xa8   :  { %v770_v52 = vmul.f32 %v8636_v56, %v762_v33  ;;  %v5728_v25 = vmul.f32 %v8628_v26, %v769_v28  ;;  %v784_v35 = vmul.f32 %v8637_v39, %v8631_v7  ;;  %v785_v13 = vmul.f32 %v8638_v62, %v5225_v45 }
  0xa9   :  { %v786_v2 = vmul.f32 %v8639_v42, %v8631_v7  ;;  %v787_v60 = vmul.f32 %v8640_v5, %v5225_v45  ;;  %v788_v23 = vmul.f32 %v8641_v15, %v8631_v7  ;;  %v789_v18 = vmul.f32 %v8604_v40, %v5225_v45 }
  0xaa   :  { %v5743_v21 = vmul.f32 %v8628_v26, %v770_v52  ;;  %v790_v59 = vmul.f32 %v8605_v0, %v8631_v7  ;;  %v791_v32 = vmul.f32 %v8610_v46, %v5225_v45  ;;  %v792_v10 = vmul.f32 %v8616_v19, %v8631_v7 }
  0xab   :  { %v793_v17 = vsel %vm61_vm0, %v780_v29, 0.0  ;;  %v801_v14 = vsel %vm61_vm0, %v782_v8, 0.0  ;;  %v809_v41 = vsel %vm61_vm0, %v784_v35, 0.0  ;;  %v817_v63 = vsel %vm61_vm0, %v786_v2, 0.0 }
  0xac   :  { %v794_v12 = vadd.f32 %v793_v17, %v5648_v34  ;;  %v802_v26 = vadd.f32 %v801_v14, %v781_v11  ;;  %v810_v48 = vadd.f32 %v809_v41, %v783_v37  ;;  %v818_v33 = vadd.f32 %v817_v63, %v785_v13 }
  0xad   :  { %v825_v28 = vsel %vm61_vm0, %v788_v23, 0.0  ;;  %v833_v45 = vsel %vm61_vm0, %v790_v59, 0.0  ;;  %v841_v52 = vsel %vm61_vm0, %v792_v10, 0.0  ;;  %v5761_v7 = vmul.f32 %v8633_v58, %v5236_v49 }
  0xae   :  { %v795_v29 = vrot.slane %v794_v12, 4  ;;  %v803_v8 = vrot.slane %v802_v26, 4  ;;  %v811_v35 = vrot.slane %v810_v48, 4  ;;  %v819_v6 = vrot.slane %v818_v33, 4 }
  0xaf   :  { %v826_v2 = vadd.f32 %v825_v28, %v787_v60  ;;  %v834_v1 = vadd.f32 %v833_v45, %v789_v18  ;;  %v842_v34 = vadd.f32 %v841_v52, %v791_v32  ;;  %v864_v11 = vmul.f32 %v8634_v47, %v8632_v50 }
  0xb0   :  { %v796_v37 = vadd.f32 %v795_v29, %v794_v12  ;;  %v804_v13 = vadd.f32 %v803_v8, %v802_v26  ;;  %v812_v23 = vadd.f32 %v811_v35, %v810_v48  ;;  %v820_v59 = vadd.f32 %v819_v6, %v818_v33 }
  0xb1   :  { %v827_v17 = vrot.slane %v826_v2, 4  ;;  %v835_v10 = vrot.slane %v834_v1, 4  ;;  %v843_v14 = vrot.slane %v842_v34, 4  ;;  %v865_v41 = vmul.f32 %v8635_v44, %v5236_v49 }
  0xb2   :  { %v797_v63 = vrot.slane %v796_v37, 2  ;;  %v805_v53 = vrot.slane %v804_v13, 2  ;;  %v813_v54 = vrot.slane %v812_v23, 2  ;;  %v821_v51 = vrot.slane %v820_v59, 2 }
  0xb3   :  { %v828_v60 = vadd.f32 %v827_v17, %v826_v2  ;;  %v836_v18 = vadd.f32 %v835_v10, %v834_v1  ;;  %v844_v32 = vadd.f32 %v843_v14, %v842_v34  ;;  %v866_v28 = vmul.f32 %v8637_v39, %v8632_v50 }
  0xb4   :  { %v798_v12 = vadd.f32 %v797_v63, %v796_v37  ;;  %v806_v26 = vadd.f32 %v805_v53, %v804_v13  ;;  %v814_v48 = vadd.f32 %v813_v54, %v812_v23  ;;  %v822_v6 = vadd.f32 %v821_v51, %v820_v59 }
  0xb5   :  { %v829_v33 = vrot.slane %v828_v60, 2  ;;  %v837_v45 = vrot.slane %v836_v18, 2  ;;  %v845_v52 = vrot.slane %v844_v32, 2  ;;  %v867_v29 = vmul.f32 %v8638_v62, %v5236_v49 }
  0xb6   :  { %v799_v8 = vrot.slane %v798_v12, 1  ;;  %v807_v35 = vrot.slane %v806_v26, 1  ;;  %v815_v30 = vrot.slane %v814_v48, 1  ;;  %v823_v4 = vrot.slane %v822_v6, 1 }
  0xb7   :  { %v830_v2 = vadd.f32 %v829_v33, %v828_v60  ;;  %v838_v1 = vadd.f32 %v837_v45, %v836_v18  ;;  %v846_v34 = vadd.f32 %v845_v52, %v844_v32  ;;  %v868_v17 = vmul.f32 %v8639_v42, %v8632_v50 }
  0xb8   :  { %v800_v37 = vadd.f32 %v799_v8, %v798_v12  ;;  %v808_v53 = vadd.f32 %v807_v35, %v806_v26  ;;  %v816_v54 = vadd.f32 %v815_v30, %v814_v48  ;;  %v824_v51 = vadd.f32 %v823_v4, %v822_v6 }
  0xb9   :  { %v831_v13 = vrot.slane %v830_v2, 1  ;;  %v839_v23 = vrot.slane %v838_v1, 1  ;;  %v847_v59 = vrot.slane %v846_v34, 1  ;;  %v869_v10 = vmul.f32 %v8640_v5, %v5236_v49 }
  0xba   :  { %v849_v14 = vmul.f32 %v5417_v16, %v800_v37  ;;  %v850_v63 = vmul.f32 %v8625_v20, %v808_v53  ;;  %v851_v60 = vmul.f32 %v8626_v61, %v816_v54  ;;  %v852_v18 = vmul.f32 %v8627_v36, %v824_v51 }
  0xbb   :  { %v832_v32 = vadd.f32 %v831_v13, %v830_v2  ;;  %v840_v33 = vadd.f32 %v839_v23, %v838_v1  ;;  %v848_v12 = vadd.f32 %v847_v59, %v846_v34  ;;  %v870_v4 = vmul.f32 %v8641_v15, %v8632_v50 }
  0xbc   :  { %v5782_v30 = vmul.f32 %v5408_v57, %v849_v14  ;;  %v5785_v26 = vmul.f32 %v5408_v57, %v850_v63  ;;  %v5788_v48 = vmul.f32 %v5408_v57, %v851_v60  ;;  %v5791_v6 = vmul.f32 %v5408_v57, %v852_v18 }
  0xbd   :  { %v853_v45 = vmul.f32 %v8629_v43, %v832_v32  ;;  %v854_v52 = vmul.f32 %v8630_v31, %v840_v33  ;;  %v855_v8 = vmul.f32 %v8636_v56, %v848_v12  ;;  %v871_v35 = vmul.f32 %v8604_v40, %v5236_v49 }
  0xbe   :  { %v872_v2 = vmul.f32 %v8605_v0, %v8632_v50  ;;  %v873_v1 = vmul.f32 %v8610_v46, %v5236_v49  ;;  %v874_v34 = vmul.f32 %v8616_v19, %v8632_v50  ;;  %v875_v37 = vsel %vm61_vm0, %v864_v11, 0.0 }
  0xbf   :  { %v5806_v53 = vmul.f32 %v5408_v57, %v853_v45  ;;  %v5809_v54 = vmul.f32 %v5408_v57, %v854_v52  ;;  %v5812_v51 = vmul.f32 %v5408_v57, %v855_v8  ;;  %v876_v13 = vadd.f32 %v875_v37, %v5761_v7 }
  0xc0   :  { %v883_v23 = vsel %vm61_vm0, %v866_v28, 0.0  ;;  %v891_v49 = vsel %vm61_vm0, %v868_v17, 0.0  ;;  %v899_v59 = vsel %vm61_vm0, %v870_v4, 0.0  ;;  %v907_v50 = vsel %vm61_vm0, %v872_v2, 0.0 }
  0xc1   :  { %8642 = vst [vmem:[#allocation13_spill] sm:$0xff] %v5806_v53  ;;  %8643 = vst [vmem:[#allocation14_spill] sm:$0xff] %v5809_v54  ;;  %v877_v11 = vrot.slane %v876_v13, 4  ;;  %v884_v14 = vadd.f32 %v883_v23, %v865_v41  ;;  %v892_v63 = vadd.f32 %v891_v49, %v867_v29  ;;  %v900_v60 = vadd.f32 %v899_v59, %v869_v10 }
  0xc2   :  { %8644 = vst [vmem:[#allocation15_spill] sm:$0xff] %v5812_v51  ;;  %v908_v18 = vadd.f32 %v907_v50, %v871_v35  ;;  %v915_v32 = vsel %vm61_vm0, %v874_v34, 0.0  ;;  %v935_v57 = vmul.f32 %v8635_v44, %v8633_v58  ;;  %v936_v7 = vmul.f32 %v8637_v39, %v8634_v47 }
  0xc3   :  { %v878_v28 = vadd.f32 %v877_v11, %v876_v13  ;;  %v885_v33 = vrot.slane %v884_v14, 4  ;;  %v893_v17 = vrot.slane %v892_v63, 4  ;;  %v901_v12 = vrot.slane %v900_v60, 4 }
  0xc4   :  { %v909_v4 = vrot.slane %v908_v18, 4  ;;  %v916_v45 = vadd.f32 %v915_v32, %v873_v1  ;;  %v937_v41 = vmul.f32 %v8638_v62, %v8633_v58  ;;  %v938_v29 = vmul.f32 %v8639_v42, %v8634_v47 }
  0xc5   :  { %v879_v10 = vrot.slane %v878_v28, 2  ;;  %v886_v52 = vadd.f32 %v885_v33, %v884_v14  ;;  %v894_v8 = vadd.f32 %v893_v17, %v892_v63  ;;  %v902_v35 = vadd.f32 %v901_v12, %v900_v60 }
  0xc6   :  { %v910_v2 = vadd.f32 %v909_v4, %v908_v18  ;;  %v917_v34 = vrot.slane %v916_v45, 4  ;;  %v939_v37 = vmul.f32 %v8640_v5, %v8633_v58  ;;  %v940_v13 = vmul.f32 %v8641_v15, %v8634_v47 }
  0xc7   :  { %v880_v23 = vadd.f32 %v879_v10, %v878_v28  ;;  %v887_v1 = vrot.slane %v886_v52, 2  ;;  %v895_v49 = vrot.slane %v894_v8, 2  ;;  %v903_v59 = vrot.slane %v902_v35, 2 }
  0xc8   :  { %v911_v50 = vrot.slane %v910_v2, 2  ;;  %v918_v11 = vadd.f32 %v917_v34, %v916_v45  ;;  %v941_v32 = vmul.f32 %v8604_v40, %v8633_v58  ;;  %v942_v14 = vmul.f32 %v8605_v0, %v8634_v47 }
  0xc9   :  { %v881_v63 = vrot.slane %v880_v23, 1  ;;  %v888_v60 = vadd.f32 %v887_v1, %v886_v52  ;;  %v896_v18 = vadd.f32 %v895_v49, %v894_v8  ;;  %v904_v33 = vadd.f32 %v903_v59, %v902_v35 }
  0xca   :  { %v912_v17 = vadd.f32 %v911_v50, %v910_v2  ;;  %v919_v12 = vrot.slane %v918_v11, 2  ;;  %v943_v28 = vmul.f32 %v8610_v46, %v8633_v58  ;;  %v944_v4 = vmul.f32 %v8616_v19, %v8634_v47 }
  0xcb   :  { %v882_v10 = vadd.f32 %v881_v63, %v880_v23  ;;  %v889_v45 = vrot.slane %v888_v60, 1  ;;  %v897_v34 = vrot.slane %v896_v18, 1  ;;  %v905_v3 = vrot.slane %v904_v33, 1 }
  0xcc   :  { %v913_v51 = vrot.slane %v912_v17, 1  ;;  %v920_v54 = vadd.f32 %v919_v12, %v918_v11  ;;  %v945_v53 = vsel %vm61_vm0, %v936_v7, 0.0  ;;  %v953_v52 = vsel %vm61_vm0, %v938_v29, 0.0 }
  0xcd   :  { %v890_v8 = vadd.f32 %v889_v45, %v888_v60  ;;  %v898_v35 = vadd.f32 %v897_v34, %v896_v18  ;;  %v906_v2 = vadd.f32 %v905_v3, %v904_v33  ;;  %v923_v1 = vmul.f32 %v8625_v20, %v882_v10 }
  0xce   :  { %v914_v49 = vadd.f32 %v913_v51, %v912_v17  ;;  %v921_v58 = vrot.slane %v920_v54, 1  ;;  %v946_v59 = vadd.f32 %v945_v53, %v935_v57  ;;  %v954_v50 = vadd.f32 %v953_v52, %v937_v41 }
  0xcf   :  { %v924_v47 = vmul.f32 %v8626_v61, %v890_v8  ;;  %v925_v23 = vmul.f32 %v8627_v36, %v898_v35  ;;  %v926_v63 = vmul.f32 %v8629_v43, %v906_v2  ;;  %v5847_v11 = vmul.f32 %v5417_v16, %v923_v1 }
  0xd0   :  { %v922_v7 = vadd.f32 %v921_v58, %v920_v54  ;;  %v927_v29 = vmul.f32 %v8630_v31, %v914_v49  ;;  %v947_v60 = vrot.slane %v946_v59, 4  ;;  %v955_v3 = vrot.slane %v954_v50, 4 }
  0xd1   :  { %v5851_v18 = vmul.f32 %v5417_v16, %v924_v47  ;;  %v5854_v53 = vmul.f32 %v5417_v16, %v925_v23  ;;  %v5857_v51 = vmul.f32 %v5417_v16, %v926_v63  ;;  %v961_v57 = vsel %vm61_vm0, %v940_v13, 0.0 }
  0xd2   :  { %v928_v41 = vmul.f32 %v8636_v56, %v922_v7  ;;  %v5862_v33 = vmul.f32 %v5417_v16, %v927_v29  ;;  %v948_v54 = vadd.f32 %v947_v60, %v946_v59  ;;  %v956_v17 = vadd.f32 %v955_v3, %v954_v50 }
  0xd3   :  { %v962_v12 = vadd.f32 %v961_v57, %v939_v37  ;;  %v969_v10 = vsel %vm61_vm0, %v942_v14, 0.0  ;;  %v977_v45 = vsel %vm61_vm0, %v944_v4, 0.0  ;;  %v995_v34 = vmul.f32 %v8638_v62, %v8635_v44 }
  0xd4   :  { %v5869_v52 = vmul.f32 %v5417_v16, %v928_v41  ;;  %v949_v8 = vrot.slane %v948_v54, 2  ;;  %v957_v13 = vrot.slane %v956_v17, 2  ;;  %v970_v35 = vadd.f32 %v969_v10, %v941_v32 }
  0xd5   :  { %v963_v2 = vrot.slane %v962_v12, 4  ;;  %v978_v1 = vadd.f32 %v977_v45, %v943_v28  ;;  %v996_v49 = vmul.f32 %v8639_v42, %v8637_v39  ;;  %v997_v37 = vmul.f32 %v8640_v5, %v8635_v44 }
  0xd6   :  { %v950_v14 = vadd.f32 %v949_v8, %v948_v54  ;;  %v958_v58 = vadd.f32 %v957_v13, %v956_v17  ;;  %v971_v4 = vrot.slane %v970_v35, 4  ;;  %v998_v59 = vmul.f32 %v8641_v15, %v8637_v39 }
  0xd7   :  { %v964_v50 = vadd.f32 %v963_v2, %v962_v12  ;;  %v979_v16 = vrot.slane %v978_v1, 4  ;;  %v999_v47 = vmul.f32 %v8604_v40, %v8635_v44  ;;  %v1000_v32 = vmul.f32 %v8605_v0, %v8637_v39 }
  0xd8   :  { %v951_v28 = vrot.slane %v950_v14, 1  ;;  %v959_v23 = vrot.slane %v958_v58, 1  ;;  %v972_v63 = vadd.f32 %v971_v4, %v970_v35  ;;  %v1001_v7 = vmul.f32 %v8610_v46, %v8635_v44 }
  0xd9   :  { %v965_v29 = vrot.slane %v964_v50, 2  ;;  %v980_v60 = vadd.f32 %v979_v16, %v978_v1  ;;  %v1002_v3 = vmul.f32 %v8616_v19, %v8637_v39  ;;  %v1003_v57 = vsel %vm61_vm0, %v996_v49, 0.0 }
  0xda   :  { %v952_v41 = vadd.f32 %v951_v28, %v950_v14  ;;  %v960_v54 = vadd.f32 %v959_v23, %v958_v58  ;;  %v973_v17 = vrot.slane %v972_v63, 2  ;;  %v1004_v12 = vadd.f32 %v1003_v57, %v995_v34 }
  0xdb   :  { %v966_v10 = vadd.f32 %v965_v29, %v964_v50  ;;  %v981_v45 = vrot.slane %v980_v60, 2  ;;  %v1011_v8 = vsel %vm61_vm0, %v998_v59, 0.0  ;;  %v1019_v13 = vsel %vm61_vm0, %v1000_v32, 0.0 }
  0xdc   :  { %v974_v35 = vadd.f32 %v973_v17, %v972_v63  ;;  %v985_v44 = vmul.f32 %v8626_v61, %v952_v41  ;;  %v986_v2 = vmul.f32 %v8627_v36, %v960_v54  ;;  %v1005_v1 = vrot.slane %v1004_v12, 4 }
  0xdd   :  { %v967_v4 = vrot.slane %v966_v10, 1  ;;  %v982_v39 = vadd.f32 %v981_v45, %v980_v60  ;;  %v1012_v16 = vadd.f32 %v1011_v8, %v997_v37  ;;  %v1020_v49 = vadd.f32 %v1019_v13, %v999_v47 }
  0xde   :  { %v975_v14 = vrot.slane %v974_v35, 1  ;;  %v5891_v58 = vmul.f32 %v8625_v20, %v985_v44  ;;  %v5894_v34 = vmul.f32 %v8625_v20, %v986_v2  ;;  %v1006_v59 = vadd.f32 %v1005_v1, %v1004_v12 }
  0xdf   :  { %v968_v50 = vadd.f32 %v967_v4, %v966_v10  ;;  %v983_v32 = vrot.slane %v982_v39, 1  ;;  %v1013_v28 = vrot.slane %v1012_v16, 4  ;;  %v1021_v23 = vrot.slane %v1020_v49, 4 }
  0xe0   :  { %v976_v63 = vadd.f32 %v975_v14, %v974_v35  ;;  %v1007_v29 = vrot.slane %v1006_v59, 2  ;;  %v1027_v57 = vsel %vm61_vm0, %v1002_v3, 0.0  ;;  %v1043_v37 = vmul.f32 %v8640_v5, %v8638_v62 }
  0xe1   :  { %v984_v47 = vadd.f32 %v983_v32, %v982_v39  ;;  %v987_v60 = vmul.f32 %v8629_v43, %v968_v50  ;;  %v1014_v41 = vadd.f32 %v1013_v28, %v1012_v16  ;;  %v1022_v54 = vadd.f32 %v1021_v23, %v1020_v49 }
  0xe2   :  { %v988_v17 = vmul.f32 %v8630_v31, %v976_v63  ;;  %v1008_v45 = vadd.f32 %v1007_v29, %v1006_v59  ;;  %v1028_v12 = vadd.f32 %v1027_v57, %v1001_v7  ;;  %v1044_v10 = vmul.f32 %v8641_v15, %v8639_v42 }
  0xe3   :  { %v989_v8 = vmul.f32 %v8636_v56, %v984_v47  ;;  %v5905_v13 = vmul.f32 %v8625_v20, %v987_v60  ;;  %v1015_v3 = vrot.slane %v1014_v41, 2  ;;  %v1023_v35 = vrot.slane %v1022_v54, 2 }
  0xe4   :  { %v5908_v44 = vmul.f32 %v8625_v20, %v988_v17  ;;  %v1009_v2 = vrot.slane %v1008_v45, 1  ;;  %v1029_v1 = vrot.slane %v1028_v12, 4  ;;  %v1045_v4 = vmul.f32 %v8604_v40, %v8638_v62 }
  0xe5   :  { %v5913_v7 = vmul.f32 %v8625_v20, %v989_v8  ;;  %v1016_v39 = vadd.f32 %v1015_v3, %v1014_v41  ;;  %v1024_v16 = vadd.f32 %v1023_v35, %v1022_v54  ;;  %v1046_v49 = vmul.f32 %v8605_v0, %v8639_v42 }
  0xe6   :  { %v1010_v14 = vadd.f32 %v1009_v2, %v1008_v45  ;;  %v1030_v59 = vadd.f32 %v1029_v1, %v1028_v12  ;;  %v1047_v50 = vmul.f32 %v8610_v46, %v8638_v62  ;;  %v1048_v32 = vmul.f32 %v8616_v19, %v8639_v42 }
  0xe7   :  { %v1017_v28 = vrot.slane %v1016_v39, 1  ;;  %v1025_v23 = vrot.slane %v1024_v16, 1  ;;  %v1049_v63 = vsel %vm61_vm0, %v1044_v10, 0.0  ;;  %v1057_v20 = vsel %vm61_vm0, %v1046_v49, 0.0 }
  0xe8   :  { %v1031_v29 = vrot.slane %v1030_v59, 2  ;;  %v1035_v57 = vmul.f32 %v8627_v36, %v1010_v14  ;;  %v1050_v47 = vadd.f32 %v1049_v63, %v1043_v37  ;;  %v1058_v60 = vadd.f32 %v1057_v20, %v1045_v4 }
  0xe9   :  { %v1018_v41 = vadd.f32 %v1017_v28, %v1016_v39  ;;  %v1026_v54 = vadd.f32 %v1025_v23, %v1024_v16  ;;  %v1065_v17 = vsel %vm61_vm0, %v1048_v32, 0.0  ;;  %v1079_v62 = vmul.f32 %v8604_v40, %v8640_v5 }
  0xea   :  { %v1032_v45 = vadd.f32 %v1031_v29, %v1030_v59  ;;  %v5928_v42 = vmul.f32 %v8626_v61, %v1035_v57  ;;  %v1051_v12 = vrot.slane %v1050_v47, 4  ;;  %v1059_v10 = vrot.slane %v1058_v60, 4 }
  0xeb   :  { %v1036_v8 = vmul.f32 %v8629_v43, %v1018_v41  ;;  %v1037_v3 = vmul.f32 %v8630_v31, %v1026_v54  ;;  %v1066_v35 = vadd.f32 %v1065_v17, %v1047_v50  ;;  %v1080_v37 = vmul.f32 %v8605_v0, %v8641_v15 }
  0xec   :  { %v1033_v2 = vrot.slane %v1032_v45, 1  ;;  %v1052_v1 = vadd.f32 %v1051_v12, %v1050_v47  ;;  %v1060_v4 = vadd.f32 %v1059_v10, %v1058_v60  ;;  %v1081_v39 = vmul.f32 %v8610_v46, %v8640_v5 }
  0xed   :  { %v5937_v16 = vmul.f32 %v8626_v61, %v1036_v8  ;;  %v5940_v49 = vmul.f32 %v8626_v61, %v1037_v3  ;;  %v1067_v14 = vrot.slane %v1066_v35, 4  ;;  %v1082_v59 = vmul.f32 %v8616_v19, %v8641_v15 }
  0xee   :  { %v1034_v50 = vadd.f32 %v1033_v2, %v1032_v45  ;;  %v1053_v32 = vrot.slane %v1052_v1, 2  ;;  %v1061_v28 = vrot.slane %v1060_v4, 2  ;;  %v1083_v23 = vsel %vm61_vm0, %v1080_v37, 0.0 }
  0xef   :  { %v1068_v63 = vadd.f32 %v1067_v14, %v1066_v35  ;;  %v1084_v20 = vadd.f32 %v1083_v23, %v1079_v62  ;;  %v1091_v29 = vsel %vm61_vm0, %v1082_v59, 0.0  ;;  %v1103_v5 = vmul.f32 %v8610_v46, %v8604_v40 }
  0xf0   :  { %v1038_v57 = vmul.f32 %v8636_v56, %v1034_v50  ;;  %v1054_v47 = vadd.f32 %v1053_v32, %v1052_v1  ;;  %v1062_v60 = vadd.f32 %v1061_v28, %v1060_v4  ;;  %v1092_v41 = vadd.f32 %v1091_v29, %v1081_v39 }
  0xf1   :  { %v1069_v54 = vrot.slane %v1068_v63, 2  ;;  %v1085_v17 = vrot.slane %v1084_v20, 4  ;;  %v1104_v15 = vmul.f32 %v8616_v19, %v8605_v0  ;;  %v1123_v45 = vrot.slane %v5703_v22, 7 }
  0xf2   :  { %v5953_v12 = vmul.f32 %v8626_v61, %v1038_v57  ;;  %v1055_v62 = vrot.slane %v1054_v47, 1  ;;  %v1063_v10 = vrot.slane %v1062_v60, 1  ;;  %v1093_v8 = vrot.slane %v1092_v41, 4 }
  0xf3   :  { %v1070_v3 = vadd.f32 %v1069_v54, %v1068_v63  ;;  %v1086_v40 = vadd.f32 %v1085_v17, %v1084_v20  ;;  %v1105_v46 = vsel %vm61_vm0, %v1104_v15, 0.0  ;;  %v1125_v0 = vsel %vm1124_vm1, %v1123_v45, %v5699_v38 }
  0xf4   :  { %v1056_v35 = vadd.f32 %v1055_v62, %v1054_v47  ;;  %v1064_v37 = vadd.f32 %v1063_v10, %v1062_v60  ;;  %v1094_v2 = vadd.f32 %v1093_v8, %v1092_v41  ;;  %v1106_v1 = vadd.f32 %v1105_v46, %v1103_v5 }
  0xf5   :  { %v1071_v4 = vrot.slane %v1070_v3, 1  ;;  %v1087_v39 = vrot.slane %v1086_v40, 2  ;;  %v1126_v19 = vrot.slane %v5706_v27, 6  ;;  %v1129_v28 = vrot.slane %v5709_v9, 5 }
  0xf6   :  { %v1073_v61 = vmul.f32 %v8629_v43, %v1056_v35  ;;  %v1074_v22 = vmul.f32 %v8630_v31, %v1064_v37  ;;  %v1095_v14 = vrot.slane %v1094_v2, 2  ;;  %v1107_v59 = vrot.slane %v1106_v1, 4 }
  0xf7   :  { %v1072_v50 = vadd.f32 %v1071_v4, %v1070_v3  ;;  %v1088_v32 = vadd.f32 %v1087_v39, %v1086_v40  ;;  %v1128_v5 = vsel %vm1127_vm2, %v1126_v19, %v1125_v0  ;;  %v1132_v9 = vrot.slane %v5713_v24, 4  ;;  %v8646_v19 = vld [vmem:[#allocation14_spill] sm:$0xff] }
  0xf8   :  { %v5963_v23 = vmul.f32 %v8627_v36, %v1073_v61  ;;  %v5966_v63 = vmul.f32 %v8627_v36, %v1074_v22  ;;  %v1096_v38 = vadd.f32 %v1095_v14, %v1094_v2  ;;  %v1108_v20 = vadd.f32 %v1107_v59, %v1106_v1  ;;  %v8647_v22 = vld [vmem:[#allocation15_spill] sm:$0xff] }
  0xf9   :  { %v1075_v27 = vmul.f32 %v8636_v56, %v1072_v50  ;;  %v1089_v29 = vrot.slane %v1088_v32, 1  ;;  %v1131_v60 = vsel %vm1130_vm3, %v1129_v28, %v1128_v5  ;;  %v1135_v17 = vrot.slane %v5718_v55, 3 }
  0xfa   :  { %v1097_v57 = vrot.slane %v1096_v38, 1  ;;  %v1109_v47 = vrot.slane %v1108_v20, 2  ;;  %v1134_v62 = vsel %vm1133_vm4, %v1132_v9, %v1131_v60  ;;  %v1138_v3 = vrot.slane %v5728_v25, 2 }
  0xfb   :  { %v5973_v41 = vmul.f32 %v8627_v36, %v1075_v27  ;;  %v1090_v54 = vadd.f32 %v1089_v29, %v1088_v32  ;;  %v1137_v8 = vsel %vm1136_vm5, %v1135_v17, %v1134_v62  ;;  %v1141_v40 = vrot.slane %v5743_v21, 1  ;;  %v8645_v21 = vld [vmem:[#allocation13_spill] sm:$0xff] }
  0xfc   :  { %v1098_v15 = vadd.f32 %v1097_v57, %v1096_v38  ;;  %v1110_v45 = vadd.f32 %v1109_v47, %v1108_v20  ;;  %v1140_v46 = vsel %vm1139_vm6, %v1138_v3, %v1137_v8  ;;  %v1152_v35 = vrot.slane %v5785_v26, 7 }
  0xfd   :  { %v1099_v10 = vmul.f32 %v8630_v31, %v1090_v54  ;;  %v1154_v37 = vrot.slane %v5788_v48, 6  ;;  %v1143_v25 = vsel %vm1142_vm7, %v1141_v40, %v1140_v46  ;;  %v1156_v4 = vrot.slane %v5791_v6, 5  ;;  %v8649_v40 = vld [vmem:[#allocation43_spill] sm:$0xff] }
  0xfe   :  { %v1100_v24 = vmul.f32 %v8636_v56, %v1098_v15  ;;  %v1111_v36 = vrot.slane %v1110_v45, 1  ;;  %v1153_v39 = vsel %vm1124_vm1, %v1152_v35, %v5782_v30  ;;  %v1158_v0 = vrot.slane %v8645_v21, 4  ;;  %v8651_v21 = vld [vmem:[#allocation49_spill] sm:$0xff] }
  0xff   :  { %v1101_v55 = vmul.f32 %v8629_v43, %v1099_v10  ;;  %v1160_v61 = vrot.slane %v8646_v19, 3  ;;  %v1162_v14 = vrot.slane %v8647_v22, 2  ;;  %v1155_v48 = vsel %vm1127_vm2, %v1154_v37, %v1153_v39 }
 0x100   :  { %v1102_v2 = vmul.f32 %v8629_v43, %v1100_v24  ;;  %v1112_v1 = vadd.f32 %v1111_v36, %v1110_v45  ;;  %v1171_v43 = vrot.slane %v5847_v11, 1  ;;  %v1172_v59 = vrot.slane %v5854_v53, 7  ;;  %v8648_v36 = vld [vmem:[#allocation41_spill] sm:$0xff] }
 0x101   :  { %v1157_v50 = vsel %vm1130_vm3, %v1156_v4, %v1155_v48  ;;  %v1174_v6 = vrot.slane %v5857_v51, 6  ;;  %v1176_v30 = vrot.slane %v5862_v33, 5  ;;  %v1178_v32 = vrot.slane %v5869_v52, 4 }
 0x102   :  { %v1113_v26 = vmul.f32 %v8636_v56, %v1112_v1  ;;  %v1159_v38 = vsel %vm1133_vm4, %v1158_v0, %v1157_v50  ;;  %v1173_v56 = vsel %vm1124_vm1, %v1172_v59, %v5851_v18  ;;  %v1187_v20 = vrot.slane %v5891_v58, 3  ;;  %v8653_v0 = vld [vmem:[#allocation47_spill] sm:$0xff] }
 0x103   :  { %v1161_v11 = vsel %vm1136_vm5, %v1160_v61, %v1159_v38  ;;  %v1175_v53 = vsel %vm1127_vm2, %v1174_v6, %v1173_v56  ;;  %v1188_v27 = vrot.slane %v5894_v34, 2  ;;  %v1190_v51 = vrot.slane %v5905_v13, 1 }
 0x104   :  { %v1114_v28 = vmul.f32 %v8630_v31, %v1113_v26  ;;  %v1163_v33 = vsel %vm1139_vm6, %v1162_v14, %v1161_v11  ;;  %v1177_v52 = vsel %vm1130_vm3, %v1176_v30, %v1175_v53  ;;  %v1192_v31 = vrot.slane %v5913_v7, 7 }
 0x105   :  { %v1200_v29 = vrot.slane %v5928_v42, 6  ;;  %v1179_v18 = vsel %vm1133_vm4, %v1178_v32, %v1177_v52  ;;  %v1189_v58 = vsel %vm1139_vm6, %v1188_v27, %v1187_v20  ;;  %v1201_v5 = vrot.slane %v5937_v16, 5 }
 0x106   :  { %v1203_v57 = vrot.slane %v5940_v49, 4  ;;  %v1191_v34 = vsel %vm1142_vm7, %v1190_v51, %v1189_v58  ;;  %v1193_v13 = vsel %vm1124_vm1, %v1192_v31, %v5908_v44  ;;  %v1205_v47 = vrot.slane %v5953_v12, 3 }
 0x107   :  { %v1211_v60 = vrot.slane %v5963_v23, 2  ;;  %v1202_v7 = vsel %vm1130_vm3, %v1201_v5, %v1200_v29  ;;  %v1212_v42 = vrot.slane %v5966_v63, 1  ;;  %v1218_v9 = vrot.slane %v1101_v55, 7 }
 0x108   :  { %v1219_v54 = vrot.slane %v1102_v2, 6  ;;  %v1204_v17 = vsel %vm1133_vm4, %v1203_v57, %v1202_v7  ;;  %vm1227_vm10 = vcmask 1045504   ;;  %v1223_v12 = vsel %vm1222_vm8, %v1163_v33, %v1171_v43  ;;  %v8650_v2 = vld [vmem:[#allocation46_spill] sm:$0xff] }
 0x109   :  { %v1206_v16 = vsel %vm1136_vm5, %v1205_v47, %v1204_v17  ;;  %v1213_v49 = vsel %vm1142_vm7, %v1212_v42, %v1211_v60  ;;  %v1225_v23 = vsel %vm1224_vm9, %v1179_v18, %v1191_v34  ;;  %vm1229_vm11 = vcmask 1040384  }
 0x10a   :  { %v1220_v44 = vsel %vm1127_vm2, %v1219_v54, %v1218_v9  ;;  %v1226_v15 = vsel %vm61_vm0, %v1193_v13, %v1206_v16  ;;  %vm1231_vm12 = vcmask 1042432   ;;  %v1233_v62 = vand.u32 2147483647, %v1143_v25  ;;  %v8652_v25 = vld [vmem:[#allocation44_spill] sm:$0xff] }
 0x10b   :  { %v1228_v63 = vsel %vm1227_vm10, %v1226_v15, %v1213_v49  ;;  %v1230_v45 = vsel %vm1229_vm11, %v5973_v41, %v1220_v44  ;;  %v1234_v10 = vand.u32 2147483647, %v1223_v12  ;;  %v1235_v3 = vand.u32 2147483647, %v1225_v23 }
 0x10c   :  { %v1232_v8 = vsel %vm1231_vm12, %v1230_v45, %v1114_v28  ;;  %v1236_v24 = vand.u32 2147483647, %v1228_v63  ;;  %v1352_v55 = vsel %vm1124_vm1, %v8649_v40, %v8648_v36  ;;  %v1238_v35 = vmin.f32 %v1233_v62, 1.0 }
 0x10d   :  { %v1237_v46 = vand.u32 2147483647, %v1232_v8  ;;  %v1239_v37 = vmin.f32 %v1234_v10, 1.0  ;;  %v1353_v1 = vsel %vm1127_vm2, %v8650_v2, %v1352_v55  ;;  %v1240_v4 = vmin.f32 %v1235_v3, 1.0 }
 0x10e   :  { %v1241_v39 = vmin.f32 %v1236_v24, 1.0  ;;  %v6044_v41 = vsel %vm1130_vm3, %v8651_v21, %v1353_v1  ;;  %v6049_v19 = vsel %vm1124_vm1, %v8653_v0, %v8652_v25  ;;  %v1243_v22 = vadd.f32 1.0, %v1238_v35 }
 0x10f   :  { %v1242_v61 = vmin.f32 %v1237_v46, 1.0  ;;  %v1244_v14 = vadd.f32 1.0, %v1239_v37  ;;  %v1253_v26 = vsub.f32 1.0, %v1238_v35  ;;  %v1245_v48 = vadd.f32 1.0, %v1240_v4 }
 0x110   :  { %v1246_v43 = vadd.f32 1.0, %v1241_v39  ;;  %v1254_v59 = vsub.f32 1.0, %v1239_v37  ;;  %v1255_v50 = vsub.f32 1.0, %v1240_v4  ;;  %v1248_v30 = vmul.f32 0.5, %v1243_v22 }
 0x111   :  { %v1247_v6 = vadd.f32 1.0, %v1242_v61  ;;  %v1249_v32 = vmul.f32 0.5, %v1244_v14  ;;  %v1256_v28 = vsub.f32 1.0, %v1241_v39  ;;  %v1250_v38 = vmul.f32 0.5, %v1245_v48 }
 0x112   :  { %v1251_v56 = vmul.f32 0.5, %v1246_v43  ;;  %v1257_v20 = vsub.f32 1.0, %v1242_v61  ;;  %v6051_v11 = vmul.f32 0.5, %v1253_v26  ;;  %v6053_v27 = vmul.f32 0.5, %v1254_v59 }
 0x113   :  { %v1252_v53 = vmul.f32 0.5, %v1247_v6  ;;  %v6055_v51 = vmul.f32 0.5, %v1255_v50  ;;  %v6057_v33 = vmul.f32 0.5, %v1256_v28  ;;  %v1268_v29 = vmul.f32 14.0, %v1248_v30 }
 0x114   :  { %v6059_v52 = vmul.f32 0.5, %v1257_v20  ;;  %v1263_v31 = vmul.f32 2.0, %v6051_v11  ;;  %v1269_v18 = vmul.f32 14.0, %v1249_v32  ;;  %v1264_v58 = vmul.f32 2.0, %v6053_v27 }
 0x115   :  { %v1265_v5 = vmul.f32 2.0, %v6055_v51  ;;  %v1266_v57 = vmul.f32 2.0, %v6057_v33  ;;  %v1270_v34 = vmul.f32 14.0, %v1250_v38  ;;  %v1271_v47 = vmul.f32 14.0, %v1251_v56 }
 0x116   :  { %v1267_v13 = vmul.f32 2.0, %v6059_v52  ;;  %v1272_v60 = vmul.f32 14.0, %v1252_v53  ;;  %v1273_v7 = vadd.f32 %v1268_v29, %v1263_v31  ;;  %v1274_v42 = vadd.f32 %v1269_v18, %v1264_v58 }
 0x117   :  { %v1275_v9 = vadd.f32 %v1270_v34, %v1265_v5  ;;  %v1278_v54 = vmul.f32 %v1248_v30, %v1248_v30  ;;  %v1279_v17 = vmul.f32 %v1249_v32, %v1249_v32  ;;  %v1276_v16 = vadd.f32 %v1271_v47, %v1266_v57 }
 0x118   :  { %v1277_v49 = vadd.f32 %v1272_v60, %v1267_v13  ;;  %v1280_v44 = vmul.f32 %v1250_v38, %v1250_v38  ;;  %v1281_v12 = vmul.f32 %v1251_v56, %v1251_v56  ;;  %v1282_v23 = vmul.f32 %v1252_v53, %v1252_v53  ;;  %v8654_v13 = vld [vmem:[#allocation52_spill] sm:$0xff]  ;;  %v8655_v60 = vld [vmem:[#allocation50_spill] sm:$0xff] }
 0x119   :  { %v1283_v15 = vmul.f32 %v1273_v7, %v6051_v11  ;;  %v1284_v63 = vmul.f32 %v1274_v42, %v6053_v27  ;;  %v1285_v45 = vmul.f32 %v1275_v9, %v6055_v51  ;;  %v1286_v62 = vmul.f32 %v1276_v16, %v6057_v33  ;;  %v8656_v42 = vld [vmem:[#allocation16_spill] sm:$0xff]  ;;  %v8657_v9 = vld [vmem:[#allocation18_spill] sm:$0xff] }
 0x11a   :  { %v1287_v10 = vmul.f32 %v1277_v49, %v6059_v52  ;;  %v1288_v8 = vmul.f32 42.0, %v1278_v54  ;;  %v1289_v3 = vmul.f32 42.0, %v1279_v17  ;;  %v1290_v24 = vmul.f32 42.0, %v1280_v44 }
 0x11b   :  { %v1291_v36 = vmul.f32 42.0, %v1281_v12  ;;  %v1292_v40 = vmul.f32 42.0, %v1282_v23  ;;  %v1298_v55 = vmul.f32 %v1278_v54, %v1248_v30  ;;  %v1299_v37 = vmul.f32 %v1279_v17, %v1249_v32 }
 0x11c   :  { %v1293_v46 = vadd.f32 %v1288_v8, %v1283_v15  ;;  %v1294_v35 = vadd.f32 %v1289_v3, %v1284_v63  ;;  %v1300_v2 = vmul.f32 %v1280_v44, %v1250_v38  ;;  %v1295_v1 = vadd.f32 %v1290_v24, %v1285_v45  ;;  %v8659_v15 = vld [vmem:[#allocation53_spill] sm:$0xff]  ;;  %v8660_v63 = vld [vmem:[#allocation19_spill] sm:$0xff] }
 0x11d   :  { %v1296_v4 = vadd.f32 %v1291_v36, %v1286_v62  ;;  %v1297_v39 = vadd.f32 %v1292_v40, %v1287_v10  ;;  %v1301_v21 = vmul.f32 %v1281_v12, %v1251_v56  ;;  %v1302_v25 = vmul.f32 %v1282_v23, %v1252_v53  ;;  %v8658_v23 = vld [vmem:[#allocation54_spill] sm:$0xff]  ;;  %v8662_v24 = vld [vmem:[#allocation55_spill] sm:$0xff]  ;;  %v8663_v36 = vld [vmem:[#allocation20_spill] sm:$0xff] }
 0x11e   :  { %v1303_v0 = vmul.f32 %v1293_v46, %v6051_v11  ;;  %v1304_v61 = vmul.f32 %v1294_v35, %v6053_v27  ;;  %v1308_v22 = vmul.f32 70.0, %v1298_v55  ;;  %v1305_v14 = vmul.f32 %v1295_v1, %v6055_v51  ;;  %v8664_v46 = vld [vmem:[#allocation59_spill] sm:$0xff]  ;;  %v8665_v35 = vld [vmem:[#allocation57_spill] sm:$0xff] }
 0x11f   :  { %v1306_v26 = vmul.f32 %v1296_v4, %v6057_v33  ;;  %v1307_v48 = vmul.f32 %v1297_v39, %v6059_v52  ;;  %v1309_v43 = vmul.f32 70.0, %v1299_v37  ;;  %v1310_v59 = vmul.f32 70.0, %v1300_v2  ;;  %v8666_v2 = vld [vmem:[#allocation21_spill] sm:$0xff]  ;;  %v6123_v4 = vld [vmem:[#allocation2 + $0x10] sm:$0xff]  ;;  %v8668_v39 = vld [vmem:[#allocation58_spill] sm:$0xff] }
 0x120   :  { %v1311_v50 = vmul.f32 70.0, %v1301_v21  ;;  %v1312_v6 = vmul.f32 70.0, %v1302_v25  ;;  %v1313_v30 = vadd.f32 %v1308_v22, %v1303_v0  ;;  %v1318_v28 = vmul.f32 %v6051_v11, %v6051_v11  ;;  %8667 = vst [vmem:[#allocation17_spill] sm:$0xff] %v6123_v4  ;;  %v8669_v25 = vld [vmem:[#allocation22_spill] sm:$0xff] }
 0x121   :  { %v1314_v32 = vadd.f32 %v1309_v43, %v1304_v61  ;;  %v1319_v38 = vmul.f32 %v6053_v27, %v6053_v27  ;;  %v1320_v56 = vmul.f32 %v6055_v51, %v6055_v51  ;;  %v1315_v20 = vadd.f32 %v1310_v59, %v1305_v14  ;;  %v8670_v61 = vld [vmem:[#allocation36_spill] sm:$0xff] }
 0x122   :  { %v1316_v53 = vadd.f32 %v1311_v50, %v1306_v26  ;;  %v1317_v31 = vadd.f32 %v1312_v6, %v1307_v48  ;;  %v1321_v29 = vmul.f32 %v6057_v33, %v6057_v33  ;;  %v1322_v18 = vmul.f32 %v6059_v52, %v6059_v52  ;;  %v8671_v14 = vld [vmem:[#allocation8_spill] sm:$0xff]  ;;  %v6134_v48 = vld [vmem:[#allocation2 + $0x30] sm:$0xff] }
 0x123   :  { %v1323_v58 = vmul.f32 %v1318_v28, %v6051_v11  ;;  %v1324_v5 = vmul.f32 %v1319_v38, %v6053_v27  ;;  %v1325_v57 = vmul.f32 %v1320_v56, %v6055_v51  ;;  %v1355_v47 = vsel %vm1133_vm4, %v8654_v13, %v6044_v41  ;;  %8672 = vst [vmem:[#allocation38_spill] sm:$0xff] %v6134_v48  ;;  %v8673_v43 = vld [vmem:[#allocation60_spill] sm:$0xff]  ;;  %v8676_v28 = vld [vmem:[#allocation10_spill] sm:$0xff]  ;;  %v6142_v56 = vld [vmem:[#allocation2 + $0x50] sm:$0xff] }
 0x124   :  { %v1326_v34 = vmul.f32 %v1321_v29, %v6057_v33  ;;  %v1373_v7 = vsel %vm1127_vm2, %v8655_v60, %v6049_v19  ;;  %v1393_v54 = vsel %vm1124_vm1, %v8657_v9, %v8656_v42  ;;  %v1327_v17 = vmul.f32 %v1322_v18, %v6059_v52  ;;  %v8674_v50 = vld [vmem:[#allocation24_spill] sm:$0xff]  ;;  %8677 = vst [vmem:[#allocation40_spill] sm:$0xff] %v6142_v56  ;;  %v8680_v18 = vld [vmem:[#allocation11_spill] sm:$0xff] }
 0x125   :  { %v1328_v16 = vmul.f32 %v1323_v58, %v6051_v11  ;;  %v1329_v49 = vmul.f32 %v1324_v5, %v6053_v27  ;;  %v1330_v44 = vmul.f32 %v1325_v57, %v6055_v51  ;;  %v1356_v41 = vsel %vm1136_vm5, %v8658_v23, %v1355_v47  ;;  %v8661_v27 = vld [vmem:[#allocation56_spill] sm:$0xff]  ;;  %v8681_v5 = vld [vmem:[#allocation37_spill] sm:$0xff] }
 0x126   :  { %v1331_v12 = vmul.f32 %v1326_v34, %v6057_v33  ;;  %v1374_v19 = vsel %vm1130_vm3, %v8659_v15, %v1373_v7  ;;  %v1394_v45 = vsel %vm1127_vm2, %v8660_v63, %v1393_v54  ;;  %v1332_v62 = vmul.f32 %v1327_v17, %v6059_v52  ;;  %v6153_v34 = vld [vmem:[#allocation2 + $0x70] sm:$0xff]  ;;  %v8683_v47 = vld [vmem:[#allocation12_spill] sm:$0xff]  ;;  %v6160_v7 = vld [vmem:[#allocation2 + $0x8] sm:$0xff] }
 0x127   :  { %v1333_v10 = vmul.f32 %v1328_v16, %v1313_v30  ;;  %v1334_v8 = vmul.f32 %v1329_v49, %v1314_v32  ;;  %v1335_v11 = vmul.f32 %v1330_v44, %v1315_v20  ;;  %v1357_v51 = vsel %vm1139_vm6, %v8661_v27, %v1356_v41  ;;  %v8675_v30 = vld [vmem:[#allocation9_spill] sm:$0xff]  ;;  %8682 = vst [vmem:[#allocation42_spill] sm:$0xff] %v6153_v34  ;;  %v6164_v54 = vld [vmem:[#allocation2 + $0x90] sm:$0xff]  ;;  %v6167_v16 = vld [vmem:[#allocation2 + $0x28] sm:$0xff] }
 0x128   :  { %v1336_v3 = vmul.f32 %v1331_v12, %v1316_v53  ;;  %v1375_v33 = vsel %vm1133_vm4, %v8662_v24, %v1374_v19  ;;  %v1395_v40 = vsel %vm1130_vm3, %v8663_v36, %v1394_v45  ;;  %v1337_v55 = vmul.f32 %v1332_v62, %v1317_v31  ;;  %v8678_v20 = vld [vmem:[#allocation25_spill] sm:$0xff]  ;;  %v8679_v31 = vld [vmem:[#allocation35_spill] sm:$0xff]  ;;  %8684 = vst [vmem:[#allocation45_spill] sm:$0xff] %v6164_v54  ;;  %v6171_v12 = vld [vmem:[#allocation2 + $0x48] sm:$0xff] }
 0x129   :  { %1338 = vst [vmem:[#allocation5] sm:$0xff] %v1333_v10  ;;  %1339 = vst [vmem:[#allocation5 + $0x8] sm:$0xff] %v1334_v8  ;;  %v1358_v52 = vsel %vm1142_vm7, %v8664_v46, %v1357_v51  ;;  %v1376_v37 = vsel %vm1136_vm5, %v8665_v35, %v1375_v33  ;;  %v1396_v1 = vsel %vm1133_vm4, %v8666_v2, %v1395_v40  ;;  %v1414_v22 = vrot.slane %v8670_v61, 7  ;;  %v6174_v41 = vld [vmem:[#allocation2 + $0xb0] sm:$0xff]  ;;  %v6179_v45 = vld [vmem:[#allocation2 + $0x68] sm:$0xff] }
 0x12a   :  { %1340 = vst [vmem:[#allocation5 + $0x10] sm:$0xff] %v1335_v11  ;;  %1341 = vst [vmem:[#allocation5 + $0x18] sm:$0xff] %v1336_v3  ;;  %v1377_v21 = vsel %vm1139_vm6, %v8668_v39, %v1376_v37  ;;  %v1397_v0 = vsel %vm1136_vm5, %v8669_v25, %v1396_v1  ;;  %v1416_v26 = vrot.slane %v8671_v14, 6  ;;  %v1418_v32 = vrot.slane %v8675_v30, 5  ;;  %v6182_v10 = vld [vmem:[#allocation2 + $0xd0] sm:$0xff]  ;;  %v6189_v51 = vld [vmem:[#allocation2 + $0x88] sm:$0xff] }
 0x12b   :  { %1361 = vst [vmem:[%s8337_s2] sm:$0xff] %v1358_v52  ;;  %1342 = vst [vmem:[#allocation5 + $0x20] sm:$0xf] %v1337_v55  ;;  %v1378_v59 = vsel %vm1142_vm7, %v8673_v43, %v1377_v21  ;;  %v1398_v6 = vsel %vm1139_vm6, %v8674_v50, %v1397_v0  ;;  %v1420_v38 = vrot.slane %v8676_v28, 4  ;;  %v1415_v29 = vsel %vm1124_vm1, %v1414_v22, %v8679_v31  ;;  %v6184_v8 = vld [vmem:[#allocation2 + $0xf0] sm:$0xff]  ;;  %v6197_v46 = vld [vmem:[#allocation2 + $0xa8] sm:$0xff] }
 0x12c   :  { %4924 = vst [vmem:[%s8337_s2 + $0x30] sm:$0xff] %v1378_v59  ;;  %v1399_v53 = vsel %vm1142_vm7, %v8678_v20, %v1398_v6  ;;  %v1422_v58 = vrot.slane %v8680_v18, 3  ;;  %v1424_v57 = vrot.slane %v8681_v5, 2  ;;  %v1417_v13 = vsel %vm1127_vm2, %v1416_v26, %v1415_v29  ;;  %8685 = vst [vmem:[#allocation39_spill] sm:$0xff] %v6174_v41  ;;  %v6192_v33 = vld [vmem:[#allocation2 + $0x110] sm:$0xff]  ;;  %v6203_v1 = vld [vmem:[#allocation2 + $0xc8] sm:$0xff] }
 0x12d   :  { %4926 = vst [vmem:[%s8337_s2 + $0x60] sm:$0xff] %v1399_v53  ;;  %v1426_v60 = vrot.slane %v8683_v47, 1  ;;  %v1451_v42 = vrot.slane %v6160_v7, 2  ;;  %v1452_v9 = vrot.slane %v6123_v4, 2  ;;  %v1419_v17 = vsel %vm1130_vm3, %v1418_v32, %v1417_v13  ;;  %8686 = vst [vmem:[#allocation48_spill] sm:$0xff] %v6182_v10  ;;  %v6211_v0 = vld [vmem:[#allocation2 + $0xe8] sm:$0xff] }
 0x12e   :  { %v1454_v49 = vrot.slane %v6167_v16, 2  ;;  %v1455_v44 = vrot.slane %v6134_v48, 2  ;;  %v1457_v23 = vrot.slane %v6171_v12, 2  ;;  %v1421_v15 = vsel %vm1133_vm4, %v1420_v38, %v1419_v17  ;;  %8687 = vst [vmem:[#allocation51_spill] sm:$0xff] %v6184_v8  ;;  %8688 = vst [vmem:[#allocation23_spill] sm:$0xff] %v6192_v33  ;;  %v6216_v26 = vld [vmem:[#allocation2 + $0x108] sm:$0xff] }
 0x12f   :  { %v1453_v19 = vsel %vm1227_vm10, %v1451_v42, %v1452_v9  ;;  %v1458_v63 = vrot.slane %v6142_v56, 2  ;;  %v1460_v62 = vrot.slane %v6179_v45, 2  ;;  %v1423_v11 = vsel %vm1136_vm5, %v1422_v58, %v1421_v15 }
 0x130   :  { %v1456_v3 = vsel %vm1227_vm10, %v1454_v49, %v1455_v44  ;;  %v1461_v27 = vrot.slane %v6153_v34, 2  ;;  %v1463_v24 = vrot.slane %v6189_v51, 2  ;;  %v1425_v36 = vsel %vm1139_vm6, %v1424_v57, %v1423_v11 }
 0x131   :  { %v1459_v40 = vsel %vm1227_vm10, %v1457_v23, %v1458_v63  ;;  %v1464_v55 = vrot.slane %v6164_v54, 2  ;;  %v1466_v52 = vrot.slane %v6197_v46, 2  ;;  %v1427_v35 = vsel %vm1142_vm7, %v1426_v60, %v1425_v36 }
 0x132   :  { %v1462_v37 = vsel %vm1227_vm10, %v1460_v62, %v1461_v27  ;;  %v1467_v2 = vrot.slane %v6174_v41, 2  ;;  %v1469_v39 = vrot.slane %v6203_v1, 2  ;;  %4928 = vst [vmem:[%s8337_s2 + $0x90] sm:$0xff] %v1427_v35  ;;  %v1470_v25 = vrot.slane %v6182_v10, 2 }
 0x133   :  { %v1465_v21 = vsel %vm1227_vm10, %v1463_v24, %v1464_v55  ;;  %v1472_v61 = vrot.slane %v6211_v0, 2  ;;  %v1473_v22 = vrot.slane %v6184_v8, 2  ;;  %v1475_v43 = vrot.slane %v6216_v26, 2 }
 0x134   :  { %v1468_v14 = vsel %vm1227_vm10, %v1466_v52, %v1467_v2  ;;  %v1476_v59 = vrot.slane %v6192_v33, 2  ;;  %v1496_v50 = vsel %vm61_vm0, %v1452_v9, 0.0  ;;  %v1471_v6 = vsel %vm1227_vm10, %v1469_v39, %v1470_v25 }
 0x135   :  { %v1474_v30 = vsel %vm1227_vm10, %v1472_v61, %v1473_v22  ;;  %v1497_v32 = vadd.f32 %v1496_v50, %v1453_v19  ;;  %v1504_v28 = vsel %vm61_vm0, %v1455_v44, 0.0  ;;  %v1512_v53 = vsel %vm61_vm0, %v1458_v63, 0.0 }
 0x136   :  { %v1477_v38 = vsel %vm1227_vm10, %v1475_v43, %v1476_v59  ;;  %v1505_v20 = vadd.f32 %v1504_v28, %v1456_v3  ;;  %v1520_v31 = vsel %vm61_vm0, %v1461_v27, 0.0  ;;  %v1513_v18 = vadd.f32 %v1512_v53, %v1459_v40 }
 0x137   :  { %v1498_v29 = vrot.slane %v1497_v32, 4  ;;  %v1521_v58 = vadd.f32 %v1520_v31, %v1462_v37  ;;  %v1528_v5 = vsel %vm61_vm0, %v1464_v55, 0.0  ;;  %v1536_v47 = vsel %vm61_vm0, %v1467_v2, 0.0 }
 0x138   :  { %v1506_v57 = vrot.slane %v1505_v20, 4  ;;  %v1529_v13 = vadd.f32 %v1528_v5, %v1465_v21  ;;  %v1544_v60 = vsel %vm61_vm0, %v1470_v25, 0.0  ;;  %v1514_v9 = vrot.slane %v1513_v18, 4 }
 0x139   :  { %v1499_v42 = vadd.f32 %v1498_v29, %v1497_v32  ;;  %v1522_v17 = vrot.slane %v1521_v58, 4  ;;  %v1537_v49 = vadd.f32 %v1536_v47, %v1468_v14  ;;  %v1545_v15 = vadd.f32 %v1544_v60, %v1471_v6 }
 0x13a   :  { %v1507_v44 = vadd.f32 %v1506_v57, %v1505_v20  ;;  %v1530_v23 = vrot.slane %v1529_v13, 4  ;;  %v1552_v19 = vsel %vm61_vm0, %v1473_v22, 0.0  ;;  %v1515_v62 = vadd.f32 %v1514_v9, %v1513_v18 }
 0x13b   :  { %v1500_v63 = vrot.slane %v1499_v42, 2  ;;  %v1523_v11 = vadd.f32 %v1522_v17, %v1521_v58  ;;  %v1538_v3 = vrot.slane %v1537_v49, 4  ;;  %v1546_v36 = vrot.slane %v1545_v15, 4 }
 0x13c   :  { %v1508_v27 = vrot.slane %v1507_v44, 2  ;;  %v1531_v24 = vadd.f32 %v1530_v23, %v1529_v13  ;;  %v1553_v40 = vadd.f32 %v1552_v19, %v1474_v30  ;;  %v1516_v52 = vrot.slane %v1515_v62, 2 }
 0x13d   :  { %v1501_v55 = vadd.f32 %v1500_v63, %v1499_v42  ;;  %v1524_v35 = vrot.slane %v1523_v11, 2  ;;  %v1539_v37 = vadd.f32 %v1538_v3, %v1537_v49  ;;  %v1547_v21 = vadd.f32 %v1546_v36, %v1545_v15 }
 0x13e   :  { %v1509_v2 = vadd.f32 %v1508_v27, %v1507_v44  ;;  %v1532_v39 = vrot.slane %v1531_v24, 2  ;;  %v1554_v25 = vrot.slane %v1553_v40, 4  ;;  %v1517_v14 = vadd.f32 %v1516_v52, %v1515_v62 }
 0x13f   :  { %v1502_v61 = vrot.slane %v1501_v55, 1  ;;  %v1525_v43 = vadd.f32 %v1524_v35, %v1523_v11  ;;  %v1540_v22 = vrot.slane %v1539_v37, 2  ;;  %v1548_v32 = vrot.slane %v1547_v21, 2 }
 0x140   :  { %v1510_v50 = vrot.slane %v1509_v2, 1  ;;  %v1533_v6 = vadd.f32 %v1532_v39, %v1531_v24  ;;  %v1555_v28 = vadd.f32 %v1554_v25, %v1553_v40  ;;  %v1518_v53 = vrot.slane %v1517_v14, 1 }
 0x141   :  { %v6231_v20 = vadd.f32 %v1502_v61, %v1501_v55  ;;  %v1526_v30 = vrot.slane %v1525_v43, 1  ;;  %v1541_v31 = vadd.f32 %v1540_v22, %v1539_v37  ;;  %v1549_v58 = vadd.f32 %v1548_v32, %v1547_v21 }
 0x142   :  { %v6233_v29 = vadd.f32 %v1510_v50, %v1509_v2  ;;  %v1534_v18 = vrot.slane %v1533_v6, 1  ;;  %v1556_v5 = vrot.slane %v1555_v28, 2  ;;  %v6235_v57 = vadd.f32 %v1518_v53, %v1517_v14 }
 0x143   :  { %8689 = vst [vmem:[#allocation26_spill] sm:$0xff] %v6231_v20  ;;  %v6237_v13 = vadd.f32 %v1526_v30, %v1525_v43  ;;  %v1542_v47 = vrot.slane %v1541_v31, 1  ;;  %v1560_v60 = vsel %vm61_vm0, %v1476_v59, 0.0  ;;  %v1550_v9 = vrot.slane %v1549_v58, 1 }
 0x144   :  { %8690 = vst [vmem:[#allocation27_spill] sm:$0xff] %v6233_v29  ;;  %8691 = vst [vmem:[#allocation28_spill] sm:$0xff] %v6235_v57  ;;  %v6240_v42 = vadd.f32 %v1534_v18, %v1533_v6  ;;  %v1557_v17 = vadd.f32 %v1556_v5, %v1555_v28  ;;  %v1561_v49 = vadd.f32 %v1560_v60, %v1477_v38  ;;  %v6245_v23 = vmul.f32 0.1, %v6231_v20 }
 0x145   :  { %8692 = vst [vmem:[#allocation29_spill] sm:$0xff] %v6237_v13  ;;  %v6242_v44 = vadd.f32 %v1542_v47, %v1541_v31  ;;  %v6248_v15 = vmul.f32 0.1, %v6233_v29  ;;  %v6251_v19 = vmul.f32 0.1, %v6235_v57  ;;  %v6253_v63 = vadd.f32 %v1550_v9, %v1549_v58 }
 0x146   :  { %8693 = vst [vmem:[#allocation61_spill] sm:$0xff] %v6240_v42  ;;  %v1558_v62 = vrot.slane %v1557_v17, 1  ;;  %v1562_v59 = vrot.slane %v1561_v49, 4  ;;  %v6256_v11 = vmul.f32 0.1, %v6237_v13  ;;  %v6266_v27 = vsub.f32 %v6160_v7, %v6245_v23 }
 0x147   :  { %8694 = vst [vmem:[#allocation30_spill] sm:$0xff] %v6242_v44  ;;  %8695 = vst [vmem:[#allocation31_spill] sm:$0xff] %v6253_v63  ;;  %v6259_v38 = vmul.f32 0.1, %v6240_v42  ;;  %v6262_v3 = vmul.f32 0.1, %v6242_v44  ;;  %v6270_v24 = vsub.f32 %v6123_v4, %v6245_v23  ;;  %v6279_v52 = vsub.f32 %v6167_v16, %v6248_v15 }
 0x148   :  { %v6272_v36 = vadd.f32 %v1558_v62, %v1557_v17  ;;  %v1563_v40 = vadd.f32 %v1562_v59, %v1561_v49  ;;  %v6275_v55 = vmul.f32 0.1, %v6253_v63  ;;  %v6283_v35 = vsub.f32 %v6134_v48, %v6248_v15 }
 0x149   :  { %v6287_v37 = vsub.f32 %v6171_v12, %v6251_v19  ;;  %v6291_v2 = vsub.f32 %v6142_v56, %v6251_v19  ;;  %v6295_v39 = vsub.f32 %v6179_v45, %v6256_v11  ;;  %v6302_v61 = vsub.f32 %v6153_v34, %v6256_v11 }
 0x14a   :  { %8696 = vst [vmem:[#allocation32_spill] sm:$0xff] %v6272_v36  ;;  %8697 = vst [vmem:[#allocation33_spill] sm:$0xff] %v6283_v35  ;;  %v1564_v21 = vrot.slane %v1563_v40, 2  ;;  %v6298_v25 = vmul.f32 0.1, %v6272_v36  ;;  %v6306_v14 = vsub.f32 %v6189_v51, %v6259_v38  ;;  %v6310_v43 = vsub.f32 %v6164_v54, %v6259_v38 }
 0x14b   :  { %8698 = vst [vmem:[#allocation34_spill] sm:$0xff] %v6291_v2  ;;  %8699 = vst [vmem:[#allocation13_spill] sm:$0xff] %v6295_v39  ;;  %v6314_v22 = vsub.f32 %v6197_v46, %v6262_v3  ;;  %v6318_v50 = vsub.f32 %v6174_v41, %v6262_v3  ;;  %v6322_v6 = vsub.f32 %v6203_v1, %v6275_v55  ;;  %vm3181_vm13 = vcmask 1043456  }
 0x14c   :  { %8700 = vst [vmem:[#allocation14_spill] sm:$0xff] %v6302_v61  ;;  %8701 = vst [vmem:[#allocation15_spill] sm:$0xff] %v6306_v14  ;;  %v1565_v32 = vadd.f32 %v1564_v21, %v1563_v40  ;;  %v6326_v28 = vsub.f32 %v6182_v10, %v6275_v55  ;;  %v6330_v53 = vsub.f32 %v6211_v0, %v6298_v25 }
 0x14d   :  { %8702 = vst [vmem:[#allocation41_spill] sm:$0xff] %v6310_v43  ;;  %8703 = vst [vmem:[#allocation43_spill] sm:$0xff] %v6314_v22  ;;  %v6334_v30 = vsub.f32 %v6184_v8, %v6298_v25  ;;  %v1595_v31 = vmul.f32 %v6266_v27, %v6266_v27  ;;  %v1596_v18 = vmul.f32 %v6270_v24, %v6270_v24 }
 0x14e   :  { %8704 = vst [vmem:[#allocation46_spill] sm:$0xff] %v6318_v50  ;;  %8705 = vst [vmem:[#allocation49_spill] sm:$0xff] %v6322_v6  ;;  %v1597_v58 = vmul.f32 %v6279_v52, %v6279_v52  ;;  %v1598_v5 = vmul.f32 %v6283_v35, %v6283_v35  ;;  %v1566_v47 = vrot.slane %v1565_v32, 1  ;;  %v1599_v60 = vmul.f32 %v6287_v37, %v6287_v37 }
 0x14f   :  { %8706 = vst [vmem:[#allocation44_spill] sm:$0xff] %v6326_v28  ;;  %8707 = vst [vmem:[#allocation47_spill] sm:$0xff] %v6330_v53  ;;  %v1600_v9 = vmul.f32 %v6291_v2, %v6291_v2  ;;  %v1601_v17 = vmul.f32 %v6295_v39, %v6295_v39  ;;  %v1602_v49 = vmul.f32 %v6302_v61, %v6302_v61  ;;  %v1631_v57 = vrot.slane %v1595_v31, 2 }
 0x150   :  { %8708 = vst [vmem:[#allocation52_spill] sm:$0xff] %v6334_v30  ;;  %v1603_v62 = vmul.f32 %v6306_v14, %v6306_v14  ;;  %v1604_v59 = vmul.f32 %v6310_v43, %v6310_v43  ;;  %v1605_v40 = vmul.f32 %v6314_v22, %v6314_v22  ;;  %v1567_v21 = vadd.f32 %v1566_v47, %v1565_v32 }
 0x151   :  { %v1606_v36 = vmul.f32 %v6318_v50, %v6318_v50  ;;  %v1607_v63 = vmul.f32 %v6322_v6, %v6322_v6  ;;  %v1608_v44 = vmul.f32 %v6326_v28, %v6326_v28  ;;  %v1609_v42 = vmul.f32 %v6330_v53, %v6330_v53 }
 0x152   :  { %v1610_v13 = vmul.f32 %v6334_v30, %v6334_v30  ;;  %v1632_v29 = vrot.slane %v1596_v18, 2  ;;  %v6368_v20 = vmul.f32 0.1, %v1567_v21  ;;  %v1634_v32 = vrot.slane %v1597_v58, 2  ;;  %4935 = vst [vmem:[%s8337_s2 + $0x78] sm:$0x1] %v1567_v21 }
 0x153   :  { %v1635_v47 = vrot.slane %v1598_v5, 2  ;;  %v1637_v8 = vrot.slane %v1599_v60, 2  ;;  %v1638_v28 = vrot.slane %v1600_v9, 2  ;;  %v1640_v6 = vrot.slane %v1601_v17, 2 }
 0x154   :  { %v1633_v10 = vsel %vm1227_vm10, %v1631_v57, %v1632_v29  ;;  %v1641_v41 = vrot.slane %v1602_v49, 2  ;;  %v6376_v53 = vsub.f32 %v6216_v26, %v6368_v20  ;;  %v6380_v31 = vsub.f32 %v6192_v33, %v6368_v20 }
 0x155   :  { %v1636_v18 = vsel %vm1227_vm10, %v1634_v32, %v1635_v47  ;;  %v1643_v58 = vrot.slane %v1603_v62, 2  ;;  %v1639_v5 = vsel %vm1227_vm10, %v1637_v8, %v1638_v28  ;;  %v1644_v21 = vrot.slane %v1604_v59, 2 }
 0x156   :  { %8709 = vst [vmem:[#allocation50_spill] sm:$0xff] %v6376_v53  ;;  %8710 = vst [vmem:[#allocation16_spill] sm:$0xff] %v6380_v31  ;;  %v1642_v60 = vsel %vm1227_vm10, %v1640_v6, %v1641_v41  ;;  %v1646_v57 = vrot.slane %v1605_v40, 2  ;;  %v1611_v9 = vmul.f32 %v6376_v53, %v6376_v53  ;;  %v6389_v17 = vmul.f32 %v6380_v31, %v6380_v31 }
 0x157   :  { %v1647_v49 = vrot.slane %v1606_v36, 2  ;;  %v1649_v30 = vrot.slane %v1607_v63, 2  ;;  %v1645_v33 = vsel %vm1227_vm10, %v1643_v58, %v1644_v21  ;;  %v1650_v54 = vrot.slane %v1608_v44, 2 }
 0x158   :  { %v1652_v32 = vrot.slane %v1609_v42, 2  ;;  %v1653_v62 = vrot.slane %v1610_v13, 2  ;;  %v1655_v34 = vrot.slane %v1611_v9, 2  ;;  %v1656_v6 = vrot.slane %v6389_v17, 2 }
 0x159   :  { %v1648_v8 = vsel %vm1227_vm10, %v1646_v57, %v1647_v49  ;;  %v1676_v59 = vsel %vm61_vm0, %v1632_v29, 0.0  ;;  %v1651_v40 = vsel %vm1227_vm10, %v1649_v30, %v1650_v54  ;;  %v1684_v36 = vsel %vm61_vm0, %v1635_v47, 0.0 }
 0x15a   :  { %v1654_v53 = vsel %vm1227_vm10, %v1652_v32, %v1653_v62  ;;  %v1677_v31 = vadd.f32 %v1676_v59, %v1633_v10  ;;  %v1657_v63 = vsel %vm1227_vm10, %v1655_v34, %v1656_v6  ;;  %v1685_v58 = vadd.f32 %v1684_v36, %v1636_v18 }
 0x15b   :  { %v1692_v42 = vsel %vm61_vm0, %v1638_v28, 0.0  ;;  %v1700_v13 = vsel %vm61_vm0, %v1641_v41, 0.0  ;;  %v1708_v17 = vsel %vm61_vm0, %v1644_v21, 0.0  ;;  %v1716_v30 = vsel %vm61_vm0, %v1647_v49, 0.0 }
 0x15c   :  { %v1678_v44 = vrot.slane %v1677_v31, 4  ;;  %v1693_v57 = vadd.f32 %v1692_v42, %v1639_v5  ;;  %v1701_v9 = vadd.f32 %v1700_v13, %v1642_v60  ;;  %v1686_v29 = vrot.slane %v1685_v58, 4 }
 0x15d   :  { %v1709_v50 = vadd.f32 %v1708_v17, %v1645_v33  ;;  %v1724_v10 = vsel %vm61_vm0, %v1650_v54, 0.0  ;;  %v1717_v34 = vadd.f32 %v1716_v30, %v1648_v8  ;;  %v1732_v41 = vsel %vm61_vm0, %v1653_v62, 0.0 }
 0x15e   :  { %v1679_v32 = vadd.f32 %v1678_v44, %v1677_v31  ;;  %v1694_v47 = vrot.slane %v1693_v57, 4  ;;  %v1702_v59 = vrot.slane %v1701_v9, 4  ;;  %v1687_v18 = vadd.f32 %v1686_v29, %v1685_v58 }
 0x15f   :  { %v1710_v36 = vrot.slane %v1709_v50, 4  ;;  %v1725_v28 = vadd.f32 %v1724_v10, %v1651_v40  ;;  %v1718_v42 = vrot.slane %v1717_v34, 4  ;;  %v1733_v17 = vadd.f32 %v1732_v41, %v1654_v53 }
 0x160   :  { %v1680_v56 = vrot.slane %v1679_v32, 2  ;;  %v1695_v5 = vadd.f32 %v1694_v47, %v1693_v57  ;;  %v1703_v60 = vadd.f32 %v1702_v59, %v1701_v9  ;;  %v1688_v21 = vrot.slane %v1687_v18, 2 }
 0x161   :  { %v1711_v13 = vadd.f32 %v1710_v36, %v1709_v50  ;;  %v1726_v33 = vrot.slane %v1725_v28, 4  ;;  %v1719_v31 = vadd.f32 %v1718_v42, %v1717_v34  ;;  %v1734_v58 = vrot.slane %v1733_v17, 4 }
 0x162   :  { %v1681_v49 = vadd.f32 %v1680_v56, %v1679_v32  ;;  %v1696_v48 = vrot.slane %v1695_v5, 2  ;;  %v1704_v54 = vrot.slane %v1703_v60, 2  ;;  %v1689_v44 = vadd.f32 %v1688_v21, %v1687_v18 }
 0x163   :  { %v1712_v4 = vrot.slane %v1711_v13, 2  ;;  %v1727_v8 = vadd.f32 %v1726_v33, %v1725_v28  ;;  %v1720_v62 = vrot.slane %v1719_v31, 2  ;;  %v1735_v47 = vadd.f32 %v1734_v58, %v1733_v17 }
 0x164   :  { %v1682_v29 = vrot.slane %v1681_v49, 1  ;;  %v1697_v40 = vadd.f32 %v1696_v48, %v1695_v5  ;;  %v1705_v30 = vadd.f32 %v1704_v54, %v1703_v60  ;;  %v1690_v10 = vrot.slane %v1689_v44, 1 }
 0x165   :  { %v1713_v57 = vadd.f32 %v1712_v4, %v1711_v13  ;;  %v1728_v9 = vrot.slane %v1727_v8, 2  ;;  %v1721_v56 = vadd.f32 %v1720_v62, %v1719_v31  ;;  %v1736_v36 = vrot.slane %v1735_v47, 2 }
 0x166   :  { %v6405_v59 = vadd.f32 %v1682_v29, %v1681_v49  ;;  %v1698_v50 = vrot.slane %v1697_v40, 1  ;;  %v1706_v53 = vrot.slane %v1705_v30, 1  ;;  %v6407_v32 = vadd.f32 %v1690_v10, %v1689_v44 }
 0x167   :  { %v1714_v34 = vrot.slane %v1713_v57, 1  ;;  %v1729_v18 = vadd.f32 %v1728_v9, %v1727_v8  ;;  %v1722_v48 = vrot.slane %v1721_v56, 1  ;;  %v1740_v5 = vsel %vm61_vm0, %v1656_v6, 0.0 }
 0x168   :  { %v6409_v28 = vadd.f32 %v1698_v50, %v1697_v40  ;;  %v6411_v41 = vadd.f32 %v1706_v53, %v1705_v30  ;;  %v1737_v42 = vadd.f32 %v1736_v36, %v1735_v47  ;;  %v1741_v21 = vadd.f32 %v1740_v5, %v1657_v63 }
 0x169   :  { %v6414_v4 = vadd.f32 %v1714_v34, %v1713_v57  ;;  %v1730_v60 = vrot.slane %v1729_v18, 1  ;;  %v6416_v13 = vadd.f32 %v1722_v48, %v1721_v56  ;;  %4968 = vrsqrt.f32 %v6405_v59 }
 0x16a   :  { %v1793_v33 = vmul.f32 0.18181819, %v6160_v7  ;;  %v1794_v17 = vmul.f32 0.18181819, %v6167_v16  ;;  %v1738_v54 = vrot.slane %v1737_v42, 1  ;;  %v1742_v31 = vrot.slane %v1741_v21, 4 }
 0x16b   :  { %v6421_v49 = vadd.f32 %v1730_v60, %v1729_v18  ;;  %4970 = vrsqrt.f32 %v6407_v32  ;;  %v1795_v6 = vmul.f32 0.18181819, %v6171_v12  ;;  %v6427_v63 = vmul.f32 0.18181819, %v6179_v45 }
 0x16c   :  { %4972 = vrsqrt.f32 %v6409_v28  ;;  %v6430_v44 = vmul.f32 0.18181819, %v6189_v51  ;;  %v6432_v8 = vadd.f32 %v1738_v54, %v1737_v42  ;;  %v1743_v58 = vadd.f32 %v1742_v31, %v1741_v21 }
 0x16d   :  { %4974 = vrsqrt.f32 %v6411_v41  ;;  %v6436_v29 = vmul.f32 0.18181819, %v6197_v46  ;;  %v6440_v40 = vmul.f32 0.18181819, %v6203_v1  ;;  %v6443_v30 = vmul.f32 0.18181819, %v6211_v0 }
 0x16e   :  { %4976 = vrsqrt.f32 %v6414_v4  ;;  %v6446_v62 = vmul.f32 0.18181819, %v6216_v26  ;;  %v1744_v10 = vrot.slane %v1743_v58, 2  ;;  %v1802_v57 = vmul.f32 0.16363636, %v6160_v7 }
 0x16f   :  { %4978 = vrsqrt.f32 %v6416_v13  ;;  %v1803_v9 = vmul.f32 0.16363636, %v6167_v16  ;;  %v1804_v47 = vmul.f32 0.16363636, %v6171_v12  ;;  %v1805_v50 = vmul.f32 0.16363636, %v6179_v45 }
 0x170   :  { %4980 = vrsqrt.f32 %v6421_v49  ;;  %v6455_v53 = vmul.f32 0.16363636, %v6189_v51  ;;  %v1745_v56 = vadd.f32 %v1744_v10, %v1743_v58  ;;  %v1807_v34 = vmul.f32 0.16363636, %v6197_v46 }
 0x171   :  { %4982 = vrsqrt.f32 %v6432_v8  ;;  %v1808_v18 = vmul.f32 0.16363636, %v6203_v1  ;;  %v1809_v36 = vmul.f32 0.16363636, %v6211_v0  ;;  %v1810_v48 = vmul.f32 0.16363636, %v6216_v26 }
 0x172   :  { %v1820_v5 = vrot.slane %v1802_v57, 1  ;;  %v1821_v60 = vrot.slane %v1803_v9, 1  ;;  %v1746_v42 = vrot.slane %v1745_v56, 1  ;;  %v1822_v21 = vrot.slane %v1804_v47, 1 }
 0x173   :  { %v1823_v54 = vrot.slane %v1805_v50, 1  ;;  %v1824_v31 = vrot.slane %v6455_v53, 1  ;;  %v6463_v22 = vpop.eup %4968  ;;  %v1825_v58 = vrot.slane %v1807_v34, 1  ;;  %v1826_v10 = vrot.slane %v1808_v18, 1 }
 0x174   :  { %8711 = vst [vmem:[#allocation18_spill] sm:$0xff] %v6463_v22  ;;  %v1827_v43 = vrot.slane %v1809_v36, 1  ;;  %v1828_v14 = vrot.slane %v1810_v48, 1  ;;  %v1747_v39 = vadd.f32 %v1746_v42, %v1745_v56  ;;  %v1757_v2 = vmul.f32 %v6463_v22, %v6405_v59 }
 0x175   :  { %v6465_v61 = vpop.eup %4970  ;;  %v1775_v57 = vmul.f32 %v6463_v22, %v6245_v23  ;;  %v6471_v9 = vadd.f32 %v1820_v5, %v1793_v33  ;;  %v6479_v34 = vadd.f32 %v1821_v60, %v1794_v17  ;;  %v6481_v18 = vadd.f32 %v1822_v21, %v1795_v6 }
 0x176   :  { %v6473_v47 = vpop.eup %4972  ;;  %v1758_v50 = vmul.f32 %v6465_v61, %v6407_v32  ;;  %v1776_v53 = vmul.f32 %v6465_v61, %v6248_v15  ;;  %4984 = vrsqrt.f32 %v1747_v39  ;;  %v6487_v59 = vmul.f32 0.31622776, %v1757_v2 }
 0x177   :  { %v6483_v56 = vpop.eup %4974  ;;  %v1759_v23 = vmul.f32 %v6473_v47, %v6409_v28  ;;  %v1777_v33 = vmul.f32 %v6473_v47, %v6251_v19  ;;  %v6499_v6 = vmul.f32 3.1622777, %v1775_v57 }
 0x178   :  { %8712 = vst [vmem:[#allocation54_spill] sm:$0xff] %v6483_v56  ;;  %8713 = vst [vmem:[#allocation53_spill] sm:$0xff] %v6487_v59  ;;  %v6491_v36 = vpop.eup %4976  ;;  %v1760_v15 = vmul.f32 %v6483_v56, %v6411_v41  ;;  %v6495_v32 = vmul.f32 0.31622776, %v1758_v50  ;;  %v1778_v17 = vmul.f32 %v6483_v56, %v6256_v11  ;;  %v6509_v5 = vmul.f32 3.1622777, %v1776_v53 }
 0x179   :  { %8714 = vst [vmem:[#allocation19_spill] sm:$0xff] %v6491_v36  ;;  %8716 = vst [vmem:[#allocation55_spill] sm:$0xff] %v6499_v6  ;;  %v6501_v48 = vpop.eup %4978  ;;  %v1761_v2 = vmul.f32 %v6491_v36, %v6414_v4  ;;  %v6505_v28 = vmul.f32 0.31622776, %v1759_v23  ;;  %v1779_v19 = vmul.f32 %v6491_v36, %v6259_v38  ;;  %v6519_v21 = vmul.f32 3.1622777, %v1777_v33 }
 0x17a   :  { %8715 = vst [vmem:[#allocation56_spill] sm:$0xff] %v6495_v32  ;;  %8717 = vst [vmem:[#allocation20_spill] sm:$0xff] %v6501_v48  ;;  %v6511_v41 = vpop.eup %4980  ;;  %v1762_v60 = vmul.f32 %v6501_v48, %v6416_v13  ;;  %v6515_v11 = vmul.f32 0.31622776, %v1760_v15  ;;  %v1780_v42 = vmul.f32 %v6501_v48, %v6262_v3  ;;  %v6529_v53 = vmul.f32 3.1622777, %v1778_v17 }
 0x17b   :  { %8718 = vst [vmem:[#allocation59_spill] sm:$0xff] %v6505_v28  ;;  %8719 = vst [vmem:[#allocation57_spill] sm:$0xff] %v6509_v5  ;;  %v6521_v4 = vpop.eup %4982  ;;  %v1763_v57 = vmul.f32 %v6511_v41, %v6421_v49  ;;  %v6525_v38 = vmul.f32 0.31622776, %v1761_v2  ;;  %v1781_v50 = vmul.f32 %v6511_v41, %v6275_v55  ;;  %v6537_v33 = vmul.f32 3.1622777, %v1779_v19 }
 0x17c   :  { %8720 = vst [vmem:[#allocation21_spill] sm:$0xff] %v6511_v41  ;;  %8721 = vst [vmem:[#allocation58_spill] sm:$0xff] %v6515_v11  ;;  %v1764_v13 = vmul.f32 %v6521_v4, %v6432_v8  ;;  %v6533_v23 = vmul.f32 0.31622776, %v1762_v60  ;;  %v1782_v3 = vmul.f32 %v6521_v4, %v6298_v25  ;;  %v6541_v49 = vmul.f32 3.1622777, %v1780_v42 }
 0x17d   :  { %8722 = vst [vmem:[#allocation22_spill] sm:$0xff] %v6519_v21  ;;  %8723 = vst [vmem:[#allocation36_spill] sm:$0xff] %v6521_v4  ;;  %v6539_v15 = vmul.f32 0.31622776, %v1763_v57  ;;  %v6543_v2 = vmul.f32 3.1622777, %v1781_v50  ;;  %v1841_v55 = vadd.f32 %v1823_v54, %v6427_v63  ;;  %v1842_v8 = vadd.f32 %v1824_v31, %v6430_v44 }
 0x17e   :  { %8724 = vst [vmem:[#allocation8_spill] sm:$0xff] %v6525_v38  ;;  %8725 = vst [vmem:[#allocation60_spill] sm:$0xff] %v6529_v53  ;;  %v6546_v17 = vmul.f32 0.31622776, %v1764_v13  ;;  %v6548_v53 = vmul.f32 3.1622777, %v1782_v3  ;;  %v1843_v60 = vadd.f32 %v1825_v58, %v6436_v29  ;;  %v1844_v25 = vadd.f32 %v1826_v10, %v6440_v40 }
 0x17f   :  { %8726 = vst [vmem:[#allocation24_spill] sm:$0xff] %v6533_v23  ;;  %8727 = vst [vmem:[#allocation9_spill] sm:$0xff] %v6537_v33  ;;  %v1845_v19 = vadd.f32 %v1827_v43, %v6443_v30  ;;  %v1846_v57 = vadd.f32 %v1828_v14, %v6446_v62  ;;  %v1847_v42 = vmul.f32 0.14545454, %v6160_v7  ;;  %v1848_v50 = vmul.f32 0.14545454, %v6167_v16 }
 0x180   :  { %8728 = vst [vmem:[#allocation10_spill] sm:$0xff] %v6539_v15  ;;  %8729 = vst [vmem:[#allocation25_spill] sm:$0xff] %v6541_v49  ;;  %v1849_v63 = vmul.f32 0.14545454, %v6171_v12  ;;  %v1850_v54 = vmul.f32 0.14545454, %v6179_v45  ;;  %v6561_v13 = vmul.f32 %v6279_v52, %v6266_v27  ;;  %v6563_v44 = vpop.eup %4984  ;;  %v6570_v40 = vmul.f32 %v6283_v35, %v6270_v24 }
 0x181   :  { %8730 = vst [vmem:[#allocation35_spill] sm:$0xff] %v6543_v2  ;;  %8731 = vst [vmem:[#allocation11_spill] sm:$0xff] %v6546_v17  ;;  %v1851_v29 = vmul.f32 0.14545454, %v6189_v51  ;;  %v1852_v43 = vmul.f32 0.14545454, %v6197_v46  ;;  %v1765_v30 = vmul.f32 %v6563_v44, %v1747_v39  ;;  %v1783_v62 = vmul.f32 %v6563_v44, %v6368_v20 }
 0x182   :  { %8732 = vst [vmem:[#allocation37_spill] sm:$0xff] %v6548_v53  ;;  %8733 = vst [vmem:[#allocation12_spill] sm:$0xff] %v6563_v44  ;;  %v1853_v14 = vmul.f32 0.14545454, %v6203_v1  ;;  %v1854_v31 = vmul.f32 0.14545454, %v6211_v0 }
 0x183   :  { %v1855_v58 = vmul.f32 0.14545454, %v6216_v26  ;;  %v1865_v10 = vrot.slane %v1847_v42, 2  ;;  %v1866_v3 = vrot.slane %v1848_v50, 2  ;;  %v1867_v53 = vrot.slane %v1849_v63, 2 }
 0x184   :  { %v1868_v2 = vrot.slane %v1850_v54, 2  ;;  %v1774_v49 = vmul.f32 0.31622776, %v1765_v30  ;;  %v1792_v33 = vmul.f32 3.1622777, %v1783_v62  ;;  %v1869_v17 = vrot.slane %v1851_v29, 2 }
 0x185   :  { %v1870_v15 = vrot.slane %v1852_v43, 2  ;;  %v1871_v21 = vrot.slane %v1853_v14, 2  ;;  %v1872_v23 = vrot.slane %v1854_v31, 2  ;;  %v1873_v38 = vrot.slane %v1855_v58, 2 }
 0x186   :  { %v1883_v39 = vadd.f32 %v1865_v10, %v6471_v9  ;;  %v1884_v5 = vadd.f32 %v1866_v3, %v6479_v34  ;;  %v1885_v20 = vadd.f32 %v1867_v53, %v6481_v18  ;;  %v1886_v6 = vadd.f32 %v1868_v2, %v1841_v55  ;;  %4931 = vst [vmem:[%s8337_s2 + $0x18] sm:$0x1] %v1774_v49 }
 0x187   :  { %v1887_v11 = vadd.f32 %v1869_v17, %v1842_v8  ;;  %4933 = vst [vmem:[%s8337_s2 + $0x48] sm:$0x1] %v1792_v33  ;;  %v1888_v42 = vadd.f32 %v1870_v15, %v1843_v60  ;;  %v1889_v50 = vadd.f32 %v1871_v21, %v1844_v25  ;;  %v1890_v63 = vadd.f32 %v1872_v23, %v1845_v19  ;;  %v8734_v21 = vld [vmem:[#allocation34_spill] sm:$0xff]  ;;  %v8735_v17 = vld [vmem:[#allocation13_spill] sm:$0xff] }
 0x188   :  { %v1891_v54 = vadd.f32 %v1873_v38, %v1846_v57  ;;  %v1892_v9 = vmul.f32 0.12727273, %v6160_v7  ;;  %v1893_v34 = vmul.f32 0.12727273, %v6167_v16  ;;  %v1894_v18 = vmul.f32 0.12727273, %v6171_v12 }
 0x189   :  { %v6591_v53 = vmul.f32 %v6287_v37, %v6266_v27  ;;  %v1895_v49 = vmul.f32 0.12727273, %v6179_v45  ;;  %v1896_v2 = vmul.f32 0.12727273, %v6189_v51  ;;  %v1897_v33 = vmul.f32 0.12727273, %v6197_v46 }
 0x18a   :  { %v6598_v23 = vmul.f32 %v8734_v21, %v6270_v24  ;;  %v1898_v38 = vmul.f32 0.12727273, %v6203_v1  ;;  %v1899_v15 = vmul.f32 0.12727273, %v6211_v0  ;;  %v1900_v55 = vmul.f32 0.12727273, %v6216_v26 }
 0x18b   :  { %v6605_v8 = vmul.f32 %v8735_v17, %v6266_v27  ;;  %v1910_v60 = vrot.slane %v1892_v9, 3  ;;  %v1911_v25 = vrot.slane %v1893_v34, 3  ;;  %v1912_v19 = vrot.slane %v1894_v18, 3 }
 0x18c   :  { %v1913_v57 = vrot.slane %v1895_v49, 3  ;;  %v1914_v29 = vrot.slane %v1896_v2, 3  ;;  %v1915_v43 = vrot.slane %v1897_v33, 3  ;;  %v1916_v14 = vrot.slane %v1898_v38, 3 }
 0x18d   :  { %v1917_v30 = vrot.slane %v1899_v15, 3  ;;  %v1918_v62 = vrot.slane %v1900_v55, 3  ;;  %v1928_v31 = vadd.f32 %v1910_v60, %v1883_v39  ;;  %v1929_v58 = vadd.f32 %v1911_v25, %v1884_v5  ;;  %v8736_v39 = vld [vmem:[#allocation14_spill] sm:$0xff] }
 0x18e   :  { %v1930_v10 = vadd.f32 %v1912_v19, %v1885_v20  ;;  %v1931_v3 = vadd.f32 %v1913_v57, %v1886_v6  ;;  %v1932_v28 = vadd.f32 %v1914_v29, %v1887_v11  ;;  %v1933_v32 = vadd.f32 %v1915_v43, %v1888_v42  ;;  %v8737_v42 = vld [vmem:[#allocation15_spill] sm:$0xff] }
 0x18f   :  { %v1934_v59 = vadd.f32 %v1916_v14, %v1889_v50  ;;  %v1935_v44 = vadd.f32 %v1917_v30, %v1890_v63  ;;  %v1936_v4 = vadd.f32 %v1918_v62, %v1891_v54  ;;  %v1937_v17 = vmul.f32 0.10909091, %v6160_v7 }
 0x190   :  { %v1938_v9 = vmul.f32 0.10909091, %v6167_v16  ;;  %v1939_v34 = vmul.f32 0.10909091, %v6171_v12  ;;  %v1940_v18 = vmul.f32 0.10909091, %v6179_v45  ;;  %v6614_v5 = vmul.f32 %v8736_v39, %v6270_v24 }
 0x191   :  { %v1941_v49 = vmul.f32 0.10909091, %v6189_v51  ;;  %v1942_v6 = vmul.f32 0.10909091, %v6197_v46  ;;  %v1943_v11 = vmul.f32 0.10909091, %v6203_v1  ;;  %v6621_v50 = vmul.f32 %v8737_v42, %v6266_v27 }
 0x192   :  { %v1944_v20 = vmul.f32 0.10909091, %v6211_v0  ;;  %v1945_v63 = vmul.f32 0.10909091, %v6216_v26  ;;  %v1955_v54 = vrot.slane %v1937_v17, 4  ;;  %v1956_v2 = vrot.slane %v1938_v9, 4 }
 0x193   :  { %v1957_v33 = vrot.slane %v1939_v34, 4  ;;  %v1958_v38 = vrot.slane %v1940_v18, 4  ;;  %v1959_v15 = vrot.slane %v1941_v49, 4  ;;  %v1960_v55 = vrot.slane %v1942_v6, 4  ;;  %v8738_v18 = vld [vmem:[#allocation41_spill] sm:$0xff] }
 0x194   :  { %v1961_v60 = vrot.slane %v1943_v11, 4  ;;  %v1962_v25 = vrot.slane %v1944_v20, 4  ;;  %v1963_v19 = vrot.slane %v1945_v63, 4  ;;  %v1973_v57 = vadd.f32 %v1955_v54, %v1928_v31 }
 0x195   :  { %v1974_v29 = vadd.f32 %v1956_v2, %v1929_v58  ;;  %v1975_v43 = vadd.f32 %v1957_v33, %v1930_v10  ;;  %v1976_v14 = vadd.f32 %v1958_v38, %v1931_v3  ;;  %v1977_v30 = vadd.f32 %v1959_v15, %v1932_v28  ;;  %v8740_v15 = vld [vmem:[#allocation17_spill] sm:$0xff] }
 0x196   :  { %v1978_v62 = vadd.f32 %v1960_v55, %v1933_v32  ;;  %v1979_v39 = vadd.f32 %v1961_v60, %v1934_v59  ;;  %v1980_v42 = vadd.f32 %v1962_v25, %v1935_v44  ;;  %v1981_v21 = vadd.f32 %v1963_v19, %v1936_v4  ;;  %v8739_v32 = vld [vmem:[#allocation43_spill] sm:$0xff]  ;;  %v8742_v60 = vld [vmem:[#allocation40_spill] sm:$0xff]  ;;  %v8743_v19 = vld [vmem:[#allocation46_spill] sm:$0xff] }
 0x197   :  { %v1982_v35 = vmul.f32 0.09090909, %v6160_v7  ;;  %v1983_v17 = vmul.f32 0.09090909, %v6167_v16  ;;  %v1984_v9 = vmul.f32 0.09090909, %v6171_v12  ;;  %v6630_v49 = vmul.f32 %v8738_v18, %v6270_v24 }
 0x198   :  { %v1985_v34 = vmul.f32 0.09090909, %v6179_v45  ;;  %v1986_v31 = vmul.f32 0.09090909, %v6189_v51  ;;  %v1987_v28 = vmul.f32 0.09090909, %v6197_v46  ;;  %v6637_v4 = vmul.f32 %v8739_v32, %v6266_v27 }
 0x199   :  { %v1988_v59 = vmul.f32 0.09090909, %v6203_v1  ;;  %v1989_v7 = vmul.f32 0.09090909, %v6211_v0  ;;  %v1990_v16 = vmul.f32 0.09090909, %v6216_v26 }
 0x19a   :  { %v2000_v12 = vrot.slane %v1982_v35, 5  ;;  %v2001_v45 = vrot.slane %v1983_v17, 5  ;;  %v2002_v44 = vrot.slane %v1984_v9, 5  ;;  %v2003_v58 = vrot.slane %v1985_v34, 5  ;;  %v8741_v35 = vld [vmem:[#allocation38_spill] sm:$0xff]  ;;  %v8749_v34 = vld [vmem:[#allocation51_spill] sm:$0xff] }
 0x19b   :  { %v2004_v10 = vrot.slane %v1986_v31, 5  ;;  %v2005_v3 = vrot.slane %v1987_v28, 5  ;;  %v2006_v6 = vrot.slane %v1988_v59, 5  ;;  %v2007_v51 = vrot.slane %v1989_v7, 5  ;;  %v8744_v9 = vld [vmem:[#allocation42_spill] sm:$0xff]  ;;  %v8750_v28 = vld [vmem:[#allocation23_spill] sm:$0xff] }
 0x19c   :  { %v2008_v11 = vrot.slane %v1990_v16, 5  ;;  %v2018_v46 = vadd.f32 %v2000_v12, %v1973_v57  ;;  %v2019_v20 = vadd.f32 %v2001_v45, %v1974_v29  ;;  %v2020_v1 = vadd.f32 %v2002_v44, %v1975_v43  ;;  %v8745_v29 = vld [vmem:[#allocation45_spill] sm:$0xff]  ;;  %v8751_v7 = vld [vmem:[#allocation44_spill] sm:$0xff] }
 0x19d   :  { %v2021_v63 = vadd.f32 %v2003_v58, %v1976_v14  ;;  %v2022_v54 = vadd.f32 %v2004_v10, %v1977_v30  ;;  %v2023_v2 = vadd.f32 %v2005_v3, %v1978_v62  ;;  %v2024_v33 = vadd.f32 %v2006_v6, %v1979_v39  ;;  %v8746_v14 = vld [vmem:[#allocation39_spill] sm:$0xff]  ;;  %v8747_v39 = vld [vmem:[#allocation49_spill] sm:$0xff] }
 0x19e   :  { %v2025_v38 = vadd.f32 %v2007_v51, %v1980_v42  ;;  %v2026_v0 = vadd.f32 %v2008_v11, %v1981_v21  ;;  %v2027_v26 = vmul.f32 0.07272727, %v8740_v15  ;;  %v2028_v55 = vmul.f32 0.07272727, %v8741_v35  ;;  %v8748_v21 = vld [vmem:[#allocation48_spill] sm:$0xff] }
 0x19f   :  { %v2029_v25 = vmul.f32 0.07272727, %v8742_v60  ;;  %v6646_v17 = vmul.f32 %v8743_v19, %v6270_v24  ;;  %v2030_v57 = vmul.f32 0.07272727, %v8744_v9  ;;  %v2031_v43 = vmul.f32 0.07272727, %v8745_v29 }
 0x1a0   :  { %v2032_v30 = vmul.f32 0.07272727, %v8746_v14  ;;  %v6653_v42 = vmul.f32 %v8747_v39, %v6266_v27  ;;  %v2033_v62 = vmul.f32 0.07272727, %v8748_v21  ;;  %v2034_v31 = vmul.f32 0.07272727, %v8749_v34 }
 0x1a1   :  { %v2035_v59 = vmul.f32 0.07272727, %v8750_v28  ;;  %v6660_v16 = vmul.f32 %v8751_v7, %v6270_v24  ;;  %v2045_v12 = vrot.slane %v2027_v26, 6  ;;  %v2046_v45 = vrot.slane %v2028_v55, 6  ;;  %v5013_v7 = vld [vmem:[#allocation2 + $0x10] sm:$0xff] }
 0x1a2   :  { %v2047_v44 = vrot.slane %v2029_v25, 6  ;;  %v2048_v58 = vrot.slane %v2030_v57, 6  ;;  %v2049_v10 = vrot.slane %v2031_v43, 6  ;;  %v2050_v3 = vrot.slane %v2032_v30, 6 }
 0x1a3   :  { %v2051_v6 = vrot.slane %v2033_v62, 6  ;;  %v2052_v51 = vrot.slane %v2034_v31, 6  ;;  %v2053_v11 = vrot.slane %v2035_v59, 6  ;;  %v2063_v15 = vadd.f32 %v2045_v12, %v2018_v46  ;;  %v8752_v46 = vld [vmem:[#allocation47_spill] sm:$0xff] }
 0x1a4   :  { %v2064_v39 = vadd.f32 %v2046_v45, %v2019_v20  ;;  %v2065_v19 = vadd.f32 %v2047_v44, %v2020_v1  ;;  %v2066_v32 = vadd.f32 %v2048_v58, %v2021_v63  ;;  %v2067_v18 = vadd.f32 %v2049_v10, %v2022_v54 }
 0x1a5   :  { %v2068_v41 = vadd.f32 %v2050_v3, %v2023_v2  ;;  %v2069_v22 = vadd.f32 %v2051_v6, %v2024_v33  ;;  %v2070_v48 = vadd.f32 %v2052_v51, %v2025_v38  ;;  %v2071_v36 = vadd.f32 %v2053_v11, %v2026_v0  ;;  %v8753_v2 = vld [vmem:[#allocation52_spill] sm:$0xff]  ;;  %v5015_v6 = vld [vmem:[#allocation2 + $0x50] sm:$0xff] }
 0x1a6   :  { %v2072_v56 = vmul.f32 0.054545455, %v5013_v7  ;;  %v2073_v26 = vmul.f32 0.054545455, %v8741_v35  ;;  %v2074_v55 = vmul.f32 0.054545455, %v8742_v60  ;;  %v6668_v20 = vmul.f32 %v8752_v46, %v6266_v27 }
 0x1a7   :  { %v2075_v25 = vmul.f32 0.054545455, %v8744_v9  ;;  %v2076_v57 = vmul.f32 0.054545455, %v8745_v29  ;;  %v2077_v1 = vmul.f32 0.054545455, %v8746_v14  ;;  %v6675_v33 = vmul.f32 %v8753_v2, %v6270_v24 }
 0x1a8   :  { %v2078_v63 = vmul.f32 0.054545455, %v8748_v21  ;;  %v2079_v54 = vmul.f32 0.054545455, %v8749_v34  ;;  %v2080_v38 = vmul.f32 0.054545455, %v8750_v28 }
 0x1a9   :  { %v2090_v0 = vrot.slane %v2072_v56, 7  ;;  %v2091_v35 = vrot.slane %v2073_v26, 7  ;;  %v2092_v60 = vrot.slane %v2074_v55, 7  ;;  %v2093_v9 = vrot.slane %v2075_v25, 7  ;;  %v5014_v28 = vld [vmem:[#allocation2 + $0x30] sm:$0xff]  ;;  %v8754_v55 = vld [vmem:[#allocation50_spill] sm:$0xff] }
 0x1aa   :  { %v2094_v29 = vrot.slane %v2076_v57, 7  ;;  %v2095_v43 = vrot.slane %v2077_v1, 7  ;;  %v2096_v30 = vrot.slane %v2078_v63, 7  ;;  %v2097_v62 = vrot.slane %v2079_v54, 7  ;;  %v5016_v11 = vld [vmem:[#allocation2 + $0x70] sm:$0xff] }
 0x1ab   :  { %v2098_v31 = vrot.slane %v2080_v38, 7  ;;  %v2108_v14 = vadd.f32 %v2090_v0, %v2063_v15  ;;  %v2109_v59 = vadd.f32 %v2091_v35, %v2064_v39  ;;  %v2110_v21 = vadd.f32 %v2092_v60, %v2065_v19  ;;  %v5017_v15 = vld [vmem:[#allocation2 + $0x90] sm:$0xff] }
 0x1ac   :  { %v2111_v12 = vadd.f32 %v2093_v9, %v2066_v32  ;;  %v2112_v34 = vadd.f32 %v2094_v29, %v2067_v18  ;;  %v2113_v45 = vadd.f32 %v2095_v43, %v2068_v41  ;;  %v2114_v44 = vadd.f32 %v2096_v30, %v2069_v22  ;;  %v5018_v19 = vld [vmem:[#allocation2 + $0xb0] sm:$0xff] }
 0x1ad   :  { %v2115_v58 = vadd.f32 %v2097_v62, %v2070_v48  ;;  %v2116_v10 = vadd.f32 %v2098_v31, %v2071_v36  ;;  %v2117_v3 = vmul.f32 0.036363635, %v5013_v7  ;;  %v2118_v56 = vmul.f32 0.036363635, %v5014_v28  ;;  %v5019_v18 = vld [vmem:[#allocation2 + $0xd0] sm:$0xff] }
 0x1ae   :  { %v2119_v51 = vmul.f32 0.036363635, %v5015_v6  ;;  %v2120_v26 = vmul.f32 0.036363635, %v5016_v11  ;;  %v6680_v25 = vmul.f32 %v8754_v55, %v6266_v27  ;;  %v2121_v39 = vmul.f32 0.036363635, %v5017_v15 }
 0x1af   :  { %v2122_v32 = vmul.f32 0.036363635, %v5018_v19  ;;  %v2123_v41 = vmul.f32 0.036363635, %v5019_v18  ;;  %v2126_v22 = vadd.f32 %v2117_v3, %v2108_v14  ;;  %v5020_v48 = vld [vmem:[#allocation2 + $0xf0] sm:$0xff]  ;;  %v2127_v63 = vadd.f32 %v2118_v56, %v2109_v59  ;;  %v8755_v55 = vld [vmem:[#allocation16_spill] sm:$0xff] }
 0x1b0   :  { %v2124_v36 = vmul.f32 0.036363635, %v5020_v48  ;;  %v5021_v57 = vld [vmem:[#allocation2 + $0x110] sm:$0xff]  ;;  %v2128_v54 = vadd.f32 %v2119_v51, %v2110_v21  ;;  %v2129_v38 = vadd.f32 %v2120_v26, %v2111_v12  ;;  %v2130_v0 = vadd.f32 %v2121_v39, %v2112_v34 }
 0x1b1   :  { %v2125_v1 = vmul.f32 0.036363635, %v5021_v57  ;;  %v2131_v35 = vadd.f32 %v2122_v32, %v2113_v45  ;;  %v2132_v60 = vadd.f32 %v2123_v41, %v2114_v44  ;;  %v2135_v29 = vmul.f32 0.018181818, %v5013_v7 }
 0x1b2   :  { %v2133_v9 = vadd.f32 %v2124_v36, %v2115_v58  ;;  %v2136_v43 = vmul.f32 0.018181818, %v5014_v28  ;;  %v2137_v30 = vmul.f32 0.018181818, %v5015_v6  ;;  %v2138_v62 = vmul.f32 0.018181818, %v5016_v11 }
 0x1b3   :  { %v2134_v27 = vadd.f32 %v2125_v1, %v2116_v10  ;;  %v2139_v31 = vmul.f32 0.018181818, %v5017_v15  ;;  %v6684_v14 = vmul.f32 %v8755_v55, %v6270_v24  ;;  %v2140_v3 = vmul.f32 0.018181818, %v5018_v19 }
 0x1b4   :  { %v2141_v2 = vmul.f32 0.018181818, %v5019_v18  ;;  %v2142_v46 = vmul.f32 0.018181818, %v5020_v48  ;;  %v6688_v59 = vmul.f32 %v6287_v37, %v6279_v52  ;;  %v2143_v21 = vmul.f32 0.018181818, %v5021_v57 }
 0x1b5   :  { %v2153_v12 = vrot.slane %v2135_v29, 1  ;;  %v2154_v34 = vrot.slane %v2136_v43, 1  ;;  %v2155_v45 = vrot.slane %v2137_v30, 1  ;;  %v2156_v7 = vrot.slane %v2138_v62, 1 }
 0x1b6   :  { %v2157_v44 = vrot.slane %v2139_v31, 1  ;;  %v2158_v58 = vrot.slane %v2140_v3, 1  ;;  %v2159_v10 = vrot.slane %v2141_v2, 1  ;;  %v2160_v28 = vrot.slane %v2142_v46, 1 }
 0x1b7   :  { %v2161_v56 = vrot.slane %v2143_v21, 1  ;;  %v6690_v6 = vadd.f32 %v2153_v12, %v2126_v22  ;;  %v6692_v24 = vadd.f32 %v2154_v34, %v2127_v63  ;;  %v6694_v51 = vadd.f32 %v2155_v45, %v2128_v54 }
 0x1b8   :  { %v6696_v11 = vadd.f32 %v2156_v7, %v2129_v38  ;;  %v6698_v26 = vadd.f32 %v2157_v44, %v2130_v0  ;;  %v6700_v15 = vadd.f32 %v2158_v58, %v2131_v35  ;;  %v6702_v39 = vadd.f32 %v2159_v10, %v2132_v60 }
 0x1b9   :  { %8756 = vst [vmem:[#allocation17_spill] sm:$0xff] %v6690_v6  ;;  %8757 = vst [vmem:[#allocation38_spill] sm:$0xff] %v6692_v24  ;;  %v6704_v19 = vadd.f32 %v2160_v28, %v2133_v9  ;;  %v6706_v32 = vadd.f32 %v2161_v56, %v2134_v27  ;;  %v2212_v46 = vrot.slane %v6561_v13, 2  ;;  %v2213_v2 = vrot.slane %v6570_v40, 2 }
 0x1ba   :  { %8758 = vst [vmem:[#allocation40_spill] sm:$0xff] %v6694_v51  ;;  %8759 = vst [vmem:[#allocation42_spill] sm:$0xff] %v6696_v11  ;;  %v2215_v18 = vrot.slane %v6591_v53, 2  ;;  %v2216_v41 = vrot.slane %v6598_v23, 2  ;;  %v2218_v22 = vrot.slane %v6605_v8, 2  ;;  %v2219_v48 = vrot.slane %v6614_v5, 2 }
 0x1bb   :  { %8760 = vst [vmem:[#allocation45_spill] sm:$0xff] %v6698_v26  ;;  %8761 = vst [vmem:[#allocation39_spill] sm:$0xff] %v6700_v15  ;;  %v2221_v36 = vrot.slane %v6621_v50, 2  ;;  %v2222_v57 = vrot.slane %v6630_v49, 2  ;;  %v2224_v1 = vrot.slane %v6637_v4, 2  ;;  %v2214_v63 = vsel %vm1227_vm10, %v2212_v46, %v2213_v2 }
 0x1bc   :  { %8762 = vst [vmem:[#allocation48_spill] sm:$0xff] %v6702_v39  ;;  %8763 = vst [vmem:[#allocation51_spill] sm:$0xff] %v6704_v19  ;;  %v2217_v13 = vsel %vm1227_vm10, %v2215_v18, %v2216_v41  ;;  %v2225_v40 = vrot.slane %v6646_v17, 2  ;;  %v2227_v53 = vrot.slane %v6653_v42, 2  ;;  %v2220_v23 = vsel %vm1227_vm10, %v2218_v22, %v2219_v48 }
 0x1bd   :  { %8764 = vst [vmem:[#allocation23_spill] sm:$0xff] %v6706_v32  ;;  %v2223_v8 = vsel %vm1227_vm10, %v2221_v36, %v2222_v57  ;;  %v2228_v5 = vrot.slane %v6660_v16, 2  ;;  %v2230_v50 = vrot.slane %v6668_v20, 2  ;;  %v2231_v4 = vrot.slane %v6675_v33, 2 }
 0x1be   :  { %v2226_v49 = vsel %vm1227_vm10, %v2224_v1, %v2225_v40  ;;  %v2233_v54 = vrot.slane %v6680_v25, 2  ;;  %v2234_v38 = vrot.slane %v6684_v14, 2  ;;  %v2252_v42 = vsel %vm61_vm0, %v2213_v2, 0.0 }
 0x1bf   :  { %v2229_v17 = vsel %vm1227_vm10, %v2227_v53, %v2228_v5  ;;  %v2260_v0 = vsel %vm61_vm0, %v2216_v41, 0.0  ;;  %v2268_v35 = vsel %vm61_vm0, %v2219_v48, 0.0  ;;  %v2232_v16 = vsel %vm1227_vm10, %v2230_v50, %v2231_v4 }
 0x1c0   :  { %v2235_v20 = vsel %vm1227_vm10, %v2233_v54, %v2234_v38  ;;  %v2253_v60 = vadd.f32 %v2252_v42, %v2214_v63  ;;  %v2261_v9 = vadd.f32 %v2260_v0, %v2217_v13  ;;  %v2269_v27 = vadd.f32 %v2268_v35, %v2220_v23 }
 0x1c1   :  { %v2276_v33 = vsel %vm61_vm0, %v2222_v57, 0.0  ;;  %v2284_v25 = vsel %vm61_vm0, %v2225_v40, 0.0  ;;  %v2292_v29 = vsel %vm61_vm0, %v2228_v5, 0.0  ;;  %v2300_v21 = vsel %vm61_vm0, %v2231_v4, 0.0 }
 0x1c2   :  { %v2254_v43 = vrot.slane %v2253_v60, 4  ;;  %v2262_v30 = vrot.slane %v2261_v9, 4  ;;  %v2277_v62 = vadd.f32 %v2276_v33, %v2223_v8  ;;  %v2285_v31 = vadd.f32 %v2284_v25, %v2226_v49 }
 0x1c3   :  { %v2270_v14 = vrot.slane %v2269_v27, 4  ;;  %v2293_v3 = vadd.f32 %v2292_v29, %v2229_v17  ;;  %v2308_v12 = vsel %vm61_vm0, %v2234_v38, 0.0  ;;  %v2301_v28 = vadd.f32 %v2300_v21, %v2232_v16  ;;  %v8765_v21 = vld [vmem:[#allocation54_spill] sm:$0xff] }
 0x1c4   :  { %v2255_v34 = vadd.f32 %v2254_v43, %v2253_v60  ;;  %v2263_v45 = vadd.f32 %v2262_v30, %v2261_v9  ;;  %v2278_v7 = vrot.slane %v2277_v62, 4  ;;  %v2286_v44 = vrot.slane %v2285_v31, 4 }
 0x1c5   :  { %v2271_v58 = vadd.f32 %v2270_v14, %v2269_v27  ;;  %v2294_v10 = vrot.slane %v2293_v3, 4  ;;  %v2309_v56 = vadd.f32 %v2308_v12, %v2235_v20  ;;  %v2302_v36 = vrot.slane %v2301_v28, 4 }
 0x1c6   :  { %v2256_v46 = vrot.slane %v2255_v34, 2  ;;  %v2264_v2 = vrot.slane %v2263_v45, 2  ;;  %v2279_v18 = vadd.f32 %v2278_v7, %v2277_v62  ;;  %v2287_v41 = vadd.f32 %v2286_v44, %v2285_v31  ;;  %v8767_v7 = vld [vmem:[#allocation20_spill] sm:$0xff] }
 0x1c7   :  { %v2272_v22 = vrot.slane %v2271_v58, 2  ;;  %v2295_v48 = vadd.f32 %v2294_v10, %v2293_v3  ;;  %v2310_v57 = vrot.slane %v2309_v56, 4  ;;  %v2303_v8 = vadd.f32 %v2302_v36, %v2301_v28  ;;  %v8770_v36 = vld [vmem:[#allocation33_spill] sm:$0xff] }
 0x1c8   :  { %v2257_v1 = vadd.f32 %v2256_v46, %v2255_v34  ;;  %v2265_v63 = vadd.f32 %v2264_v2, %v2263_v45  ;;  %v2280_v13 = vrot.slane %v2279_v18, 2  ;;  %v2288_v40 = vrot.slane %v2287_v41, 2  ;;  %v8766_v34 = vld [vmem:[#allocation19_spill] sm:$0xff]  ;;  %v8769_v2 = vld [vmem:[#allocation21_spill] sm:$0xff] }
 0x1c9   :  { %v2273_v53 = vadd.f32 %v2272_v22, %v2271_v58  ;;  %v2296_v23 = vrot.slane %v2295_v48, 2  ;;  %v2311_v5 = vadd.f32 %v2310_v57, %v2309_v56  ;;  %v2304_v42 = vrot.slane %v2303_v8, 2  ;;  %v8768_v58 = vld [vmem:[#allocation18_spill] sm:$0xff] }
 0x1ca   :  { %v2258_v50 = vrot.slane %v2257_v1, 1  ;;  %v2266_v49 = vrot.slane %v2265_v63, 1  ;;  %v2281_v4 = vadd.f32 %v2280_v13, %v2279_v18  ;;  %v2289_v54 = vadd.f32 %v2288_v40, %v2287_v41  ;;  %v8771_v57 = vld [vmem:[#allocation34_spill] sm:$0xff]  ;;  %v8773_v40 = vld [vmem:[#allocation36_spill] sm:$0xff] }
 0x1cb   :  { %v2274_v38 = vrot.slane %v2273_v53, 1  ;;  %v2297_v17 = vadd.f32 %v2296_v23, %v2295_v48  ;;  %v2312_v0 = vrot.slane %v2311_v5, 2  ;;  %v2305_v33 = vadd.f32 %v2304_v42, %v2303_v8  ;;  %v8774_v23 = vld [vmem:[#allocation12_spill] sm:$0xff]  ;;  %v8778_v42 = vld [vmem:[#allocation43_spill] sm:$0xff] }
 0x1cc   :  { %v2259_v35 = vadd.f32 %v2258_v50, %v2257_v1  ;;  %v2267_v16 = vadd.f32 %v2266_v49, %v2265_v63  ;;  %v2282_v20 = vrot.slane %v2281_v4, 1  ;;  %v2290_v60 = vrot.slane %v2289_v54, 1  ;;  %v8772_v63 = vld [vmem:[#allocation13_spill] sm:$0xff]  ;;  %v8775_v50 = vld [vmem:[#allocation14_spill] sm:$0xff] }
 0x1cd   :  { %v2275_v9 = vadd.f32 %v2274_v38, %v2273_v53  ;;  %v2298_v27 = vrot.slane %v2297_v17, 1  ;;  %v2313_v25 = vadd.f32 %v2312_v0, %v2311_v5  ;;  %v2306_v14 = vrot.slane %v2305_v33, 1  ;;  %v8777_v38 = vld [vmem:[#allocation41_spill] sm:$0xff] }
 0x1ce   :  { %v2283_v29 = vadd.f32 %v2282_v20, %v2281_v4  ;;  %v2291_v43 = vadd.f32 %v2290_v60, %v2289_v54  ;;  %v2316_v30 = vmul.f32 %v6465_v61, %v2259_v35  ;;  %v2317_v62 = vmul.f32 %v6473_v47, %v2267_v16  ;;  %v8776_v4 = vld [vmem:[#allocation15_spill] sm:$0xff]  ;;  %v8779_v35 = vld [vmem:[#allocation46_spill] sm:$0xff] }
 0x1cf   :  { %v2299_v31 = vadd.f32 %v2298_v27, %v2297_v17  ;;  %v2314_v3 = vrot.slane %v2313_v25, 1  ;;  %v2318_v12 = vmul.f32 %v8765_v21, %v2275_v9  ;;  %v2307_v56 = vadd.f32 %v2306_v14, %v2305_v33  ;;  %v8780_v9 = vld [vmem:[#allocation49_spill] sm:$0xff]  ;;  %v8781_v33 = vld [vmem:[#allocation44_spill] sm:$0xff] }
 0x1d0   :  { %v2319_v45 = vmul.f32 %v8766_v34, %v2283_v29  ;;  %v2320_v44 = vmul.f32 %v8767_v7, %v2291_v43  ;;  %v6746_v10 = vmul.f32 %v8768_v58, %v2316_v30  ;;  %v6749_v28 = vmul.f32 %v8768_v58, %v2317_v62  ;;  %v8782_v29 = vld [vmem:[#allocation47_spill] sm:$0xff]  ;;  %v8783_v30 = vld [vmem:[#allocation52_spill] sm:$0xff] }
 0x1d1   :  { %v2315_v46 = vadd.f32 %v2314_v3, %v2313_v25  ;;  %v2321_v18 = vmul.f32 %v8769_v2, %v2299_v31  ;;  %v6753_v41 = vmul.f32 %v8768_v58, %v2318_v12  ;;  %v2333_v1 = vmul.f32 %v8771_v57, %v8770_v36  ;;  %v8784_v31 = vld [vmem:[#allocation50_spill] sm:$0xff] }
 0x1d2   :  { %v6756_v22 = vmul.f32 %v8768_v58, %v2319_v45  ;;  %v6759_v48 = vmul.f32 %v8768_v58, %v2320_v44  ;;  %v2334_v13 = vmul.f32 %v8772_v63, %v6279_v52  ;;  %v2322_v53 = vmul.f32 %v8773_v40, %v2307_v56 }
 0x1d3   :  { %v2323_v8 = vmul.f32 %v8774_v23, %v2315_v46  ;;  %v6768_v5 = vmul.f32 %v8768_v58, %v2321_v18  ;;  %v2335_v49 = vmul.f32 %v8775_v50, %v8770_v36  ;;  %v2336_v54 = vmul.f32 %v8776_v4, %v6279_v52 }
 0x1d4   :  { %v2337_v17 = vmul.f32 %v8777_v38, %v8770_v36  ;;  %v2338_v0 = vmul.f32 %v8778_v42, %v6279_v52  ;;  %v2339_v16 = vmul.f32 %v8779_v35, %v8770_v36  ;;  %v6781_v20 = vmul.f32 %v8768_v58, %v2322_v53 }
 0x1d5   :  { %v6784_v60 = vmul.f32 %v8768_v58, %v2323_v8  ;;  %v2340_v27 = vmul.f32 %v8780_v9, %v6279_v52  ;;  %v2341_v25 = vmul.f32 %v8781_v33, %v8770_v36  ;;  %v2342_v43 = vmul.f32 %v8782_v29, %v6279_v52 }
 0x1d6   :  { %v2343_v62 = vmul.f32 %v8783_v30, %v8770_v36  ;;  %v2344_v14 = vmul.f32 %v8784_v31, %v6279_v52  ;;  %v2345_v3 = vmul.f32 %v8755_v55, %v8770_v36  ;;  %v2360_v12 = vrot.slane %v6688_v59, 2 }
 0x1d7   :  { %v2361_v45 = vrot.slane %v2333_v1, 2  ;;  %v2363_v44 = vrot.slane %v2334_v13, 2  ;;  %v2364_v58 = vrot.slane %v2335_v49, 2  ;;  %v2366_v56 = vrot.slane %v2336_v54, 2 }
 0x1d8   :  { %v2367_v46 = vrot.slane %v2337_v17, 2  ;;  %v2369_v18 = vrot.slane %v2338_v0, 2  ;;  %v2370_v53 = vrot.slane %v2339_v16, 2  ;;  %v2372_v19 = vrot.slane %v2340_v27, 2 }
 0x1d9   :  { %v2362_v8 = vsel %vm1227_vm10, %v2360_v12, %v2361_v45  ;;  %v2365_v32 = vsel %vm1227_vm10, %v2363_v44, %v2364_v58  ;;  %v2373_v39 = vrot.slane %v2341_v25, 2  ;;  %v2375_v36 = vrot.slane %v2342_v43, 2 }
 0x1da   :  { %v2368_v52 = vsel %vm1227_vm10, %v2366_v56, %v2367_v46  ;;  %v2371_v15 = vsel %vm1227_vm10, %v2369_v18, %v2370_v53  ;;  %v2376_v6 = vrot.slane %v2343_v62, 2  ;;  %v2378_v1 = vrot.slane %v2344_v14, 2 }
 0x1db   :  { %v2374_v59 = vsel %vm1227_vm10, %v2372_v19, %v2373_v39  ;;  %v2379_v13 = vrot.slane %v2345_v3, 2  ;;  %v2395_v49 = vsel %vm61_vm0, %v2361_v45, 0.0  ;;  %v2403_v0 = vsel %vm61_vm0, %v2364_v58, 0.0 }
 0x1dc   :  { %v2377_v54 = vsel %vm1227_vm10, %v2375_v36, %v2376_v6  ;;  %v2396_v17 = vadd.f32 %v2395_v49, %v2362_v8  ;;  %v2411_v16 = vsel %vm61_vm0, %v2367_v46, 0.0  ;;  %v2404_v25 = vadd.f32 %v2403_v0, %v2365_v32 }
 0x1dd   :  { %v2380_v27 = vsel %vm1227_vm10, %v2378_v1, %v2379_v13  ;;  %v2412_v12 = vadd.f32 %v2411_v16, %v2368_v52  ;;  %v2419_v43 = vsel %vm61_vm0, %v2370_v53, 0.0  ;;  %v2427_v19 = vsel %vm61_vm0, %v2373_v39, 0.0 }
 0x1de   :  { %v2397_v62 = vrot.slane %v2396_v17, 4  ;;  %v2420_v44 = vadd.f32 %v2419_v43, %v2371_v15  ;;  %v2435_v14 = vsel %vm61_vm0, %v2376_v6, 0.0  ;;  %v2405_v3 = vrot.slane %v2404_v25, 4 }
 0x1df   :  { %v2413_v45 = vrot.slane %v2412_v12, 4  ;;  %v2428_v56 = vadd.f32 %v2427_v19, %v2374_v59  ;;  %v2436_v18 = vadd.f32 %v2435_v14, %v2377_v54  ;;  %v2443_v46 = vsel %vm61_vm0, %v2379_v13, 0.0 }
 0x1e0   :  { %v2398_v8 = vadd.f32 %v2397_v62, %v2396_v17  ;;  %v2421_v58 = vrot.slane %v2420_v44, 4  ;;  %v6815_v32 = vmul.f32 %v8772_v63, %v6287_v37  ;;  %v2406_v52 = vadd.f32 %v2405_v3, %v2404_v25 }
 0x1e1   :  { %v2414_v53 = vadd.f32 %v2413_v45, %v2412_v12  ;;  %v2429_v36 = vrot.slane %v2428_v56, 4  ;;  %v2437_v15 = vrot.slane %v2436_v18, 4  ;;  %v2444_v49 = vadd.f32 %v2443_v46, %v2380_v27 }
 0x1e2   :  { %v2399_v1 = vrot.slane %v2398_v8, 2  ;;  %v2422_v39 = vadd.f32 %v2421_v58, %v2420_v44  ;;  %v6819_v6 = vmul.f32 %v8775_v50, %v8771_v57  ;;  %v2407_v59 = vrot.slane %v2406_v52, 2 }
 0x1e3   :  { %v2415_v54 = vrot.slane %v2414_v53, 2  ;;  %v2430_v17 = vadd.f32 %v2429_v36, %v2428_v56  ;;  %v2438_v0 = vadd.f32 %v2437_v15, %v2436_v18  ;;  %v2445_v43 = vrot.slane %v2444_v49, 4 }
 0x1e4   :  { %v2400_v13 = vadd.f32 %v2399_v1, %v2398_v8  ;;  %v2423_v16 = vrot.slane %v2422_v39, 2  ;;  %v2467_v25 = vmul.f32 %v8776_v4, %v6287_v37  ;;  %v2408_v12 = vadd.f32 %v2407_v59, %v2406_v52 }
 0x1e5   :  { %v2416_v62 = vadd.f32 %v2415_v54, %v2414_v53  ;;  %v2431_v19 = vrot.slane %v2430_v17, 2  ;;  %v2439_v14 = vrot.slane %v2438_v0, 2  ;;  %v2446_v3 = vadd.f32 %v2445_v43, %v2444_v49 }
 0x1e6   :  { %v2401_v44 = vrot.slane %v2400_v13, 1  ;;  %v2424_v27 = vadd.f32 %v2423_v16, %v2422_v39  ;;  %v2468_v45 = vmul.f32 %v8777_v38, %v8771_v57  ;;  %v2409_v58 = vrot.slane %v2408_v12, 1 }
 0x1e7   :  { %v2417_v46 = vrot.slane %v2416_v62, 1  ;;  %v2432_v56 = vadd.f32 %v2431_v19, %v2430_v17  ;;  %v2440_v18 = vadd.f32 %v2439_v14, %v2438_v0  ;;  %v2447_v15 = vrot.slane %v2446_v3, 2 }
 0x1e8   :  { %v2402_v8 = vadd.f32 %v2401_v44, %v2400_v13  ;;  %v2425_v36 = vrot.slane %v2424_v27, 1  ;;  %v2469_v1 = vmul.f32 %v8778_v42, %v6287_v37  ;;  %v2410_v52 = vadd.f32 %v2409_v58, %v2408_v12 }
 0x1e9   :  { %v2418_v53 = vadd.f32 %v2417_v46, %v2416_v62  ;;  %v2433_v59 = vrot.slane %v2432_v56, 1  ;;  %v2441_v54 = vrot.slane %v2440_v18, 1  ;;  %v2448_v39 = vadd.f32 %v2447_v15, %v2446_v3 }
 0x1ea   :  { %v2426_v26 = vadd.f32 %v2425_v36, %v2424_v27  ;;  %v2451_v49 = vmul.f32 %v6473_v47, %v2402_v8  ;;  %v2470_v16 = vmul.f32 %v8779_v35, %v8771_v57  ;;  %v2452_v0 = vmul.f32 %v8765_v21, %v2410_v52 }
 0x1eb   :  { %v2434_v43 = vadd.f32 %v2433_v59, %v2432_v56  ;;  %v2442_v17 = vadd.f32 %v2441_v54, %v2440_v18  ;;  %v2453_v13 = vmul.f32 %v8766_v34, %v2418_v53  ;;  %v2449_v19 = vrot.slane %v2448_v39, 1 }
 0x1ec   :  { %v2454_v14 = vmul.f32 %v8767_v7, %v2426_v26  ;;  %v6834_v12 = vmul.f32 %v6465_v61, %v2451_v49  ;;  %v2471_v62 = vmul.f32 %v8780_v9, %v6287_v37  ;;  %v6841_v3 = vmul.f32 %v6465_v61, %v2452_v0 }
 0x1ed   :  { %v2455_v44 = vmul.f32 %v8769_v2, %v2434_v43  ;;  %v2456_v27 = vmul.f32 %v8773_v40, %v2442_v17  ;;  %v6844_v58 = vmul.f32 %v6465_v61, %v2453_v13  ;;  %v2450_v46 = vadd.f32 %v2449_v19, %v2448_v39 }
 0x1ee   :  { %v6847_v56 = vmul.f32 %v6465_v61, %v2454_v14  ;;  %v2472_v26 = vmul.f32 %v8781_v33, %v8771_v57  ;;  %v2473_v18 = vmul.f32 %v8782_v29, %v6287_v37  ;;  %v2474_v15 = vmul.f32 %v8783_v30, %v8771_v57 }
 0x1ef   :  { %v6854_v8 = vmul.f32 %v6465_v61, %v2455_v44  ;;  %v6857_v36 = vmul.f32 %v6465_v61, %v2456_v27  ;;  %v2475_v52 = vmul.f32 %v8784_v31, %v6287_v37  ;;  %v2457_v53 = vmul.f32 %v8774_v23, %v2450_v46 }
 0x1f0   :  { %v2476_v59 = vmul.f32 %v8755_v55, %v8771_v57  ;;  %v2489_v54 = vrot.slane %v6815_v32, 2  ;;  %v2490_v39 = vrot.slane %v6819_v6, 2  ;;  %v2492_v49 = vrot.slane %v2467_v25, 2 }
 0x1f1   :  { %8785 = vst [vmem:[#allocation16_spill] sm:$0xff] %v6854_v8  ;;  %8786 = vst [vmem:[#allocation54_spill] sm:$0xff] %v6857_v36  ;;  %v2493_v43 = vrot.slane %v2468_v45, 2  ;;  %v2495_v17 = vrot.slane %v2469_v1, 2  ;;  %v2496_v0 = vrot.slane %v2470_v16, 2  ;;  %v6869_v13 = vmul.f32 %v6465_v61, %v2457_v53 }
 0x1f2   :  { %v2491_v19 = vsel %vm1227_vm10, %v2489_v54, %v2490_v39  ;;  %v2498_v14 = vrot.slane %v2471_v62, 2  ;;  %v2499_v37 = vrot.slane %v2472_v26, 2  ;;  %v2501_v57 = vrot.slane %v2473_v18, 2 }
 0x1f3   :  { %8787 = vst [vmem:[#allocation19_spill] sm:$0xff] %v6869_v13  ;;  %v2494_v44 = vsel %vm1227_vm10, %v2492_v49, %v2493_v43  ;;  %v2497_v27 = vsel %vm1227_vm10, %v2495_v17, %v2496_v0  ;;  %v2502_v46 = vrot.slane %v2474_v15, 2  ;;  %v2504_v6 = vrot.slane %v2475_v52, 2 }
 0x1f4   :  { %v2500_v32 = vsel %vm1227_vm10, %v2498_v14, %v2499_v37  ;;  %v2505_v25 = vrot.slane %v2476_v59, 2  ;;  %v2519_v45 = vsel %vm61_vm0, %v2490_v39, 0.0  ;;  %v2527_v16 = vsel %vm61_vm0, %v2493_v43, 0.0 }
 0x1f5   :  { %v2503_v1 = vsel %vm1227_vm10, %v2501_v57, %v2502_v46  ;;  %v2520_v61 = vadd.f32 %v2519_v45, %v2491_v19  ;;  %v2535_v62 = vsel %vm61_vm0, %v2496_v0, 0.0  ;;  %v2528_v53 = vadd.f32 %v2527_v16, %v2494_v44 }
 0x1f6   :  { %v2506_v26 = vsel %vm1227_vm10, %v2504_v6, %v2505_v25  ;;  %v2536_v54 = vadd.f32 %v2535_v62, %v2497_v27  ;;  %v2543_v18 = vsel %vm61_vm0, %v2499_v37, 0.0  ;;  %v2551_v52 = vsel %vm61_vm0, %v2502_v46, 0.0 }
 0x1f7   :  { %v2521_v15 = vrot.slane %v2520_v61, 4  ;;  %v2544_v49 = vadd.f32 %v2543_v18, %v2500_v32  ;;  %v2559_v59 = vsel %vm61_vm0, %v2505_v25, 0.0  ;;  %v2529_v39 = vrot.slane %v2528_v53, 4 }
 0x1f8   :  { %v2537_v17 = vrot.slane %v2536_v54, 4  ;;  %v2552_v14 = vadd.f32 %v2551_v52, %v2503_v1  ;;  %v2560_v19 = vadd.f32 %v2559_v59, %v2506_v26  ;;  %v2579_v0 = vmul.f32 %v8776_v4, %v8772_v63 }
 0x1f9   :  { %v2522_v57 = vadd.f32 %v2521_v15, %v2520_v61  ;;  %v2545_v43 = vrot.slane %v2544_v49, 4  ;;  %v6887_v44 = vmul.f32 %v8777_v38, %v8775_v50  ;;  %v2530_v37 = vadd.f32 %v2529_v39, %v2528_v53 }
 0x1fa   :  { %v2538_v27 = vadd.f32 %v2537_v17, %v2536_v54  ;;  %v2553_v32 = vrot.slane %v2552_v14, 4  ;;  %v2561_v6 = vrot.slane %v2560_v19, 4  ;;  %v2581_v25 = vmul.f32 %v8778_v42, %v8772_v63 }
 0x1fb   :  { %v2523_v46 = vrot.slane %v2522_v57, 2  ;;  %v2546_v45 = vadd.f32 %v2545_v43, %v2544_v49  ;;  %v2582_v1 = vmul.f32 %v8779_v35, %v8775_v50  ;;  %v2531_v61 = vrot.slane %v2530_v37, 2 }
 0x1fc   :  { %v2539_v16 = vrot.slane %v2538_v27, 2  ;;  %v2554_v62 = vadd.f32 %v2553_v32, %v2552_v14  ;;  %v2562_v26 = vadd.f32 %v2561_v6, %v2560_v19  ;;  %v2583_v53 = vmul.f32 %v8780_v9, %v8772_v63 }
 0x1fd   :  { %v2524_v18 = vadd.f32 %v2523_v46, %v2522_v57  ;;  %v2547_v15 = vrot.slane %v2546_v45, 2  ;;  %v2584_v54 = vmul.f32 %v8781_v33, %v8775_v50  ;;  %v2532_v52 = vadd.f32 %v2531_v61, %v2530_v37 }
 0x1fe   :  { %v2540_v49 = vadd.f32 %v2539_v16, %v2538_v27  ;;  %v2555_v59 = vrot.slane %v2554_v62, 2  ;;  %v2563_v39 = vrot.slane %v2562_v26, 2  ;;  %v2585_v11 = vmul.f32 %v8782_v29, %v8772_v63 }
 0x1ff   :  { %v2525_v17 = vrot.slane %v2524_v18, 1  ;;  %v2548_v43 = vadd.f32 %v2547_v15, %v2546_v45  ;;  %v2586_v14 = vmul.f32 %v8783_v30, %v8775_v50  ;;  %v2533_v19 = vrot.slane %v2532_v52, 1 }
 0x200   :  { %v2541_v57 = vrot.slane %v2540_v49, 1  ;;  %v2556_v32 = vadd.f32 %v2555_v59, %v2554_v62  ;;  %v2564_v6 = vadd.f32 %v2563_v39, %v2562_v26  ;;  %v2587_v37 = vmul.f32 %v8784_v31, %v8772_v63 }
 0x201   :  { %v2526_v46 = vadd.f32 %v2525_v17, %v2524_v18  ;;  %v2549_v51 = vrot.slane %v2548_v43, 1  ;;  %v2588_v27 = vmul.f32 %v8755_v55, %v8775_v50  ;;  %v2534_v61 = vadd.f32 %v2533_v19, %v2532_v52 }
 0x202   :  { %v2542_v45 = vadd.f32 %v2541_v57, %v2540_v49  ;;  %v2557_v16 = vrot.slane %v2556_v32, 1  ;;  %v2565_v15 = vrot.slane %v2564_v6, 1  ;;  %v2599_v36 = vrot.slane %v2579_v0, 2 }
 0x203   :  { %v2550_v24 = vadd.f32 %v2549_v51, %v2548_v43  ;;  %v2567_v13 = vmul.f32 %v8765_v21, %v2526_v46  ;;  %v2600_v8 = vrot.slane %v6887_v44, 2  ;;  %v2568_v18 = vmul.f32 %v8766_v34, %v2534_v61 }
 0x204   :  { %v2558_v62 = vadd.f32 %v2557_v16, %v2556_v32  ;;  %v2566_v26 = vadd.f32 %v2565_v15, %v2564_v6  ;;  %v2569_v59 = vmul.f32 %v8767_v7, %v2542_v45  ;;  %v2602_v49 = vrot.slane %v2581_v25, 2 }
 0x205   :  { %v2570_v63 = vmul.f32 %v8769_v2, %v2550_v24  ;;  %v6911_v50 = vmul.f32 %v6473_v47, %v2567_v13  ;;  %v2601_v52 = vsel %vm1227_vm10, %v2599_v36, %v2600_v8  ;;  %v6917_v44 = vmul.f32 %v6473_v47, %v2568_v18 }
 0x206   :  { %v2571_v51 = vmul.f32 %v8773_v40, %v2558_v62  ;;  %v2572_v0 = vmul.f32 %v8774_v23, %v2566_v26  ;;  %v6920_v39 = vmul.f32 %v6473_v47, %v2569_v59  ;;  %v2603_v24 = vrot.slane %v2582_v1, 2 }
 0x207   :  { %8788 = vst [vmem:[#allocation20_spill] sm:$0xff] %v6917_v44  ;;  %v6923_v17 = vmul.f32 %v6473_v47, %v2570_v63  ;;  %v2605_v43 = vrot.slane %v2583_v53, 2  ;;  %v2606_v13 = vrot.slane %v2584_v54, 2  ;;  %v2608_v25 = vrot.slane %v2585_v11, 2 }
 0x208   :  { %v6926_v19 = vmul.f32 %v6473_v47, %v2571_v51  ;;  %v6929_v36 = vmul.f32 %v6473_v47, %v2572_v0  ;;  %v2609_v57 = vrot.slane %v2586_v14, 2  ;;  %v2604_v32 = vsel %vm1227_vm10, %v2602_v49, %v2603_v24 }
 0x209   :  { %8789 = vst [vmem:[#allocation18_spill] sm:$0xff] %v6923_v17  ;;  %v2607_v6 = vsel %vm1227_vm10, %v2605_v43, %v2606_v13  ;;  %v2611_v46 = vrot.slane %v2587_v37, 2  ;;  %v2612_v61 = vrot.slane %v2588_v27, 2  ;;  %v2624_v1 = vsel %vm61_vm0, %v2600_v8, 0.0 }
 0x20a   :  { %8790 = vst [vmem:[#allocation21_spill] sm:$0xff] %v6926_v19  ;;  %8791 = vst [vmem:[#allocation33_spill] sm:$0xff] %v6929_v36  ;;  %v2610_v45 = vsel %vm1227_vm10, %v2608_v25, %v2609_v57  ;;  %v2632_v53 = vsel %vm61_vm0, %v2603_v24, 0.0  ;;  %v2640_v54 = vsel %vm61_vm0, %v2606_v13, 0.0  ;;  %v2625_v47 = vadd.f32 %v2624_v1, %v2601_v52 }
 0x20b   :  { %v2613_v16 = vsel %vm1227_vm10, %v2611_v46, %v2612_v61  ;;  %v2633_v15 = vadd.f32 %v2632_v53, %v2604_v32  ;;  %v2641_v11 = vadd.f32 %v2640_v54, %v2607_v6  ;;  %v2648_v14 = vsel %vm61_vm0, %v2609_v57, 0.0 }
 0x20c   :  { %v2656_v62 = vsel %vm61_vm0, %v2612_v61, 0.0  ;;  %v2674_v37 = vmul.f32 %v8778_v42, %v8776_v4  ;;  %v2675_v27 = vmul.f32 %v8779_v35, %v8777_v38  ;;  %v2626_v8 = vrot.slane %v2625_v47, 4 }
 0x20d   :  { %v2634_v26 = vrot.slane %v2633_v15, 4  ;;  %v2642_v18 = vrot.slane %v2641_v11, 4  ;;  %v2649_v59 = vadd.f32 %v2648_v14, %v2610_v45  ;;  %v2657_v63 = vadd.f32 %v2656_v62, %v2613_v16 }
 0x20e   :  { %v2676_v52 = vmul.f32 %v8780_v9, %v8776_v4  ;;  %v2677_v49 = vmul.f32 %v8781_v33, %v8777_v38  ;;  %v2678_v51 = vmul.f32 %v8782_v29, %v8776_v4  ;;  %v2627_v0 = vadd.f32 %v2626_v8, %v2625_v47 }
 0x20f   :  { %v2635_v24 = vadd.f32 %v2634_v26, %v2633_v15  ;;  %v2643_v43 = vadd.f32 %v2642_v18, %v2641_v11  ;;  %v2650_v13 = vrot.slane %v2649_v59, 4  ;;  %v2658_v25 = vrot.slane %v2657_v63, 4 }
 0x210   :  { %v2679_v57 = vmul.f32 %v8783_v30, %v8777_v38  ;;  %v2680_v32 = vmul.f32 %v8784_v31, %v8776_v4  ;;  %v2681_v6 = vmul.f32 %v8755_v55, %v8777_v38  ;;  %v2628_v46 = vrot.slane %v2627_v0, 2 }
 0x211   :  { %v2636_v61 = vrot.slane %v2635_v24, 2  ;;  %v2644_v45 = vrot.slane %v2643_v43, 2  ;;  %v2651_v1 = vadd.f32 %v2650_v13, %v2649_v59  ;;  %v2659_v53 = vadd.f32 %v2658_v25, %v2657_v63 }
 0x212   :  { %v2690_v54 = vrot.slane %v2674_v37, 2  ;;  %v2691_v16 = vrot.slane %v2675_v27, 2  ;;  %v2693_v47 = vrot.slane %v2676_v52, 2  ;;  %v2629_v15 = vadd.f32 %v2628_v46, %v2627_v0 }
 0x213   :  { %v2637_v11 = vadd.f32 %v2636_v61, %v2635_v24  ;;  %v2645_v14 = vadd.f32 %v2644_v45, %v2643_v43  ;;  %v2652_v62 = vrot.slane %v2651_v1, 2  ;;  %v2660_v8 = vrot.slane %v2659_v53, 2 }
 0x214   :  { %v2692_v26 = vsel %vm1227_vm10, %v2690_v54, %v2691_v16  ;;  %v2694_v18 = vrot.slane %v2677_v49, 2  ;;  %v2696_v4 = vrot.slane %v2678_v51, 2  ;;  %v2630_v36 = vrot.slane %v2629_v15, 1 }
 0x215   :  { %v2638_v44 = vrot.slane %v2637_v11, 1  ;;  %v2646_v38 = vrot.slane %v2645_v14, 1  ;;  %v2653_v19 = vadd.f32 %v2652_v62, %v2651_v1  ;;  %v2661_v17 = vadd.f32 %v2660_v8, %v2659_v53 }
 0x216   :  { %v2695_v59 = vsel %vm1227_vm10, %v2693_v47, %v2694_v18  ;;  %v2697_v63 = vrot.slane %v2679_v57, 2  ;;  %v2699_v37 = vrot.slane %v2680_v32, 2  ;;  %v2631_v27 = vadd.f32 %v2630_v36, %v2629_v15 }
 0x217   :  { %v2639_v52 = vadd.f32 %v2638_v44, %v2637_v11  ;;  %v2647_v0 = vadd.f32 %v2646_v38, %v2645_v14  ;;  %v2654_v24 = vrot.slane %v2653_v19, 1  ;;  %v2662_v43 = vrot.slane %v2661_v17, 1 }
 0x218   :  { %v2698_v13 = vsel %vm1227_vm10, %v2696_v4, %v2697_v63  ;;  %v2700_v25 = vrot.slane %v2681_v6, 2  ;;  %v2710_v49 = vsel %vm61_vm0, %v2691_v16, 0.0  ;;  %v2664_v46 = vmul.f32 %v8766_v34, %v2631_v27 }
 0x219   :  { %v2655_v51 = vadd.f32 %v2654_v24, %v2653_v19  ;;  %v2665_v61 = vmul.f32 %v8767_v7, %v2639_v52  ;;  %v2666_v45 = vmul.f32 %v8769_v2, %v2647_v0  ;;  %v2663_v1 = vadd.f32 %v2662_v43, %v2661_v17 }
 0x21a   :  { %v2701_v57 = vsel %vm1227_vm10, %v2699_v37, %v2700_v25  ;;  %v2711_v36 = vadd.f32 %v2710_v49, %v2692_v26  ;;  %v2718_v44 = vsel %vm61_vm0, %v2694_v18, 0.0  ;;  %v6967_v53 = vmul.f32 %v8765_v21, %v2664_v46 }
 0x21b   :  { %v2667_v32 = vmul.f32 %v8773_v40, %v2655_v51  ;;  %v6970_v6 = vmul.f32 %v8765_v21, %v2665_v61  ;;  %v6973_v19 = vmul.f32 %v8765_v21, %v2666_v45  ;;  %v2668_v54 = vmul.f32 %v8774_v23, %v2663_v1 }
 0x21c   :  { %v2712_v16 = vrot.slane %v2711_v36, 4  ;;  %v2719_v17 = vadd.f32 %v2718_v44, %v2695_v59  ;;  %v2726_v47 = vsel %vm61_vm0, %v2697_v63, 0.0  ;;  %v2734_v14 = vsel %vm61_vm0, %v2700_v25, 0.0 }
 0x21d   :  { %v6978_v15 = vmul.f32 %v8765_v21, %v2667_v32  ;;  %v2727_v11 = vadd.f32 %v2726_v47, %v2698_v13  ;;  %v2750_v62 = vmul.f32 %v8780_v9, %v8778_v42  ;;  %v6984_v8 = vmul.f32 %v8765_v21, %v2668_v54 }
 0x21e   :  { %v2713_v26 = vadd.f32 %v2712_v16, %v2711_v36  ;;  %v2720_v18 = vrot.slane %v2719_v17, 4  ;;  %v2735_v4 = vadd.f32 %v2734_v14, %v2701_v57  ;;  %v2751_v59 = vmul.f32 %v8781_v33, %v8779_v35 }
 0x21f   :  { %v2728_v38 = vrot.slane %v2727_v11, 4  ;;  %v2752_v63 = vmul.f32 %v8782_v29, %v8778_v42  ;;  %v2753_v37 = vmul.f32 %v8783_v30, %v8779_v35  ;;  %v2754_v21 = vmul.f32 %v8784_v31, %v8778_v42 }
 0x220   :  { %v2714_v27 = vrot.slane %v2713_v26, 2  ;;  %v2721_v52 = vadd.f32 %v2720_v18, %v2719_v17  ;;  %v2736_v0 = vrot.slane %v2735_v4, 4  ;;  %v2755_v43 = vmul.f32 %v8755_v55, %v8779_v35 }
 0x221   :  { %v2729_v24 = vadd.f32 %v2728_v38, %v2727_v11  ;;  %v2762_v13 = vrot.slane %v2750_v62, 2  ;;  %v2763_v25 = vrot.slane %v2751_v59, 2  ;;  %v2765_v61 = vrot.slane %v2752_v63, 2 }
 0x222   :  { %v2715_v49 = vadd.f32 %v2714_v27, %v2713_v26  ;;  %v2722_v51 = vrot.slane %v2721_v52, 2  ;;  %v2737_v46 = vadd.f32 %v2736_v0, %v2735_v4  ;;  %v2766_v57 = vrot.slane %v2753_v37, 2 }
 0x223   :  { %v2730_v45 = vrot.slane %v2729_v24, 2  ;;  %v2764_v1 = vsel %vm1227_vm10, %v2762_v13, %v2763_v25  ;;  %v2768_v36 = vrot.slane %v2754_v21, 2  ;;  %v2769_v16 = vrot.slane %v2755_v43, 2 }
 0x224   :  { %v2716_v44 = vrot.slane %v2715_v49, 1  ;;  %v2723_v32 = vadd.f32 %v2722_v51, %v2721_v52  ;;  %v2738_v54 = vrot.slane %v2737_v46, 2  ;;  %v2767_v17 = vsel %vm1227_vm10, %v2765_v61, %v2766_v57 }
 0x225   :  { %v2731_v42 = vadd.f32 %v2730_v45, %v2729_v24  ;;  %v2777_v35 = vsel %vm61_vm0, %v2763_v25, 0.0  ;;  %v2785_v47 = vsel %vm61_vm0, %v2766_v57, 0.0  ;;  %v2770_v26 = vsel %vm1227_vm10, %v2768_v36, %v2769_v16 }
 0x226   :  { %v2717_v11 = vadd.f32 %v2716_v44, %v2715_v49  ;;  %v2724_v14 = vrot.slane %v2723_v32, 1  ;;  %v2739_v62 = vadd.f32 %v2738_v54, %v2737_v46  ;;  %v2778_v4 = vadd.f32 %v2777_v35, %v2764_v1 }
 0x227   :  { %v2732_v18 = vrot.slane %v2731_v42, 1  ;;  %v2786_v38 = vadd.f32 %v2785_v47, %v2767_v17  ;;  %v2793_v59 = vsel %vm61_vm0, %v2769_v16, 0.0  ;;  %v2807_v43 = vmul.f32 %v8782_v29, %v8780_v9 }
 0x228   :  { %v2725_v63 = vadd.f32 %v2724_v14, %v2723_v32  ;;  %v2740_v37 = vrot.slane %v2739_v62, 1  ;;  %v2742_v27 = vmul.f32 %v8767_v7, %v2717_v11  ;;  %v2794_v52 = vadd.f32 %v2793_v59, %v2770_v26 }
 0x229   :  { %v2733_v0 = vadd.f32 %v2732_v18, %v2731_v42  ;;  %v2779_v21 = vrot.slane %v2778_v4, 4  ;;  %v2787_v24 = vrot.slane %v2786_v38, 4  ;;  %v2808_v1 = vmul.f32 %v8783_v30, %v8781_v33 }
 0x22a   :  { %v2741_v13 = vadd.f32 %v2740_v37, %v2739_v62  ;;  %v2743_v25 = vmul.f32 %v8769_v2, %v2725_v63  ;;  %v7007_v49 = vmul.f32 %v8766_v34, %v2742_v27  ;;  %v2795_v51 = vrot.slane %v2794_v52, 4 }
 0x22b   :  { %v2744_v46 = vmul.f32 %v8773_v40, %v2733_v0  ;;  %v2780_v61 = vadd.f32 %v2779_v21, %v2778_v4  ;;  %v2788_v45 = vadd.f32 %v2787_v24, %v2786_v38  ;;  %v2809_v32 = vmul.f32 %v8784_v31, %v8780_v9 }
 0x22c   :  { %v2745_v57 = vmul.f32 %v8774_v23, %v2741_v13  ;;  %v7014_v36 = vmul.f32 %v8766_v34, %v2743_v25  ;;  %v2796_v44 = vadd.f32 %v2795_v51, %v2794_v52  ;;  %v2810_v17 = vmul.f32 %v8755_v55, %v8781_v33 }
 0x22d   :  { %v7019_v54 = vmul.f32 %v8766_v34, %v2744_v46  ;;  %v2781_v16 = vrot.slane %v2780_v61, 2  ;;  %v2789_v42 = vrot.slane %v2788_v45, 2  ;;  %v2815_v11 = vrot.slane %v2807_v43, 2 }
 0x22e   :  { %v7024_v35 = vmul.f32 %v8766_v34, %v2745_v57  ;;  %v2797_v47 = vrot.slane %v2796_v44, 2  ;;  %v2816_v14 = vrot.slane %v2808_v1, 2  ;;  %v2818_v18 = vrot.slane %v2809_v32, 2 }
 0x22f   :  { %v2782_v62 = vadd.f32 %v2781_v16, %v2780_v61  ;;  %v2790_v26 = vadd.f32 %v2789_v42, %v2788_v45  ;;  %v2819_v4 = vrot.slane %v2810_v17, 2  ;;  %v2845_v63 = vmul.f32 %v8784_v31, %v8782_v29 }
 0x230   :  { %v2798_v38 = vadd.f32 %v2797_v47, %v2796_v44  ;;  %v2817_v9 = vsel %vm1227_vm10, %v2815_v11, %v2816_v14  ;;  %v2825_v59 = vsel %vm61_vm0, %v2816_v14, 0.0  ;;  %v2846_v21 = vmul.f32 %v8755_v55, %v8783_v30 }
 0x231   :  { %v2783_v37 = vrot.slane %v2782_v62, 1  ;;  %v2791_v33 = vrot.slane %v2790_v26, 1  ;;  %v2820_v34 = vsel %vm1227_vm10, %v2818_v18, %v2819_v4  ;;  %v2826_v27 = vadd.f32 %v2825_v59, %v2817_v9 }
 0x232   :  { %v2799_v52 = vrot.slane %v2798_v38, 1  ;;  %v2833_v0 = vsel %vm61_vm0, %v2819_v4, 0.0  ;;  %v2849_v24 = vrot.slane %v2845_v63, 2  ;;  %v2850_v61 = vrot.slane %v2846_v21, 2 }
 0x233   :  { %v2784_v43 = vadd.f32 %v2783_v37, %v2782_v62  ;;  %v2792_v13 = vadd.f32 %v2791_v33, %v2790_v26  ;;  %v2827_v25 = vrot.slane %v2826_v27, 4  ;;  %v2834_v51 = vadd.f32 %v2833_v0, %v2820_v34 }
 0x234   :  { %v2800_v46 = vadd.f32 %v2799_v52, %v2798_v38  ;;  %v2872_v29 = vrot.slane %v6749_v28, 7  ;;  %v2874_v31 = vrot.slane %v6753_v41, 6  ;;  %v2851_v55 = vsel %vm1227_vm10, %v2849_v24, %v2850_v61 }
 0x235   :  { %v2801_v45 = vmul.f32 %v8769_v2, %v2784_v43  ;;  %v2802_v1 = vmul.f32 %v8773_v40, %v2792_v13  ;;  %v2828_v57 = vadd.f32 %v2827_v25, %v2826_v27  ;;  %v2835_v44 = vrot.slane %v2834_v51, 4 }
 0x236   :  { %v2803_v32 = vmul.f32 %v8774_v23, %v2800_v46  ;;  %v2854_v30 = vsel %vm61_vm0, %v2850_v61, 0.0  ;;  %v2873_v16 = vsel %vm1124_vm1, %v2872_v29, %v6746_v10  ;;  %v2876_v62 = vrot.slane %v6756_v22, 5 }
 0x237   :  { %v7044_v42 = vmul.f32 %v8767_v7, %v2801_v45  ;;  %v7047_v28 = vmul.f32 %v8767_v7, %v2802_v1  ;;  %v2829_v41 = vrot.slane %v2828_v57, 2  ;;  %v2836_v17 = vadd.f32 %v2835_v44, %v2834_v51 }
 0x238   :  { %v7050_v47 = vmul.f32 %v8767_v7, %v2803_v32  ;;  %v2855_v11 = vadd.f32 %v2854_v30, %v2851_v55  ;;  %v2875_v14 = vsel %vm1127_vm2, %v2874_v31, %v2873_v16  ;;  %v2878_v10 = vrot.slane %v6759_v48, 4  ;;  %v8794_v31 = vld [vmem:[#allocation19_spill] sm:$0xff]  ;;  %v8795_v16 = vld [vmem:[#allocation18_spill] sm:$0xff] }
 0x239   :  { %v2830_v26 = vadd.f32 %v2829_v41, %v2828_v57  ;;  %v2837_v18 = vrot.slane %v2836_v17, 2  ;;  %v2880_v4 = vrot.slane %v6768_v5, 3  ;;  %v2877_v9 = vsel %vm1130_vm3, %v2876_v62, %v2875_v14  ;;  %v8797_v62 = vld [vmem:[#allocation20_spill] sm:$0xff] }
 0x23a   :  { %v2856_v38 = vrot.slane %v2855_v11, 4  ;;  %v2882_v59 = vrot.slane %v6781_v20, 2  ;;  %v2884_v63 = vrot.slane %v6784_v60, 1  ;;  %v2879_v33 = vsel %vm1133_vm4, %v2878_v10, %v2877_v9 }
 0x23b   :  { %v2831_v7 = vrot.slane %v2830_v26, 1  ;;  %v2838_v37 = vadd.f32 %v2837_v18, %v2836_v17  ;;  %v2894_v34 = vrot.slane %v6841_v3, 7  ;;  %v2881_v27 = vsel %vm1136_vm5, %v2880_v4, %v2879_v33  ;;  %v8792_v3 = vld [vmem:[#allocation16_spill] sm:$0xff]  ;;  %v8796_v17 = vld [vmem:[#allocation21_spill] sm:$0xff] }
 0x23c   :  { %v2857_v22 = vadd.f32 %v2856_v38, %v2855_v11  ;;  %v2896_v48 = vrot.slane %v6844_v58, 6  ;;  %v2898_v5 = vrot.slane %v6847_v56, 5  ;;  %v2883_v21 = vsel %vm1139_vm6, %v2882_v59, %v2881_v27  ;;  %v8793_v56 = vld [vmem:[#allocation54_spill] sm:$0xff] }
 0x23d   :  { %v2832_v52 = vadd.f32 %v2831_v7, %v2830_v26  ;;  %v2839_v0 = vrot.slane %v2838_v37, 1  ;;  %v2895_v20 = vsel %vm1124_vm1, %v2894_v34, %v6834_v12  ;;  %v2885_v24 = vsel %vm1142_vm7, %v2884_v63, %v2883_v21  ;;  %v8798_v26 = vld [vmem:[#allocation33_spill] sm:$0xff] }
 0x23e   :  { %v2858_v60 = vrot.slane %v2857_v22, 2  ;;  %v2897_v43 = vsel %vm1127_vm2, %v2896_v48, %v2895_v20  ;;  %v2900_v13 = vrot.slane %v8792_v3, 4  ;;  %v2902_v46 = vrot.slane %v8793_v56, 3 }
 0x23f   :  { %v2840_v25 = vadd.f32 %v2839_v0, %v2838_v37  ;;  %v2841_v51 = vmul.f32 %v8773_v40, %v2832_v52  ;;  %v2899_v58 = vsel %vm1130_vm3, %v2898_v5, %v2897_v43  ;;  %v2904_v45 = vrot.slane %v8794_v31, 2 }
 0x240   :  { %v2859_v61 = vadd.f32 %v2858_v60, %v2857_v22  ;;  %v2901_v29 = vsel %vm1133_vm4, %v2900_v13, %v2899_v58  ;;  %v2913_v12 = vrot.slane %v6911_v50, 1  ;;  %v2914_v32 = vrot.slane %v6920_v39, 7  ;;  %v8799_v13 = vld [vmem:[#allocation53_spill] sm:$0xff] }
 0x241   :  { %v2842_v1 = vmul.f32 %v8774_v23, %v2840_v25  ;;  %v2843_v57 = vmul.f32 %v8769_v2, %v2841_v51  ;;  %v2903_v44 = vsel %vm1136_vm5, %v2902_v46, %v2901_v29  ;;  %v2916_v41 = vrot.slane %v8795_v16, 6  ;;  %v8800_v25 = vld [vmem:[#allocation56_spill] sm:$0xff] }
 0x242   :  { %v2860_v55 = vrot.slane %v2859_v61, 1  ;;  %v2905_v30 = vsel %vm1139_vm6, %v2904_v45, %v2903_v44  ;;  %v2918_v11 = vrot.slane %v8796_v17, 5  ;;  %v2915_v50 = vsel %vm1124_vm1, %v2914_v32, %v8797_v62 }
 0x243   :  { %v2844_v14 = vmul.f32 %v8769_v2, %v2842_v1  ;;  %v2920_v18 = vrot.slane %v8798_v26, 4  ;;  %v2929_v10 = vrot.slane %v6967_v53, 3  ;;  %v2917_v38 = vsel %vm1127_vm2, %v2916_v41, %v2915_v50 }
 0x244   :  { %v2861_v4 = vadd.f32 %v2860_v55, %v2859_v61  ;;  %v2930_v39 = vrot.slane %v6970_v6, 2  ;;  %v2932_v9 = vrot.slane %v6973_v19, 1  ;;  %v2919_v59 = vsel %vm1130_vm3, %v2918_v11, %v2917_v38 }
 0x245   :  { %v2934_v63 = vrot.slane %v6984_v8, 7  ;;  %v2942_v2 = vrot.slane %v7007_v49, 6  ;;  %v2943_v7 = vrot.slane %v7014_v36, 5  ;;  %v2921_v33 = vsel %vm1133_vm4, %v2920_v18, %v2919_v59 }
 0x246   :  { %v2862_v37 = vmul.f32 %v8774_v23, %v2861_v4  ;;  %v2931_v53 = vsel %vm1139_vm6, %v2930_v39, %v2929_v10  ;;  %v2945_v34 = vrot.slane %v7019_v54, 4  ;;  %v2947_v8 = vrot.slane %v7024_v35, 3 }
 0x247   :  { %v2933_v6 = vsel %vm1142_vm7, %v2932_v9, %v2931_v53  ;;  %v2935_v19 = vsel %vm1124_vm1, %v2934_v63, %v6978_v15  ;;  %v2944_v22 = vsel %vm1130_vm3, %v2943_v7, %v2942_v2  ;;  %v2953_v23 = vrot.slane %v7044_v42, 2 }
 0x248   :  { %v2863_v49 = vmul.f32 %v8773_v40, %v2862_v37  ;;  %v2946_v36 = vsel %vm1133_vm4, %v2945_v34, %v2944_v22  ;;  %v2954_v27 = vrot.slane %v7047_v28, 1  ;;  %v2960_v54 = vrot.slane %v2843_v57, 7 }
 0x249   :  { %v2948_v48 = vsel %vm1136_vm5, %v2947_v8, %v2946_v36  ;;  %v2961_v5 = vrot.slane %v2844_v14, 6  ;;  %v2964_v52 = vsel %vm1222_vm8, %v2905_v30, %v2913_v12  ;;  %v2965_v0 = vsel %vm1224_vm9, %v2921_v33, %v2933_v6 }
 0x24a   :  { %v2955_v15 = vsel %vm1142_vm7, %v2954_v27, %v2953_v23  ;;  %v2966_v35 = vsel %vm61_vm0, %v2935_v19, %v2948_v48  ;;  %v2970_v21 = vand.u32 2147483647, %v2885_v24  ;;  %v2971_v42 = vand.u32 2147483647, %v2964_v52  ;;  %v8801_v24 = vld [vmem:[#allocation59_spill] sm:$0xff] }
 0x24b   :  { %v2962_v40 = vsel %vm1127_vm2, %v2961_v5, %v2960_v54  ;;  %v2967_v20 = vsel %vm1227_vm10, %v2966_v35, %v2955_v15  ;;  %v2972_v60 = vand.u32 2147483647, %v2965_v0  ;;  %v3090_v51 = vsel %vm1124_vm1, %v8800_v25, %v8799_v13 }
 0x24c   :  { %v2968_v28 = vsel %vm1229_vm11, %v7050_v47, %v2962_v40  ;;  %v2973_v43 = vand.u32 2147483647, %v2967_v20  ;;  %v2975_v3 = vmin.f32 %v2970_v21, 1.0  ;;  %v2976_v56 = vmin.f32 %v2971_v42, 1.0 }
 0x24d   :  { %v2969_v58 = vsel %vm1231_vm12, %v2968_v28, %v2863_v49  ;;  %v2977_v46 = vmin.f32 %v2972_v60, 1.0  ;;  %v7123_v61 = vsel %vm1127_vm2, %v8801_v24, %v3090_v51 }
 0x24e   :  { %v2974_v29 = vand.u32 2147483647, %v2969_v58  ;;  %v2978_v31 = vmin.f32 %v2973_v43, 1.0  ;;  %v2980_v45 = vadd.f32 1.0, %v2975_v3  ;;  %v2990_v12 = vsub.f32 1.0, %v2975_v3 }
 0x24f   :  { %v2981_v1 = vadd.f32 1.0, %v2976_v56  ;;  %v2982_v47 = vadd.f32 1.0, %v2977_v46  ;;  %v2991_v57 = vsub.f32 1.0, %v2976_v56  ;;  %v2992_v44 = vsub.f32 1.0, %v2977_v46 }
 0x250   :  { %v2979_v32 = vmin.f32 %v2974_v29, 1.0  ;;  %v2983_v55 = vadd.f32 1.0, %v2978_v31  ;;  %v2985_v30 = vmul.f32 0.5, %v2980_v45  ;;  %v2993_v16 = vsub.f32 1.0, %v2978_v31 }
 0x251   :  { %v2986_v41 = vmul.f32 0.5, %v2981_v1  ;;  %v2987_v17 = vmul.f32 0.5, %v2982_v47  ;;  %v7125_v11 = vmul.f32 0.5, %v2990_v12  ;;  %v7127_v14 = vmul.f32 0.5, %v2991_v57 }
 0x252   :  { %v2984_v62 = vadd.f32 1.0, %v2979_v32  ;;  %v2988_v50 = vmul.f32 0.5, %v2983_v55  ;;  %v2994_v26 = vsub.f32 1.0, %v2979_v32  ;;  %v7129_v18 = vmul.f32 0.5, %v2992_v44 }
 0x253   :  { %v7131_v10 = vmul.f32 0.5, %v2993_v16  ;;  %v3000_v4 = vmul.f32 2.0, %v7125_v11  ;;  %v3001_v38 = vmul.f32 2.0, %v7127_v14  ;;  %v3005_v39 = vmul.f32 14.0, %v2985_v30 }
 0x254   :  { %v2989_v9 = vmul.f32 0.5, %v2984_v62  ;;  %v7135_v59 = vmul.f32 0.5, %v2994_v26  ;;  %v3002_v63 = vmul.f32 2.0, %v7129_v18  ;;  %v3006_v2 = vmul.f32 14.0, %v2986_v41 }
 0x255   :  { %v3003_v7 = vmul.f32 2.0, %v7131_v10  ;;  %v3007_v37 = vmul.f32 14.0, %v2987_v17  ;;  %v3008_v33 = vmul.f32 14.0, %v2988_v50  ;;  %v3010_v53 = vadd.f32 %v3005_v39, %v3000_v4 }
 0x256   :  { %v3004_v34 = vmul.f32 2.0, %v7135_v59  ;;  %v3009_v6 = vmul.f32 14.0, %v2989_v9  ;;  %v3011_v19 = vadd.f32 %v3006_v2, %v3001_v38  ;;  %v3015_v22 = vmul.f32 %v2985_v30, %v2985_v30 }
 0x257   :  { %v3012_v8 = vadd.f32 %v3007_v37, %v3002_v63  ;;  %v3013_v49 = vadd.f32 %v3008_v33, %v3003_v7  ;;  %v3016_v36 = vmul.f32 %v2986_v41, %v2986_v41  ;;  %v3017_v23 = vmul.f32 %v2987_v17, %v2987_v17  ;;  %v8802_v7 = vld [vmem:[#allocation58_spill] sm:$0xff]  ;;  %v8803_v33 = vld [vmem:[#allocation55_spill] sm:$0xff] }
 0x258   :  { %v3014_v27 = vadd.f32 %v3009_v6, %v3004_v34  ;;  %v3018_v48 = vmul.f32 %v2988_v50, %v2988_v50  ;;  %v3019_v54 = vmul.f32 %v2989_v9, %v2989_v9  ;;  %v3020_v5 = vmul.f32 %v3010_v53, %v7125_v11  ;;  %v8804_v53 = vld [vmem:[#allocation57_spill] sm:$0xff] }
 0x259   :  { %v3021_v52 = vmul.f32 %v3011_v19, %v7127_v14  ;;  %v3022_v15 = vmul.f32 %v3012_v8, %v7129_v18  ;;  %v3023_v0 = vmul.f32 %v3013_v49, %v7131_v10  ;;  %v3025_v35 = vmul.f32 42.0, %v3015_v22  ;;  %v8805_v8 = vld [vmem:[#allocation8_spill] sm:$0xff] }
 0x25a   :  { %v3024_v21 = vmul.f32 %v3014_v27, %v7135_v59  ;;  %v3026_v40 = vmul.f32 42.0, %v3016_v36  ;;  %v3027_v20 = vmul.f32 42.0, %v3017_v23  ;;  %v3028_v42 = vmul.f32 42.0, %v3018_v48  ;;  %v8806_v27 = vld [vmem:[#allocation24_spill] sm:$0xff] }
 0x25b   :  { %v3029_v60 = vmul.f32 42.0, %v3019_v54  ;;  %v3030_v28 = vadd.f32 %v3025_v35, %v3020_v5  ;;  %v3035_v43 = vmul.f32 %v3015_v22, %v2985_v30  ;;  %v3036_v3 = vmul.f32 %v3016_v36, %v2986_v41 }
 0x25c   :  { %v3031_v13 = vadd.f32 %v3026_v40, %v3021_v52  ;;  %v3032_v25 = vadd.f32 %v3027_v20, %v3022_v15  ;;  %v3033_v51 = vadd.f32 %v3028_v42, %v3023_v0  ;;  %v3037_v58 = vmul.f32 %v3017_v23, %v2987_v17  ;;  %v8808_v0 = vld [vmem:[#allocation10_spill] sm:$0xff]  ;;  %v8809_v40 = vld [vmem:[#allocation11_spill] sm:$0xff] }
 0x25d   :  { %v3034_v56 = vadd.f32 %v3029_v60, %v3024_v21  ;;  %v3038_v46 = vmul.f32 %v3018_v48, %v2988_v50  ;;  %v3039_v24 = vmul.f32 %v3019_v54, %v2989_v9  ;;  %v3040_v29 = vmul.f32 %v3030_v28, %v7125_v11  ;;  %v8807_v48 = vld [vmem:[#allocation22_spill] sm:$0xff] }
 0x25e   :  { %v3041_v31 = vmul.f32 %v3031_v13, %v7127_v14  ;;  %v3042_v45 = vmul.f32 %v3032_v25, %v7129_v18  ;;  %v3043_v12 = vmul.f32 %v3033_v51, %v7131_v10  ;;  %v3045_v1 = vmul.f32 70.0, %v3035_v43  ;;  %v8812_v28 = vld [vmem:[#allocation26_spill] sm:$0xff]  ;;  %v8813_v43 = vld [vmem:[#allocation27_spill] sm:$0xff]  ;;  %v8814_v13 = vld [vmem:[#allocation25_spill] sm:$0xff] }
 0x25f   :  { %v3044_v47 = vmul.f32 %v3034_v56, %v7135_v59  ;;  %v3046_v57 = vmul.f32 70.0, %v3036_v3  ;;  %v3047_v44 = vmul.f32 70.0, %v3037_v58  ;;  %v3048_v32 = vmul.f32 70.0, %v3038_v46  ;;  %v8815_v51 = vld [vmem:[#allocation28_spill] sm:$0xff]  ;;  %v8816_v56 = vld [vmem:[#allocation38_spill] sm:$0xff] }
 0x260   :  { %v3049_v55 = vmul.f32 70.0, %v3039_v24  ;;  %v3050_v30 = vadd.f32 %v3045_v1, %v3040_v29  ;;  %v3055_v16 = vmul.f32 %v7125_v11, %v7125_v11  ;;  %v3056_v41 = vmul.f32 %v7127_v14, %v7127_v14  ;;  %v8817_v24 = vld [vmem:[#allocation40_spill] sm:$0xff] }
 0x261   :  { %v3051_v17 = vadd.f32 %v3046_v57, %v3041_v31  ;;  %v3052_v62 = vadd.f32 %v3047_v44, %v3042_v45  ;;  %v3053_v50 = vadd.f32 %v3048_v32, %v3043_v12  ;;  %v3057_v26 = vmul.f32 %v7129_v18, %v7129_v18  ;;  %v8818_v31 = vld [vmem:[#allocation35_spill] sm:$0xff]  ;;  %v8819_v12 = vld [vmem:[#allocation29_spill] sm:$0xff] }
 0x262   :  { %v3054_v4 = vadd.f32 %v3049_v55, %v3044_v47  ;;  %v3058_v38 = vmul.f32 %v7131_v10, %v7131_v10  ;;  %v3059_v39 = vmul.f32 %v7135_v59, %v7135_v59  ;;  %v3060_v9 = vmul.f32 %v3055_v16, %v7125_v11  ;;  %v8820_v47 = vld [vmem:[#allocation42_spill] sm:$0xff]  ;;  %v8821_v44 = vld [vmem:[#allocation45_spill] sm:$0xff]  ;;  %v7208_v55 = vld [vmem:[#allocation2 + $0x18] sm:$0x3f] }
 0x263   :  { %v3061_v63 = vmul.f32 %v3056_v41, %v7127_v14  ;;  %v3062_v2 = vmul.f32 %v3057_v26, %v7129_v18  ;;  %v3092_v37 = vsel %vm1130_vm3, %v8802_v7, %v7123_v61  ;;  %v3111_v34 = vsel %vm1124_vm1, %v8804_v53, %v8803_v33  ;;  %8822 = vst [vmem:[#allocation34_spill] sm:$0xff] %v7208_v55  ;;  %v8824_v41 = vld [vmem:[#allocation61_spill] sm:$0xff]  ;;  %v8826_v26 = vld [vmem:[#allocation39_spill] sm:$0xff]  ;;  %v7227_v53 = vld [vmem:[#allocation2 + $0x58] sm:$0x3f] }
 0x264   :  { %v3063_v6 = vmul.f32 %v3058_v38, %v7131_v10  ;;  %v3064_v19 = vmul.f32 %v3059_v39, %v7135_v59  ;;  %v3065_v22 = vmul.f32 %v3060_v9, %v7125_v11  ;;  %v3093_v49 = vsel %vm1133_vm4, %v8805_v8, %v3092_v37  ;;  %v7217_v38 = vld [vmem:[#allocation2 + $0x38] sm:$0x3f]  ;;  %v8828_v39 = vld [vmem:[#allocation30_spill] sm:$0xff]  ;;  %v8830_v37 = vld [vmem:[#allocation51_spill] sm:$0xff]  ;;  %8831 = vst [vmem:[#allocation36_spill] sm:$0xff] %v7227_v53 }
 0x265   :  { %v3066_v36 = vmul.f32 %v3061_v63, %v7127_v14  ;;  %v3067_v23 = vmul.f32 %v3062_v2, %v7129_v18  ;;  %v3094_v61 = vsel %vm1136_vm5, %v8806_v27, %v3093_v49  ;;  %v3112_v54 = vsel %vm1127_vm2, %v8807_v48, %v3111_v34  ;;  %v8810_v18 = vld [vmem:[#allocation60_spill] sm:$0xff]  ;;  %8827 = vst [vmem:[#allocation13_spill] sm:$0xff] %v7217_v38  ;;  %v8832_v34 = vld [vmem:[#allocation31_spill] sm:$0xff] }
 0x266   :  { %v3068_v5 = vmul.f32 %v3063_v6, %v7131_v10  ;;  %v3069_v52 = vmul.f32 %v3064_v19, %v7135_v59  ;;  %v3070_v15 = vmul.f32 %v3065_v22, %v3050_v30  ;;  %v3095_v11 = vsel %vm1139_vm6, %v8808_v0, %v3094_v61  ;;  %v8811_v10 = vld [vmem:[#allocation9_spill] sm:$0xff]  ;;  %v8829_v2 = vld [vmem:[#allocation48_spill] sm:$0xff]  ;;  %v7232_v22 = vld [vmem:[#allocation2 + $0x10] sm:$0xff] }
 0x267   :  { %v3071_v35 = vmul.f32 %v3066_v36, %v3051_v17  ;;  %v3072_v21 = vmul.f32 %v3067_v23, %v3052_v62  ;;  %v3096_v14 = vsel %vm1142_vm7, %v8809_v40, %v3095_v11  ;;  %v3113_v20 = vsel %vm1130_vm3, %v8810_v18, %v3112_v54  ;;  %v8823_v30 = vld [vmem:[#allocation37_spill] sm:$0xff]  ;;  %v7235_v49 = vld [vmem:[#allocation2 + $0x78] sm:$0x3f]  ;;  %v8838_v0 = vld [vmem:[#allocation23_spill] sm:$0xff] }
 0x268   :  { %v3073_v42 = vmul.f32 %v3068_v5, %v3053_v50  ;;  %v3074_v60 = vmul.f32 %v3069_v52, %v3054_v4  ;;  %3076 = vst [vmem:[#allocation5 + $0x28] sm:$0xff] %v3070_v15  ;;  %4930 = vst [vmem:[%s8337_s2 + $0x10] sm:$0xff] %v3096_v14  ;;  %v3114_v59 = vsel %vm1133_vm4, %v8811_v10, %v3113_v20  ;;  %v3153_v46 = vrot.slane %v8816_v56, 7  ;;  %v8825_v62 = vld [vmem:[#allocation17_spill] sm:$0xff]  ;;  %v7237_v36 = vld [vmem:[#allocation2 + $0x98] sm:$0x3f] }
 0x269   :  { %v3132_v3 = vsel %vm1124_vm1, %v8813_v43, %v8812_v28  ;;  %3077 = vst [vmem:[#allocation5 + $0x30] sm:$0xff] %v3071_v35  ;;  %3078 = vst [vmem:[#allocation5 + $0x38] sm:$0xff] %v3072_v21  ;;  %v3115_v25 = vsel %vm1136_vm5, %v8814_v13, %v3114_v59  ;;  %v3155_v29 = vrot.slane %v8817_v24, 6  ;;  %v3157_v57 = vrot.slane %v8820_v47, 5  ;;  %v8835_v23 = vld [vmem:[#allocation32_spill] sm:$0xff]  ;;  %v7254_v35 = vld [vmem:[#allocation2 + $0x30] sm:$0xff] }
 0x26a   :  { %v3133_v58 = vsel %vm1127_vm2, %v8815_v51, %v3132_v3  ;;  %3079 = vst [vmem:[#allocation5 + $0x40] sm:$0xff] %v3073_v42  ;;  %3080 = vst [vmem:[#allocation5 + $0x48] sm:$0xf] %v3074_v60  ;;  %v3116_v45 = vsel %vm1139_vm6, %v8818_v31, %v3115_v25  ;;  %v3159_v32 = vrot.slane %v8821_v44, 4  ;;  %v3154_v50 = vsel %vm1130_vm3, %v3153_v46, %v8825_v62  ;;  %v7244_v5 = vld [vmem:[#allocation2 + $0xb8] sm:$0x3f] }
 0x26b   :  { %v3134_v1 = vsel %vm1130_vm3, %v8819_v12, %v3133_v58  ;;  %v3117_v16 = vsel %vm1142_vm7, %v8823_v30, %v3116_v45  ;;  %v3161_v4 = vrot.slane %v8826_v26, 3  ;;  %v3156_v63 = vsel %vm1133_vm4, %v3155_v29, %v3154_v50  ;;  %8833 = vst [vmem:[#allocation12_spill] sm:$0xff] %v7235_v49  ;;  %8834 = vst [vmem:[#allocation14_spill] sm:$0xff] %v7237_v36  ;;  %v7246_v52 = vld [vmem:[#allocation2 + $0xd8] sm:$0x3f]  ;;  %v7267_v20 = vld [vmem:[#allocation2 + $0x50] sm:$0xff] }
 0x26c   :  { %v3135_v17 = vsel %vm1133_vm4, %v8824_v41, %v3134_v1  ;;  %4932 = vst [vmem:[%s8337_s2 + $0x40] sm:$0xff] %v3117_v16  ;;  %v3163_v7 = vrot.slane %v8829_v2, 2  ;;  %v3164_v33 = vrot.slane %v8830_v37, 1  ;;  %v3158_v19 = vsel %vm1136_vm5, %v3157_v57, %v3156_v63  ;;  %8836 = vst [vmem:[#allocation15_spill] sm:$0xff] %v7244_v5  ;;  %v7258_v14 = vld [vmem:[#allocation2 + $0xf8] sm:$0x3f] }
 0x26d   :  { %v3136_v9 = vsel %vm1136_vm5, %v8828_v39, %v3135_v17  ;;  %v3182_v8 = vrot.slane %v7232_v22, 4  ;;  %v3160_v61 = vsel %vm1139_vm6, %v3159_v32, %v3158_v19  ;;  %v3183_v54 = vrot.slane %v7208_v55, 4  ;;  %8837 = vst [vmem:[#allocation41_spill] sm:$0xff] %v7246_v52  ;;  %8839 = vst [vmem:[#allocation43_spill] sm:$0xff] %v7258_v14  ;;  %v7271_v10 = vld [vmem:[#allocation2 + $0x70] sm:$0xff] }
 0x26e   :  { %v3137_v6 = vsel %vm1139_vm6, %v8832_v34, %v3136_v9  ;;  %v3165_v48 = vsel %vm1124_vm1, %v3164_v33, %v3163_v7  ;;  %v3162_v15 = vsel %vm1142_vm7, %v3161_v4, %v3160_v61  ;;  %v3185_v21 = vrot.slane %v7254_v35, 4  ;;  %v7274_v28 = vld [vmem:[#allocation2 + $0x118] sm:$0x3f]  ;;  %v7278_v13 = vld [vmem:[#allocation2 + $0x90] sm:$0xff] }
 0x26f   :  { %v3138_v27 = vsel %vm1142_vm7, %v8835_v23, %v3137_v6  ;;  %v3166_v11 = vsel %vm1127_vm2, %v8838_v0, %v3165_v48  ;;  %v3186_v40 = vrot.slane %v7217_v38, 4  ;;  %4936 = vst [vmem:[%s8337_s2 + $0x9e] sm:$0xfc] %v3162_v15  ;;  %v3184_v18 = vsel %vm3181_vm13, %v3182_v8, %v3183_v54  ;;  %8840 = vst [vmem:[#allocation46_spill] sm:$0xff] %v7274_v28  ;;  %v7283_v56 = vld [vmem:[#allocation2 + $0xb0] sm:$0xff] }
 0x270   :  { %4934 = vst [vmem:[%s8337_s2 + $0x70] sm:$0xff] %v3138_v27  ;;  %4937 = vst [vmem:[%s8337_s2 + $0xa6] sm:$0x7] %v3166_v11  ;;  %v3188_v42 = vrot.slane %v7267_v20, 4  ;;  %v3189_v60 = vrot.slane %v7227_v53, 4  ;;  %v3191_v59 = vrot.slane %v7271_v10, 4 }
 0x271   :  { %v3187_v43 = vsel %vm3181_vm13, %v3185_v21, %v3186_v40  ;;  %v3192_v3 = vrot.slane %v7235_v49, 4  ;;  %v3194_v25 = vrot.slane %v7278_v13, 4  ;;  %v3195_v51 = vrot.slane %v7237_v36, 4  ;;  %v7287_v29 = vld [vmem:[#allocation2 + $0xd0] sm:$0xff] }
 0x272   :  { %v3190_v58 = vsel %vm3181_vm13, %v3188_v42, %v3189_v60  ;;  %v3197_v46 = vrot.slane %v7283_v56, 4  ;;  %v3198_v24 = vrot.slane %v7244_v5, 4  ;;  %v3200_v31 = vrot.slane %v7287_v29, 4  ;;  %v7293_v47 = vld [vmem:[#allocation2 + $0xf0] sm:$0xff] }
 0x273   :  { %v3193_v45 = vsel %vm3181_vm13, %v3191_v59, %v3192_v3  ;;  %v3196_v12 = vsel %vm3181_vm13, %v3194_v25, %v3195_v51  ;;  %v3201_v1 = vrot.slane %v7246_v52, 4  ;;  %v3203_v57 = vrot.slane %v7293_v47, 4  ;;  %v7298_v30 = vld [vmem:[#allocation2 + $0x110] sm:$0xff] }
 0x274   :  { %v3199_v44 = vsel %vm3181_vm13, %v3197_v46, %v3198_v24  ;;  %v3204_v32 = vrot.slane %v7258_v14, 4  ;;  %v3206_v16 = vrot.slane %v7298_v30, 4  ;;  %v3207_v41 = vrot.slane %v7274_v28, 4 }
 0x275   :  { %v3202_v17 = vsel %vm3181_vm13, %v3200_v31, %v3201_v1  ;;  %v3227_v62 = vsel %vm61_vm0, %v3183_v54, 0.0  ;;  %v3235_v50 = vsel %vm61_vm0, %v3186_v40, 0.0  ;;  %v3243_v26 = vsel %vm61_vm0, %v3189_v60, 0.0 }
 0x276   :  { %v3205_v4 = vsel %vm3181_vm13, %v3203_v57, %v3204_v32  ;;  %v3208_v39 = vsel %vm3181_vm13, %v3206_v16, %v3207_v41  ;;  %v3228_v9 = vadd.f32 %v3227_v62, %v3184_v18  ;;  %v3236_v63 = vadd.f32 %v3235_v50, %v3187_v43 }
 0x277   :  { %v3244_v2 = vadd.f32 %v3243_v26, %v3190_v58  ;;  %v3251_v7 = vsel %vm61_vm0, %v3192_v3, 0.0  ;;  %v3259_v37 = vsel %vm61_vm0, %v3195_v51, 0.0  ;;  %v3267_v33 = vsel %vm61_vm0, %v3198_v24, 0.0 }
 0x278   :  { %v3229_v34 = vrot.slane %v3228_v9, 4  ;;  %v3237_v6 = vrot.slane %v3236_v63, 4  ;;  %v3252_v19 = vadd.f32 %v3251_v7, %v3193_v45  ;;  %v3260_v8 = vadd.f32 %v3259_v37, %v3196_v12 }
 0x279   :  { %v3245_v23 = vrot.slane %v3244_v2, 4  ;;  %v3268_v27 = vadd.f32 %v3267_v33, %v3199_v44  ;;  %v3275_v61 = vsel %vm61_vm0, %v3201_v1, 0.0  ;;  %v3283_v48 = vsel %vm61_vm0, %v3204_v32, 0.0 }
 0x27a   :  { %v3230_v54 = vadd.f32 %v3229_v34, %v3228_v9  ;;  %v3238_v15 = vadd.f32 %v3237_v6, %v3236_v63  ;;  %v3253_v0 = vrot.slane %v3252_v19, 4  ;;  %v3261_v11 = vrot.slane %v3260_v8, 4 }
 0x27b   :  { %v3246_v21 = vadd.f32 %v3245_v23, %v3244_v2  ;;  %v3269_v40 = vrot.slane %v3268_v27, 4  ;;  %v3276_v18 = vadd.f32 %v3275_v61, %v3202_v17  ;;  %v3284_v42 = vadd.f32 %v3283_v48, %v3205_v4 }
 0x27c   :  { %v3231_v60 = vrot.slane %v3230_v54, 2  ;;  %v3239_v59 = vrot.slane %v3238_v15, 2  ;;  %v3254_v43 = vadd.f32 %v3253_v0, %v3252_v19  ;;  %v3262_v3 = vadd.f32 %v3261_v11, %v3260_v8 }
 0x27d   :  { %v3247_v25 = vrot.slane %v3246_v21, 2  ;;  %v3270_v51 = vadd.f32 %v3269_v40, %v3268_v27  ;;  %v3277_v58 = vrot.slane %v3276_v18, 4  ;;  %v3285_v46 = vrot.slane %v3284_v42, 4 }
 0x27e   :  { %v3232_v24 = vadd.f32 %v3231_v60, %v3230_v54  ;;  %v3240_v31 = vadd.f32 %v3239_v59, %v3238_v15  ;;  %v3255_v45 = vrot.slane %v3254_v43, 2  ;;  %v3263_v12 = vrot.slane %v3262_v3, 2 }
 0x27f   :  { %v3248_v1 = vadd.f32 %v3247_v25, %v3246_v21  ;;  %v3271_v57 = vrot.slane %v3270_v51, 2  ;;  %v3278_v44 = vadd.f32 %v3277_v58, %v3276_v18  ;;  %v3286_v32 = vadd.f32 %v3285_v46, %v3284_v42 }
 0x280   :  { %v3233_v16 = vrot.slane %v3232_v24, 1  ;;  %v3241_v62 = vrot.slane %v3240_v31, 1  ;;  %v3256_v17 = vadd.f32 %v3255_v45, %v3254_v43  ;;  %v3264_v50 = vadd.f32 %v3263_v12, %v3262_v3 }
 0x281   :  { %v3249_v26 = vrot.slane %v3248_v1, 1  ;;  %v3272_v4 = vadd.f32 %v3271_v57, %v3270_v51  ;;  %v3279_v9 = vrot.slane %v3278_v44, 2  ;;  %v3287_v63 = vrot.slane %v3286_v32, 2 }
 0x282   :  { %v7315_v2 = vadd.f32 %v3233_v16, %v3232_v24  ;;  %v7317_v7 = vadd.f32 %v3241_v62, %v3240_v31  ;;  %v3257_v37 = vrot.slane %v3256_v17, 1  ;;  %v3265_v33 = vrot.slane %v3264_v50, 1 }
 0x283   :  { %v7319_v34 = vadd.f32 %v3249_v26, %v3248_v1  ;;  %v3273_v6 = vrot.slane %v3272_v4, 1  ;;  %v3280_v19 = vadd.f32 %v3279_v9, %v3278_v44  ;;  %v3288_v8 = vadd.f32 %v3287_v63, %v3286_v32 }
 0x284   :  { %8841 = vst [vmem:[#allocation49_spill] sm:$0xff] %v7315_v2  ;;  %8842 = vst [vmem:[#allocation44_spill] sm:$0xff] %v7317_v7  ;;  %v7321_v23 = vadd.f32 %v3257_v37, %v3256_v17  ;;  %v7323_v27 = vadd.f32 %v3265_v33, %v3264_v50  ;;  %v3291_v61 = vsel %vm61_vm0, %v3207_v41, 0.0  ;;  %v7329_v48 = vmul.f32 0.1, %v7315_v2 }
 0x285   :  { %8843 = vst [vmem:[#allocation47_spill] sm:$0xff] %v7319_v34  ;;  %v7331_v54 = vadd.f32 %v3273_v6, %v3272_v4  ;;  %v3281_v15 = vrot.slane %v3280_v19, 1  ;;  %v3289_v0 = vrot.slane %v3288_v8, 1  ;;  %v3292_v11 = vadd.f32 %v3291_v61, %v3208_v39 }
 0x286   :  { %8844 = vst [vmem:[#allocation52_spill] sm:$0xff] %v7321_v23  ;;  %8845 = vst [vmem:[#allocation50_spill] sm:$0xff] %v7323_v27  ;;  %v7334_v21 = vmul.f32 0.1, %v7317_v7  ;;  %v7337_v40 = vmul.f32 0.1, %v7319_v34  ;;  %v7344_v41 = vsub.f32 %v7232_v22, %v7329_v48  ;;  %v7358_v3 = vsub.f32 %v7208_v55, %v7329_v48 }
 0x287   :  { %8846 = vst [vmem:[#allocation16_spill] sm:$0xff] %v7331_v54  ;;  %v7340_v18 = vmul.f32 0.1, %v7321_v23  ;;  %v7346_v42 = vadd.f32 %v3281_v15, %v3280_v19  ;;  %v7348_v60 = vadd.f32 %v3289_v0, %v3288_v8  ;;  %v3293_v59 = vrot.slane %v3292_v11, 4 }
 0x288   :  { %v7351_v39 = vmul.f32 0.1, %v7323_v27  ;;  %v7354_v43 = vmul.f32 0.1, %v7331_v54  ;;  %v7362_v25 = vsub.f32 %v7254_v35, %v7334_v21  ;;  %v7366_v51 = vsub.f32 %v7217_v38, %v7334_v21 }
 0x289   :  { %8847 = vst [vmem:[#allocation54_spill] sm:$0xff] %v7346_v42  ;;  %8848 = vst [vmem:[#allocation19_spill] sm:$0xff] %v7348_v60  ;;  %v3294_v58 = vadd.f32 %v3293_v59, %v3292_v11  ;;  %v7369_v46 = vmul.f32 0.1, %v7346_v42  ;;  %v7372_v24 = vmul.f32 0.1, %v7348_v60  ;;  %v7376_v31 = vsub.f32 %v7267_v20, %v7337_v40 }
 0x28a   :  { %8849 = vst [vmem:[#allocation18_spill] sm:$0xff] %v7362_v25  ;;  %8850 = vst [vmem:[#allocation21_spill] sm:$0xff] %v7366_v51  ;;  %v7380_v45 = vsub.f32 %v7227_v53, %v7337_v40  ;;  %v7384_v12 = vsub.f32 %v7271_v10, %v7340_v18  ;;  %v7388_v1 = vsub.f32 %v7235_v49, %v7340_v18 }
 0x28b   :  { %8851 = vst [vmem:[#allocation20_spill] sm:$0xff] %v7376_v31  ;;  %v7392_v57 = vsub.f32 %v7278_v13, %v7351_v39  ;;  %v3295_v44 = vrot.slane %v3294_v58, 2  ;;  %v7396_v32 = vsub.f32 %v7237_v36, %v7351_v39  ;;  %v7400_v16 = vsub.f32 %v7283_v56, %v7354_v43 }
 0x28c   :  { %8852 = vst [vmem:[#allocation33_spill] sm:$0xff] %v7380_v45  ;;  %8853 = vst [vmem:[#allocation53_spill] sm:$0xff] %v7384_v12  ;;  %v7404_v62 = vsub.f32 %v7244_v5, %v7354_v43  ;;  %v7408_v17 = vsub.f32 %v7287_v29, %v7369_v46  ;;  %v7412_v50 = vsub.f32 %v7246_v52, %v7369_v46 }
 0x28d   :  { %8854 = vst [vmem:[#allocation56_spill] sm:$0xff] %v7388_v1  ;;  %8855 = vst [vmem:[#allocation59_spill] sm:$0xff] %v7392_v57  ;;  %v7416_v26 = vsub.f32 %v7293_v47, %v7372_v24  ;;  %v7420_v4 = vsub.f32 %v7258_v14, %v7372_v24  ;;  %v3296_v9 = vadd.f32 %v3295_v44, %v3294_v58 }
 0x28e   :  { %8856 = vst [vmem:[#allocation58_spill] sm:$0xff] %v7396_v32  ;;  %8857 = vst [vmem:[#allocation55_spill] sm:$0xff] %v7400_v16  ;;  %v3326_v63 = vmul.f32 %v7344_v41, %v7344_v41  ;;  %v3327_v37 = vmul.f32 %v7358_v3, %v7358_v3  ;;  %v3328_v33 = vmul.f32 %v7362_v25, %v7362_v25 }
 0x28f   :  { %8858 = vst [vmem:[#allocation57_spill] sm:$0xff] %v7404_v62  ;;  %8859 = vst [vmem:[#allocation8_spill] sm:$0xff] %v7408_v17  ;;  %v3329_v6 = vmul.f32 %v7366_v51, %v7366_v51  ;;  %v3330_v19 = vmul.f32 %v7376_v31, %v7376_v31  ;;  %v3331_v8 = vmul.f32 %v7380_v45, %v7380_v45  ;;  %v3297_v15 = vrot.slane %v3296_v9, 1 }
 0x290   :  { %8860 = vst [vmem:[#allocation24_spill] sm:$0xff] %v7412_v50  ;;  %8861 = vst [vmem:[#allocation22_spill] sm:$0xff] %v7416_v26  ;;  %v3332_v61 = vmul.f32 %v7384_v12, %v7384_v12  ;;  %v3333_v0 = vmul.f32 %v7388_v1, %v7388_v1  ;;  %v3334_v11 = vmul.f32 %v7392_v57, %v7392_v57  ;;  %v3362_v34 = vrot.slane %v3326_v63, 4 }
 0x291   :  { %8862 = vst [vmem:[#allocation10_spill] sm:$0xff] %v7420_v4  ;;  %v3335_v59 = vmul.f32 %v7396_v32, %v7396_v32  ;;  %v3336_v58 = vmul.f32 %v7400_v16, %v7400_v16  ;;  %v3337_v44 = vmul.f32 %v7404_v62, %v7404_v62  ;;  %v3338_v60 = vmul.f32 %v7408_v17, %v7408_v17 }
 0x292   :  { %v3339_v42 = vmul.f32 %v7412_v50, %v7412_v50  ;;  %v3298_v54 = vadd.f32 %v3297_v15, %v3296_v9  ;;  %v3340_v27 = vmul.f32 %v7416_v26, %v7416_v26  ;;  %v3341_v23 = vmul.f32 %v7420_v4, %v7420_v4 }
 0x293   :  { %v3363_v7 = vrot.slane %v3327_v37, 4  ;;  %v3365_v2 = vrot.slane %v3328_v33, 4  ;;  %v3366_v16 = vrot.slane %v3329_v6, 4  ;;  %v3368_v32 = vrot.slane %v3330_v19, 4 }
 0x294   :  { %v7454_v57 = vmul.f32 0.1, %v3298_v54  ;;  %v3369_v62 = vrot.slane %v3331_v8, 4  ;;  %v3371_v1 = vrot.slane %v3332_v61, 4  ;;  %v3372_v17 = vrot.slane %v3333_v0, 4 }
 0x295   :  { %4943 = vst [vmem:[%s8337_s2 + $0x88] sm:$0x1] %v3298_v54  ;;  %v3364_v9 = vsel %vm3181_vm13, %v3362_v34, %v3363_v7  ;;  %v3367_v15 = vsel %vm3181_vm13, %v3365_v2, %v3366_v16  ;;  %v3374_v26 = vrot.slane %v3334_v11, 4  ;;  %v3375_v4 = vrot.slane %v3335_v59, 4 }
 0x296   :  { %v7463_v63 = vsub.f32 %v7298_v30, %v7454_v57  ;;  %v7467_v37 = vsub.f32 %v7274_v28, %v7454_v57  ;;  %v3370_v33 = vsel %vm3181_vm13, %v3368_v32, %v3369_v62  ;;  %v3373_v6 = vsel %vm3181_vm13, %v3371_v1, %v3372_v17 }
 0x297   :  { %v3376_v54 = vsel %vm3181_vm13, %v3374_v26, %v3375_v4  ;;  %v3377_v19 = vrot.slane %v3336_v58, 4  ;;  %v3378_v34 = vrot.slane %v3337_v44, 4  ;;  %v3380_v8 = vrot.slane %v3338_v60, 4 }
 0x298   :  { %8863 = vst [vmem:[#allocation11_spill] sm:$0xff] %v7463_v63  ;;  %8864 = vst [vmem:[#allocation60_spill] sm:$0xff] %v7467_v37  ;;  %v3342_v2 = vmul.f32 %v7463_v63, %v7463_v63  ;;  %v7476_v61 = vmul.f32 %v7467_v37, %v7467_v37  ;;  %v3381_v0 = vrot.slane %v3339_v42, 4  ;;  %v3383_v11 = vrot.slane %v3340_v27, 4 }
 0x299   :  { %v3379_v59 = vsel %vm3181_vm13, %v3377_v19, %v3378_v34  ;;  %v3384_v50 = vrot.slane %v3341_v23, 4  ;;  %v3407_v32 = vsel %vm61_vm0, %v3363_v7, 0.0  ;;  %v3415_v1 = vsel %vm61_vm0, %v3366_v16, 0.0 }
 0x29a   :  { %v3382_v26 = vsel %vm3181_vm13, %v3380_v8, %v3381_v0  ;;  %v3386_v58 = vrot.slane %v3342_v2, 4  ;;  %v3387_v60 = vrot.slane %v7476_v61, 4  ;;  %v3408_v44 = vadd.f32 %v3407_v32, %v3364_v9 }
 0x29b   :  { %v3385_v63 = vsel %vm3181_vm13, %v3383_v11, %v3384_v50  ;;  %v3416_v28 = vadd.f32 %v3415_v1, %v3367_v15  ;;  %v3423_v37 = vsel %vm61_vm0, %v3369_v62, 0.0  ;;  %v3431_v27 = vsel %vm61_vm0, %v3372_v17, 0.0 }
 0x29c   :  { %v3388_v42 = vsel %vm3181_vm13, %v3386_v58, %v3387_v60  ;;  %v3409_v23 = vrot.slane %v3408_v44, 4  ;;  %v3424_v19 = vadd.f32 %v3423_v37, %v3370_v33  ;;  %v3432_v7 = vadd.f32 %v3431_v27, %v3373_v6 }
 0x29d   :  { %v3417_v14 = vrot.slane %v3416_v28, 4  ;;  %v3439_v16 = vsel %vm61_vm0, %v3375_v4, 0.0  ;;  %v3447_v8 = vsel %vm61_vm0, %v3378_v34, 0.0  ;;  %v3455_v2 = vsel %vm61_vm0, %v3381_v0, 0.0 }
 0x29e   :  { %v3410_v9 = vadd.f32 %v3409_v23, %v3408_v44  ;;  %v3425_v61 = vrot.slane %v3424_v19, 4  ;;  %v3433_v11 = vrot.slane %v3432_v7, 4  ;;  %v3440_v15 = vadd.f32 %v3439_v16, %v3376_v54 }
 0x29f   :  { %v3418_v32 = vadd.f32 %v3417_v14, %v3416_v28  ;;  %v3448_v62 = vadd.f32 %v3447_v8, %v3379_v59  ;;  %v3456_v1 = vadd.f32 %v3455_v2, %v3382_v26  ;;  %v3463_v17 = vsel %vm61_vm0, %v3384_v50, 0.0 }
 0x2a0   :  { %v3411_v58 = vrot.slane %v3410_v9, 2  ;;  %v3426_v52 = vadd.f32 %v3425_v61, %v3424_v19  ;;  %v3434_v37 = vadd.f32 %v3433_v11, %v3432_v7  ;;  %v3441_v33 = vrot.slane %v3440_v15, 4 }
 0x2a1   :  { %v3419_v6 = vrot.slane %v3418_v32, 2  ;;  %v3449_v27 = vrot.slane %v3448_v62, 4  ;;  %v3457_v4 = vrot.slane %v3456_v1, 4  ;;  %v3464_v5 = vadd.f32 %v3463_v17, %v3385_v63 }
 0x2a2   :  { %v3412_v34 = vadd.f32 %v3411_v58, %v3410_v9  ;;  %v3427_v12 = vrot.slane %v3426_v52, 2  ;;  %v3435_v0 = vrot.slane %v3434_v37, 2  ;;  %v3442_v44 = vadd.f32 %v3441_v33, %v3440_v15 }
 0x2a3   :  { %v3420_v23 = vadd.f32 %v3419_v6, %v3418_v32  ;;  %v3450_v36 = vadd.f32 %v3449_v27, %v3448_v62  ;;  %v3458_v54 = vadd.f32 %v3457_v4, %v3456_v1  ;;  %v3465_v14 = vrot.slane %v3464_v5, 4 }
 0x2a4   :  { %v3413_v28 = vrot.slane %v3412_v34, 1  ;;  %v3428_v59 = vadd.f32 %v3427_v12, %v3426_v52  ;;  %v3436_v26 = vadd.f32 %v3435_v0, %v3434_v37  ;;  %v3443_v50 = vrot.slane %v3442_v44, 2 }
 0x2a5   :  { %v3421_v16 = vrot.slane %v3420_v23, 1  ;;  %v3451_v19 = vrot.slane %v3450_v36, 2  ;;  %v3459_v7 = vrot.slane %v3458_v54, 2  ;;  %v3466_v8 = vadd.f32 %v3465_v14, %v3464_v5 }
 0x2a6   :  { %v3414_v2 = vadd.f32 %v3413_v28, %v3412_v34  ;;  %v3429_v61 = vrot.slane %v3428_v59, 1  ;;  %v3437_v11 = vrot.slane %v3436_v26, 1  ;;  %v3444_v63 = vadd.f32 %v3443_v50, %v3442_v44 }
 0x2a7   :  { %v7491_v9 = vadd.f32 %v3421_v16, %v3420_v23  ;;  %v3452_v17 = vadd.f32 %v3451_v19, %v3450_v36  ;;  %v3460_v15 = vadd.f32 %v3459_v7, %v3458_v54  ;;  %v3467_v32 = vrot.slane %v3466_v8, 2 }
 0x2a8   :  { %v7493_v62 = vadd.f32 %v3429_v61, %v3428_v59  ;;  %v7495_v1 = vadd.f32 %v3437_v11, %v3436_v26  ;;  %v3445_v52 = vrot.slane %v3444_v63, 1  ;;  %v3471_v12 = vsel %vm61_vm0, %v3387_v60, 0.0 }
 0x2a9   :  { %v3453_v58 = vrot.slane %v3452_v17, 1  ;;  %v3461_v37 = vrot.slane %v3460_v15, 1  ;;  %v3468_v33 = vadd.f32 %v3467_v32, %v3466_v8  ;;  %v3472_v5 = vadd.f32 %v3471_v12, %v3388_v42 }
 0x2aa   :  { %v7498_v6 = vadd.f32 %v3445_v52, %v3444_v63  ;;  %4986 = vrsqrt.f32 %v3414_v2  ;;  %v3524_v27 = vmul.f32 0.18181819, %v7232_v22  ;;  %v3525_v36 = vmul.f32 0.18181819, %v7254_v35 }
 0x2ab   :  { %v7502_v4 = vadd.f32 %v3453_v58, %v3452_v17  ;;  %v7504_v34 = vadd.f32 %v3461_v37, %v3460_v15  ;;  %v3469_v0 = vrot.slane %v3468_v33, 1  ;;  %v3473_v44 = vrot.slane %v3472_v5, 4 }
 0x2ac   :  { %4988 = vrsqrt.f32 %v7491_v9  ;;  %v3526_v60 = vmul.f32 0.18181819, %v7267_v20  ;;  %v3527_v23 = vmul.f32 0.18181819, %v7271_v10  ;;  %v3528_v42 = vmul.f32 0.18181819, %v7278_v13 }
 0x2ad   :  { %v7510_v54 = vadd.f32 %v3469_v0, %v3468_v33  ;;  %v3474_v14 = vadd.f32 %v3473_v44, %v3472_v5  ;;  %4990 = vrsqrt.f32 %v7493_v62  ;;  %v7514_v28 = vmul.f32 0.18181819, %v7283_v56 }
 0x2ae   :  { %4992 = vrsqrt.f32 %v7495_v1  ;;  %v7518_v59 = vmul.f32 0.18181819, %v7287_v29  ;;  %v7521_v26 = vmul.f32 0.18181819, %v7293_v47  ;;  %v7524_v50 = vmul.f32 0.18181819, %v7298_v30 }
 0x2af   :  { %v3475_v16 = vrot.slane %v3474_v14, 2  ;;  %4994 = vrsqrt.f32 %v7498_v6  ;;  %v3533_v19 = vmul.f32 0.16363636, %v7232_v22  ;;  %v3534_v7 = vmul.f32 0.16363636, %v7254_v35 }
 0x2b0   :  { %4996 = vrsqrt.f32 %v7502_v4  ;;  %v3535_v8 = vmul.f32 0.16363636, %v7267_v20  ;;  %v3536_v61 = vmul.f32 0.16363636, %v7271_v10  ;;  %v3537_v11 = vmul.f32 0.16363636, %v7278_v13 }
 0x2b1   :  { %v3476_v63 = vadd.f32 %v3475_v16, %v3474_v14  ;;  %4998 = vrsqrt.f32 %v7504_v34  ;;  %v3538_v17 = vmul.f32 0.16363636, %v7283_v56  ;;  %v3539_v15 = vmul.f32 0.16363636, %v7287_v29 }
 0x2b2   :  { %5000 = vrsqrt.f32 %v7510_v54  ;;  %v3540_v32 = vmul.f32 0.16363636, %v7293_v47  ;;  %v3541_v52 = vmul.f32 0.16363636, %v7298_v30  ;;  %v3551_v12 = vrot.slane %v3533_v19, 1 }
 0x2b3   :  { %v3477_v58 = vrot.slane %v3476_v63, 1  ;;  %v3552_v37 = vrot.slane %v3534_v7, 1  ;;  %v3553_v33 = vrot.slane %v3535_v8, 1  ;;  %v3554_v5 = vrot.slane %v3536_v61, 1 }
 0x2b4   :  { %v7539_v0 = vpop.eup %4986  ;;  %v3555_v44 = vrot.slane %v3537_v11, 1  ;;  %v3556_v14 = vrot.slane %v3538_v17, 1  ;;  %v3557_v16 = vrot.slane %v3539_v15, 1  ;;  %v3558_v49 = vrot.slane %v3540_v32, 1 }
 0x2b5   :  { %8865 = vst [vmem:[#allocation9_spill] sm:$0xff] %v7539_v0  ;;  %v3478_v53 = vadd.f32 %v3477_v58, %v3476_v63  ;;  %v3488_v38 = vmul.f32 %v7539_v0, %v3414_v2  ;;  %v3506_v55 = vmul.f32 %v7539_v0, %v7329_v48  ;;  %v3559_v45 = vrot.slane %v3541_v52, 1 }
 0x2b6   :  { %v7544_v31 = vpop.eup %4988  ;;  %v7546_v19 = vadd.f32 %v3551_v12, %v3524_v27  ;;  %v7548_v7 = vadd.f32 %v3552_v37, %v3525_v36  ;;  %v7550_v8 = vadd.f32 %v3553_v33, %v3526_v60  ;;  %v7552_v61 = vadd.f32 %v3554_v5, %v3527_v23 }
 0x2b7   :  { %v7554_v11 = vpop.eup %4990  ;;  %5002 = vrsqrt.f32 %v3478_v53  ;;  %v3489_v2 = vmul.f32 %v7544_v31, %v7491_v9  ;;  %v7558_v63 = vmul.f32 0.31622776, %v3488_v38  ;;  %v3507_v48 = vmul.f32 %v7544_v31, %v7334_v21 }
 0x2b8   :  { %v7562_v17 = vpop.eup %4992  ;;  %v3490_v27 = vmul.f32 %v7554_v11, %v7493_v62  ;;  %v3508_v36 = vmul.f32 %v7554_v11, %v7337_v40  ;;  %v7568_v60 = vmul.f32 3.1622777, %v3506_v55  ;;  %v7570_v23 = vadd.f32 %v3555_v44, %v3528_v42 }
 0x2b9   :  { %8866 = vst [vmem:[#allocation26_spill] sm:$0xff] %v7558_v63  ;;  %v7572_v15 = vpop.eup %4994  ;;  %v3491_v38 = vmul.f32 %v7562_v17, %v7495_v1  ;;  %v7576_v9 = vmul.f32 0.31622776, %v3489_v2  ;;  %v3509_v21 = vmul.f32 %v7562_v17, %v7340_v18  ;;  %v7580_v32 = vmul.f32 3.1622777, %v3507_v48 }
 0x2ba   :  { %8867 = vst [vmem:[#allocation27_spill] sm:$0xff] %v7568_v60  ;;  %v7582_v62 = vpop.eup %4996  ;;  %v3492_v55 = vmul.f32 %v7572_v15, %v7498_v6  ;;  %v7586_v40 = vmul.f32 0.31622776, %v3490_v27  ;;  %v3510_v42 = vmul.f32 %v7572_v15, %v7351_v39  ;;  %v7590_v52 = vmul.f32 3.1622777, %v3508_v36 }
 0x2bb   :  { %8868 = vst [vmem:[#allocation25_spill] sm:$0xff] %v7576_v9  ;;  %8869 = vst [vmem:[#allocation28_spill] sm:$0xff] %v7580_v32  ;;  %v7592_v1 = vpop.eup %4998  ;;  %v3493_v12 = vmul.f32 %v7582_v62, %v7502_v4  ;;  %v7596_v18 = vmul.f32 0.31622776, %v3491_v38  ;;  %v3511_v58 = vmul.f32 %v7582_v62, %v7354_v43  ;;  %v7600_v37 = vmul.f32 3.1622777, %v3509_v21 }
 0x2bc   :  { %8870 = vst [vmem:[#allocation38_spill] sm:$0xff] %v7582_v62  ;;  %8871 = vst [vmem:[#allocation40_spill] sm:$0xff] %v7586_v40  ;;  %v7602_v6 = vpop.eup %5000  ;;  %v3494_v33 = vmul.f32 %v7592_v1, %v7504_v34  ;;  %v7606_v39 = vmul.f32 0.31622776, %v3492_v55  ;;  %v3512_v5 = vmul.f32 %v7592_v1, %v7369_v46  ;;  %v7610_v44 = vmul.f32 3.1622777, %v3510_v42 }
 0x2bd   :  { %8872 = vst [vmem:[#allocation35_spill] sm:$0xff] %v7590_v52  ;;  %8873 = vst [vmem:[#allocation29_spill] sm:$0xff] %v7592_v1  ;;  %v3495_v4 = vmul.f32 %v7602_v6, %v7510_v54  ;;  %v7614_v2 = vmul.f32 0.31622776, %v3493_v12  ;;  %v3513_v43 = vmul.f32 %v7602_v6, %v7372_v24  ;;  %v7618_v48 = vmul.f32 3.1622777, %v3511_v58 }
 0x2be   :  { %8874 = vst [vmem:[#allocation42_spill] sm:$0xff] %v7596_v18  ;;  %8875 = vst [vmem:[#allocation45_spill] sm:$0xff] %v7600_v37  ;;  %v7620_v27 = vmul.f32 0.31622776, %v3494_v33  ;;  %v7622_v34 = vmul.f32 3.1622777, %v3512_v5  ;;  %v3574_v36 = vadd.f32 %v3556_v14, %v7514_v28  ;;  %v3575_v46 = vadd.f32 %v3557_v16, %v7518_v59 }
 0x2bf   :  { %8876 = vst [vmem:[#allocation37_spill] sm:$0xff] %v7602_v6  ;;  %8877 = vst [vmem:[#allocation61_spill] sm:$0xff] %v7606_v39  ;;  %v7626_v38 = vmul.f32 0.31622776, %v3495_v4  ;;  %v7628_v21 = vmul.f32 3.1622777, %v3513_v43  ;;  %v3576_v54 = vadd.f32 %v3558_v49, %v7521_v26  ;;  %v3577_v55 = vadd.f32 %v3559_v45, %v7524_v50 }
 0x2c0   :  { %8878 = vst [vmem:[#allocation17_spill] sm:$0xff] %v7610_v44  ;;  %8879 = vst [vmem:[#allocation39_spill] sm:$0xff] %v7614_v2  ;;  %v3578_v24 = vmul.f32 0.14545454, %v7232_v22  ;;  %v3579_v42 = vmul.f32 0.14545454, %v7254_v35  ;;  %v7637_v58 = vmul.f32 %v7362_v25, %v7344_v41  ;;  %v7646_v45 = vmul.f32 %v7366_v51, %v7358_v3 }
 0x2c1   :  { %8880 = vst [vmem:[#allocation30_spill] sm:$0xff] %v7618_v48  ;;  %8881 = vst [vmem:[#allocation48_spill] sm:$0xff] %v7620_v27  ;;  %v3580_v12 = vmul.f32 0.14545454, %v7267_v20  ;;  %v7639_v28 = vpop.eup %5002  ;;  %v3581_v59 = vmul.f32 0.14545454, %v7271_v10 }
 0x2c2   :  { %8882 = vst [vmem:[#allocation51_spill] sm:$0xff] %v7622_v34  ;;  %8883 = vst [vmem:[#allocation31_spill] sm:$0xff] %v7626_v38  ;;  %v3582_v14 = vmul.f32 0.14545454, %v7278_v13  ;;  %v3583_v49 = vmul.f32 0.14545454, %v7283_v56  ;;  %v3496_v26 = vmul.f32 %v7639_v28, %v3478_v53  ;;  %v3514_v50 = vmul.f32 %v7639_v28, %v7454_v57 }
 0x2c3   :  { %8884 = vst [vmem:[#allocation32_spill] sm:$0xff] %v7628_v21  ;;  %8885 = vst [vmem:[#allocation23_spill] sm:$0xff] %v7639_v28  ;;  %v3584_v16 = vmul.f32 0.14545454, %v7287_v29  ;;  %v3585_v33 = vmul.f32 0.14545454, %v7293_v47 }
 0x2c4   :  { %v3586_v5 = vmul.f32 0.14545454, %v7298_v30  ;;  %v3596_v4 = vrot.slane %v3578_v24, 2  ;;  %v3597_v43 = vrot.slane %v3579_v42, 2  ;;  %v3598_v21 = vrot.slane %v3580_v12, 2 }
 0x2c5   :  { %v3505_v34 = vmul.f32 0.31622776, %v3496_v26  ;;  %v3523_v48 = vmul.f32 3.1622777, %v3514_v50  ;;  %v3599_v44 = vrot.slane %v3581_v59, 2  ;;  %v3600_v37 = vrot.slane %v3582_v14, 2 }
 0x2c6   :  { %v3601_v38 = vrot.slane %v3583_v49, 2  ;;  %v3602_v52 = vrot.slane %v3584_v16, 2  ;;  %v3603_v27 = vrot.slane %v3585_v33, 2  ;;  %v3604_v53 = vrot.slane %v3586_v5, 2  ;;  %v8888_v5 = vld [vmem:[#allocation34_spill] sm:$0xff] }
 0x2c7   :  { %v3614_v2 = vadd.f32 %v3596_v4, %v7546_v19  ;;  %v3615_v57 = vadd.f32 %v3597_v43, %v7548_v7  ;;  %v3616_v32 = vadd.f32 %v3598_v21, %v7550_v8  ;;  %v3617_v60 = vadd.f32 %v3599_v44, %v7552_v61  ;;  %4939 = vst [vmem:[%s8337_s2 + $0x28] sm:$0x1] %v3505_v34  ;;  %v8889_v43 = vld [vmem:[#allocation13_spill] sm:$0xff] }
 0x2c8   :  { %4941 = vst [vmem:[%s8337_s2 + $0x58] sm:$0x1] %v3523_v48  ;;  %v3618_v24 = vadd.f32 %v3600_v37, %v7570_v23  ;;  %v3619_v42 = vadd.f32 %v3601_v38, %v3574_v36  ;;  %v3620_v12 = vadd.f32 %v3602_v52, %v3575_v46  ;;  %v3621_v59 = vadd.f32 %v3603_v27, %v3576_v54  ;;  %v8886_v48 = vld [vmem:[#allocation20_spill] sm:$0xff] }
 0x2c9   :  { %v3622_v19 = vadd.f32 %v3604_v53, %v3577_v55  ;;  %v3623_v7 = vmul.f32 0.12727273, %v7232_v22  ;;  %v3624_v8 = vmul.f32 0.12727273, %v7254_v35  ;;  %v3625_v61 = vmul.f32 0.12727273, %v7267_v20 }
 0x2ca   :  { %v3626_v44 = vmul.f32 0.12727273, %v7271_v10  ;;  %v3627_v34 = vmul.f32 0.12727273, %v7278_v13  ;;  %v3628_v21 = vmul.f32 0.12727273, %v7283_v56  ;;  %v7673_v14 = vmul.f32 %v8886_v48, %v7344_v41 }
 0x2cb   :  { %v3629_v23 = vmul.f32 0.12727273, %v7287_v29  ;;  %v3630_v52 = vmul.f32 0.12727273, %v7293_v47  ;;  %v3631_v22 = vmul.f32 0.12727273, %v7298_v30 }
 0x2cc   :  { %v8887_v35 = vld [vmem:[#allocation33_spill] sm:$0xff]  ;;  %v3641_v20 = vrot.slane %v3623_v7, 3  ;;  %v3642_v10 = vrot.slane %v3624_v8, 3  ;;  %v3643_v27 = vrot.slane %v3625_v61, 3  ;;  %v3644_v13 = vrot.slane %v3626_v44, 3  ;;  %v8890_v7 = vld [vmem:[#allocation36_spill] sm:$0xff] }
 0x2cd   :  { %v7680_v37 = vmul.f32 %v8887_v35, %v7358_v3  ;;  %v3645_v36 = vrot.slane %v3627_v34, 3  ;;  %v3646_v56 = vrot.slane %v3628_v21, 3  ;;  %v3647_v46 = vrot.slane %v3629_v23, 3  ;;  %v8891_v61 = vld [vmem:[#allocation12_spill] sm:$0xff]  ;;  %v8892_v34 = vld [vmem:[#allocation14_spill] sm:$0xff] }
 0x2ce   :  { %v3648_v38 = vrot.slane %v3630_v52, 3  ;;  %v3649_v54 = vrot.slane %v3631_v22, 3  ;;  %v3659_v55 = vadd.f32 %v3641_v20, %v3614_v2  ;;  %v3660_v49 = vadd.f32 %v3642_v10, %v3615_v57  ;;  %v8893_v2 = vld [vmem:[#allocation53_spill] sm:$0xff]  ;;  %v8898_v52 = vld [vmem:[#allocation46_spill] sm:$0xff] }
 0x2cf   :  { %v3661_v29 = vadd.f32 %v3643_v27, %v3616_v32  ;;  %v3662_v26 = vadd.f32 %v3644_v13, %v3617_v60  ;;  %v3663_v47 = vadd.f32 %v3645_v36, %v3618_v24  ;;  %v3664_v50 = vadd.f32 %v3646_v56, %v3619_v42  ;;  %v8894_v60 = vld [vmem:[#allocation15_spill] sm:$0xff]  ;;  %v8895_v24 = vld [vmem:[#allocation41_spill] sm:$0xff] }
 0x2d0   :  { %v3665_v30 = vadd.f32 %v3647_v46, %v3620_v12  ;;  %v3666_v16 = vadd.f32 %v3648_v38, %v3621_v59  ;;  %v3667_v33 = vadd.f32 %v3649_v54, %v3622_v19  ;;  %v3668_v4 = vmul.f32 0.10909091, %v8888_v5  ;;  %v8896_v12 = vld [vmem:[#allocation43_spill] sm:$0xff]  ;;  %v8897_v19 = vld [vmem:[#allocation56_spill] sm:$0xff] }
 0x2d1   :  { %v3669_v53 = vmul.f32 0.10909091, %v8889_v43  ;;  %v3670_v8 = vmul.f32 0.10909091, %v8890_v7  ;;  %v3671_v44 = vmul.f32 0.10909091, %v8891_v61  ;;  %v7689_v57 = vmul.f32 %v8893_v2, %v7344_v41 }
 0x2d2   :  { %v3672_v21 = vmul.f32 0.10909091, %v8892_v34  ;;  %v3673_v32 = vmul.f32 0.10909091, %v8894_v60  ;;  %v3674_v42 = vmul.f32 0.10909091, %v8895_v24  ;;  %v7696_v23 = vmul.f32 %v8897_v19, %v7358_v3 }
 0x2d3   :  { %v3675_v59 = vmul.f32 0.10909091, %v8896_v12  ;;  %v3676_v22 = vmul.f32 0.10909091, %v8898_v52  ;;  %v3686_v20 = vrot.slane %v3668_v4, 4  ;;  %v3687_v10 = vrot.slane %v3669_v53, 4 }
 0x2d4   :  { %v3688_v27 = vrot.slane %v3670_v8, 4  ;;  %v3689_v13 = vrot.slane %v3671_v44, 4  ;;  %v3690_v36 = vrot.slane %v3672_v21, 4  ;;  %v3691_v56 = vrot.slane %v3673_v32, 4  ;;  %v8899_v44 = vld [vmem:[#allocation59_spill] sm:$0xff] }
 0x2d5   :  { %v3692_v46 = vrot.slane %v3674_v42, 4  ;;  %v3693_v38 = vrot.slane %v3675_v59, 4  ;;  %v3694_v54 = vrot.slane %v3676_v22, 4  ;;  %v3704_v39 = vadd.f32 %v3686_v20, %v3659_v55 }
 0x2d6   :  { %v3705_v18 = vadd.f32 %v3687_v10, %v3660_v49  ;;  %v3706_v40 = vadd.f32 %v3688_v27, %v3661_v29  ;;  %v3707_v9 = vadd.f32 %v3689_v13, %v3662_v26  ;;  %v3708_v63 = vadd.f32 %v3690_v36, %v3663_v47  ;;  %v8900_v26 = vld [vmem:[#allocation58_spill] sm:$0xff] }
 0x2d7   :  { %v3709_v2 = vadd.f32 %v3691_v56, %v3664_v50  ;;  %v3710_v28 = vadd.f32 %v3692_v46, %v3665_v30  ;;  %v3711_v19 = vadd.f32 %v3693_v38, %v3666_v16  ;;  %v3712_v6 = vadd.f32 %v3694_v54, %v3667_v33 }
 0x2d8   :  { %v3713_v35 = vmul.f32 0.09090909, %v8888_v5  ;;  %v3714_v4 = vmul.f32 0.09090909, %v8889_v43  ;;  %v3715_v53 = vmul.f32 0.09090909, %v8890_v7  ;;  %v7705_v21 = vmul.f32 %v8899_v44, %v7344_v41 }
 0x2d9   :  { %v3716_v8 = vmul.f32 0.09090909, %v8891_v61  ;;  %v3717_v55 = vmul.f32 0.09090909, %v8892_v34  ;;  %v3718_v49 = vmul.f32 0.09090909, %v8894_v60  ;;  %v7712_v47 = vmul.f32 %v8900_v26, %v7358_v3 }
 0x2da   :  { %v3719_v29 = vmul.f32 0.09090909, %v8895_v24  ;;  %v3720_v50 = vmul.f32 0.09090909, %v8896_v12  ;;  %v3721_v30 = vmul.f32 0.09090909, %v8898_v52 }
 0x2db   :  { %v3731_v16 = vrot.slane %v3713_v35, 5  ;;  %v3732_v33 = vrot.slane %v3714_v4, 5  ;;  %v3733_v32 = vrot.slane %v3715_v53, 5  ;;  %v3734_v42 = vrot.slane %v3716_v8, 5  ;;  %v8901_v53 = vld [vmem:[#allocation55_spill] sm:$0xff] }
 0x2dc   :  { %v3735_v59 = vrot.slane %v3717_v55, 5  ;;  %v3736_v22 = vrot.slane %v3718_v49, 5  ;;  %v3737_v20 = vrot.slane %v3719_v29, 5  ;;  %v3738_v10 = vrot.slane %v3720_v50, 5 }
 0x2dd   :  { %v3739_v27 = vrot.slane %v3721_v30, 5  ;;  %v3749_v13 = vadd.f32 %v3731_v16, %v3704_v39  ;;  %v3750_v36 = vadd.f32 %v3732_v33, %v3705_v18  ;;  %v3751_v56 = vadd.f32 %v3733_v32, %v3706_v40 }
 0x2de   :  { %v3752_v46 = vadd.f32 %v3734_v42, %v3707_v9  ;;  %v3753_v38 = vadd.f32 %v3735_v59, %v3708_v63  ;;  %v3754_v54 = vadd.f32 %v3736_v22, %v3709_v2  ;;  %v3755_v26 = vadd.f32 %v3737_v20, %v3710_v28  ;;  %v8902_v9 = vld [vmem:[#allocation57_spill] sm:$0xff] }
 0x2df   :  { %v3756_v44 = vadd.f32 %v3738_v10, %v3711_v19  ;;  %v3757_v51 = vadd.f32 %v3739_v27, %v3712_v6  ;;  %v3758_v48 = vmul.f32 0.07272727, %v8888_v5  ;;  %v3759_v35 = vmul.f32 0.07272727, %v8889_v43  ;;  %v8903_v19 = vld [vmem:[#allocation8_spill] sm:$0xff] }
 0x2e0   :  { %v3760_v4 = vmul.f32 0.07272727, %v8890_v7  ;;  %v7721_v8 = vmul.f32 %v8901_v53, %v7344_v41  ;;  %v3761_v39 = vmul.f32 0.07272727, %v8891_v61  ;;  %v3762_v40 = vmul.f32 0.07272727, %v8892_v34 }
 0x2e1   :  { %v3763_v63 = vmul.f32 0.07272727, %v8894_v60  ;;  %v7728_v18 = vmul.f32 %v8902_v9, %v7358_v3  ;;  %v3764_v6 = vmul.f32 0.07272727, %v8895_v24  ;;  %v3765_v28 = vmul.f32 0.07272727, %v8896_v12 }
 0x2e2   :  { %v3766_v2 = vmul.f32 0.07272727, %v8898_v52  ;;  %v7735_v55 = vmul.f32 %v8903_v19, %v7344_v41  ;;  %v3776_v49 = vrot.slane %v3758_v48, 6  ;;  %v3777_v29 = vrot.slane %v3759_v35, 6 }
 0x2e3   :  { %v3778_v50 = vrot.slane %v3760_v4, 6  ;;  %v3779_v30 = vrot.slane %v3761_v39, 6  ;;  %v3780_v16 = vrot.slane %v3762_v40, 6  ;;  %v3781_v33 = vrot.slane %v3763_v63, 6 }
 0x2e4   :  { %v3782_v32 = vrot.slane %v3764_v6, 6  ;;  %v3783_v42 = vrot.slane %v3765_v28, 6  ;;  %v3784_v59 = vrot.slane %v3766_v2, 6  ;;  %v3794_v22 = vadd.f32 %v3776_v49, %v3749_v13  ;;  %v8904_v13 = vld [vmem:[#allocation24_spill] sm:$0xff] }
 0x2e5   :  { %v3795_v20 = vadd.f32 %v3777_v29, %v3750_v36  ;;  %v3796_v10 = vadd.f32 %v3778_v50, %v3751_v56  ;;  %v3797_v27 = vadd.f32 %v3779_v30, %v3752_v46  ;;  %v3798_v9 = vadd.f32 %v3780_v16, %v3753_v38  ;;  %v5031_v16 = vld [vmem:[#allocation2 + $0x18] sm:$0x3f] }
 0x2e6   :  { %v3799_v53 = vadd.f32 %v3781_v33, %v3754_v54  ;;  %v3800_v25 = vadd.f32 %v3782_v32, %v3755_v26  ;;  %v3801_v1 = vadd.f32 %v3783_v42, %v3756_v44  ;;  %v3802_v0 = vadd.f32 %v3784_v59, %v3757_v51  ;;  %v5033_v32 = vld [vmem:[#allocation2 + $0x58] sm:$0x3f] }
 0x2e7   :  { %v3803_v19 = vmul.f32 0.054545455, %v8888_v5  ;;  %v3804_v48 = vmul.f32 0.054545455, %v8889_v43  ;;  %v3805_v35 = vmul.f32 0.054545455, %v8890_v7  ;;  %v7744_v36 = vmul.f32 %v8904_v13, %v7358_v3 }
 0x2e8   :  { %v3806_v4 = vmul.f32 0.054545455, %v8891_v61  ;;  %v3807_v39 = vmul.f32 0.054545455, %v8892_v34  ;;  %v3808_v56 = vmul.f32 0.054545455, %v8894_v60 }
 0x2e9   :  { %v3809_v26 = vmul.f32 0.054545455, %v8895_v24  ;;  %v3810_v51 = vmul.f32 0.054545455, %v8896_v12  ;;  %v8905_v5 = vld [vmem:[#allocation22_spill] sm:$0xff]  ;;  %v3821_v7 = vrot.slane %v3803_v19, 7 }
 0x2ea   :  { %v7751_v44 = vmul.f32 %v8905_v5, %v7344_v41  ;;  %v3811_v43 = vmul.f32 0.054545455, %v8898_v52  ;;  %v3822_v61 = vrot.slane %v3804_v48, 7  ;;  %v3823_v46 = vrot.slane %v3805_v35, 7  ;;  %v5032_v19 = vld [vmem:[#allocation2 + $0x38] sm:$0x3f] }
 0x2eb   :  { %v3824_v34 = vrot.slane %v3806_v4, 7  ;;  %v3825_v38 = vrot.slane %v3807_v39, 7  ;;  %v3826_v54 = vrot.slane %v3808_v56, 7  ;;  %v3827_v40 = vrot.slane %v3809_v26, 7  ;;  %v5034_v59 = vld [vmem:[#allocation2 + $0x78] sm:$0x3f] }
 0x2ec   :  { %v3828_v63 = vrot.slane %v3810_v51, 7  ;;  %v3829_v6 = vrot.slane %v3811_v43, 7  ;;  %v3839_v60 = vadd.f32 %v3821_v7, %v3794_v22  ;;  %v3840_v28 = vadd.f32 %v3822_v61, %v3795_v20  ;;  %v8906_v35 = vld [vmem:[#allocation10_spill] sm:$0xff]  ;;  %v5035_v22 = vld [vmem:[#allocation2 + $0x98] sm:$0x3f]  ;;  %v8907_v5 = vld [vmem:[#allocation11_spill] sm:$0xff] }
 0x2ed   :  { %v3841_v24 = vadd.f32 %v3823_v46, %v3796_v10  ;;  %v3842_v2 = vadd.f32 %v3824_v34, %v3797_v27  ;;  %v3843_v12 = vadd.f32 %v3825_v38, %v3798_v9  ;;  %v3844_v49 = vadd.f32 %v3826_v54, %v3799_v53  ;;  %v5036_v10 = vld [vmem:[#allocation2 + $0xb8] sm:$0x3f] }
 0x2ee   :  { %v3845_v29 = vadd.f32 %v3827_v40, %v3800_v25  ;;  %v3846_v50 = vadd.f32 %v3828_v63, %v3801_v1  ;;  %v3847_v30 = vadd.f32 %v3829_v6, %v3802_v0  ;;  %v3848_v52 = vmul.f32 0.036363635, %v5031_v16  ;;  %v5037_v53 = vld [vmem:[#allocation2 + $0xd8] sm:$0x3f] }
 0x2ef   :  { %v3849_v33 = vmul.f32 0.036363635, %v5032_v19  ;;  %v3850_v42 = vmul.f32 0.036363635, %v5033_v32  ;;  %v3851_v48 = vmul.f32 0.036363635, %v5034_v59  ;;  %v7756_v4 = vmul.f32 %v8906_v35, %v7358_v3 }
 0x2f0   :  { %v3852_v20 = vmul.f32 0.036363635, %v5035_v22  ;;  %v3853_v9 = vmul.f32 0.036363635, %v5036_v10  ;;  %v3854_v25 = vmul.f32 0.036363635, %v5037_v53  ;;  %v3857_v1 = vadd.f32 %v3848_v52, %v3839_v60 }
 0x2f1   :  { %v5038_v0 = vld [vmem:[#allocation2 + $0xf8] sm:$0x3f]  ;;  %v3858_v26 = vadd.f32 %v3849_v33, %v3840_v28  ;;  %v3859_v51 = vadd.f32 %v3850_v42, %v3841_v24  ;;  %v3860_v43 = vadd.f32 %v3851_v48, %v3842_v2  ;;  %v3866_v54 = vmul.f32 0.018181818, %v5031_v16 }
 0x2f2   :  { %v3855_v27 = vmul.f32 0.036363635, %v5038_v0  ;;  %v5039_v39 = vld [vmem:[#allocation2 + $0x118] sm:$0x3f]  ;;  %v3861_v7 = vadd.f32 %v3852_v20, %v3843_v12  ;;  %v3862_v61 = vadd.f32 %v3853_v9, %v3844_v49  ;;  %v3863_v46 = vadd.f32 %v3854_v25, %v3845_v29 }
 0x2f3   :  { %v3856_v56 = vmul.f32 0.036363635, %v5039_v39  ;;  %v3867_v40 = vmul.f32 0.018181818, %v5032_v19  ;;  %v3868_v63 = vmul.f32 0.018181818, %v5033_v32  ;;  %v3925_v60 = vmul.f32 %v8907_v5, %v7344_v41 }
 0x2f4   :  { %v3864_v34 = vadd.f32 %v3855_v27, %v3846_v50  ;;  %v3869_v6 = vmul.f32 0.018181818, %v5034_v59  ;;  %v3870_v35 = vmul.f32 0.018181818, %v5035_v22  ;;  %v3871_v52 = vmul.f32 0.018181818, %v5036_v10 }
 0x2f5   :  { %v3865_v38 = vadd.f32 %v3856_v56, %v3847_v30  ;;  %v3872_v13 = vmul.f32 0.018181818, %v5037_v53  ;;  %v3873_v62 = vmul.f32 0.018181818, %v5038_v0  ;;  %v8908_v28 = vld [vmem:[#allocation60_spill] sm:$0xff]  ;;  %v3884_v12 = vrot.slane %v3866_v54, 1 }
 0x2f6   :  { %v3926_v24 = vmul.f32 %v8908_v28, %v7358_v3  ;;  %v3874_v2 = vmul.f32 0.018181818, %v5039_v39  ;;  %v3885_v49 = vrot.slane %v3867_v40, 1  ;;  %v3886_v29 = vrot.slane %v3868_v63, 1 }
 0x2f7   :  { %v3887_v50 = vrot.slane %v3869_v6, 1  ;;  %v3888_v30 = vrot.slane %v3870_v35, 1  ;;  %v3889_v16 = vrot.slane %v3871_v52, 1  ;;  %v3890_v19 = vrot.slane %v3872_v13, 1 }
 0x2f8   :  { %v3891_v33 = vrot.slane %v3873_v62, 1  ;;  %v3892_v32 = vrot.slane %v3874_v2, 1  ;;  %v7762_v42 = vadd.f32 %v3884_v12, %v3857_v1  ;;  %v7764_v59 = vadd.f32 %v3885_v49, %v3858_v26 }
 0x2f9   :  { %v7766_v41 = vadd.f32 %v3886_v29, %v3859_v51  ;;  %v7768_v48 = vadd.f32 %v3887_v50, %v3860_v43  ;;  %v7770_v22 = vadd.f32 %v3888_v30, %v3861_v7  ;;  %v7772_v3 = vadd.f32 %v3889_v16, %v3862_v61 }
 0x2fa   :  { %8909 = vst [vmem:[#allocation34_spill] sm:$0xff] %v7762_v42  ;;  %8910 = vst [vmem:[#allocation13_spill] sm:$0xff] %v7764_v59  ;;  %v7774_v20 = vadd.f32 %v3890_v19, %v3863_v46  ;;  %v7776_v10 = vadd.f32 %v3891_v33, %v3864_v34  ;;  %v7778_v35 = vadd.f32 %v3892_v32, %v3865_v38  ;;  %v3943_v62 = vrot.slane %v7637_v58, 4 }
 0x2fb   :  { %8911 = vst [vmem:[#allocation36_spill] sm:$0xff] %v7766_v41  ;;  %8912 = vst [vmem:[#allocation12_spill] sm:$0xff] %v7768_v48  ;;  %v3944_v13 = vrot.slane %v7646_v45, 4  ;;  %v3946_v9 = vrot.slane %v7673_v14, 4  ;;  %v3947_v53 = vrot.slane %v7680_v37, 4  ;;  %v3949_v25 = vrot.slane %v7689_v57, 4 }
 0x2fc   :  { %8913 = vst [vmem:[#allocation14_spill] sm:$0xff] %v7770_v22  ;;  %8914 = vst [vmem:[#allocation15_spill] sm:$0xff] %v7772_v3  ;;  %v3950_v1 = vrot.slane %v7696_v23, 4  ;;  %v3952_v0 = vrot.slane %v7705_v21, 4  ;;  %v3953_v27 = vrot.slane %v7712_v47, 4  ;;  %v3955_v39 = vrot.slane %v7721_v8, 4 }
 0x2fd   :  { %8915 = vst [vmem:[#allocation41_spill] sm:$0xff] %v7774_v20  ;;  %8916 = vst [vmem:[#allocation43_spill] sm:$0xff] %v7776_v10  ;;  %v3945_v56 = vsel %vm3181_vm13, %v3943_v62, %v3944_v13  ;;  %v3948_v58 = vsel %vm3181_vm13, %v3946_v9, %v3947_v53  ;;  %v3956_v45 = vrot.slane %v7728_v18, 4  ;;  %v3958_v14 = vrot.slane %v7735_v55, 4 }
 0x2fe   :  { %8917 = vst [vmem:[#allocation46_spill] sm:$0xff] %v7778_v35  ;;  %v3951_v37 = vsel %vm3181_vm13, %v3949_v25, %v3950_v1  ;;  %v3954_v57 = vsel %vm3181_vm13, %v3952_v0, %v3953_v27  ;;  %v3959_v23 = vrot.slane %v7744_v36, 4  ;;  %v3961_v21 = vrot.slane %v7751_v44, 4 }
 0x2ff   :  { %v3957_v47 = vsel %vm3181_vm13, %v3955_v39, %v3956_v45  ;;  %v3962_v8 = vrot.slane %v7756_v4, 4  ;;  %v3964_v26 = vrot.slane %v3925_v60, 4  ;;  %v3965_v51 = vrot.slane %v3926_v24, 4 }
 0x300   :  { %v3960_v43 = vsel %vm3181_vm13, %v3958_v14, %v3959_v23  ;;  %v3983_v18 = vsel %vm61_vm0, %v3944_v13, 0.0  ;;  %v3991_v55 = vsel %vm61_vm0, %v3947_v53, 0.0  ;;  %v3999_v7 = vsel %vm61_vm0, %v3950_v1, 0.0 }
 0x301   :  { %v3963_v61 = vsel %vm3181_vm13, %v3961_v21, %v3962_v8  ;;  %v3966_v36 = vsel %vm3181_vm13, %v3964_v26, %v3965_v51  ;;  %v3984_v46 = vadd.f32 %v3983_v18, %v3945_v56  ;;  %v3992_v44 = vadd.f32 %v3991_v55, %v3948_v58 }
 0x302   :  { %v4000_v34 = vadd.f32 %v3999_v7, %v3951_v37  ;;  %v4007_v38 = vsel %vm61_vm0, %v3953_v27, 0.0  ;;  %v4015_v4 = vsel %vm61_vm0, %v3956_v45, 0.0  ;;  %v4023_v54 = vsel %vm61_vm0, %v3959_v23, 0.0 }
 0x303   :  { %v3985_v40 = vrot.slane %v3984_v46, 4  ;;  %v3993_v63 = vrot.slane %v3992_v44, 4  ;;  %v4008_v6 = vadd.f32 %v4007_v38, %v3954_v57  ;;  %v4016_v60 = vadd.f32 %v4015_v4, %v3957_v47 }
 0x304   :  { %v4001_v52 = vrot.slane %v4000_v34, 4  ;;  %v4024_v24 = vadd.f32 %v4023_v54, %v3960_v43  ;;  %v4031_v2 = vsel %vm61_vm0, %v3962_v8, 0.0  ;;  %v4039_v12 = vsel %vm61_vm0, %v3965_v51, 0.0 }
 0x305   :  { %v3986_v49 = vadd.f32 %v3985_v40, %v3984_v46  ;;  %v3994_v29 = vadd.f32 %v3993_v63, %v3992_v44  ;;  %v4009_v50 = vrot.slane %v4008_v6, 4  ;;  %v4017_v30 = vrot.slane %v4016_v60, 4 }
 0x306   :  { %v4002_v16 = vadd.f32 %v4001_v52, %v4000_v34  ;;  %v4025_v19 = vrot.slane %v4024_v24, 4  ;;  %v4032_v33 = vadd.f32 %v4031_v2, %v3963_v61  ;;  %v4040_v32 = vadd.f32 %v4039_v12, %v3966_v36 }
 0x307   :  { %v3987_v62 = vrot.slane %v3986_v49, 2  ;;  %v3995_v13 = vrot.slane %v3994_v29, 2  ;;  %v4010_v9 = vadd.f32 %v4009_v50, %v4008_v6  ;;  %v4018_v53 = vadd.f32 %v4017_v30, %v4016_v60  ;;  %v8919_v50 = vld [vmem:[#allocation9_spill] sm:$0xff] }
 0x308   :  { %v4003_v25 = vrot.slane %v4002_v16, 2  ;;  %v4026_v1 = vadd.f32 %v4025_v19, %v4024_v24  ;;  %v4033_v0 = vrot.slane %v4032_v33, 4  ;;  %v4041_v27 = vrot.slane %v4040_v32, 4 }
 0x309   :  { %v3988_v39 = vadd.f32 %v3987_v62, %v3986_v49  ;;  %v3996_v56 = vadd.f32 %v3995_v13, %v3994_v29  ;;  %v4011_v58 = vrot.slane %v4010_v9, 2  ;;  %v4019_v45 = vrot.slane %v4018_v53, 2  ;;  %v8918_v49 = vld [vmem:[#allocation38_spill] sm:$0xff] }
 0x30a   :  { %v4004_v14 = vadd.f32 %v4003_v25, %v4002_v16  ;;  %v4027_v37 = vrot.slane %v4026_v1, 2  ;;  %v4034_v57 = vadd.f32 %v4033_v0, %v4032_v33  ;;  %v4042_v23 = vadd.f32 %v4041_v27, %v4040_v32  ;;  %v8920_v32 = vld [vmem:[#allocation29_spill] sm:$0xff]  ;;  %v8921_v25 = vld [vmem:[#allocation18_spill] sm:$0xff] }
 0x30b   :  { %v3989_v21 = vrot.slane %v3988_v39, 1  ;;  %v3997_v47 = vrot.slane %v3996_v56, 1  ;;  %v4012_v8 = vadd.f32 %v4011_v58, %v4010_v9  ;;  %v4020_v26 = vadd.f32 %v4019_v45, %v4018_v53  ;;  %v8923_v27 = vld [vmem:[#allocation21_spill] sm:$0xff] }
 0x30c   :  { %v4005_v51 = vrot.slane %v4004_v14, 1  ;;  %v4028_v43 = vadd.f32 %v4027_v37, %v4026_v1  ;;  %v4035_v18 = vrot.slane %v4034_v57, 2  ;;  %v4043_v55 = vrot.slane %v4042_v23, 2  ;;  %v8922_v1 = vld [vmem:[#allocation20_spill] sm:$0xff]  ;;  %v8925_v58 = vld [vmem:[#allocation37_spill] sm:$0xff] }
 0x30d   :  { %v3990_v7 = vadd.f32 %v3989_v21, %v3988_v39  ;;  %v3998_v61 = vadd.f32 %v3997_v47, %v3996_v56  ;;  %v4013_v36 = vrot.slane %v4012_v8, 1  ;;  %v4021_v46 = vrot.slane %v4020_v26, 1  ;;  %v8924_v39 = vld [vmem:[#allocation33_spill] sm:$0xff]  ;;  %v8928_v47 = vld [vmem:[#allocation56_spill] sm:$0xff] }
 0x30e   :  { %v4006_v44 = vadd.f32 %v4005_v51, %v4004_v14  ;;  %v4029_v34 = vrot.slane %v4028_v43, 1  ;;  %v4036_v38 = vadd.f32 %v4035_v18, %v4034_v57  ;;  %v4044_v4 = vadd.f32 %v4043_v55, %v4042_v23  ;;  %v8926_v14 = vld [vmem:[#allocation23_spill] sm:$0xff]  ;;  %v8927_v23 = vld [vmem:[#allocation53_spill] sm:$0xff] }
 0x30f   :  { %v4014_v54 = vadd.f32 %v4013_v36, %v4012_v8  ;;  %v4022_v40 = vadd.f32 %v4021_v46, %v4020_v26  ;;  %v4047_v63 = vmul.f32 %v7544_v31, %v3990_v7  ;;  %v4048_v6 = vmul.f32 %v7554_v11, %v3998_v61  ;;  %v8929_v26 = vld [vmem:[#allocation59_spill] sm:$0xff]  ;;  %v8932_v46 = vld [vmem:[#allocation57_spill] sm:$0xff] }
 0x310   :  { %v4030_v60 = vadd.f32 %v4029_v34, %v4028_v43  ;;  %v4037_v52 = vrot.slane %v4036_v38, 1  ;;  %v4045_v24 = vrot.slane %v4044_v4, 1  ;;  %v4049_v2 = vmul.f32 %v7562_v17, %v4006_v44  ;;  %v8930_v43 = vld [vmem:[#allocation58_spill] sm:$0xff]  ;;  %v8931_v55 = vld [vmem:[#allocation55_spill] sm:$0xff]  ;;  %v8933_v34 = vld [vmem:[#allocation8_spill] sm:$0xff] }
 0x311   :  { %v4050_v12 = vmul.f32 %v7572_v15, %v4014_v54  ;;  %v4051_v29 = vmul.f32 %v8918_v49, %v4022_v40  ;;  %v7816_v30 = vmul.f32 %v8919_v50, %v4047_v63  ;;  %v7819_v16 = vmul.f32 %v8919_v50, %v4048_v6  ;;  %v8935_v40 = vld [vmem:[#allocation22_spill] sm:$0xff] }
 0x312   :  { %v4038_v19 = vadd.f32 %v4037_v52, %v4036_v38  ;;  %v4046_v33 = vadd.f32 %v4045_v24, %v4044_v4  ;;  %v4052_v62 = vmul.f32 %v8920_v32, %v4030_v60  ;;  %v7823_v13 = vmul.f32 %v8919_v50, %v4049_v2  ;;  %v8934_v4 = vld [vmem:[#allocation24_spill] sm:$0xff]  ;;  %v8936_v6 = vld [vmem:[#allocation10_spill] sm:$0xff] }
 0x313   :  { %v7826_v9 = vmul.f32 %v8919_v50, %v4050_v12  ;;  %v7829_v53 = vmul.f32 %v8919_v50, %v4051_v29  ;;  %v4063_v0 = vmul.f32 %v8922_v1, %v8921_v25  ;;  %v4064_v56 = vmul.f32 %v8924_v39, %v8923_v27 }
 0x314   :  { %v4053_v45 = vmul.f32 %v8925_v58, %v4038_v19  ;;  %v4054_v37 = vmul.f32 %v8926_v14, %v4046_v33  ;;  %v7838_v57 = vmul.f32 %v8919_v50, %v4052_v62  ;;  %v4065_v21 = vmul.f32 %v8927_v23, %v8921_v25 }
 0x315   :  { %v4066_v8 = vmul.f32 %v8928_v47, %v8923_v27  ;;  %v4067_v51 = vmul.f32 %v8929_v26, %v8921_v25  ;;  %v4068_v18 = vmul.f32 %v8930_v43, %v8923_v27  ;;  %v4069_v7 = vmul.f32 %v8931_v55, %v8921_v25 }
 0x316   :  { %v7851_v61 = vmul.f32 %v8919_v50, %v4053_v45  ;;  %v7854_v36 = vmul.f32 %v8919_v50, %v4054_v37  ;;  %v4070_v44 = vmul.f32 %v8932_v46, %v8923_v27  ;;  %v4071_v38 = vmul.f32 %v8933_v34, %v8921_v25 }
 0x317   :  { %v4072_v54 = vmul.f32 %v8934_v4, %v8923_v27  ;;  %v4073_v63 = vmul.f32 %v8935_v40, %v8921_v25  ;;  %v4074_v60 = vmul.f32 %v8936_v6, %v8923_v27  ;;  %v4075_v52 = vmul.f32 %v8907_v5, %v8921_v25 }
 0x318   :  { %v4076_v24 = vmul.f32 %v8908_v28, %v8923_v27  ;;  %v4091_v2 = vrot.slane %v4063_v0, 4  ;;  %v4092_v12 = vrot.slane %v4064_v56, 4  ;;  %v4094_v29 = vrot.slane %v4065_v21, 4 }
 0x319   :  { %v4095_v50 = vrot.slane %v4066_v8, 4  ;;  %v4097_v19 = vrot.slane %v4067_v51, 4  ;;  %v4098_v33 = vrot.slane %v4068_v18, 4  ;;  %v4100_v62 = vrot.slane %v4069_v7, 4 }
 0x31a   :  { %v4093_v45 = vsel %vm3181_vm13, %v4091_v2, %v4092_v12  ;;  %v4101_v37 = vrot.slane %v4070_v44, 4  ;;  %v4103_v35 = vrot.slane %v4071_v38, 4  ;;  %v4104_v10 = vrot.slane %v4072_v54, 4 }
 0x31b   :  { %v4096_v20 = vsel %vm3181_vm13, %v4094_v29, %v4095_v50  ;;  %v4099_v3 = vsel %vm3181_vm13, %v4097_v19, %v4098_v33  ;;  %v4106_v25 = vrot.slane %v4073_v63, 4  ;;  %v4107_v42 = vrot.slane %v4074_v60, 4 }
 0x31c   :  { %v4102_v27 = vsel %vm3181_vm13, %v4100_v62, %v4101_v37  ;;  %v4105_v0 = vsel %vm3181_vm13, %v4103_v35, %v4104_v10  ;;  %v4109_v56 = vrot.slane %v4075_v52, 4  ;;  %v4110_v21 = vrot.slane %v4076_v24, 4 }
 0x31d   :  { %v4108_v8 = vsel %vm3181_vm13, %v4106_v25, %v4107_v42  ;;  %v4126_v51 = vsel %vm61_vm0, %v4092_v12, 0.0  ;;  %v4134_v18 = vsel %vm61_vm0, %v4095_v50, 0.0  ;;  %v4142_v7 = vsel %vm61_vm0, %v4098_v33, 0.0 }
 0x31e   :  { %v4111_v44 = vsel %vm3181_vm13, %v4109_v56, %v4110_v21  ;;  %v4127_v38 = vadd.f32 %v4126_v51, %v4093_v45  ;;  %v4135_v54 = vadd.f32 %v4134_v18, %v4096_v20  ;;  %v4143_v63 = vadd.f32 %v4142_v7, %v4099_v3 }
 0x31f   :  { %v4150_v60 = vsel %vm61_vm0, %v4101_v37, 0.0  ;;  %v4158_v2 = vsel %vm61_vm0, %v4104_v10, 0.0  ;;  %v4166_v35 = vsel %vm61_vm0, %v4107_v42, 0.0  ;;  %v4174_v52 = vsel %vm61_vm0, %v4110_v21, 0.0 }
 0x320   :  { %v4128_v24 = vrot.slane %v4127_v38, 4  ;;  %v4136_v29 = vrot.slane %v4135_v54, 4  ;;  %v4144_v12 = vrot.slane %v4143_v63, 4  ;;  %v4151_v19 = vadd.f32 %v4150_v60, %v4102_v27 }
 0x321   :  { %v4159_v50 = vadd.f32 %v4158_v2, %v4105_v0  ;;  %v4167_v62 = vadd.f32 %v4166_v35, %v4108_v8  ;;  %v4175_v33 = vadd.f32 %v4174_v52, %v4111_v44  ;;  %v7886_v45 = vmul.f32 %v8927_v23, %v8922_v1 }
 0x322   :  { %v4129_v3 = vadd.f32 %v4128_v24, %v4127_v38  ;;  %v4137_v20 = vadd.f32 %v4136_v29, %v4135_v54  ;;  %v4145_v37 = vadd.f32 %v4144_v12, %v4143_v63  ;;  %v4152_v25 = vrot.slane %v4151_v19, 4 }
 0x323   :  { %v4160_v10 = vrot.slane %v4159_v50, 4  ;;  %v4168_v56 = vrot.slane %v4167_v62, 4  ;;  %v4176_v42 = vrot.slane %v4175_v33, 4  ;;  %v7890_v21 = vmul.f32 %v8928_v47, %v8924_v39 }
 0x324   :  { %v4130_v51 = vrot.slane %v4129_v3, 2  ;;  %v4138_v27 = vrot.slane %v4137_v20, 2  ;;  %v4146_v0 = vrot.slane %v4145_v37, 2  ;;  %v4153_v8 = vadd.f32 %v4152_v25, %v4151_v19 }
 0x325   :  { %v4161_v18 = vadd.f32 %v4160_v10, %v4159_v50  ;;  %v4169_v7 = vadd.f32 %v4168_v56, %v4167_v62  ;;  %v4177_v44 = vadd.f32 %v4176_v42, %v4175_v33  ;;  %v4198_v38 = vmul.f32 %v8929_v26, %v8922_v1 }
 0x326   :  { %v4131_v54 = vadd.f32 %v4130_v51, %v4129_v3  ;;  %v4139_v63 = vadd.f32 %v4138_v27, %v4137_v20  ;;  %v4147_v60 = vadd.f32 %v4146_v0, %v4145_v37  ;;  %v4154_v2 = vrot.slane %v4153_v8, 2 }
 0x327   :  { %v4162_v35 = vrot.slane %v4161_v18, 2  ;;  %v4170_v52 = vrot.slane %v4169_v7, 2  ;;  %v4178_v24 = vrot.slane %v4177_v44, 2  ;;  %v4199_v29 = vmul.f32 %v8930_v43, %v8924_v39 }
 0x328   :  { %v4132_v12 = vrot.slane %v4131_v54, 1  ;;  %v4140_v22 = vrot.slane %v4139_v63, 1  ;;  %v4148_v48 = vrot.slane %v4147_v60, 1  ;;  %v4155_v19 = vadd.f32 %v4154_v2, %v4153_v8 }
 0x329   :  { %v4163_v50 = vadd.f32 %v4162_v35, %v4161_v18  ;;  %v4171_v62 = vadd.f32 %v4170_v52, %v4169_v7  ;;  %v4179_v33 = vadd.f32 %v4178_v24, %v4177_v44  ;;  %v4200_v25 = vmul.f32 %v8931_v55, %v8922_v1 }
 0x32a   :  { %v4133_v3 = vadd.f32 %v4132_v12, %v4131_v54  ;;  %v4141_v20 = vadd.f32 %v4140_v22, %v4139_v63  ;;  %v4149_v37 = vadd.f32 %v4148_v48, %v4147_v60  ;;  %v4156_v10 = vrot.slane %v4155_v19, 1 }
 0x32b   :  { %v4164_v56 = vrot.slane %v4163_v50, 1  ;;  %v4172_v42 = vrot.slane %v4171_v62, 1  ;;  %v4180_v51 = vrot.slane %v4179_v33, 1  ;;  %v4201_v27 = vmul.f32 %v8932_v46, %v8924_v39 }
 0x32c   :  { %v4157_v0 = vadd.f32 %v4156_v10, %v4155_v19  ;;  %v4182_v41 = vmul.f32 %v7554_v11, %v4133_v3  ;;  %v4183_v8 = vmul.f32 %v7562_v17, %v4141_v20  ;;  %v4184_v18 = vmul.f32 %v7572_v15, %v4149_v37 }
 0x32d   :  { %v4165_v7 = vadd.f32 %v4164_v56, %v4163_v50  ;;  %v4173_v44 = vadd.f32 %v4172_v42, %v4171_v62  ;;  %v4181_v2 = vadd.f32 %v4180_v51, %v4179_v33  ;;  %v4202_v48 = vmul.f32 %v8933_v34, %v8922_v1 }
 0x32e   :  { %v4185_v22 = vmul.f32 %v8918_v49, %v4157_v0  ;;  %v7907_v54 = vmul.f32 %v7544_v31, %v4182_v41  ;;  %v7910_v63 = vmul.f32 %v7544_v31, %v4183_v8  ;;  %v7913_v60 = vmul.f32 %v7544_v31, %v4184_v18 }
 0x32f   :  { %v4186_v35 = vmul.f32 %v8920_v32, %v4165_v7  ;;  %v4187_v52 = vmul.f32 %v8925_v58, %v4173_v44  ;;  %v4188_v24 = vmul.f32 %v8926_v14, %v4181_v2  ;;  %v4203_v12 = vmul.f32 %v8934_v4, %v8924_v39 }
 0x330   :  { %8937 = vst [vmem:[#allocation11_spill] sm:$0xff] %v7907_v54  ;;  %v7921_v19 = vmul.f32 %v7544_v31, %v4185_v22  ;;  %v4204_v41 = vmul.f32 %v8935_v40, %v8922_v1  ;;  %v4205_v50 = vmul.f32 %v8936_v6, %v8924_v39  ;;  %v4206_v62 = vmul.f32 %v8907_v5, %v8922_v1 }
 0x331   :  { %v7930_v33 = vmul.f32 %v7544_v31, %v4186_v35  ;;  %v7933_v3 = vmul.f32 %v7544_v31, %v4187_v52  ;;  %v7936_v20 = vmul.f32 %v7544_v31, %v4188_v24  ;;  %v4207_v37 = vmul.f32 %v8908_v28, %v8924_v39 }
 0x332   :  { %8938 = vst [vmem:[#allocation60_spill] sm:$0xff] %v7921_v19  ;;  %v4220_v10 = vrot.slane %v7886_v45, 4  ;;  %v4221_v56 = vrot.slane %v7890_v21, 4  ;;  %v4223_v42 = vrot.slane %v4198_v38, 4  ;;  %v4224_v51 = vrot.slane %v4199_v29, 4 }
 0x333   :  { %8939 = vst [vmem:[#allocation38_spill] sm:$0xff] %v7930_v33  ;;  %8940 = vst [vmem:[#allocation9_spill] sm:$0xff] %v7933_v3  ;;  %v4226_v0 = vrot.slane %v4200_v25, 4  ;;  %v4227_v1 = vrot.slane %v4201_v27, 4  ;;  %v4229_v8 = vrot.slane %v4202_v48, 4  ;;  %v4230_v18 = vrot.slane %v4203_v12, 4 }
 0x334   :  { %8941 = vst [vmem:[#allocation29_spill] sm:$0xff] %v7936_v20  ;;  %v4222_v7 = vsel %vm3181_vm13, %v4220_v10, %v4221_v56  ;;  %v4225_v44 = vsel %vm3181_vm13, %v4223_v42, %v4224_v51  ;;  %v4232_v2 = vrot.slane %v4204_v41, 4  ;;  %v4233_v31 = vrot.slane %v4205_v50, 4 }
 0x335   :  { %v4228_v22 = vsel %vm3181_vm13, %v4226_v0, %v4227_v1  ;;  %v4231_v39 = vsel %vm3181_vm13, %v4229_v8, %v4230_v18  ;;  %v4235_v35 = vrot.slane %v4206_v62, 4  ;;  %v4236_v45 = vrot.slane %v4207_v37, 4 }
 0x336   :  { %v4234_v21 = vsel %vm3181_vm13, %v4232_v2, %v4233_v31  ;;  %v4250_v38 = vsel %vm61_vm0, %v4221_v56, 0.0  ;;  %v4258_v29 = vsel %vm61_vm0, %v4224_v51, 0.0  ;;  %v4266_v25 = vsel %vm61_vm0, %v4227_v1, 0.0 }
 0x337   :  { %v4237_v27 = vsel %vm3181_vm13, %v4235_v35, %v4236_v45  ;;  %v4251_v48 = vadd.f32 %v4250_v38, %v4222_v7  ;;  %v4259_v52 = vadd.f32 %v4258_v29, %v4225_v44  ;;  %v4267_v24 = vadd.f32 %v4266_v25, %v4228_v22 }
 0x338   :  { %v4274_v12 = vsel %vm61_vm0, %v4230_v18, 0.0  ;;  %v4282_v41 = vsel %vm61_vm0, %v4233_v31, 0.0  ;;  %v4290_v50 = vsel %vm61_vm0, %v4236_v45, 0.0  ;;  %v4310_v62 = vmul.f32 %v8929_v26, %v8927_v23 }
 0x339   :  { %v4252_v37 = vrot.slane %v4251_v48, 4  ;;  %v4260_v10 = vrot.slane %v4259_v52, 4  ;;  %v4268_v56 = vrot.slane %v4267_v24, 4  ;;  %v4275_v42 = vadd.f32 %v4274_v12, %v4231_v39 }
 0x33a   :  { %v4283_v51 = vadd.f32 %v4282_v41, %v4234_v21  ;;  %v4291_v0 = vadd.f32 %v4290_v50, %v4237_v27  ;;  %v7958_v1 = vmul.f32 %v8930_v43, %v8928_v47  ;;  %v4312_v8 = vmul.f32 %v8931_v55, %v8927_v23 }
 0x33b   :  { %v4253_v18 = vadd.f32 %v4252_v37, %v4251_v48  ;;  %v4261_v7 = vadd.f32 %v4260_v10, %v4259_v52  ;;  %v4269_v44 = vadd.f32 %v4268_v56, %v4267_v24  ;;  %v4276_v2 = vrot.slane %v4275_v42, 4 }
 0x33c   :  { %v4284_v31 = vrot.slane %v4283_v51, 4  ;;  %v4292_v22 = vrot.slane %v4291_v0, 4  ;;  %v4313_v35 = vmul.f32 %v8932_v46, %v8928_v47  ;;  %v4314_v39 = vmul.f32 %v8933_v34, %v8927_v23 }
 0x33d   :  { %v4254_v45 = vrot.slane %v4253_v18, 2  ;;  %v4262_v21 = vrot.slane %v4261_v7, 2  ;;  %v4270_v38 = vrot.slane %v4269_v44, 2  ;;  %v4277_v29 = vadd.f32 %v4276_v2, %v4275_v42 }
 0x33e   :  { %v4285_v25 = vadd.f32 %v4284_v31, %v4283_v51  ;;  %v4293_v27 = vadd.f32 %v4292_v22, %v4291_v0  ;;  %v4315_v48 = vmul.f32 %v8934_v4, %v8928_v47  ;;  %v4316_v52 = vmul.f32 %v8935_v40, %v8927_v23 }
 0x33f   :  { %v4255_v24 = vadd.f32 %v4254_v45, %v4253_v18  ;;  %v4263_v12 = vadd.f32 %v4262_v21, %v4261_v7  ;;  %v4271_v41 = vadd.f32 %v4270_v38, %v4269_v44  ;;  %v4278_v50 = vrot.slane %v4277_v29, 2 }
 0x340   :  { %v4286_v37 = vrot.slane %v4285_v25, 2  ;;  %v4294_v10 = vrot.slane %v4293_v27, 2  ;;  %v4317_v56 = vmul.f32 %v8936_v6, %v8928_v47  ;;  %v4318_v42 = vmul.f32 %v8907_v5, %v8927_v23 }
 0x341   :  { %v4256_v51 = vrot.slane %v4255_v24, 1  ;;  %v4264_v0 = vrot.slane %v4263_v12, 1  ;;  %v4272_v2 = vrot.slane %v4271_v41, 1  ;;  %v4279_v31 = vadd.f32 %v4278_v50, %v4277_v29 }
 0x342   :  { %v4287_v22 = vadd.f32 %v4286_v37, %v4285_v25  ;;  %v4295_v59 = vadd.f32 %v4294_v10, %v4293_v27  ;;  %v4319_v18 = vmul.f32 %v8908_v28, %v8928_v47  ;;  %v4330_v7 = vrot.slane %v4310_v62, 4 }
 0x343   :  { %v4257_v44 = vadd.f32 %v4256_v51, %v4255_v24  ;;  %v4265_v45 = vadd.f32 %v4264_v0, %v4263_v12  ;;  %v4273_v21 = vadd.f32 %v4272_v2, %v4271_v41  ;;  %v4280_v38 = vrot.slane %v4279_v31, 1 }
 0x344   :  { %v4288_v20 = vrot.slane %v4287_v22, 1  ;;  %v4296_v3 = vrot.slane %v4295_v59, 1  ;;  %v4331_v33 = vrot.slane %v7958_v1, 4  ;;  %v4333_v54 = vrot.slane %v4312_v8, 4 }
 0x345   :  { %v4281_v23 = vadd.f32 %v4280_v38, %v4279_v31  ;;  %v4298_v19 = vmul.f32 %v7562_v17, %v4257_v44  ;;  %v4299_v29 = vmul.f32 %v7572_v15, %v4265_v45  ;;  %v4300_v25 = vmul.f32 %v8918_v49, %v4273_v21 }
 0x346   :  { %v4289_v27 = vadd.f32 %v4288_v20, %v4287_v22  ;;  %v4297_v50 = vadd.f32 %v4296_v3, %v4295_v59  ;;  %v4332_v47 = vsel %vm3181_vm13, %v4330_v7, %v4331_v33  ;;  %v4334_v62 = vrot.slane %v4313_v35, 4 }
 0x347   :  { %v4301_v24 = vmul.f32 %v8920_v32, %v4281_v23  ;;  %v7983_v12 = vmul.f32 %v7554_v11, %v4298_v19  ;;  %v7986_v1 = vmul.f32 %v7554_v11, %v4299_v29  ;;  %v7989_v8 = vmul.f32 %v7554_v11, %v4300_v25 }
 0x348   :  { %v4302_v41 = vmul.f32 %v8925_v58, %v4289_v27  ;;  %v4303_v37 = vmul.f32 %v8926_v14, %v4297_v50  ;;  %v4335_v59 = vsel %vm3181_vm13, %v4333_v54, %v4334_v62  ;;  %v4336_v3 = vrot.slane %v4314_v39, 4 }
 0x349   :  { %v7995_v20 = vmul.f32 %v7554_v11, %v4301_v24  ;;  %v4337_v35 = vrot.slane %v4315_v48, 4  ;;  %v4339_v10 = vrot.slane %v4316_v52, 4  ;;  %v4340_v19 = vrot.slane %v4317_v56, 4 }
 0x34a   :  { %v7998_v51 = vmul.f32 %v7554_v11, %v4302_v41  ;;  %v8001_v0 = vmul.f32 %v7554_v11, %v4303_v37  ;;  %v4342_v2 = vrot.slane %v4318_v42, 4  ;;  %v4343_v31 = vrot.slane %v4319_v18, 4 }
 0x34b   :  { %v4338_v22 = vsel %vm3181_vm13, %v4336_v3, %v4337_v35  ;;  %v4341_v7 = vsel %vm3181_vm13, %v4339_v10, %v4340_v19  ;;  %v4355_v54 = vsel %vm61_vm0, %v4331_v33, 0.0  ;;  %v4363_v39 = vsel %vm61_vm0, %v4334_v62, 0.0 }
 0x34c   :  { %v4344_v48 = vsel %vm3181_vm13, %v4342_v2, %v4343_v31  ;;  %v4356_v52 = vadd.f32 %v4355_v54, %v4332_v47  ;;  %v4364_v56 = vadd.f32 %v4363_v39, %v4335_v59  ;;  %v4371_v44 = vsel %vm61_vm0, %v4337_v35, 0.0 }
 0x34d   :  { %v4372_v45 = vadd.f32 %v4371_v44, %v4338_v22  ;;  %v4379_v11 = vsel %vm61_vm0, %v4340_v19, 0.0  ;;  %v4387_v42 = vsel %vm61_vm0, %v4343_v31, 0.0  ;;  %v4405_v18 = vmul.f32 %v8931_v55, %v8929_v26 }
 0x34e   :  { %v4357_v21 = vrot.slane %v4356_v52, 4  ;;  %v4365_v38 = vrot.slane %v4364_v56, 4  ;;  %v4380_v23 = vadd.f32 %v4379_v11, %v4341_v7  ;;  %v4388_v33 = vadd.f32 %v4387_v42, %v4344_v48 }
 0x34f   :  { %v4373_v29 = vrot.slane %v4372_v45, 4  ;;  %v4406_v25 = vmul.f32 %v8932_v46, %v8930_v43  ;;  %v4407_v27 = vmul.f32 %v8933_v34, %v8929_v26  ;;  %v4408_v50 = vmul.f32 %v8934_v4, %v8930_v43 }
 0x350   :  { %v4358_v47 = vadd.f32 %v4357_v21, %v4356_v52  ;;  %v4366_v62 = vadd.f32 %v4365_v38, %v4364_v56  ;;  %v4381_v24 = vrot.slane %v4380_v23, 4  ;;  %v4389_v41 = vrot.slane %v4388_v33, 4 }
 0x351   :  { %v4374_v37 = vadd.f32 %v4373_v29, %v4372_v45  ;;  %v4409_v59 = vmul.f32 %v8935_v40, %v8929_v26  ;;  %v4410_v3 = vmul.f32 %v8936_v6, %v8930_v43  ;;  %v4411_v35 = vmul.f32 %v8907_v5, %v8929_v26 }
 0x352   :  { %v4359_v10 = vrot.slane %v4358_v47, 2  ;;  %v4367_v19 = vrot.slane %v4366_v62, 2  ;;  %v4382_v2 = vadd.f32 %v4381_v24, %v4380_v23  ;;  %v4390_v31 = vadd.f32 %v4389_v41, %v4388_v33 }
 0x353   :  { %v4375_v22 = vrot.slane %v4374_v37, 2  ;;  %v4412_v7 = vmul.f32 %v8908_v28, %v8930_v43  ;;  %v4421_v54 = vrot.slane %v4405_v18, 4  ;;  %v4422_v39 = vrot.slane %v4406_v25, 4 }
 0x354   :  { %v4360_v48 = vadd.f32 %v4359_v10, %v4358_v47  ;;  %v4368_v52 = vadd.f32 %v4367_v19, %v4366_v62  ;;  %v4383_v56 = vrot.slane %v4382_v2, 2  ;;  %v4391_v44 = vrot.slane %v4390_v31, 2 }
 0x355   :  { %v4376_v45 = vadd.f32 %v4375_v22, %v4374_v37  ;;  %v4423_v11 = vsel %vm3181_vm13, %v4421_v54, %v4422_v39  ;;  %v4424_v42 = vrot.slane %v4407_v27, 4  ;;  %v4425_v21 = vrot.slane %v4408_v50, 4 }
 0x356   :  { %v4361_v26 = vrot.slane %v4360_v48, 1  ;;  %v4369_v38 = vrot.slane %v4368_v52, 1  ;;  %v4384_v29 = vadd.f32 %v4383_v56, %v4382_v2  ;;  %v4392_v23 = vadd.f32 %v4391_v44, %v4390_v31 }
 0x357   :  { %v4377_v33 = vrot.slane %v4376_v45, 1  ;;  %v4426_v24 = vsel %vm3181_vm13, %v4424_v42, %v4425_v21  ;;  %v4427_v41 = vrot.slane %v4409_v59, 4  ;;  %v4428_v43 = vrot.slane %v4410_v3, 4 }
 0x358   :  { %v4362_v18 = vadd.f32 %v4361_v26, %v4360_v48  ;;  %v4370_v25 = vadd.f32 %v4369_v38, %v4368_v52  ;;  %v4385_v47 = vrot.slane %v4384_v29, 1  ;;  %v4393_v62 = vrot.slane %v4392_v23, 1 }
 0x359   :  { %v4378_v10 = vadd.f32 %v4377_v33, %v4376_v45  ;;  %v4429_v37 = vsel %vm3181_vm13, %v4427_v41, %v4428_v43  ;;  %v4430_v19 = vrot.slane %v4411_v35, 4  ;;  %v4431_v22 = vrot.slane %v4412_v7, 4 }
 0x35a   :  { %v4386_v27 = vadd.f32 %v4385_v47, %v4384_v29  ;;  %v4394_v50 = vadd.f32 %v4393_v62, %v4392_v23  ;;  %v4395_v54 = vmul.f32 %v7572_v15, %v4362_v18  ;;  %v4396_v2 = vmul.f32 %v8918_v49, %v4370_v25 }
 0x35b   :  { %v4397_v31 = vmul.f32 %v8920_v32, %v4378_v10  ;;  %v4432_v59 = vsel %vm3181_vm13, %v4430_v19, %v4431_v22  ;;  %v4441_v3 = vsel %vm61_vm0, %v4422_v39, 0.0  ;;  %v4449_v48 = vsel %vm61_vm0, %v4425_v21, 0.0 }
 0x35c   :  { %v4398_v52 = vmul.f32 %v8925_v58, %v4386_v27  ;;  %v4399_v56 = vmul.f32 %v8926_v14, %v4394_v50  ;;  %v8039_v35 = vmul.f32 %v7562_v17, %v4395_v54  ;;  %v8042_v7 = vmul.f32 %v7562_v17, %v4396_v2 }
 0x35d   :  { %v8045_v44 = vmul.f32 %v7562_v17, %v4397_v31  ;;  %v4442_v45 = vadd.f32 %v4441_v3, %v4423_v11  ;;  %v4450_v42 = vadd.f32 %v4449_v48, %v4426_v24  ;;  %v4457_v26 = vsel %vm61_vm0, %v4428_v43, 0.0 }
 0x35e   :  { %v8049_v39 = vmul.f32 %v7562_v17, %v4398_v52  ;;  %v8052_v21 = vmul.f32 %v7562_v17, %v4399_v56  ;;  %v4458_v38 = vadd.f32 %v4457_v26, %v4429_v37  ;;  %v4465_v29 = vsel %vm61_vm0, %v4431_v22, 0.0 }
 0x35f   :  { %v4443_v23 = vrot.slane %v4442_v45, 4  ;;  %v4451_v33 = vrot.slane %v4450_v42, 4  ;;  %v4466_v41 = vadd.f32 %v4465_v29, %v4432_v59  ;;  %v4481_v18 = vmul.f32 %v8933_v34, %v8931_v55 }
 0x360   :  { %v4459_v25 = vrot.slane %v4458_v38, 4  ;;  %v4482_v11 = vmul.f32 %v8934_v4, %v8932_v46  ;;  %v4483_v24 = vmul.f32 %v8935_v40, %v8931_v55  ;;  %v4484_v17 = vmul.f32 %v8936_v6, %v8932_v46 }
 0x361   :  { %v4444_v43 = vadd.f32 %v4443_v23, %v4442_v45  ;;  %v4452_v47 = vadd.f32 %v4451_v33, %v4450_v42  ;;  %v4467_v62 = vrot.slane %v4466_v41, 4  ;;  %v4485_v10 = vmul.f32 %v8907_v5, %v8931_v55 }
 0x362   :  { %v4460_v37 = vadd.f32 %v4459_v25, %v4458_v38  ;;  %v4486_v19 = vmul.f32 %v8908_v28, %v8932_v46  ;;  %v4493_v22 = vrot.slane %v4481_v18, 4  ;;  %v4494_v27 = vrot.slane %v4482_v11, 4 }
 0x363   :  { %v4445_v50 = vrot.slane %v4444_v43, 2  ;;  %v4453_v54 = vrot.slane %v4452_v47, 2  ;;  %v4468_v2 = vadd.f32 %v4467_v62, %v4466_v41  ;;  %v4496_v31 = vrot.slane %v4483_v24, 4 }
 0x364   :  { %v4461_v59 = vrot.slane %v4460_v37, 2  ;;  %v4495_v3 = vsel %vm3181_vm13, %v4493_v22, %v4494_v27  ;;  %v4497_v48 = vrot.slane %v4484_v17, 4  ;;  %v4499_v52 = vrot.slane %v4485_v10, 4 }
 0x365   :  { %v4446_v56 = vadd.f32 %v4445_v50, %v4444_v43  ;;  %v4454_v45 = vadd.f32 %v4453_v54, %v4452_v47  ;;  %v4469_v42 = vrot.slane %v4468_v2, 2  ;;  %v4500_v26 = vrot.slane %v4486_v19, 4 }
 0x366   :  { %v4462_v55 = vadd.f32 %v4461_v59, %v4460_v37  ;;  %v4498_v38 = vsel %vm3181_vm13, %v4496_v31, %v4497_v48  ;;  %v4508_v46 = vsel %vm61_vm0, %v4494_v27, 0.0  ;;  %v4516_v29 = vsel %vm61_vm0, %v4497_v48, 0.0 }
 0x367   :  { %v4447_v23 = vrot.slane %v4446_v56, 1  ;;  %v4455_v33 = vrot.slane %v4454_v45, 1  ;;  %v4470_v41 = vadd.f32 %v4469_v42, %v4468_v2  ;;  %v4501_v18 = vsel %vm3181_vm13, %v4499_v52, %v4500_v26 }
 0x368   :  { %v4463_v25 = vrot.slane %v4462_v55, 1  ;;  %v4509_v11 = vadd.f32 %v4508_v46, %v4495_v3  ;;  %v4517_v24 = vadd.f32 %v4516_v29, %v4498_v38  ;;  %v4524_v17 = vsel %vm61_vm0, %v4500_v26, 0.0 }
 0x369   :  { %v4448_v43 = vadd.f32 %v4447_v23, %v4446_v56  ;;  %v4456_v47 = vadd.f32 %v4455_v33, %v4454_v45  ;;  %v4471_v62 = vrot.slane %v4470_v41, 1  ;;  %v4525_v10 = vadd.f32 %v4524_v17, %v4501_v18 }
 0x36a   :  { %v4464_v37 = vadd.f32 %v4463_v25, %v4462_v55  ;;  %v4510_v19 = vrot.slane %v4509_v11, 4  ;;  %v4518_v22 = vrot.slane %v4517_v24, 4  ;;  %v4538_v27 = vmul.f32 %v8935_v40, %v8933_v34 }
 0x36b   :  { %v4472_v50 = vadd.f32 %v4471_v62, %v4470_v41  ;;  %v4473_v54 = vmul.f32 %v8918_v49, %v4448_v43  ;;  %v4474_v2 = vmul.f32 %v8920_v32, %v4456_v47  ;;  %v4526_v31 = vrot.slane %v4525_v10, 4 }
 0x36c   :  { %v4475_v59 = vmul.f32 %v8925_v58, %v4464_v37  ;;  %v4511_v3 = vadd.f32 %v4510_v19, %v4509_v11  ;;  %v4519_v48 = vadd.f32 %v4518_v22, %v4517_v24  ;;  %v4539_v52 = vmul.f32 %v8936_v6, %v8934_v4 }
 0x36d   :  { %v4476_v56 = vmul.f32 %v8926_v14, %v4472_v50  ;;  %v8082_v45 = vmul.f32 %v7572_v15, %v4473_v54  ;;  %v8085_v42 = vmul.f32 %v7572_v15, %v4474_v2  ;;  %v4527_v26 = vadd.f32 %v4526_v31, %v4525_v10 }
 0x36e   :  { %v8088_v55 = vmul.f32 %v7572_v15, %v4475_v59  ;;  %v4512_v38 = vrot.slane %v4511_v3, 2  ;;  %v4520_v46 = vrot.slane %v4519_v48, 2  ;;  %v4540_v29 = vmul.f32 %v8907_v5, %v8933_v34 }
 0x36f   :  { %v8093_v23 = vmul.f32 %v7572_v15, %v4476_v56  ;;  %v4528_v33 = vrot.slane %v4527_v26, 2  ;;  %v4541_v41 = vmul.f32 %v8908_v28, %v8934_v4  ;;  %v4546_v18 = vrot.slane %v4538_v27, 4 }
 0x370   :  { %v4513_v25 = vadd.f32 %v4512_v38, %v4511_v3  ;;  %v4521_v11 = vadd.f32 %v4520_v46, %v4519_v48  ;;  %v4547_v24 = vrot.slane %v4539_v52, 4  ;;  %v4549_v17 = vrot.slane %v4540_v29, 4 }
 0x371   :  { %v4529_v43 = vadd.f32 %v4528_v33, %v4527_v26  ;;  %v4550_v47 = vrot.slane %v4541_v41, 4  ;;  %v4576_v62 = vmul.f32 %v8907_v5, %v8935_v40  ;;  %v4577_v34 = vmul.f32 %v8908_v28, %v8936_v6 }
 0x372   :  { %v4514_v10 = vrot.slane %v4513_v25, 1  ;;  %v4522_v15 = vrot.slane %v4521_v11, 1  ;;  %v4548_v37 = vsel %vm3181_vm13, %v4546_v18, %v4547_v24  ;;  %v4556_v19 = vsel %vm61_vm0, %v4547_v24, 0.0 }
 0x373   :  { %v4530_v4 = vrot.slane %v4529_v43, 1  ;;  %v4551_v22 = vsel %vm3181_vm13, %v4549_v17, %v4550_v47  ;;  %v4557_v27 = vadd.f32 %v4556_v19, %v4548_v37  ;;  %v4564_v50 = vsel %vm61_vm0, %v4550_v47, 0.0 }
 0x374   :  { %v4515_v54 = vadd.f32 %v4514_v10, %v4513_v25  ;;  %v4523_v2 = vadd.f32 %v4522_v15, %v4521_v11  ;;  %v4565_v31 = vadd.f32 %v4564_v50, %v4551_v22  ;;  %v4580_v59 = vrot.slane %v4576_v62, 4 }
 0x375   :  { %v4531_v5 = vadd.f32 %v4530_v4, %v4529_v43  ;;  %v4558_v40 = vrot.slane %v4557_v27, 4  ;;  %v4581_v3 = vrot.slane %v4577_v34, 4  ;;  %v4603_v28 = vrot.slane %v7819_v16, 7 }
 0x376   :  { %v4532_v6 = vmul.f32 %v8920_v32, %v4515_v54  ;;  %v4533_v48 = vmul.f32 %v8925_v58, %v4523_v2  ;;  %v4566_v52 = vrot.slane %v4565_v31, 4  ;;  %v4605_v56 = vrot.slane %v7823_v13, 6 }
 0x377   :  { %v4534_v26 = vmul.f32 %v8926_v14, %v4531_v5  ;;  %v4559_v38 = vadd.f32 %v4558_v40, %v4557_v27  ;;  %v4582_v46 = vsel %vm3181_vm13, %v4580_v59, %v4581_v3  ;;  %v4585_v29 = vsel %vm61_vm0, %v4581_v3, 0.0  ;;  %v8943_v5 = vld [vmem:[#allocation11_spill] sm:$0xff] }
 0x378   :  { %v8113_v33 = vmul.f32 %v8918_v49, %v4532_v6  ;;  %v8116_v41 = vmul.f32 %v8918_v49, %v4533_v48  ;;  %v4567_v16 = vadd.f32 %v4566_v52, %v4565_v31  ;;  %v4586_v18 = vadd.f32 %v4585_v29, %v4582_v46  ;;  %v8945_v48 = vld [vmem:[#allocation9_spill] sm:$0xff] }
 0x379   :  { %v8119_v25 = vmul.f32 %v8918_v49, %v4534_v26  ;;  %v4560_v11 = vrot.slane %v4559_v38, 2  ;;  %v4604_v13 = vsel %vm1124_vm1, %v4603_v28, %v7816_v30  ;;  %v4607_v24 = vrot.slane %v7826_v9, 5  ;;  %v8946_v26 = vld [vmem:[#allocation29_spill] sm:$0xff] }
 0x37a   :  { %v4568_v17 = vrot.slane %v4567_v16, 2  ;;  %v4587_v43 = vrot.slane %v4586_v18, 4  ;;  %v4606_v47 = vsel %vm1127_vm2, %v4605_v56, %v4604_v13  ;;  %v4609_v62 = vrot.slane %v7829_v53, 4 }
 0x37b   :  { %v4561_v34 = vadd.f32 %v4560_v11, %v4559_v38  ;;  %v4608_v10 = vsel %vm1130_vm3, %v4607_v24, %v4606_v47  ;;  %v4611_v15 = vrot.slane %v7838_v57, 3  ;;  %v4613_v49 = vrot.slane %v7851_v61, 2  ;;  %v8942_v57 = vld [vmem:[#allocation60_spill] sm:$0xff] }
 0x37c   :  { %v4569_v37 = vadd.f32 %v4568_v17, %v4567_v16  ;;  %v4588_v19 = vadd.f32 %v4587_v43, %v4586_v18  ;;  %v4610_v4 = vsel %vm1133_vm4, %v4609_v62, %v4608_v10  ;;  %v4615_v30 = vrot.slane %v7854_v36, 1  ;;  %v8944_v36 = vld [vmem:[#allocation38_spill] sm:$0xff] }
 0x37d   :  { %v4562_v9 = vrot.slane %v4561_v34, 1  ;;  %v4612_v22 = vsel %vm1136_vm5, %v4611_v15, %v4610_v4  ;;  %v4625_v27 = vrot.slane %v7910_v63, 7  ;;  %v4627_v53 = vrot.slane %v7913_v60, 6 }
 0x37e   :  { %v4570_v50 = vrot.slane %v4569_v37, 1  ;;  %v4589_v54 = vrot.slane %v4588_v19, 2  ;;  %v4614_v2 = vsel %vm1139_vm6, %v4613_v49, %v4612_v22  ;;  %v4629_v31 = vrot.slane %v8942_v57, 5 }
 0x37f   :  { %v4563_v61 = vadd.f32 %v4562_v9, %v4561_v34  ;;  %v4616_v59 = vsel %vm1142_vm7, %v4615_v30, %v4614_v2  ;;  %v4626_v40 = vsel %vm1124_vm1, %v4625_v27, %v8943_v5  ;;  %v4631_v3 = vrot.slane %v8944_v36, 4  ;;  %v8948_v5 = vld [vmem:[#allocation25_spill] sm:$0xff] }
 0x380   :  { %v4571_v28 = vadd.f32 %v4570_v50, %v4569_v37  ;;  %v4590_v6 = vadd.f32 %v4589_v54, %v4588_v19  ;;  %v4628_v63 = vsel %vm1127_vm2, %v4627_v53, %v4626_v40  ;;  %v4633_v60 = vrot.slane %v8945_v48, 3 }
 0x381   :  { %v4572_v52 = vmul.f32 %v8925_v58, %v4563_v61  ;;  %v4630_v56 = vsel %vm1130_vm3, %v4629_v31, %v4628_v63  ;;  %v4635_v38 = vrot.slane %v8946_v26, 2  ;;  %v4644_v46 = vrot.slane %v7983_v12, 1  ;;  %v8947_v61 = vld [vmem:[#allocation26_spill] sm:$0xff] }
 0x382   :  { %v4573_v29 = vmul.f32 %v8926_v14, %v4571_v28  ;;  %v4591_v16 = vrot.slane %v4590_v6, 1  ;;  %v4632_v18 = vsel %vm1133_vm4, %v4631_v3, %v4630_v56  ;;  %v4645_v11 = vrot.slane %v7989_v8, 7 }
 0x383   :  { %v4574_v13 = vmul.f32 %v8920_v32, %v4572_v52  ;;  %v4634_v24 = vsel %vm1136_vm5, %v4633_v60, %v4632_v18  ;;  %v4647_v17 = vrot.slane %v7995_v20, 6  ;;  %v4649_v43 = vrot.slane %v7998_v51, 5  ;;  %v8949_v60 = vld [vmem:[#allocation40_spill] sm:$0xff] }
 0x384   :  { %v4575_v47 = vmul.f32 %v8920_v32, %v4573_v29  ;;  %v4592_v62 = vadd.f32 %v4591_v16, %v4590_v6  ;;  %v4636_v12 = vsel %vm1139_vm6, %v4635_v38, %v4634_v24  ;;  %v4646_v34 = vsel %vm1124_vm1, %v4645_v11, %v7986_v1 }
 0x385   :  { %v4648_v10 = vsel %vm1127_vm2, %v4647_v17, %v4646_v34  ;;  %v4651_v8 = vrot.slane %v8001_v0, 4  ;;  %v4660_v15 = vrot.slane %v8039_v35, 3  ;;  %v4661_v49 = vrot.slane %v8042_v7, 2 }
 0x386   :  { %v4593_v20 = vmul.f32 %v8926_v14, %v4592_v62  ;;  %v4650_v51 = vsel %vm1130_vm3, %v4649_v43, %v4648_v10  ;;  %v4663_v32 = vrot.slane %v8045_v44, 1  ;;  %v4665_v37 = vrot.slane %v8052_v21, 7 }
 0x387   :  { %v4652_v19 = vsel %vm1133_vm4, %v4651_v8, %v4650_v51  ;;  %v4662_v1 = vsel %vm1139_vm6, %v4661_v49, %v4660_v15  ;;  %v4673_v4 = vrot.slane %v8082_v45, 6  ;;  %v4674_v0 = vrot.slane %v8085_v42, 5 }
 0x388   :  { %v4594_v35 = vmul.f32 %v8925_v58, %v4593_v20  ;;  %v4664_v7 = vsel %vm1142_vm7, %v4663_v32, %v4662_v1  ;;  %v4666_v14 = vsel %vm1124_vm1, %v4665_v37, %v8049_v39  ;;  %v4676_v30 = vrot.slane %v8088_v55, 4 }
 0x389   :  { %v4675_v44 = vsel %vm1130_vm3, %v4674_v0, %v4673_v4  ;;  %v4678_v21 = vrot.slane %v8093_v23, 3  ;;  %v4684_v9 = vrot.slane %v8113_v33, 2  ;;  %v4685_v22 = vrot.slane %v8116_v41, 1 }
 0x38a   :  { %v4677_v45 = vsel %vm1133_vm4, %v4676_v30, %v4675_v44  ;;  %v4691_v42 = vrot.slane %v4574_v13, 7  ;;  %v4692_v27 = vrot.slane %v4575_v47, 6  ;;  %v4695_v58 = vsel %vm1222_vm8, %v4636_v12, %v4644_v46 }
 0x38b   :  { %v4679_v53 = vsel %vm1136_vm5, %v4678_v21, %v4677_v45  ;;  %v4686_v39 = vsel %vm1142_vm7, %v4685_v22, %v4684_v9  ;;  %v4696_v55 = vsel %vm1224_vm9, %v4652_v19, %v4664_v7  ;;  %v4701_v50 = vand.u32 2147483647, %v4616_v59 }
 0x38c   :  { %v4693_v54 = vsel %vm1127_vm2, %v4692_v27, %v4691_v42  ;;  %v4697_v23 = vsel %vm61_vm0, %v4666_v14, %v4679_v53  ;;  %v4702_v33 = vand.u32 2147483647, %v4695_v58  ;;  %v4703_v2 = vand.u32 2147483647, %v4696_v55 }
 0x38d   :  { %v4698_v41 = vsel %vm1227_vm10, %v4697_v23, %v4686_v39  ;;  %v4699_v57 = vsel %vm1229_vm11, %v8119_v25, %v4693_v54  ;;  %v4706_v31 = vmin.f32 %v4701_v50, 1.0  ;;  %v4821_v40 = vsel %vm1124_vm1, %v8948_v5, %v8947_v61 }
 0x38e   :  { %v4700_v36 = vsel %vm1231_vm12, %v4699_v57, %v4594_v35  ;;  %v4704_v3 = vand.u32 2147483647, %v4698_v41  ;;  %v4707_v59 = vmin.f32 %v4702_v33, 1.0  ;;  %v4708_v28 = vmin.f32 %v4703_v2, 1.0 }
 0x38f   :  { %v4705_v6 = vand.u32 2147483647, %v4700_v36  ;;  %v4711_v63 = vadd.f32 1.0, %v4706_v31  ;;  %v4721_v48 = vsub.f32 1.0, %v4706_v31  ;;  %v8194_v52 = vsel %vm1127_vm2, %v8949_v60, %v4821_v40 }
 0x390   :  { %v4709_v56 = vmin.f32 %v4704_v3, 1.0  ;;  %v4712_v26 = vadd.f32 1.0, %v4707_v59  ;;  %v4713_v25 = vadd.f32 1.0, %v4708_v28  ;;  %v4722_v38 = vsub.f32 1.0, %v4707_v59 }
 0x391   :  { %v4710_v46 = vmin.f32 %v4705_v6, 1.0  ;;  %v4716_v29 = vmul.f32 0.5, %v4711_v63  ;;  %v4723_v16 = vsub.f32 1.0, %v4708_v28  ;;  %v8196_v18 = vmul.f32 0.5, %v4721_v48 }
 0x392   :  { %v4714_v11 = vadd.f32 1.0, %v4709_v56  ;;  %v4717_v13 = vmul.f32 0.5, %v4712_v26  ;;  %v4718_v24 = vmul.f32 0.5, %v4713_v25  ;;  %v4724_v17 = vsub.f32 1.0, %v4709_v56 }
 0x393   :  { %v4715_v43 = vadd.f32 1.0, %v4710_v46  ;;  %v4725_v47 = vsub.f32 1.0, %v4710_v46  ;;  %v8198_v62 = vmul.f32 0.5, %v4722_v38  ;;  %v8200_v12 = vmul.f32 0.5, %v4723_v16 }
 0x394   :  { %v4719_v34 = vmul.f32 0.5, %v4714_v11  ;;  %v8202_v10 = vmul.f32 0.5, %v4724_v17  ;;  %v4731_v8 = vmul.f32 2.0, %v8196_v18  ;;  %v4736_v15 = vmul.f32 14.0, %v4716_v29 }
 0x395   :  { %v4720_v49 = vmul.f32 0.5, %v4715_v43  ;;  %v8205_v20 = vmul.f32 0.5, %v4725_v47  ;;  %v4732_v51 = vmul.f32 2.0, %v8198_v62  ;;  %v4733_v32 = vmul.f32 2.0, %v8200_v12 }
 0x396   :  { %v4734_v37 = vmul.f32 2.0, %v8202_v10  ;;  %v4737_v19 = vmul.f32 14.0, %v4717_v13  ;;  %v4738_v1 = vmul.f32 14.0, %v4718_v24  ;;  %v4739_v4 = vmul.f32 14.0, %v4719_v34 }
 0x397   :  { %v4735_v0 = vmul.f32 2.0, %v8205_v20  ;;  %v4740_v35 = vmul.f32 14.0, %v4720_v49  ;;  %v4741_v7 = vadd.f32 %v4736_v15, %v4731_v8  ;;  %v4746_v14 = vmul.f32 %v4716_v29, %v4716_v29 }
 0x398   :  { %v4742_v30 = vadd.f32 %v4737_v19, %v4732_v51  ;;  %v4743_v44 = vadd.f32 %v4738_v1, %v4733_v32  ;;  %v4744_v21 = vadd.f32 %v4739_v4, %v4734_v37  ;;  %v4747_v9 = vmul.f32 %v4717_v13, %v4717_v13  ;;  %v8950_v19 = vld [vmem:[#allocation42_spill] sm:$0xff] }
 0x399   :  { %v4745_v22 = vadd.f32 %v4740_v35, %v4735_v0  ;;  %v4748_v45 = vmul.f32 %v4718_v24, %v4718_v24  ;;  %v4749_v42 = vmul.f32 %v4719_v34, %v4719_v34  ;;  %v4750_v27 = vmul.f32 %v4720_v49, %v4720_v49  ;;  %v8951_v35 = vld [vmem:[#allocation61_spill] sm:$0xff] }
 0x39a   :  { %v4751_v58 = vmul.f32 %v4741_v7, %v8196_v18  ;;  %v4752_v53 = vmul.f32 %v4742_v30, %v8198_v62  ;;  %v4753_v39 = vmul.f32 %v4743_v44, %v8200_v12  ;;  %v4754_v55 = vmul.f32 %v4744_v21, %v8202_v10  ;;  %v8953_v30 = vld [vmem:[#allocation28_spill] sm:$0xff] }
 0x39b   :  { %v4755_v50 = vmul.f32 %v4745_v22, %v8205_v20  ;;  %v4756_v54 = vmul.f32 42.0, %v4746_v14  ;;  %v4757_v23 = vmul.f32 42.0, %v4747_v9  ;;  %v4758_v33 = vmul.f32 42.0, %v4748_v45 }
 0x39c   :  { %v4759_v2 = vmul.f32 42.0, %v4749_v42  ;;  %v4760_v41 = vmul.f32 42.0, %v4750_v27  ;;  %v4766_v57 = vmul.f32 %v4746_v14, %v4716_v29  ;;  %v4767_v31 = vmul.f32 %v4747_v9, %v4717_v13  ;;  %v8952_v14 = vld [vmem:[#allocation27_spill] sm:$0xff] }
 0x39d   :  { %v4761_v61 = vadd.f32 %v4756_v54, %v4751_v58  ;;  %v4762_v5 = vadd.f32 %v4757_v23, %v4752_v53  ;;  %v4763_v40 = vadd.f32 %v4758_v33, %v4753_v39  ;;  %v4768_v36 = vmul.f32 %v4748_v45, %v4718_v24  ;;  %v8954_v45 = vld [vmem:[#allocation39_spill] sm:$0xff]  ;;  %v8955_v58 = vld [vmem:[#allocation48_spill] sm:$0xff] }
 0x39e   :  { %v4764_v3 = vadd.f32 %v4759_v2, %v4754_v55  ;;  %v4765_v59 = vadd.f32 %v4760_v41, %v4755_v50  ;;  %v4769_v28 = vmul.f32 %v4749_v42, %v4719_v34  ;;  %v4770_v6 = vmul.f32 %v4750_v27, %v4720_v49  ;;  %v8956_v39 = vld [vmem:[#allocation35_spill] sm:$0xff]  ;;  %v8959_v2 = vld [vmem:[#allocation49_spill] sm:$0xff]  ;;  %v8960_v41 = vld [vmem:[#allocation44_spill] sm:$0xff] }
 0x39f   :  { %v4771_v63 = vmul.f32 %v4761_v61, %v8196_v18  ;;  %v4772_v48 = vmul.f32 %v4762_v5, %v8198_v62  ;;  %v4773_v60 = vmul.f32 %v4763_v40, %v8200_v12  ;;  %v4776_v56 = vmul.f32 70.0, %v4766_v57  ;;  %v8957_v54 = vld [vmem:[#allocation31_spill] sm:$0xff] }
 0x3a0   :  { %v4774_v26 = vmul.f32 %v4764_v3, %v8202_v10  ;;  %v4775_v25 = vmul.f32 %v4765_v59, %v8205_v20  ;;  %v4777_v38 = vmul.f32 70.0, %v4767_v31  ;;  %v4778_v46 = vmul.f32 70.0, %v4768_v36  ;;  %v8961_v31 = vld [vmem:[#allocation17_spill] sm:$0xff]  ;;  %v8962_v5 = vld [vmem:[#allocation47_spill] sm:$0xff]  ;;  %v8964_v59 = vld [vmem:[#allocation36_spill] sm:$0xff] }
 0x3a1   :  { %v4779_v29 = vmul.f32 70.0, %v4769_v28  ;;  %v4780_v16 = vmul.f32 70.0, %v4770_v6  ;;  %v4781_v11 = vadd.f32 %v4776_v56, %v4771_v63  ;;  %v4786_v13 = vmul.f32 %v8196_v18, %v8196_v18  ;;  %v8963_v36 = vld [vmem:[#allocation13_spill] sm:$0xff]  ;;  %v8965_v6 = vld [vmem:[#allocation30_spill] sm:$0xff]  ;;  %v8967_v56 = vld [vmem:[#allocation12_spill] sm:$0xff] }
 0x3a2   :  { %v4782_v24 = vadd.f32 %v4777_v38, %v4772_v48  ;;  %v4783_v17 = vadd.f32 %v4778_v46, %v4773_v60  ;;  %v4787_v43 = vmul.f32 %v8198_v62, %v8198_v62  ;;  %v4788_v47 = vmul.f32 %v8200_v12, %v8200_v12  ;;  %v8966_v48 = vld [vmem:[#allocation52_spill] sm:$0xff]  ;;  %v8969_v46 = vld [vmem:[#allocation51_spill] sm:$0xff] }
 0x3a3   :  { %v4784_v34 = vadd.f32 %v4779_v29, %v4774_v26  ;;  %v4785_v8 = vadd.f32 %v4780_v16, %v4775_v25  ;;  %v4789_v15 = vmul.f32 %v8202_v10, %v8202_v10  ;;  %v4790_v49 = vmul.f32 %v8205_v20, %v8205_v20  ;;  %v8968_v25 = vld [vmem:[#allocation14_spill] sm:$0xff] }
 0x3a4   :  { %v4791_v51 = vmul.f32 %v4786_v13, %v8196_v18  ;;  %v4792_v32 = vmul.f32 %v4787_v43, %v8198_v62  ;;  %v4793_v37 = vmul.f32 %v4788_v47, %v8200_v12  ;;  %v4823_v1 = vsel %vm1130_vm3, %v8950_v19, %v8194_v52  ;;  %v8970_v16 = vld [vmem:[#allocation50_spill] sm:$0xff] }
 0x3a5   :  { %v4794_v4 = vmul.f32 %v4789_v15, %v8202_v10  ;;  %v4795_v0 = vmul.f32 %v4790_v49, %v8205_v20  ;;  %v4824_v7 = vsel %vm1133_vm4, %v8951_v35, %v4823_v1  ;;  %v4842_v44 = vsel %vm1124_vm1, %v8953_v30, %v8952_v14  ;;  %v8971_v13 = vld [vmem:[#allocation34_spill] sm:$0xff] }
 0x3a6   :  { %v4796_v21 = vmul.f32 %v4791_v51, %v8196_v18  ;;  %v4797_v9 = vmul.f32 %v4792_v32, %v8198_v62  ;;  %v4798_v22 = vmul.f32 %v4793_v37, %v8200_v12  ;;  %v4825_v52 = vsel %vm1136_vm5, %v8954_v45, %v4824_v7 }
 0x3a7   :  { %v4799_v42 = vmul.f32 %v4794_v4, %v8202_v10  ;;  %v4800_v27 = vmul.f32 %v4795_v0, %v8205_v20  ;;  %v4826_v53 = vsel %vm1139_vm6, %v8955_v58, %v4825_v52  ;;  %v4843_v55 = vsel %vm1127_vm2, %v8956_v39, %v4842_v44  ;;  %v8958_v10 = vld [vmem:[#allocation45_spill] sm:$0xff] }
 0x3a8   :  { %v4801_v18 = vmul.f32 %v4796_v21, %v4781_v11  ;;  %v4802_v50 = vmul.f32 %v4797_v9, %v4782_v24  ;;  %v4803_v62 = vmul.f32 %v4798_v22, %v4783_v17  ;;  %v4827_v12 = vsel %vm1142_vm7, %v8957_v54, %v4826_v53  ;;  %v8972_v17 = vld [vmem:[#allocation15_spill] sm:$0xff] }
 0x3a9   :  { %v4804_v23 = vmul.f32 %v4799_v42, %v4784_v34  ;;  %v4805_v33 = vmul.f32 %v4800_v27, %v4785_v8  ;;  %4938 = vst [vmem:[%s8337_s2 + $0x20] sm:$0xff] %v4827_v12  ;;  %v4844_v20 = vsel %vm1130_vm3, %v8958_v10, %v4843_v55  ;;  %v4863_v57 = vsel %vm1124_vm1, %v8960_v41, %v8959_v2 }
 0x3aa   :  { %4807 = vst [vmem:[#allocation5 + $0x50] sm:$0xff] %v4801_v18  ;;  %4808 = vst [vmem:[#allocation5 + $0x58] sm:$0xff] %v4802_v50  ;;  %v4845_v61 = vsel %vm1133_vm4, %v8961_v31, %v4844_v20  ;;  %v4864_v40 = vsel %vm1127_vm2, %v8962_v5, %v4863_v57  ;;  %v4884_v3 = vrot.slane %v8963_v36, 7  ;;  %v4886_v28 = vrot.slane %v8964_v59, 6 }
 0x3ab   :  { %4809 = vst [vmem:[#allocation5 + $0x60] sm:$0xff] %v4803_v62  ;;  %4810 = vst [vmem:[#allocation5 + $0x68] sm:$0xff] %v4804_v23  ;;  %v4846_v63 = vsel %vm1136_vm5, %v8965_v6, %v4845_v61  ;;  %v4865_v60 = vsel %vm1130_vm3, %v8966_v48, %v4864_v40  ;;  %v4888_v26 = vrot.slane %v8967_v56, 5  ;;  %v4890_v38 = vrot.slane %v8968_v25, 4 }
 0x3ac   :  { %4811 = vst [vmem:[#allocation5 + $0x70] sm:$0xf] %v4805_v33  ;;  %v4847_v29 = vsel %vm1139_vm6, %v8969_v46, %v4846_v63  ;;  %v4866_v11 = vsel %vm1133_vm4, %v8970_v16, %v4865_v60  ;;  %v4885_v24 = vsel %vm1136_vm5, %v4884_v3, %v8971_v13  ;;  %v4891_v43 = vrot.slane %v8972_v17, 3 }
 0x3ad   :  { %5073 = shalt.err (!%p5070_p12)
}
 0x3ae   :  { %s5074_s12 = scalar_lea.hbm %s8336_s1, 1920 }
 0x3af   :  { %p5075_p13 = scmp.ne.s32.totalorder %s8336_s1, %s5074_s12  ;;  %p5078_p0 = scmp.lt.u32.totalorder %s5074_s12, %s8336_s1 }
 0x3b1   :  { %p5080_p1 = pnand %p5078_p0, %p5075_p13 }
 0x3b3   :  { %5083 = shalt.err (!%p5080_p1)
}
 0x3b4   :  { %4914 = dma.vmem_to_hbm [thread:$0]  %s8265_s6, 1920, %s8336_s1, [#allocation4], %s5089_s19, %s5089_s19, %s5090_s20   ;;  %v8973_v47 = vld [vmem:[#allocation32_spill] sm:$0xff]  ;;  %v4887_v49 = vsel %vm1139_vm6, %v4886_v28, %v4885_v24  ;;  %v8975_v51 = vld [vmem:[#allocation41_spill] sm:$0xff]  ;;  %v8976_v37 = vld [vmem:[#allocation54_spill] sm:$0xff]  ;;  %v4892_v4 = vsel %vm1124_vm1, %v4891_v43, %v4890_v38 }
 0x3b5   :  { %v4848_v34 = vsel %vm1142_vm7, %v8973_v47, %v4847_v29  ;;  %v8974_v8 = vld [vmem:[#allocation16_spill] sm:$0xff]  ;;  %v4893_v32 = vrot.slane %v8975_v51, 2  ;;  %v4889_v1 = vsel %vm1142_vm7, %v4888_v26, %v4887_v49  ;;  %v8977_v0 = vld [vmem:[#allocation43_spill] sm:$0xff]  ;;  %v8979_v21 = vld [vmem:[#allocation46_spill] sm:$0xff] }
 0x3b6   :  { %v4867_v15 = vsel %vm1136_vm5, %v8974_v8, %v4866_v11  ;;  %4940 = vst [vmem:[%s8337_s2 + $0x50] sm:$0xff] %v4848_v34  ;;  %v4895_v35 = vrot.slane %v8977_v0, 1  ;;  %v8978_v7 = vld [vmem:[#allocation19_spill] sm:$0xff]  ;;  %4944 = vst [vmem:[%s8337_s2 + $0xac] sm:$0xf0] %v4889_v1 }
 0x3b7   :  { %v4868_v19 = vsel %vm1139_vm6, %v8976_v37, %v4867_v15  ;;  %v4894_v30 = vsel %vm1127_vm2, %v4893_v32, %v4892_v4 }
 0x3b8   :  { %v4869_v14 = vsel %vm1142_vm7, %v8978_v7, %v4868_v19  ;;  %v4896_v44 = vsel %vm1130_vm3, %v4895_v35, %v4894_v30 }
 0x3b9   :  { %4942 = vst [vmem:[%s8337_s2 + $0x80] sm:$0xff] %v4869_v14  ;;  %v4897_v9 = vsel %vm1133_vm4, %v8979_v21, %v4896_v44 }
 0x3ba   :  { %4945 = vst [vmem:[%s8337_s2 + $0xb4] sm:$0x1f] %v4897_v9 }
 0x3bb   :  { %5086 = dma.done.wait [#allocation4], 1920  }
 0x3bc   :  { %5087 = vsyncadd [#allocation4], 4294965376 }
 0x3bd   :  { %4922 = vsyncpa [#allocation3], 1 }
 0x3be   :  { %4923 = vsyncpa [#allocation4], 1 }

</bundles_post_ra>
